<compile_context>
chip_gen: v7x
topology: tpu7x:2x2x1
jax: 0.10.0
libtpu: 0.0.40
codegen_flags: <defaults>
</compile_context>

<pallas_src>
import jax
import jax.numpy as jnp
from jax import lax
from jax.experimental import pallas as pl
from jax.experimental.pallas import tpu as pltpu

# ----------------------------- hyperparameters ------------------------------
NODE_INDIM = 14
EDGE_INDIM = 6
H_OUTDIM = 8
HIDDEN_DIM = 40
ALPHA = 0.5
ALPHA_FCNN = 0.5
N_LAYERS = 1

N_NODES = 64
N_EDGES = 96
N_GRAPHS = 8            # total graphs in the batch
GRAPHS_PER_STEP = 4     # graphs fused per grid step (keep >= 2 grid steps for v7x)
OUT_LANES = 128         # lane-dense padded output width (sliced to H_OUTDIM on host)
COMPUTE_DTYPE = jnp.bfloat16   # MXU operand dtype; accumulation stays f32


# --------------------------------- kernel -----------------------------------
def _resin_kernel(
    # per-step data (GRAPHS_PER_STEP graphs stacked on the sublane axis)
    x_ref, ea_ref, src_ref, dst_ref, dstrow_ref,
    # node encoder (bias=False)
    wn1_ref, wn2_ref,
    # edge encoder (bias=False)
    we1_ref, we2_ref,
    # interaction network: relational MLP (first layer pre-split, bias=True)
    wr1a_ref, wr1b_ref, wr1c_ref, br1_ref, wr2_ref, br2_ref, wr3_ref, br3_ref,
    # interaction network: object MLP (first layer pre-split, bias=True)
    wo1a_ref, wo1b_ref, bo1_ref, wo2_ref, bo2_ref, wo3_ref, bo3_ref,
    # decoder (bias=False); wd2p and sel already carry latnorm / alpha_fcnn scaling
    wd1_ref, wd2p_ref, sel_ref,
    # output: (GB*N_NODES, OUT_LANES) lane-dense slab
    out_ref,
    # scratch
    gath_ref,   # VMEM (GB*E, h): per-graph gather results  x_i@wr1a + x_j@wr1b
    aggp_ref,   # VMEM (GB*N, h): per-graph scatter results  agg@wo1b
):
    f32 = jnp.float32
    cdt = COMPUTE_DTYPE
    GB, N, E = GRAPHS_PER_STEP, N_NODES, N_EDGES

    def mm(a, b):
        return jnp.dot(a.astype(cdt), b.astype(cdt), preferred_element_type=f32)

    x_in = x_ref[...]                               # (GB*N, node_indim)
    ea_in = ea_ref[...]                             # (GB*E, edge_indim)

    # --- node / edge encoders on the stacked sub-batch ---
    x = mm(jnp.maximum(mm(x_in, wn1_ref[...]), 0.0), wn2_ref[...])      # (GB*N, h)
    ea = mm(jnp.maximum(mm(ea_in, we1_ref[...]), 0.0), we2_ref[...])    # (GB*E, h)

    # lane-axis node ids for building one-hot incidence matrices
    iota_en = lax.broadcasted_iota(jnp.int32, (E, N), 1)   # (E, N) value = node id
    iota_ne = lax.broadcasted_iota(jnp.int32, (N, E), 0)   # (N, E) value = node id

    # --- ResIN stack (shared weights; correct for N_LAYERS == 1) ---
    for _layer in range(N_LAYERS):
        # Push wr1a / wr1b through the gather: (dst_oh @ x) @ W == dst_oh @ (x @ W).
        xa = mm(x, wr1a_ref[...])                   # (GB*N, h)
        xb = mm(x, wr1b_ref[...])                   # (GB*N, h)

        # Per-graph one-hot gather (static, sublane-aligned offsets).
        for g in range(GB):
            dst_oh = (dst_ref[pl.ds(g * E, E), :] == iota_en).astype(cdt)   # (E, N)
            src_oh = (src_ref[pl.ds(g * E, E), :] == iota_en).astype(cdt)   # (E, N)
            xa_g = xa[g * N:(g + 1) * N, :]
            xb_g = xb[g * N:(g + 1) * N, :]
            gath_ref[pl.ds(g * E, E), :] = mm(dst_oh, xa_g) + mm(src_oh, xb_g)

        # Remaining relational MLP on the stacked edges.
        r = jnp.maximum(gath_ref[...] + mm(ea, wr1c_ref[...]) + br1_ref[...], 0.0)
        r = jnp.maximum(mm(r, wr2_ref[...]) + br2_ref[...], 0.0)
        e_tilde = mm(r, wr3_ref[...]) + br3_ref[...]                    # (GB*E, h)

        # Push wo1b through the scatter-add:
        #   scatter_add(e_tilde, dst) @ wo1b == scatter_add(e_tilde @ wo1b, dst).
        eb = mm(e_tilde, wo1b_ref[...])                                 # (GB*E, h)
        for g in range(GB):
            dst_oh_t = (dstrow_ref[g] == iota_ne).astype(cdt)           # (N, E)
            eb_g = eb[g * E:(g + 1) * E, :]
            aggp_ref[pl.ds(g * N, N), :] = mm(dst_oh_t, eb_g)

        # Object MLP on the stacked nodes.
        o = jnp.maximum(mm(x, wo1a_ref[...]) + aggp_ref[...] + bo1_ref[...], 0.0)
        o = jnp.maximum(mm(o, wo2_ref[...]) + bo2_ref[...], 0.0)
        x_tilde = mm(o, wo3_ref[...]) + bo3_ref[...]                    # (GB*N, h)

        x = ALPHA * x + (1.0 - ALPHA) * x_tilde
        ea = ALPHA * ea + (1.0 - ALPHA) * e_tilde

    # --- decoder + folded residual/latnorm, lane-dense 128-wide output ---
    #   delta_term = relu(x @ wd1) @ (wd2 * (1-alpha_fcnn)*latnorm, zero-padded to 128)
    #   fcnn_term  = x_in @ sel   (sel[i,i] = alpha_fcnn*latnorm for i < h_outdim)
    delta_term = mm(jnp.maximum(mm(x, wd1_ref[...]), 0.0), wd2p_ref[...])   # (GB*N, 128)
    fcnn_term = mm(x_in, sel_ref[...])                                      # (GB*N, 128)
    out_ref[...] = fcnn_term + delta_term


# --------------------------------- wrapper -----------------------------------
@jax.jit
def graph_construction_resin(x, edge_attr, src, dst, params):
    """Batched forward.

    x: (G, N_NODES, NODE_INDIM) f32, edge_attr: (G, N_EDGES, EDGE_INDIM) f32,
    src/dst: (G, N_EDGES) int32.  Returns (G, N_NODES, H_OUTDIM) f32.
    """
    g_count = x.shape[0]
    assert g_count % GRAPHS_PER_STEP == 0
    gb, n, e, h = GRAPHS_PER_STEP, N_NODES, N_EDGES, HIDDEN_DIM
    n_steps = g_count // gb
    cdt = COMPUTE_DTYPE
    latnorm = params["latnorm"][0, 0]

    # Weight prep (traced inside this jit): split concat weights, fold
    # residual + latnorm constants, pad decoder projection to 128 lanes, cast to bf16.
    wr1a = params["wr1"][:h].astype(cdt)
    wr1b = params["wr1"][h:2 * h].astype(cdt)
    wr1c = params["wr1"][2 * h:].astype(cdt)
    wo1a = params["wo1"][:h].astype(cdt)
    wo1b = params["wo1"][h:].astype(cdt)
    wd2p = jnp.zeros((h, OUT_LANES), jnp.float32).at[:, :H_OUTDIM].set(
        params["wd2"] * ((1.0 - ALPHA_FCNN) * latnorm)).astype(cdt)
    sel = jnp.zeros((NODE_INDIM, OUT_LANES), jnp.float32).at[
        jnp.arange(H_OUTDIM), jnp.arange(H_OUTDIM)].set(
        ALPHA_FCNN * latnorm).astype(cdt)

    # Flatten the graph axis into the sublane axis -> no in-kernel reshapes needed.
    x2d = x.reshape(g_count * n, NODE_INDIM)
    ea2d = edge_attr.reshape(g_count * e, EDGE_INDIM)
    src_col = src.reshape(g_count * e, 1).astype(jnp.int32)
    dst_col = dst.reshape(g_count * e, 1).astype(jnp.int32)
    dst_row = dst.reshape(g_count, 1, e).astype(jnp.int32)

    data_args = (x2d, ea2d, src_col, dst_col, dst_row)
    weight_args = (
        params["wn1"].astype(cdt), params["wn2"].astype(cdt),
        params["we1"].astype(cdt), params["we2"].astype(cdt),
        wr1a, wr1b, wr1c, params["br1"], params["wr2"].astype(cdt), params["br2"],
        params["wr3"].astype(cdt), params["br3"],
        wo1a, wo1b, params["bo1"], params["wo2"].astype(cdt), params["bo2"],
        params["wo3"].astype(cdt), params["bo3"],
        params["wd1"].astype(cdt), wd2p, sel,
    )

    data_specs = [
        pl.BlockSpec((gb * n, NODE_INDIM), lambda s: (s, 0)),
        pl.BlockSpec((gb * e, EDGE_INDIM), lambda s: (s, 0)),
        pl.BlockSpec((gb * e, 1), lambda s: (s, 0)),
        pl.BlockSpec((gb * e, 1), lambda s: (s, 0)),
        pl.BlockSpec((gb, 1, e), lambda s: (s, 0, 0)),
    ]

    def resident_spec(arr):
        # Same block at every grid step -> DMA'd once, stays resident in VMEM.
        return pl.BlockSpec(arr.shape, lambda s: (0,) * arr.ndim)

    in_specs = data_specs + [resident_spec(a) for a in weight_args]

    out2d = pl.pallas_call(
        _resin_kernel,
        out_shape=jax.ShapeDtypeStruct((g_count * n, OUT_LANES), jnp.float32),
        grid=(n_steps,),
        in_specs=in_specs,
        out_specs=pl.BlockSpec((gb * n, OUT_LANES), lambda s: (s, 0)),
        scratch_shapes=[
            pltpu.VMEM((gb * e, h), jnp.float32),
            pltpu.VMEM((gb * n, h), jnp.float32),
        ],
        compiler_params=pltpu.CompilerParams(
            dimension_semantics=("parallel",)),
    )(*data_args, *weight_args)

    return out2d.reshape(g_count, n, OUT_LANES)[:, :, :H_OUTDIM]


# ----------------------------- parameter init -------------------------------
def init_params(key):
    def lin(k, fan_in, fan_out):
        return (jax.random.normal(k, (fan_in, fan_out), jnp.float32)
                / jnp.sqrt(jnp.float32(fan_in)))

    keys = jax.random.split(key, 16)
    h, d3, d2 = HIDDEN_DIM, 3 * HIDDEN_DIM, 2 * HIDDEN_DIM
    params = {
        # node encoder MLP (L=2, bias=False)
        "wn1": lin(keys[0], NODE_INDIM, h),
        "wn2": lin(keys[1], h, h),
        # edge encoder MLP (L=2, bias=False)
        "we1": lin(keys[2], EDGE_INDIM, h),
        "we2": lin(keys[3], h, h),
        # IN relational MLP (L=3, bias=True), input = [x_i, x_j, edge_attr]
        "wr1": lin(keys[4], d3, h), "br1": jnp.zeros((1, h), jnp.float32) + 0.01,
        "wr2": lin(keys[5], h, h),  "br2": jnp.zeros((1, h), jnp.float32) + 0.01,
        "wr3": lin(keys[6], h, h),  "br3": jnp.zeros((1, h), jnp.float32) + 0.01,
        # IN object MLP (L=3, bias=True), input = [x, aggregated_messages]
        "wo1": lin(keys[7], d2, h), "bo1": jnp.zeros((1, h), jnp.float32) + 0.01,
        "wo2": lin(keys[8], h, h),  "bo2": jnp.zeros((1, h), jnp.float32) + 0.01,
        "wo3": lin(keys[9], h, h),  "bo3": jnp.zeros((1, h), jnp.float32) + 0.01,
        # decoder MLP (L=2, bias=False)
        "wd1": lin(keys[10], h, h),
        "wd2": lin(keys[11], h, H_OUTDIM),
        # latent normalization parameter (torch.tensor([1.0]))
        "latnorm": jnp.ones((1, 1), jnp.float32),
    }
    return params


# ------------------------------ pure-JAX reference ---------------------------
def ref_forward(x, edge_attr, src, dst, p):
    x_fcnn = x[:, :H_OUTDIM]
    hvec = jnp.maximum(x @ p["wn1"], 0.0) @ p["wn2"]
    ea = jnp.maximum(edge_attr @ p["we1"], 0.0) @ p["we2"]
    for _ in range(N_LAYERS):
        x_i, x_j = hvec[dst], hvec[src]
        m = jnp.concatenate([x_i, x_j, ea], axis=1)
        r = jnp.maximum(m @ p["wr1"] + p["br1"], 0.0)
        r = jnp.maximum(r @ p["wr2"] + p["br2"], 0.0)
        e_tilde = r @ p["wr3"] + p["br3"]
        agg = jax.ops.segment_sum(e_tilde, dst, num_segments=N_NODES)
        o = jnp.concatenate([hvec, agg], axis=1)
        o = jnp.maximum(o @ p["wo1"] + p["bo1"], 0.0)
        o = jnp.maximum(o @ p["wo2"] + p["bo2"], 0.0)
        x_tilde = o @ p["wo3"] + p["bo3"]
        hvec = ALPHA * hvec + (1.0 - ALPHA) * x_tilde
        ea = ALPHA * ea + (1.0 - ALPHA) * e_tilde
    delta = jnp.maximum(hvec @ p["wd1"], 0.0) @ p["wd2"]
    out = ALPHA_FCNN * x_fcnn + (1.0 - ALPHA_FCNN) * delta
    return out * p["latnorm"][0, 0]


# ----------------------------------- main ------------------------------------
if __name__ == "__main__":
    key = jax.random.PRNGKey(0)
    k_x, k_ea, k_src, k_dst, k_p = jax.random.split(key, 5)

    x = jax.random.normal(k_x, (N_GRAPHS, N_NODES, NODE_INDIM), jnp.float32)
    edge_attr = jax.random.normal(k_ea, (N_GRAPHS, N_EDGES, EDGE_INDIM), jnp.float32)
    src_idx = jax.random.randint(k_src, (N_GRAPHS, N_EDGES), 0, N_NODES, jnp.int32)
    dst_idx = jax.random.randint(k_dst, (N_GRAPHS, N_EDGES), 0, N_NODES, jnp.int32)
    params = init_params(k_p)

    out = graph_construction_resin(x, edge_attr, src_idx, dst_idx, params)
    out = jax.block_until_ready(out)

    ref = jnp.stack([
        ref_forward(x[g], edge_attr[g], src_idx[g], dst_idx[g], params)
        for g in range(N_GRAPHS)
    ])
    ref = jax.block_until_ready(ref)

    assert out.shape == (N_GRAPHS, N_NODES, H_OUTDIM)
    max_err = jnp.max(jnp.abs(out - ref))
    # bf16 MXU operands (f32 accumulation) -> relaxed tolerance vs the f32 reference.
    assert jnp.allclose(out, ref, rtol=5e-2, atol=5e-2), f"max abs err {max_err}"

    print("KERNEL_OK")
</pallas_src>

<mosaic_0001>
module attributes {stable_mosaic.version = 11 : i64} {
  func.func @_resin_kernel(%arg0: i32, %arg1: memref<256x14xf32, #tpu.memory_space<vmem>>, %arg2: memref<384x6xf32, #tpu.memory_space<vmem>>, %arg3: memref<384x1xi32, #tpu.memory_space<vmem>>, %arg4: memref<384x1xi32, #tpu.memory_space<vmem>>, %arg5: memref<4x1x96xi32, #tpu.memory_space<vmem>>, %arg6: memref<14x40xbf16, #tpu.memory_space<vmem>>, %arg7: memref<40x40xbf16, #tpu.memory_space<vmem>>, %arg8: memref<6x40xbf16, #tpu.memory_space<vmem>>, %arg9: memref<40x40xbf16, #tpu.memory_space<vmem>>, %arg10: memref<40x40xbf16, #tpu.memory_space<vmem>>, %arg11: memref<40x40xbf16, #tpu.memory_space<vmem>>, %arg12: memref<40x40xbf16, #tpu.memory_space<vmem>>, %arg13: memref<1x40xf32, #tpu.memory_space<vmem>>, %arg14: memref<40x40xbf16, #tpu.memory_space<vmem>>, %arg15: memref<1x40xf32, #tpu.memory_space<vmem>>, %arg16: memref<40x40xbf16, #tpu.memory_space<vmem>>, %arg17: memref<1x40xf32, #tpu.memory_space<vmem>>, %arg18: memref<40x40xbf16, #tpu.memory_space<vmem>>, %arg19: memref<40x40xbf16, #tpu.memory_space<vmem>>, %arg20: memref<1x40xf32, #tpu.memory_space<vmem>>, %arg21: memref<40x40xbf16, #tpu.memory_space<vmem>>, %arg22: memref<1x40xf32, #tpu.memory_space<vmem>>, %arg23: memref<40x40xbf16, #tpu.memory_space<vmem>>, %arg24: memref<1x40xf32, #tpu.memory_space<vmem>>, %arg25: memref<40x40xbf16, #tpu.memory_space<vmem>>, %arg26: memref<40x128xbf16, #tpu.memory_space<vmem>>, %arg27: memref<14x128xbf16, #tpu.memory_space<vmem>>, %arg28: memref<256x128xf32, #tpu.memory_space<vmem>>, %arg29: memref<384x40xf32, #tpu.memory_space<vmem>>, %arg30: memref<256x40xf32, #tpu.memory_space<vmem>>) attributes {dimension_semantics = [#tpu.dimension_semantics<parallel>], iteration_bounds = array<i64: 2>, scalar_prefetch = 0 : i64, scratch_operands = 2 : i64, tpu.core_type = #tpu.core_type<tc>, window_params = [{transform_indices = @transform_0, window_bounds = array<i64: 256, 14>}, {transform_indices = @transform_1, window_bounds = array<i64: 384, 6>}, {transform_indices = @transform_2, window_bounds = array<i64: 384, 1>}, {transform_indices = @transform_3, window_bounds = array<i64: 384, 1>}, {transform_indices = @transform_4, window_bounds = array<i64: 4, 1, 96>}, {pipeline_mode = #tpu.pipeline_mode<synchronous>, transform_indices = @transform_5, window_bounds = array<i64: 14, 40>}, {pipeline_mode = #tpu.pipeline_mode<synchronous>, transform_indices = @transform_6, window_bounds = array<i64: 40, 40>}, {pipeline_mode = #tpu.pipeline_mode<synchronous>, transform_indices = @transform_7, window_bounds = array<i64: 6, 40>}, {pipeline_mode = #tpu.pipeline_mode<synchronous>, transform_indices = @transform_8, window_bounds = array<i64: 40, 40>}, {pipeline_mode = #tpu.pipeline_mode<synchronous>, transform_indices = @transform_9, window_bounds = array<i64: 40, 40>}, {pipeline_mode = #tpu.pipeline_mode<synchronous>, transform_indices = @transform_10, window_bounds = array<i64: 40, 40>}, {pipeline_mode = #tpu.pipeline_mode<synchronous>, transform_indices = @transform_11, window_bounds = array<i64: 40, 40>}, {pipeline_mode = #tpu.pipeline_mode<synchronous>, transform_indices = @transform_12, window_bounds = array<i64: 1, 40>}, {pipeline_mode = #tpu.pipeline_mode<synchronous>, transform_indices = @transform_13, window_bounds = array<i64: 40, 40>}, {pipeline_mode = #tpu.pipeline_mode<synchronous>, transform_indices = @transform_14, window_bounds = array<i64: 1, 40>}, {pipeline_mode = #tpu.pipeline_mode<synchronous>, transform_indices = @transform_15, window_bounds = array<i64: 40, 40>}, {pipeline_mode = #tpu.pipeline_mode<synchronous>, transform_indices = @transform_16, window_bounds = array<i64: 1, 40>}, {pipeline_mode = #tpu.pipeline_mode<synchronous>, transform_indices = @transform_17, window_bounds = array<i64: 40, 40>}, {pipeline_mode = #tpu.pipeline_mode<synchronous>, transform_indices = @transform_18, window_bounds = array<i64: 40, 40>}, {pipeline_mode = #tpu.pipeline_mode<synchronous>, transform_indices = @transform_19, window_bounds = array<i64: 1, 40>}, {pipeline_mode = #tpu.pipeline_mode<synchronous>, transform_indices = @transform_20, window_bounds = array<i64: 40, 40>}, {pipeline_mode = #tpu.pipeline_mode<synchronous>, transform_indices = @transform_21, window_bounds = array<i64: 1, 40>}, {pipeline_mode = #tpu.pipeline_mode<synchronous>, transform_indices = @transform_22, window_bounds = array<i64: 40, 40>}, {pipeline_mode = #tpu.pipeline_mode<synchronous>, transform_indices = @transform_23, window_bounds = array<i64: 1, 40>}, {pipeline_mode = #tpu.pipeline_mode<synchronous>, transform_indices = @transform_24, window_bounds = array<i64: 40, 40>}, {pipeline_mode = #tpu.pipeline_mode<synchronous>, transform_indices = @transform_25, window_bounds = array<i64: 40, 128>}, {pipeline_mode = #tpu.pipeline_mode<synchronous>, transform_indices = @transform_26, window_bounds = array<i64: 14, 128>}, {transform_indices = @transform_27, window_bounds = array<i64: 256, 128>}]} {
    %c0 = arith.constant 0 : index
    %c0_0 = arith.constant 0 : index
    %0 = vector.load %arg1[%c0, %c0_0] : memref<256x14xf32, #tpu.memory_space<vmem>>, vector<256x14xf32>
    %c0_1 = arith.constant 0 : index
    %c0_2 = arith.constant 0 : index
    %1 = vector.load %arg2[%c0_1, %c0_2] : memref<384x6xf32, #tpu.memory_space<vmem>>, vector<384x6xf32>
    %c0_3 = arith.constant 0 : index
    %c0_4 = arith.constant 0 : index
    %2 = vector.load %arg6[%c0_3, %c0_4] : memref<14x40xbf16, #tpu.memory_space<vmem>>, vector<14x40xbf16>
    %3 = arith.truncf %0 : vector<256x14xf32> to vector<256x14xbf16>
    %cst = arith.constant dense<0.000000e+00> : vector<256x40xf32>
    %4 = tpu.matmul %3, %2, %cst {dimension_numbers = #tpu.dot_dimension_numbers<[1], [0], [0], [1], [0, 0, 1, 1], [], []>} : vector<256x14xbf16>, vector<14x40xbf16>, vector<256x40xf32> -> vector<256x40xf32>
    %cst_5 = arith.constant 0.000000e+00 : f32
    %5 = vector.broadcast %cst_5 : f32 to vector<256x40xf32>
    %6 = arith.maximumf %4, %5 : vector<256x40xf32>
    %c0_6 = arith.constant 0 : index
    %c0_7 = arith.constant 0 : index
    %7 = vector.load %arg7[%c0_6, %c0_7] : memref<40x40xbf16, #tpu.memory_space<vmem>>, vector<40x40xbf16>
    %8 = arith.truncf %6 : vector<256x40xf32> to vector<256x40xbf16>
    %cst_8 = arith.constant dense<0.000000e+00> : vector<256x40xf32>
    %9 = tpu.matmul %8, %7, %cst_8 {dimension_numbers = #tpu.dot_dimension_numbers<[1], [0], [0], [1], [0, 0, 1, 1], [], []>} : vector<256x40xbf16>, vector<40x40xbf16>, vector<256x40xf32> -> vector<256x40xf32>
    %c0_9 = arith.constant 0 : index
    %c0_10 = arith.constant 0 : index
    %10 = vector.load %arg8[%c0_9, %c0_10] : memref<6x40xbf16, #tpu.memory_space<vmem>>, vector<6x40xbf16>
    %11 = arith.truncf %1 : vector<384x6xf32> to vector<384x6xbf16>
    %cst_11 = arith.constant dense<0.000000e+00> : vector<384x40xf32>
    %12 = tpu.matmul %11, %10, %cst_11 {dimension_numbers = #tpu.dot_dimension_numbers<[1], [0], [0], [1], [0, 0, 1, 1], [], []>} : vector<384x6xbf16>, vector<6x40xbf16>, vector<384x40xf32> -> vector<384x40xf32>
    %cst_12 = arith.constant 0.000000e+00 : f32
    %13 = vector.broadcast %cst_12 : f32 to vector<384x40xf32>
    %14 = arith.maximumf %12, %13 : vector<384x40xf32>
    %c0_13 = arith.constant 0 : index
    %c0_14 = arith.constant 0 : index
    %15 = vector.load %arg9[%c0_13, %c0_14] : memref<40x40xbf16, #tpu.memory_space<vmem>>, vector<40x40xbf16>
    %16 = arith.truncf %14 : vector<384x40xf32> to vector<384x40xbf16>
    %cst_15 = arith.constant dense<0.000000e+00> : vector<384x40xf32>
    %17 = tpu.matmul %16, %15, %cst_15 {dimension_numbers = #tpu.dot_dimension_numbers<[1], [0], [0], [1], [0, 0, 1, 1], [], []>} : vector<384x40xbf16>, vector<40x40xbf16>, vector<384x40xf32> -> vector<384x40xf32>
    %18 = tpu.iota {dimensions = array<i32: 1>} : vector<96x64xi32>
    %19 = tpu.iota {dimensions = array<i32: 0>} : vector<64x96xi32>
    %c0_16 = arith.constant 0 : index
    %c0_17 = arith.constant 0 : index
    %20 = vector.load %arg10[%c0_16, %c0_17] : memref<40x40xbf16, #tpu.memory_space<vmem>>, vector<40x40xbf16>
    %21 = arith.truncf %9 : vector<256x40xf32> to vector<256x40xbf16>
    %cst_18 = arith.constant dense<0.000000e+00> : vector<256x40xf32>
    %22 = tpu.matmul %21, %20, %cst_18 {dimension_numbers = #tpu.dot_dimension_numbers<[1], [0], [0], [1], [0, 0, 1, 1], [], []>} : vector<256x40xbf16>, vector<40x40xbf16>, vector<256x40xf32> -> vector<256x40xf32>
    %c0_19 = arith.constant 0 : index
    %c0_20 = arith.constant 0 : index
    %23 = vector.load %arg11[%c0_19, %c0_20] : memref<40x40xbf16, #tpu.memory_space<vmem>>, vector<40x40xbf16>
    %24 = arith.truncf %9 : vector<256x40xf32> to vector<256x40xbf16>
    %cst_21 = arith.constant dense<0.000000e+00> : vector<256x40xf32>
    %25 = tpu.matmul %24, %23, %cst_21 {dimension_numbers = #tpu.dot_dimension_numbers<[1], [0], [0], [1], [0, 0, 1, 1], [], []>} : vector<256x40xbf16>, vector<40x40xbf16>, vector<256x40xf32> -> vector<256x40xf32>
    %c0_22 = arith.constant 0 : index
    %c0_23 = arith.constant 0 : index
    %26 = vector.load %arg4[%c0_22, %c0_23] : memref<384x1xi32, #tpu.memory_space<vmem>>, vector<96x1xi32>
    %27 = vector.broadcast %26 : vector<96x1xi32> to vector<96x64xi32>
    %28 = arith.cmpi eq, %27, %18 : vector<96x64xi32>
    %29 = arith.extui %28 : vector<96x64xi1> to vector<96x64xi32>
    %30 = arith.sitofp %29 : vector<96x64xi32> to vector<96x64xf32>
    %31 = arith.truncf %30 : vector<96x64xf32> to vector<96x64xbf16>
    %c0_24 = arith.constant 0 : index
    %c0_25 = arith.constant 0 : index
    %32 = vector.load %arg3[%c0_24, %c0_25] : memref<384x1xi32, #tpu.memory_space<vmem>>, vector<96x1xi32>
    %33 = vector.broadcast %32 : vector<96x1xi32> to vector<96x64xi32>
    %34 = arith.cmpi eq, %33, %18 : vector<96x64xi32>
    %35 = arith.extui %34 : vector<96x64xi1> to vector<96x64xi32>
    %36 = arith.sitofp %35 : vector<96x64xi32> to vector<96x64xf32>
    %37 = arith.truncf %36 : vector<96x64xf32> to vector<96x64xbf16>
    %38 = vector.extract_strided_slice %22 {offsets = [0, 0], sizes = [64, 40], strides = [1, 1]} : vector<256x40xf32> to vector<64x40xf32>
    %39 = vector.extract_strided_slice %25 {offsets = [0, 0], sizes = [64, 40], strides = [1, 1]} : vector<256x40xf32> to vector<64x40xf32>
    %40 = arith.truncf %38 : vector<64x40xf32> to vector<64x40xbf16>
    %cst_26 = arith.constant dense<0.000000e+00> : vector<96x40xf32>
    %41 = tpu.matmul %31, %40, %cst_26 {dimension_numbers = #tpu.dot_dimension_numbers<[1], [0], [0], [1], [0, 0, 1, 1], [], []>} : vector<96x64xbf16>, vector<64x40xbf16>, vector<96x40xf32> -> vector<96x40xf32>
    %42 = arith.truncf %39 : vector<64x40xf32> to vector<64x40xbf16>
    %cst_27 = arith.constant dense<0.000000e+00> : vector<96x40xf32>
    %43 = tpu.matmul %37, %42, %cst_27 {dimension_numbers = #tpu.dot_dimension_numbers<[1], [0], [0], [1], [0, 0, 1, 1], [], []>} : vector<96x64xbf16>, vector<64x40xbf16>, vector<96x40xf32> -> vector<96x40xf32>
    %44 = arith.addf %41, %43 : vector<96x40xf32>
    %c0_28 = arith.constant 0 : index
    %c0_29 = arith.constant 0 : index
    %45 = vector.load %arg29[%c0_28, %c0_29] : memref<384x40xf32, #tpu.memory_space<vmem>>, vector<96x40xf32>
    tpu.vector_store %arg29[%c0_28, %c0_29], %44 {strides = array<i32>} : memref<384x40xf32, #tpu.memory_space<vmem>>, vector<96x40xf32>,
    %c96 = arith.constant 96 : index
    %c0_30 = arith.constant 0 : index
    %46 = vector.load %arg4[%c96, %c0_30] : memref<384x1xi32, #tpu.memory_space<vmem>>, vector<96x1xi32>
    %47 = vector.broadcast %46 : vector<96x1xi32> to vector<96x64xi32>
    %48 = arith.cmpi eq, %47, %18 : vector<96x64xi32>
    %49 = arith.extui %48 : vector<96x64xi1> to vector<96x64xi32>
    %50 = arith.sitofp %49 : vector<96x64xi32> to vector<96x64xf32>
    %51 = arith.truncf %50 : vector<96x64xf32> to vector<96x64xbf16>
    %c96_31 = arith.constant 96 : index
    %c0_32 = arith.constant 0 : index
    %52 = vector.load %arg3[%c96_31, %c0_32] : memref<384x1xi32, #tpu.memory_space<vmem>>, vector<96x1xi32>
    %53 = vector.broadcast %52 : vector<96x1xi32> to vector<96x64xi32>
    %54 = arith.cmpi eq, %53, %18 : vector<96x64xi32>
    %55 = arith.extui %54 : vector<96x64xi1> to vector<96x64xi32>
    %56 = arith.sitofp %55 : vector<96x64xi32> to vector<96x64xf32>
    %57 = arith.truncf %56 : vector<96x64xf32> to vector<96x64xbf16>
    %58 = vector.extract_strided_slice %22 {offsets = [64, 0], sizes = [64, 40], strides = [1, 1]} : vector<256x40xf32> to vector<64x40xf32>
    %59 = vector.extract_strided_slice %25 {offsets = [64, 0], sizes = [64, 40], strides = [1, 1]} : vector<256x40xf32> to vector<64x40xf32>
    %60 = arith.truncf %58 : vector<64x40xf32> to vector<64x40xbf16>
    %cst_33 = arith.constant dense<0.000000e+00> : vector<96x40xf32>
    %61 = tpu.matmul %51, %60, %cst_33 {dimension_numbers = #tpu.dot_dimension_numbers<[1], [0], [0], [1], [0, 0, 1, 1], [], []>} : vector<96x64xbf16>, vector<64x40xbf16>, vector<96x40xf32> -> vector<96x40xf32>
    %62 = arith.truncf %59 : vector<64x40xf32> to vector<64x40xbf16>
    %cst_34 = arith.constant dense<0.000000e+00> : vector<96x40xf32>
    %63 = tpu.matmul %57, %62, %cst_34 {dimension_numbers = #tpu.dot_dimension_numbers<[1], [0], [0], [1], [0, 0, 1, 1], [], []>} : vector<96x64xbf16>, vector<64x40xbf16>, vector<96x40xf32> -> vector<96x40xf32>
    %64 = arith.addf %61, %63 : vector<96x40xf32>
    %c96_35 = arith.constant 96 : index
    %c0_36 = arith.constant 0 : index
    %65 = vector.load %arg29[%c96_35, %c0_36] : memref<384x40xf32, #tpu.memory_space<vmem>>, vector<96x40xf32>
    tpu.vector_store %arg29[%c96_35, %c0_36], %64 {strides = array<i32>} : memref<384x40xf32, #tpu.memory_space<vmem>>, vector<96x40xf32>,
    %c192 = arith.constant 192 : index
    %c0_37 = arith.constant 0 : index
    %66 = vector.load %arg4[%c192, %c0_37] : memref<384x1xi32, #tpu.memory_space<vmem>>, vector<96x1xi32>
    %67 = vector.broadcast %66 : vector<96x1xi32> to vector<96x64xi32>
    %68 = arith.cmpi eq, %67, %18 : vector<96x64xi32>
    %69 = arith.extui %68 : vector<96x64xi1> to vector<96x64xi32>
    %70 = arith.sitofp %69 : vector<96x64xi32> to vector<96x64xf32>
    %71 = arith.truncf %70 : vector<96x64xf32> to vector<96x64xbf16>
    %c192_38 = arith.constant 192 : index
    %c0_39 = arith.constant 0 : index
    %72 = vector.load %arg3[%c192_38, %c0_39] : memref<384x1xi32, #tpu.memory_space<vmem>>, vector<96x1xi32>
    %73 = vector.broadcast %72 : vector<96x1xi32> to vector<96x64xi32>
    %74 = arith.cmpi eq, %73, %18 : vector<96x64xi32>
    %75 = arith.extui %74 : vector<96x64xi1> to vector<96x64xi32>
    %76 = arith.sitofp %75 : vector<96x64xi32> to vector<96x64xf32>
    %77 = arith.truncf %76 : vector<96x64xf32> to vector<96x64xbf16>
    %78 = vector.extract_strided_slice %22 {offsets = [128, 0], sizes = [64, 40], strides = [1, 1]} : vector<256x40xf32> to vector<64x40xf32>
    %79 = vector.extract_strided_slice %25 {offsets = [128, 0], sizes = [64, 40], strides = [1, 1]} : vector<256x40xf32> to vector<64x40xf32>
    %80 = arith.truncf %78 : vector<64x40xf32> to vector<64x40xbf16>
    %cst_40 = arith.constant dense<0.000000e+00> : vector<96x40xf32>
    %81 = tpu.matmul %71, %80, %cst_40 {dimension_numbers = #tpu.dot_dimension_numbers<[1], [0], [0], [1], [0, 0, 1, 1], [], []>} : vector<96x64xbf16>, vector<64x40xbf16>, vector<96x40xf32> -> vector<96x40xf32>
    %82 = arith.truncf %79 : vector<64x40xf32> to vector<64x40xbf16>
    %cst_41 = arith.constant dense<0.000000e+00> : vector<96x40xf32>
    %83 = tpu.matmul %77, %82, %cst_41 {dimension_numbers = #tpu.dot_dimension_numbers<[1], [0], [0], [1], [0, 0, 1, 1], [], []>} : vector<96x64xbf16>, vector<64x40xbf16>, vector<96x40xf32> -> vector<96x40xf32>
    %84 = arith.addf %81, %83 : vector<96x40xf32>
    %c192_42 = arith.constant 192 : index
    %c0_43 = arith.constant 0 : index
    %85 = vector.load %arg29[%c192_42, %c0_43] : memref<384x40xf32, #tpu.memory_space<vmem>>, vector<96x40xf32>
    tpu.vector_store %arg29[%c192_42, %c0_43], %84 {strides = array<i32>} : memref<384x40xf32, #tpu.memory_space<vmem>>, vector<96x40xf32>,
    %c288 = arith.constant 288 : index
    %c0_44 = arith.constant 0 : index
    %86 = vector.load %arg4[%c288, %c0_44] : memref<384x1xi32, #tpu.memory_space<vmem>>, vector<96x1xi32>
    %87 = vector.broadcast %86 : vector<96x1xi32> to vector<96x64xi32>
    %88 = arith.cmpi eq, %87, %18 : vector<96x64xi32>
    %89 = arith.extui %88 : vector<96x64xi1> to vector<96x64xi32>
    %90 = arith.sitofp %89 : vector<96x64xi32> to vector<96x64xf32>
    %91 = arith.truncf %90 : vector<96x64xf32> to vector<96x64xbf16>
    %c288_45 = arith.constant 288 : index
    %c0_46 = arith.constant 0 : index
    %92 = vector.load %arg3[%c288_45, %c0_46] : memref<384x1xi32, #tpu.memory_space<vmem>>, vector<96x1xi32>
    %93 = vector.broadcast %92 : vector<96x1xi32> to vector<96x64xi32>
    %94 = arith.cmpi eq, %93, %18 : vector<96x64xi32>
    %95 = arith.extui %94 : vector<96x64xi1> to vector<96x64xi32>
    %96 = arith.sitofp %95 : vector<96x64xi32> to vector<96x64xf32>
    %97 = arith.truncf %96 : vector<96x64xf32> to vector<96x64xbf16>
    %98 = vector.extract_strided_slice %22 {offsets = [192, 0], sizes = [64, 40], strides = [1, 1]} : vector<256x40xf32> to vector<64x40xf32>
    %99 = vector.extract_strided_slice %25 {offsets = [192, 0], sizes = [64, 40], strides = [1, 1]} : vector<256x40xf32> to vector<64x40xf32>
    %100 = arith.truncf %98 : vector<64x40xf32> to vector<64x40xbf16>
    %cst_47 = arith.constant dense<0.000000e+00> : vector<96x40xf32>
    %101 = tpu.matmul %91, %100, %cst_47 {dimension_numbers = #tpu.dot_dimension_numbers<[1], [0], [0], [1], [0, 0, 1, 1], [], []>} : vector<96x64xbf16>, vector<64x40xbf16>, vector<96x40xf32> -> vector<96x40xf32>
    %102 = arith.truncf %99 : vector<64x40xf32> to vector<64x40xbf16>
    %cst_48 = arith.constant dense<0.000000e+00> : vector<96x40xf32>
    %103 = tpu.matmul %97, %102, %cst_48 {dimension_numbers = #tpu.dot_dimension_numbers<[1], [0], [0], [1], [0, 0, 1, 1], [], []>} : vector<96x64xbf16>, vector<64x40xbf16>, vector<96x40xf32> -> vector<96x40xf32>
    %104 = arith.addf %101, %103 : vector<96x40xf32>
    %c288_49 = arith.constant 288 : index
    %c0_50 = arith.constant 0 : index
    %105 = vector.load %arg29[%c288_49, %c0_50] : memref<384x40xf32, #tpu.memory_space<vmem>>, vector<96x40xf32>
    tpu.vector_store %arg29[%c288_49, %c0_50], %104 {strides = array<i32>} : memref<384x40xf32, #tpu.memory_space<vmem>>, vector<96x40xf32>,
    %c0_51 = arith.constant 0 : index
    %c0_52 = arith.constant 0 : index
    %106 = vector.load %arg29[%c0_51, %c0_52] : memref<384x40xf32, #tpu.memory_space<vmem>>, vector<384x40xf32>
    %c0_53 = arith.constant 0 : index
    %c0_54 = arith.constant 0 : index
    %107 = vector.load %arg12[%c0_53, %c0_54] : memref<40x40xbf16, #tpu.memory_space<vmem>>, vector<40x40xbf16>
    %108 = arith.truncf %17 : vector<384x40xf32> to vector<384x40xbf16>
    %cst_55 = arith.constant dense<0.000000e+00> : vector<384x40xf32>
    %109 = tpu.matmul %108, %107, %cst_55 {dimension_numbers = #tpu.dot_dimension_numbers<[1], [0], [0], [1], [0, 0, 1, 1], [], []>} : vector<384x40xbf16>, vector<40x40xbf16>, vector<384x40xf32> -> vector<384x40xf32>
    %110 = arith.addf %106, %109 : vector<384x40xf32>
    %c0_56 = arith.constant 0 : index
    %c0_57 = arith.constant 0 : index
    %111 = vector.load %arg13[%c0_56, %c0_57] : memref<1x40xf32, #tpu.memory_space<vmem>>, vector<1x40xf32>
    %112 = vector.broadcast %111 : vector<1x40xf32> to vector<384x40xf32>
    %113 = arith.addf %110, %112 : vector<384x40xf32>
    %cst_58 = arith.constant 0.000000e+00 : f32
    %114 = vector.broadcast %cst_58 : f32 to vector<384x40xf32>
    %115 = arith.maximumf %113, %114 : vector<384x40xf32>
    %c0_59 = arith.constant 0 : index
    %c0_60 = arith.constant 0 : index
    %116 = vector.load %arg14[%c0_59, %c0_60] : memref<40x40xbf16, #tpu.memory_space<vmem>>, vector<40x40xbf16>
    %117 = arith.truncf %115 : vector<384x40xf32> to vector<384x40xbf16>
    %cst_61 = arith.constant dense<0.000000e+00> : vector<384x40xf32>
    %118 = tpu.matmul %117, %116, %cst_61 {dimension_numbers = #tpu.dot_dimension_numbers<[1], [0], [0], [1], [0, 0, 1, 1], [], []>} : vector<384x40xbf16>, vector<40x40xbf16>, vector<384x40xf32> -> vector<384x40xf32>
    %c0_62 = arith.constant 0 : index
    %c0_63 = arith.constant 0 : index
    %119 = vector.load %arg15[%c0_62, %c0_63] : memref<1x40xf32, #tpu.memory_space<vmem>>, vector<1x40xf32>
    %120 = vector.broadcast %119 : vector<1x40xf32> to vector<384x40xf32>
    %121 = arith.addf %118, %120 : vector<384x40xf32>
    %cst_64 = arith.constant 0.000000e+00 : f32
    %122 = vector.broadcast %cst_64 : f32 to vector<384x40xf32>
    %123 = arith.maximumf %121, %122 : vector<384x40xf32>
    %c0_65 = arith.constant 0 : index
    %c0_66 = arith.constant 0 : index
    %124 = vector.load %arg16[%c0_65, %c0_66] : memref<40x40xbf16, #tpu.memory_space<vmem>>, vector<40x40xbf16>
    %125 = arith.truncf %123 : vector<384x40xf32> to vector<384x40xbf16>
    %cst_67 = arith.constant dense<0.000000e+00> : vector<384x40xf32>
    %126 = tpu.matmul %125, %124, %cst_67 {dimension_numbers = #tpu.dot_dimension_numbers<[1], [0], [0], [1], [0, 0, 1, 1], [], []>} : vector<384x40xbf16>, vector<40x40xbf16>, vector<384x40xf32> -> vector<384x40xf32>
    %c0_68 = arith.constant 0 : index
    %c0_69 = arith.constant 0 : index
    %127 = vector.load %arg17[%c0_68, %c0_69] : memref<1x40xf32, #tpu.memory_space<vmem>>, vector<1x40xf32>
    %128 = vector.broadcast %127 : vector<1x40xf32> to vector<384x40xf32>
    %129 = arith.addf %126, %128 : vector<384x40xf32>
    %c0_70 = arith.constant 0 : index
    %c0_71 = arith.constant 0 : index
    %130 = vector.load %arg19[%c0_70, %c0_71] : memref<40x40xbf16, #tpu.memory_space<vmem>>, vector<40x40xbf16>
    %131 = arith.truncf %129 : vector<384x40xf32> to vector<384x40xbf16>
    %cst_72 = arith.constant dense<0.000000e+00> : vector<384x40xf32>
    %132 = tpu.matmul %131, %130, %cst_72 {dimension_numbers = #tpu.dot_dimension_numbers<[1], [0], [0], [1], [0, 0, 1, 1], [], []>} : vector<384x40xbf16>, vector<40x40xbf16>, vector<384x40xf32> -> vector<384x40xf32>
    %c0_73 = arith.constant 0 : index
    %c0_74 = arith.constant 0 : index
    %c0_75 = arith.constant 0 : index
    %133 = vector.load %arg5[%c0_73, %c0_74, %c0_75] : memref<4x1x96xi32, #tpu.memory_space<vmem>>, vector<1x1x96xi32>
    %134 = vector.shape_cast %133 : vector<1x1x96xi32> to vector<1x96xi32>
    %135 = vector.broadcast %134 : vector<1x96xi32> to vector<64x96xi32>
    %136 = arith.cmpi eq, %135, %19 : vector<64x96xi32>
    %137 = arith.extui %136 : vector<64x96xi1> to vector<64x96xi32>
    %138 = arith.sitofp %137 : vector<64x96xi32> to vector<64x96xf32>
    %139 = arith.truncf %138 : vector<64x96xf32> to vector<64x96xbf16>
    %140 = vector.extract_strided_slice %132 {offsets = [0, 0], sizes = [96, 40], strides = [1, 1]} : vector<384x40xf32> to vector<96x40xf32>
    %141 = arith.truncf %140 : vector<96x40xf32> to vector<96x40xbf16>
    %cst_76 = arith.constant dense<0.000000e+00> : vector<64x40xf32>
    %142 = tpu.matmul %139, %141, %cst_76 {dimension_numbers = #tpu.dot_dimension_numbers<[1], [0], [0], [1], [0, 0, 1, 1], [], []>} : vector<64x96xbf16>, vector<96x40xbf16>, vector<64x40xf32> -> vector<64x40xf32>
    %c0_77 = arith.constant 0 : index
    %c0_78 = arith.constant 0 : index
    %143 = vector.load %arg30[%c0_77, %c0_78] : memref<256x40xf32, #tpu.memory_space<vmem>>, vector<64x40xf32>
    tpu.vector_store %arg30[%c0_77, %c0_78], %142 {strides = array<i32>} : memref<256x40xf32, #tpu.memory_space<vmem>>, vector<64x40xf32>,
    %c1 = arith.constant 1 : index
    %c0_79 = arith.constant 0 : index
    %c0_80 = arith.constant 0 : index
    %144 = vector.load %arg5[%c1, %c0_79, %c0_80] : memref<4x1x96xi32, #tpu.memory_space<vmem>>, vector<1x1x96xi32>
    %145 = vector.shape_cast %144 : vector<1x1x96xi32> to vector<1x96xi32>
    %146 = vector.broadcast %145 : vector<1x96xi32> to vector<64x96xi32>
    %147 = arith.cmpi eq, %146, %19 : vector<64x96xi32>
    %148 = arith.extui %147 : vector<64x96xi1> to vector<64x96xi32>
    %149 = arith.sitofp %148 : vector<64x96xi32> to vector<64x96xf32>
    %150 = arith.truncf %149 : vector<64x96xf32> to vector<64x96xbf16>
    %151 = vector.extract_strided_slice %132 {offsets = [96, 0], sizes = [96, 40], strides = [1, 1]} : vector<384x40xf32> to vector<96x40xf32>
    %152 = arith.truncf %151 : vector<96x40xf32> to vector<96x40xbf16>
    %cst_81 = arith.constant dense<0.000000e+00> : vector<64x40xf32>
    %153 = tpu.matmul %150, %152, %cst_81 {dimension_numbers = #tpu.dot_dimension_numbers<[1], [0], [0], [1], [0, 0, 1, 1], [], []>} : vector<64x96xbf16>, vector<96x40xbf16>, vector<64x40xf32> -> vector<64x40xf32>
    %c64 = arith.constant 64 : index
    %c0_82 = arith.constant 0 : index
    %154 = vector.load %arg30[%c64, %c0_82] : memref<256x40xf32, #tpu.memory_space<vmem>>, vector<64x40xf32>
    tpu.vector_store %arg30[%c64, %c0_82], %153 {strides = array<i32>} : memref<256x40xf32, #tpu.memory_space<vmem>>, vector<64x40xf32>,
    %c2 = arith.constant 2 : index
    %c0_83 = arith.constant 0 : index
    %c0_84 = arith.constant 0 : index
    %155 = vector.load %arg5[%c2, %c0_83, %c0_84] : memref<4x1x96xi32, #tpu.memory_space<vmem>>, vector<1x1x96xi32>
    %156 = vector.shape_cast %155 : vector<1x1x96xi32> to vector<1x96xi32>
    %157 = vector.broadcast %156 : vector<1x96xi32> to vector<64x96xi32>
    %158 = arith.cmpi eq, %157, %19 : vector<64x96xi32>
    %159 = arith.extui %158 : vector<64x96xi1> to vector<64x96xi32>
    %160 = arith.sitofp %159 : vector<64x96xi32> to vector<64x96xf32>
    %161 = arith.truncf %160 : vector<64x96xf32> to vector<64x96xbf16>
    %162 = vector.extract_strided_slice %132 {offsets = [192, 0], sizes = [96, 40], strides = [1, 1]} : vector<384x40xf32> to vector<96x40xf32>
    %163 = arith.truncf %162 : vector<96x40xf32> to vector<96x40xbf16>
    %cst_85 = arith.constant dense<0.000000e+00> : vector<64x40xf32>
    %164 = tpu.matmul %161, %163, %cst_85 {dimension_numbers = #tpu.dot_dimension_numbers<[1], [0], [0], [1], [0, 0, 1, 1], [], []>} : vector<64x96xbf16>, vector<96x40xbf16>, vector<64x40xf32> -> vector<64x40xf32>
    %c128 = arith.constant 128 : index
    %c0_86 = arith.constant 0 : index
    %165 = vector.load %arg30[%c128, %c0_86] : memref<256x40xf32, #tpu.memory_space<vmem>>, vector<64x40xf32>
    tpu.vector_store %arg30[%c128, %c0_86], %164 {strides = array<i32>} : memref<256x40xf32, #tpu.memory_space<vmem>>, vector<64x40xf32>,
    %c3 = arith.constant 3 : index
    %c0_87 = arith.constant 0 : index
    %c0_88 = arith.constant 0 : index
    %166 = vector.load %arg5[%c3, %c0_87, %c0_88] : memref<4x1x96xi32, #tpu.memory_space<vmem>>, vector<1x1x96xi32>
    %167 = vector.shape_cast %166 : vector<1x1x96xi32> to vector<1x96xi32>
    %168 = vector.broadcast %167 : vector<1x96xi32> to vector<64x96xi32>
    %169 = arith.cmpi eq, %168, %19 : vector<64x96xi32>
    %170 = arith.extui %169 : vector<64x96xi1> to vector<64x96xi32>
    %171 = arith.sitofp %170 : vector<64x96xi32> to vector<64x96xf32>
    %172 = arith.truncf %171 : vector<64x96xf32> to vector<64x96xbf16>
    %173 = vector.extract_strided_slice %132 {offsets = [288, 0], sizes = [96, 40], strides = [1, 1]} : vector<384x40xf32> to vector<96x40xf32>
    %174 = arith.truncf %173 : vector<96x40xf32> to vector<96x40xbf16>
    %cst_89 = arith.constant dense<0.000000e+00> : vector<64x40xf32>
    %175 = tpu.matmul %172, %174, %cst_89 {dimension_numbers = #tpu.dot_dimension_numbers<[1], [0], [0], [1], [0, 0, 1, 1], [], []>} : vector<64x96xbf16>, vector<96x40xbf16>, vector<64x40xf32> -> vector<64x40xf32>
    %c192_90 = arith.constant 192 : index
    %c0_91 = arith.constant 0 : index
    %176 = vector.load %arg30[%c192_90, %c0_91] : memref<256x40xf32, #tpu.memory_space<vmem>>, vector<64x40xf32>
    tpu.vector_store %arg30[%c192_90, %c0_91], %175 {strides = array<i32>} : memref<256x40xf32, #tpu.memory_space<vmem>>, vector<64x40xf32>,
    %c0_92 = arith.constant 0 : index
    %c0_93 = arith.constant 0 : index
    %177 = vector.load %arg18[%c0_92, %c0_93] : memref<40x40xbf16, #tpu.memory_space<vmem>>, vector<40x40xbf16>
    %178 = arith.truncf %9 : vector<256x40xf32> to vector<256x40xbf16>
    %cst_94 = arith.constant dense<0.000000e+00> : vector<256x40xf32>
    %179 = tpu.matmul %178, %177, %cst_94 {dimension_numbers = #tpu.dot_dimension_numbers<[1], [0], [0], [1], [0, 0, 1, 1], [], []>} : vector<256x40xbf16>, vector<40x40xbf16>, vector<256x40xf32> -> vector<256x40xf32>
    %c0_95 = arith.constant 0 : index
    %c0_96 = arith.constant 0 : index
    %180 = vector.load %arg30[%c0_95, %c0_96] : memref<256x40xf32, #tpu.memory_space<vmem>>, vector<256x40xf32>
    %181 = arith.addf %179, %180 : vector<256x40xf32>
    %c0_97 = arith.constant 0 : index
    %c0_98 = arith.constant 0 : index
    %182 = vector.load %arg20[%c0_97, %c0_98] : memref<1x40xf32, #tpu.memory_space<vmem>>, vector<1x40xf32>
    %183 = vector.broadcast %182 : vector<1x40xf32> to vector<256x40xf32>
    %184 = arith.addf %181, %183 : vector<256x40xf32>
    %cst_99 = arith.constant 0.000000e+00 : f32
    %185 = vector.broadcast %cst_99 : f32 to vector<256x40xf32>
    %186 = arith.maximumf %184, %185 : vector<256x40xf32>
    %c0_100 = arith.constant 0 : index
    %c0_101 = arith.constant 0 : index
    %187 = vector.load %arg21[%c0_100, %c0_101] : memref<40x40xbf16, #tpu.memory_space<vmem>>, vector<40x40xbf16>
    %188 = arith.truncf %186 : vector<256x40xf32> to vector<256x40xbf16>
    %cst_102 = arith.constant dense<0.000000e+00> : vector<256x40xf32>
    %189 = tpu.matmul %188, %187, %cst_102 {dimension_numbers = #tpu.dot_dimension_numbers<[1], [0], [0], [1], [0, 0, 1, 1], [], []>} : vector<256x40xbf16>, vector<40x40xbf16>, vector<256x40xf32> -> vector<256x40xf32>
    %c0_103 = arith.constant 0 : index
    %c0_104 = arith.constant 0 : index
    %190 = vector.load %arg22[%c0_103, %c0_104] : memref<1x40xf32, #tpu.memory_space<vmem>>, vector<1x40xf32>
    %191 = vector.broadcast %190 : vector<1x40xf32> to vector<256x40xf32>
    %192 = arith.addf %189, %191 : vector<256x40xf32>
    %cst_105 = arith.constant 0.000000e+00 : f32
    %193 = vector.broadcast %cst_105 : f32 to vector<256x40xf32>
    %194 = arith.maximumf %192, %193 : vector<256x40xf32>
    %c0_106 = arith.constant 0 : index
    %c0_107 = arith.constant 0 : index
    %195 = vector.load %arg23[%c0_106, %c0_107] : memref<40x40xbf16, #tpu.memory_space<vmem>>, vector<40x40xbf16>
    %196 = arith.truncf %194 : vector<256x40xf32> to vector<256x40xbf16>
    %cst_108 = arith.constant dense<0.000000e+00> : vector<256x40xf32>
    %197 = tpu.matmul %196, %195, %cst_108 {dimension_numbers = #tpu.dot_dimension_numbers<[1], [0], [0], [1], [0, 0, 1, 1], [], []>} : vector<256x40xbf16>, vector<40x40xbf16>, vector<256x40xf32> -> vector<256x40xf32>
    %c0_109 = arith.constant 0 : index
    %c0_110 = arith.constant 0 : index
    %198 = vector.load %arg24[%c0_109, %c0_110] : memref<1x40xf32, #tpu.memory_space<vmem>>, vector<1x40xf32>
    %199 = vector.broadcast %198 : vector<1x40xf32> to vector<256x40xf32>
    %200 = arith.addf %197, %199 : vector<256x40xf32>
    %cst_111 = arith.constant 5.000000e-01 : f32
    %201 = vector.broadcast %cst_111 : f32 to vector<256x40xf32>
    %202 = arith.mulf %201, %9 : vector<256x40xf32>
    %cst_112 = arith.constant 5.000000e-01 : f32
    %203 = vector.broadcast %cst_112 : f32 to vector<256x40xf32>
    %204 = arith.mulf %203, %200 : vector<256x40xf32>
    %205 = arith.addf %202, %204 : vector<256x40xf32>
    %c0_113 = arith.constant 0 : index
    %c0_114 = arith.constant 0 : index
    %206 = vector.load %arg25[%c0_113, %c0_114] : memref<40x40xbf16, #tpu.memory_space<vmem>>, vector<40x40xbf16>
    %207 = arith.truncf %205 : vector<256x40xf32> to vector<256x40xbf16>
    %cst_115 = arith.constant dense<0.000000e+00> : vector<256x40xf32>
    %208 = tpu.matmul %207, %206, %cst_115 {dimension_numbers = #tpu.dot_dimension_numbers<[1], [0], [0], [1], [0, 0, 1, 1], [], []>} : vector<256x40xbf16>, vector<40x40xbf16>, vector<256x40xf32> -> vector<256x40xf32>
    %cst_116 = arith.constant 0.000000e+00 : f32
    %209 = vector.broadcast %cst_116 : f32 to vector<256x40xf32>
    %210 = arith.maximumf %208, %209 : vector<256x40xf32>
    %c0_117 = arith.constant 0 : index
    %c0_118 = arith.constant 0 : index
    %211 = vector.load %arg26[%c0_117, %c0_118] : memref<40x128xbf16, #tpu.memory_space<vmem>>, vector<40x128xbf16>
    %212 = arith.truncf %210 : vector<256x40xf32> to vector<256x40xbf16>
    %cst_119 = arith.constant dense<0.000000e+00> : vector<256x128xf32>
    %213 = tpu.matmul %212, %211, %cst_119 {dimension_numbers = #tpu.dot_dimension_numbers<[1], [0], [0], [1], [0, 0, 1, 1], [], []>} : vector<256x40xbf16>, vector<40x128xbf16>, vector<256x128xf32> -> vector<256x128xf32>
    %c0_120 = arith.constant 0 : index
    %c0_121 = arith.constant 0 : index
    %214 = vector.load %arg27[%c0_120, %c0_121] : memref<14x128xbf16, #tpu.memory_space<vmem>>, vector<14x128xbf16>
    %215 = arith.truncf %0 : vector<256x14xf32> to vector<256x14xbf16>
    %cst_122 = arith.constant dense<0.000000e+00> : vector<256x128xf32>
    %216 = tpu.matmul %215, %214, %cst_122 {dimension_numbers = #tpu.dot_dimension_numbers<[1], [0], [0], [1], [0, 0, 1, 1], [], []>} : vector<256x14xbf16>, vector<14x128xbf16>, vector<256x128xf32> -> vector<256x128xf32>
    %217 = arith.addf %216, %213 : vector<256x128xf32>
    %c0_123 = arith.constant 0 : index
    %c0_124 = arith.constant 0 : index
    %218 = vector.load %arg28[%c0_123, %c0_124] : memref<256x128xf32, #tpu.memory_space<vmem>>, vector<256x128xf32>
    tpu.vector_store %arg28[%c0_123, %c0_124], %217 {strides = array<i32>} : memref<256x128xf32, #tpu.memory_space<vmem>>, vector<256x128xf32>,
    return
  }
  func.func @transform_0(%arg0: i32) -> (i32, i32) {
    %c0_i32 = arith.constant 0 : i32
    %c0_i32_0 = arith.constant 0 : i32
    return %arg0, %c0_i32 : i32, i32
  }
  func.func @transform_1(%arg0: i32) -> (i32, i32) {
    %c0_i32 = arith.constant 0 : i32
    %c0_i32_0 = arith.constant 0 : i32
    return %arg0, %c0_i32 : i32, i32
  }
  func.func @transform_2(%arg0: i32) -> (i32, i32) {
    %c0_i32 = arith.constant 0 : i32
    %c0_i32_0 = arith.constant 0 : i32
    return %arg0, %c0_i32 : i32, i32
  }
  func.func @transform_3(%arg0: i32) -> (i32, i32) {
    %c0_i32 = arith.constant 0 : i32
    %c0_i32_0 = arith.constant 0 : i32
    return %arg0, %c0_i32 : i32, i32
  }
  func.func @transform_4(%arg0: i32) -> (i32, i32, i32) {
    %c0_i32 = arith.constant 0 : i32
    %c0_i32_0 = arith.constant 0 : i32
    %c0_i32_1 = arith.constant 0 : i32
    return %arg0, %c0_i32, %c0_i32_0 : i32, i32, i32
  }
  func.func @transform_5(%arg0: i32) -> (i32, i32) {
    %c0_i32 = arith.constant 0 : i32
    %c0_i32_0 = arith.constant 0 : i32
    %c0_i32_1 = arith.constant 0 : i32
    return %c0_i32, %c0_i32_0 : i32, i32
  }
  func.func @transform_6(%arg0: i32) -> (i32, i32) {
    %c0_i32 = arith.constant 0 : i32
    %c0_i32_0 = arith.constant 0 : i32
    %c0_i32_1 = arith.constant 0 : i32
    return %c0_i32, %c0_i32_0 : i32, i32
  }
  func.func @transform_7(%arg0: i32) -> (i32, i32) {
    %c0_i32 = arith.constant 0 : i32
    %c0_i32_0 = arith.constant 0 : i32
    %c0_i32_1 = arith.constant 0 : i32
    return %c0_i32, %c0_i32_0 : i32, i32
  }
  func.func @transform_8(%arg0: i32) -> (i32, i32) {
    %c0_i32 = arith.constant 0 : i32
    %c0_i32_0 = arith.constant 0 : i32
    %c0_i32_1 = arith.constant 0 : i32
    return %c0_i32, %c0_i32_0 : i32, i32
  }
  func.func @transform_9(%arg0: i32) -> (i32, i32) {
    %c0_i32 = arith.constant 0 : i32
    %c0_i32_0 = arith.constant 0 : i32
    %c0_i32_1 = arith.constant 0 : i32
    return %c0_i32, %c0_i32_0 : i32, i32
  }
  func.func @transform_10(%arg0: i32) -> (i32, i32) {
    %c0_i32 = arith.constant 0 : i32
    %c0_i32_0 = arith.constant 0 : i32
    %c0_i32_1 = arith.constant 0 : i32
    return %c0_i32, %c0_i32_0 : i32, i32
  }
  func.func @transform_11(%arg0: i32) -> (i32, i32) {
    %c0_i32 = arith.constant 0 : i32
    %c0_i32_0 = arith.constant 0 : i32
    %c0_i32_1 = arith.constant 0 : i32
    return %c0_i32, %c0_i32_0 : i32, i32
  }
  func.func @transform_12(%arg0: i32) -> (i32, i32) {
    %c0_i32 = arith.constant 0 : i32
    %c0_i32_0 = arith.constant 0 : i32
    %c0_i32_1 = arith.constant 0 : i32
    return %c0_i32, %c0_i32_0 : i32, i32
  }
  func.func @transform_13(%arg0: i32) -> (i32, i32) {
    %c0_i32 = arith.constant 0 : i32
    %c0_i32_0 = arith.constant 0 : i32
    %c0_i32_1 = arith.constant 0 : i32
    return %c0_i32, %c0_i32_0 : i32, i32
  }
  func.func @transform_14(%arg0: i32) -> (i32, i32) {
    %c0_i32 = arith.constant 0 : i32
    %c0_i32_0 = arith.constant 0 : i32
    %c0_i32_1 = arith.constant 0 : i32
    return %c0_i32, %c0_i32_0 : i32, i32
  }
  func.func @transform_15(%arg0: i32) -> (i32, i32) {
    %c0_i32 = arith.constant 0 : i32
    %c0_i32_0 = arith.constant 0 : i32
    %c0_i32_1 = arith.constant 0 : i32
    return %c0_i32, %c0_i32_0 : i32, i32
  }
  func.func @transform_16(%arg0: i32) -> (i32, i32) {
    %c0_i32 = arith.constant 0 : i32
    %c0_i32_0 = arith.constant 0 : i32
    %c0_i32_1 = arith.constant 0 : i32
    return %c0_i32, %c0_i32_0 : i32, i32
  }
  func.func @transform_17(%arg0: i32) -> (i32, i32) {
    %c0_i32 = arith.constant 0 : i32
    %c0_i32_0 = arith.constant 0 : i32
    %c0_i32_1 = arith.constant 0 : i32
    return %c0_i32, %c0_i32_0 : i32, i32
  }
  func.func @transform_18(%arg0: i32) -> (i32, i32) {
    %c0_i32 = arith.constant 0 : i32
    %c0_i32_0 = arith.constant 0 : i32
    %c0_i32_1 = arith.constant 0 : i32
    return %c0_i32, %c0_i32_0 : i32, i32
  }
  func.func @transform_19(%arg0: i32) -> (i32, i32) {
    %c0_i32 = arith.constant 0 : i32
    %c0_i32_0 = arith.constant 0 : i32
    %c0_i32_1 = arith.constant 0 : i32
    return %c0_i32, %c0_i32_0 : i32, i32
  }
  func.func @transform_20(%arg0: i32) -> (i32, i32) {
    %c0_i32 = arith.constant 0 : i32
    %c0_i32_0 = arith.constant 0 : i32
    %c0_i32_1 = arith.constant 0 : i32
    return %c0_i32, %c0_i32_0 : i32, i32
  }
  func.func @transform_21(%arg0: i32) -> (i32, i32) {
    %c0_i32 = arith.constant 0 : i32
    %c0_i32_0 = arith.constant 0 : i32
    %c0_i32_1 = arith.constant 0 : i32
    return %c0_i32, %c0_i32_0 : i32, i32
  }
  func.func @transform_22(%arg0: i32) -> (i32, i32) {
    %c0_i32 = arith.constant 0 : i32
    %c0_i32_0 = arith.constant 0 : i32
    %c0_i32_1 = arith.constant 0 : i32
    return %c0_i32, %c0_i32_0 : i32, i32
  }
  func.func @transform_23(%arg0: i32) -> (i32, i32) {
    %c0_i32 = arith.constant 0 : i32
    %c0_i32_0 = arith.constant 0 : i32
    %c0_i32_1 = arith.constant 0 : i32
    return %c0_i32, %c0_i32_0 : i32, i32
  }
  func.func @transform_24(%arg0: i32) -> (i32, i32) {
    %c0_i32 = arith.constant 0 : i32
    %c0_i32_0 = arith.constant 0 : i32
    %c0_i32_1 = arith.constant 0 : i32
    return %c0_i32, %c0_i32_0 : i32, i32
  }
  func.func @transform_25(%arg0: i32) -> (i32, i32) {
    %c0_i32 = arith.constant 0 : i32
    %c0_i32_0 = arith.constant 0 : i32
    %c0_i32_1 = arith.constant 0 : i32
    return %c0_i32, %c0_i32_0 : i32, i32
  }
  func.func @transform_26(%arg0: i32) -> (i32, i32) {
    %c0_i32 = arith.constant 0 : i32
    %c0_i32_0 = arith.constant 0 : i32
    %c0_i32_1 = arith.constant 0 : i32
    return %c0_i32, %c0_i32_0 : i32, i32
  }
  func.func @transform_27(%arg0: i32) -> (i32, i32) {
    %c0_i32 = arith.constant 0 : i32
    %c0_i32_0 = arith.constant 0 : i32
    return %arg0, %c0_i32 : i32, i32
  }
}

</mosaic_0001>

<bundles_post_ra>
// kernel: graph_construction_resin.1
= control target key start
LH: loop header
LB: loop body
LE: loop exit
PB: predicated region body
PF: predicated region fallthrough
CT: control target
= control target key end

     0   :  { %s12834_s0 = inlined_call_operand.vmem [shape: f32[512,14], index: 0, kind: input, shape index: {}]   ;;  %s12835_s1 = inlined_call_operand.vmem [shape: f32[768,6], index: 1, kind: input, shape index: {}]   ;;  %s12836_s2 = inlined_call_operand.vmem [shape: s32[768,1], index: 2, kind: input, shape index: {}]   ;;  %s12837_s3 = inlined_call_operand.vmem [shape: s32[768,1], index: 3, kind: input, shape index: {}]   ;;  %s12838_s4 = inlined_call_operand.vmem [shape: s32[8,1,96], index: 4, kind: input, shape index: {}]   ;;  %s12839_s5 = inlined_call_operand.vmem [shape: bf16[14,40], index: 5, kind: input, shape index: {}]   ;;  %s12840_s6 = inlined_call_operand.vmem [shape: bf16[40,40], index: 6, kind: input, shape index: {}]   ;;  %s12841_s7 = inlined_call_operand.vmem [shape: bf16[6,40], index: 7, kind: input, shape index: {}]   ;;  %s12842_s8 = inlined_call_operand.vmem [shape: bf16[40,40], index: 8, kind: input, shape index: {}]   ;;  %s12843_s9 = inlined_call_operand.vmem [shape: bf16[40,40], index: 9, kind: input, shape index: {}]   ;;  %s12844_s10 = inlined_call_operand.vmem [shape: bf16[40,40], index: 10, kind: input, shape index: {}]   ;;  %s12845_s11 = inlined_call_operand.vmem [shape: bf16[40,40], index: 11, kind: input, shape index: {}]   ;;  %s12846_s12 = inlined_call_operand.vmem [shape: f32[1,40], index: 12, kind: input, shape index: {}]   ;;  %s12847_s13 = inlined_call_operand.vmem [shape: bf16[40,40], index: 13, kind: input, shape index: {}]   ;;  %s12848_s14 = inlined_call_operand.vmem [shape: f32[1,40], index: 14, kind: input, shape index: {}]   ;;  %s12849_s15 = inlined_call_operand.vmem [shape: bf16[40,40], index: 15, kind: input, shape index: {}]   ;;  %s12850_s16 = inlined_call_operand.vmem [shape: f32[1,40], index: 16, kind: input, shape index: {}]   ;;  %s12851_s17 = inlined_call_operand.vmem [shape: bf16[40,40], index: 17, kind: input, shape index: {}]   ;;  %s12852_s18 = inlined_call_operand.vmem [shape: bf16[40,40], index: 18, kind: input, shape index: {}]   ;;  %s12853_s19 = inlined_call_operand.vmem [shape: f32[1,40], index: 19, kind: input, shape index: {}]   ;;  %s12854_s20 = inlined_call_operand.vmem [shape: bf16[40,40], index: 20, kind: input, shape index: {}]   ;;  %s12855_s21 = inlined_call_operand.vmem [shape: f32[1,40], index: 21, kind: input, shape index: {}]   ;;  %s12856_s22 = inlined_call_operand.vmem [shape: bf16[40,40], index: 22, kind: input, shape index: {}]   ;;  %s12857_s23 = inlined_call_operand.vmem [shape: f32[1,40], index: 23, kind: input, shape index: {}]   ;;  %s12858_s24 = inlined_call_operand.vmem [shape: bf16[40,40], index: 24, kind: input, shape index: {}]   ;;  %s12859_s25 = inlined_call_operand.vmem [shape: bf16[40,128], index: 25, kind: input, shape index: {}]   ;;  %s12860_s26 = inlined_call_operand.vmem [shape: bf16[14,128], index: 26, kind: input, shape index: {}]   ;;  %s12861_s27 = inlined_call_operand.vmem [shape: f32[512,128], index: 27, kind: output, shape index: {}]  }
   0x1   :  { %13004 = sst [smem:[#allocation137_spill]] %s12834_s0 }
   0x2   :  { %13005 = sst [smem:[#allocation138_spill]] %s12835_s1 }
   0x3   :  { %13006 = sst [smem:[#allocation139_spill]] %s12836_s2 }
   0x4   :  { %13007 = sst [smem:[#allocation140_spill]] %s12837_s3 }
   0x5   :  { %13008 = sst [smem:[#allocation141_spill]] %s12838_s4 }
   0x6   :  { %13009 = sst [smem:[#allocation142_spill]] %s12839_s5 }
   0x7   :  { %13010 = sst [smem:[#allocation143_spill]] %s12840_s6 }
   0x8   :  { %13011 = sst [smem:[#allocation144_spill]] %s12841_s7  ;;  %s10418_s7 = smov 0  }
   0x9   :  { %13012 = sst [smem:[#allocation145_spill]] %s12842_s8 }
   0xa   :  { %13013 = sst [smem:[#allocation146_spill]] %s12843_s9 }
   0xb   :  { %13014 = sst [smem:[#allocation147_spill]] %s12844_s10 }
   0xc   :  { %13015 = sst [smem:[#allocation148_spill]] %s12845_s11 }
   0xd LB: > { %s10424_s4 = sadd.s32 4294967295, %s10274_s7   ;;  %p8160_p0 = scmp.ge.s32.totalorder %s10274_s7, 1  ;;  %s10274_s7 = sphi %s10418_s7, %s37_s7  }
   0xe   : > { %p781_p1 = scmp.lt.s32.totalorder %s10274_s7, 3 }
  0x10   : > { %p782_p2 = pnand %p8160_p0, %p781_p1 }
  0x12   : > { %785 = sbr.rel (%p782_p2) target bundleno = 3003 (0xbbb), region = 128 }
  0x19   : > { %s13016_s9 = sld [smem:[#allocation142_spill]]  ;;  %vm1060_vm0 = vcmask 1046528   ;;  %s8161_s5 = sshll.u32 %s10424_s4, 5  ;;  %vm1605_vm1 = vcmask 1042432   ;;  %vm1011_vm2 = vcmask 113664   ;;  %vm1532_vm3 = vcmask 48128  }
  0x1a   : > { %s13017_s10 = sld [smem:[#allocation144_spill]]  ;;  %p873_p3 = scmp.lt.s32.totalorder %s8161_s5, 63  ;;  %vm1342_vm4 = vcmask 1043456   ;;  %vm1293_vm5 = vcmask 326656  }
  0x1b   : > { %s878_s29 = smul.u32 48, %s10424_s4  ;;  %s13018_s11 = sld [smem:[#allocation143_spill]] }
  0x1c   : > { %s13346_s5 = smov (!%p873_p3, %s8161_s5), 63  ;;  %s13019_s30 = sld [smem:[#allocation137_spill]] }
  0x1d   : > { %p879_p4 = scmp.lt.s32.totalorder %s878_s29, 95  ;;  %s13003_s2 = sshll.u32 %s13346_s5, 3 }
  0x1e   : > { %s13023_s1 = sld [smem:[#allocation138_spill]]  ;;  %s13038_s3 = sld [smem:[#allocation139_spill]] }
  0x1f   : > { %v10227_v0 = vld [vmem:[%s13016_s9] sm:$0x7f]   ;;  %s13348_s29 = smov (!%p879_p4, %s878_s29), 95 }
  0x20   : > { %v1507_v1 = vld [vmem:[%s13017_s10] sm:$0x7]  ;;  %10199 = vmatprep.subr.msk.bf16.mxu1 %vm1060_vm0, %v10227_v0  ;;  %v1062_v2 = vsel %vm1060_vm0, %v10227_v0, 0  ;;  %s10467_s28 = sshll.u32 %s13348_s29, 3  ;;  %s13037_s10 = sld [smem:[#allocation145_spill]] }
  0x21   : > { %10201 = vmatprep.subr.msk.bf16.mxu0 %vm1605_vm1, %v1507_v1  ;;  %v1607_v3 = vsel %vm1605_vm1, %v1507_v1, 0  ;;  %v10228_v4 = vld [vmem:[%s13018_s11] sm:$0xff]   ;;  %9188 = vmatpush3.bf16.msra.mxu1 %v1062_v2  ;;  %s13041_s29 = sld [smem:[#allocation146_spill]] }
  0x22   : > { %9260 = vmatpush3.bf16.msra.mxu0 %v1607_v3  ;;  %9221 = vmatprep.subr.bf16.mxu1 %v10228_v4  ;;  %s10449_s9 = scalar_lea.vmem %s13019_s30, %s13003_s2  ;;  %s13279_s2 = sld [smem:[#allocation141_spill]] }
  0x23   : > { %v908_v5 = vld [vmem:[%s10449_s9] sm:$0xff]  ;;  %v909_v6 = vld [vmem:[%s10449_s9 + $0x8] sm:$0xff]  ;;  %v910_v7 = vld [vmem:[%s10449_s9 + $0x10] sm:$0xff] }
  0x24   : > { %v10454_v8 = vpack.c.bf16 %v909_v6, %v908_v5  ;;  %v911_v9 = vld [vmem:[%s10449_s9 + $0x18] sm:$0xff]  ;;  %v912_v10 = vld [vmem:[%s10449_s9 + $0x20] sm:$0xff]  ;;  %v913_v11 = vld [vmem:[%s10449_s9 + $0x28] sm:$0xff]  ;;  %s10479_s6 = scalar_lea.vmem %s13023_s1, %s10467_s28  ;;  %s10645_s8 = scalar_lea.vmem %s13038_s3, %s10467_s28 }
  0x25   : > { %v10459_v12 = vpack.c.bf16 %v911_v9, %v910_v7  ;;  %v10461_v13 = vpack.c.bf16 %v913_v11, %v912_v10  ;;  %v914_v14 = vld [vmem:[%s10449_s9 + $0x30] sm:$0xff]  ;;  %v915_v15 = vld [vmem:[%s10449_s9 + $0x38] sm:$0xff]  ;;  %v916_v16 = vld [vmem:[%s10449_s9 + $0x40] sm:$0xff] }
  0x26   : > { %13020 = vst [vmem:[#allocation4_spill] sm:$0xff] %v10454_v8  ;;  %9189 = vmatprep.mubr.msk.bf16.mxu1 %vm1011_vm2, %v10454_v8  ;;  %v917_v17 = vld [vmem:[%s10449_s9 + $0x48] sm:$0xff]  ;;  %v10481_v18 = vpack.c.bf16 %v915_v15, %v914_v14  ;;  %v940_v20 = vld [vmem:[%s10479_s6] sm:$0xff]  ;;  %v942_v22 = vld [vmem:[%s10479_s6 + $0x10] sm:$0xff] }
  0x27   : > { %13021 = vst [vmem:[#allocation5_spill] sm:$0xff] %v10459_v12  ;;  %13022 = vst [vmem:[#allocation6_spill] sm:$0xff] %v10461_v13  ;;  %9190 = vmatmul.mubr.msk.bf16.vlgmr.msra.gmra.mrb[0].mxu1 %vm1011_vm2, %v10459_v12  ;;  %v10483_v19 = vpack.c.bf16 %v917_v17, %v916_v16  ;;  %v941_v21 = vld [vmem:[%s10479_s6 + $0x8] sm:$0xff]  ;;  %v943_v23 = vld [vmem:[%s10479_s6 + $0x18] sm:$0xff]  ;;  %v13070_v12 = vmov 0.0  }
  0x28   : > { %9193 = vmatprep.mubr.msk.bf16.mxu1 %vm1011_vm2, %v10461_v13  ;;  %9222 = vmatpush3.bf16.msra.mxu1 %v10228_v4  ;;  %13024 = vst [vmem:[#allocation7_spill] sm:$0xff] %v10481_v18  ;;  %v1508_v24 = vpack.c.bf16 %v941_v21, %v940_v20  ;;  %v1509_v25 = vpack.c.bf16 %v943_v23, %v942_v22  ;;  %v944_v26 = vld [vmem:[%s10479_s6 + $0x20] sm:$0xff]  ;;  %v945_v27 = vld [vmem:[%s10479_s6 + $0x28] sm:$0xff]  ;;  %v918_v28 = vld [vmem:[%s10449_s9 + $0x50] sm:$0xff] }
  0x29   : > { %13025 = vst [vmem:[#allocation8_spill] sm:$0xff] %v10483_v19  ;;  %v919_v29 = vld [vmem:[%s10449_s9 + $0x58] sm:$0xff]  ;;  %v1510_v30 = vpack.c.bf16 %v945_v27, %v944_v26  ;;  %v920_v31 = vld [vmem:[%s10449_s9 + $0x60] sm:$0xff]  ;;  %v921_v32 = vld [vmem:[%s10449_s9 + $0x68] sm:$0xff] }
  0x2a   : > { %9261 = vmatprep.mubr.msk.bf16.mxu0 %vm1532_vm3, %v1508_v24  ;;  %v10501_v33 = vpack.c.bf16 %v919_v29, %v918_v28  ;;  %v946_v34 = vld [vmem:[%s10479_s6 + $0x30] sm:$0xff]  ;;  %v947_v35 = vld [vmem:[%s10479_s6 + $0x38] sm:$0xff]  ;;  %v10506_v36 = vpack.c.bf16 %v921_v32, %v920_v31  ;;  %v948_v37 = vld [vmem:[%s10479_s6 + $0x40] sm:$0xff] }
  0x2b   : > { %9262 = vmatmul.mubr.msk.bf16.vlgmr.msra.gmra.mrb[0].mxu0 %vm1532_vm3, %v1509_v25  ;;  %v949_v38 = vld [vmem:[%s10479_s6 + $0x48] sm:$0xff]  ;;  %v1511_v39 = vpack.c.bf16 %v947_v35, %v946_v34  ;;  %v922_v41 = vld [vmem:[%s10449_s9 + $0x70] sm:$0xff]  ;;  %v923_v42 = vld [vmem:[%s10449_s9 + $0x78] sm:$0xff] }
  0x2c   : > { %13026 = vst [vmem:[#allocation9_spill] sm:$0xff] %v10501_v33  ;;  %9265 = vmatprep.mubr.msk.bf16.mxu0 %vm1532_vm3, %v1510_v30  ;;  %13027 = vst [vmem:[#allocation10_spill] sm:$0xff] %v10506_v36  ;;  %v1512_v40 = vpack.c.bf16 %v949_v38, %v948_v37  ;;  %v924_v43 = vld [vmem:[%s10449_s9 + $0x80] sm:$0xff]  ;;  %v925_v44 = vld [vmem:[%s10449_s9 + $0x88] sm:$0xff]  ;;  %v10519_v45 = vpack.c.bf16 %v923_v42, %v922_v41 }
  0x2d   : > { %v950_v46 = vld [vmem:[%s10479_s6 + $0x50] sm:$0xff]  ;;  %v951_v47 = vld [vmem:[%s10479_s6 + $0x58] sm:$0xff]  ;;  %v10524_v48 = vpack.c.bf16 %v925_v44, %v924_v43  ;;  %v952_v49 = vld [vmem:[%s10479_s6 + $0x60] sm:$0xff] }
  0x2e   : > { %13028 = vst [vmem:[#allocation11_spill] sm:$0xff] %v10519_v45  ;;  %v953_v50 = vld [vmem:[%s10479_s6 + $0x68] sm:$0xff]  ;;  %v926_v51 = vld [vmem:[%s10449_s9 + $0x90] sm:$0xff]  ;;  %v927_v52 = vld [vmem:[%s10449_s9 + $0x98] sm:$0xff]  ;;  %v1513_v53 = vpack.c.bf16 %v951_v47, %v950_v46 }
  0x2f   : > { %9194 = vmatmul.mubr.msk.bf16.gmra.mrb[4].mxu1 %vm1011_vm2, %v10481_v18  ;;  %13029 = vst [vmem:[#allocation12_spill] sm:$0xff] %v10524_v48  ;;  %v928_v54 = vld [vmem:[%s10449_s9 + $0xa0] sm:$0xff]  ;;  %v929_v55 = vld [vmem:[%s10449_s9 + $0xa8] sm:$0xff]  ;;  %v1514_v56 = vpack.c.bf16 %v953_v50, %v952_v49  ;;  %v954_v57 = vld [vmem:[%s10479_s6 + $0x70] sm:$0xff]  ;;  %v10541_v61 = vpack.c.bf16 %v927_v52, %v926_v51 }
  0x30   : > { %9197 = vmatprep.mubr.msk.bf16.mxu1 %vm1011_vm2, %v10483_v19  ;;  %v955_v58 = vld [vmem:[%s10479_s6 + $0x78] sm:$0xff]  ;;  %v956_v59 = vld [vmem:[%s10479_s6 + $0x80] sm:$0xff]  ;;  %v957_v60 = vld [vmem:[%s10479_s6 + $0x88] sm:$0xff]  ;;  %v10544_v62 = vpack.c.bf16 %v929_v55, %v928_v54 }
  0x31   : > { %13030 = vst [vmem:[#allocation13_spill] sm:$0xff] %v10541_v61  ;;  %v930_v63 = vld [vmem:[%s10449_s9 + $0xb0] sm:$0xff]  ;;  %v931_v0 = vld [vmem:[%s10449_s9 + $0xb8] sm:$0xff]  ;;  %v1515_v1 = vpack.c.bf16 %v955_v58, %v954_v57  ;;  %v932_v2 = vld [vmem:[%s10449_s9 + $0xc0] sm:$0xff]  ;;  %v1516_v4 = vpack.c.bf16 %v957_v60, %v956_v59 }
  0x32   : > { %13031 = vst [vmem:[#allocation14_spill] sm:$0xff] %v10544_v62  ;;  %v933_v3 = vld [vmem:[%s10449_s9 + $0xc8] sm:$0xff]  ;;  %v958_v5 = vld [vmem:[%s10479_s6 + $0x90] sm:$0xff]  ;;  %v959_v6 = vld [vmem:[%s10479_s6 + $0x98] sm:$0xff]  ;;  %v10559_v10 = vpack.c.bf16 %v931_v0, %v930_v63 }
  0x33   : > { %9266 = vmatmul.mubr.msk.bf16.gmra.mrb[4].mxu0 %vm1532_vm3, %v1511_v39  ;;  %v960_v7 = vld [vmem:[%s10479_s6 + $0xa0] sm:$0xff]  ;;  %v961_v9 = vld [vmem:[%s10479_s6 + $0xa8] sm:$0xff]  ;;  %v10562_v11 = vpack.c.bf16 %v933_v3, %v932_v2  ;;  %v1517_v14 = vpack.c.bf16 %v959_v6, %v958_v5  ;;  %v934_v16 = vld [vmem:[%s10449_s9 + $0xd0] sm:$0xff] }
  0x34   : > { %9269 = vmatprep.mubr.msk.bf16.mxu0 %vm1532_vm3, %v1512_v40  ;;  %13032 = vst [vmem:[#allocation15_spill] sm:$0xff] %v10559_v10  ;;  %v1518_v15 = vpack.c.bf16 %v961_v9, %v960_v7  ;;  %v935_v17 = vld [vmem:[%s10449_s9 + $0xd8] sm:$0xff]  ;;  %v936_v20 = vld [vmem:[%s10449_s9 + $0xe0] sm:$0xff]  ;;  %v937_v21 = vld [vmem:[%s10449_s9 + $0xe8] sm:$0xff] }
  0x35   : > { %13033 = vst [vmem:[#allocation16_spill] sm:$0xff] %v10562_v11  ;;  %v10573_v22 = vpack.c.bf16 %v935_v17, %v934_v16  ;;  %v962_v23 = vld [vmem:[%s10479_s6 + $0xb0] sm:$0xff]  ;;  %v963_v24 = vld [vmem:[%s10479_s6 + $0xb8] sm:$0xff]  ;;  %v10578_v25 = vpack.c.bf16 %v937_v21, %v936_v20  ;;  %v964_v26 = vld [vmem:[%s10479_s6 + $0xc0] sm:$0xff]  ;;  %v10276_v17 = vmov 0  }
  0x36   : > { %v965_v27 = vld [vmem:[%s10479_s6 + $0xc8] sm:$0xff]  ;;  %v1519_v28 = vpack.c.bf16 %v963_v24, %v962_v23  ;;  %v938_v30 = vld [vmem:[%s10449_s9 + $0xf0] sm:$0xff]  ;;  %v939_v31 = vld [vmem:[%s10449_s9 + $0xf8] sm:$0xff]  ;;  %10226 = vset.pattern.permute.xlu1 %v10276_v17  ;;  %10225 = vset.pattern.permute.xlu0 %v10276_v17  ;;  %s13039_s9 = sld [smem:[#allocation140_spill]] }
  0x37   : > { %9198 = vmatmul.mubr.msk.bf16.gmra.mrb[8].mxu1 %vm1011_vm2, %v10501_v33  ;;  %13034 = vst [vmem:[#allocation17_spill] sm:$0xff] %v10573_v22  ;;  %13035 = vst [vmem:[#allocation18_spill] sm:$0xff] %v10578_v25  ;;  %v1520_v29 = vpack.c.bf16 %v965_v27, %v964_v26  ;;  %v10589_v32 = vpack.c.bf16 %v939_v31, %v938_v30  ;;  %v966_v34 = vld [vmem:[%s10479_s6 + $0xd0] sm:$0xff]  ;;  %v967_v35 = vld [vmem:[%s10479_s6 + $0xd8] sm:$0xff] }
  0x38   : > { %9201 = vmatprep.mubr.msk.bf16.mxu1 %vm1011_vm2, %v10506_v36  ;;  %v968_v37 = vld [vmem:[%s10479_s6 + $0xe0] sm:$0xff]  ;;  %v969_v38 = vld [vmem:[%s10479_s6 + $0xe8] sm:$0xff]  ;;  %v1521_v39 = vpack.c.bf16 %v967_v35, %v966_v34  ;;  %v970_v41 = vld [vmem:[%s10479_s6 + $0xf0] sm:$0xff] }
  0x39   : > { %13036 = vst [vmem:[#allocation19_spill] sm:$0xff] %v10589_v32  ;;  %v1522_v40 = vpack.c.bf16 %v969_v38, %v968_v37  ;;  %v971_v42 = vld [vmem:[%s10479_s6 + $0xf8] sm:$0xff]  ;;  %v972_v43 = vld [vmem:[%s10479_s6 + $0x100] sm:$0xff]  ;;  %v973_v44 = vld [vmem:[%s10479_s6 + $0x108] sm:$0xff] }
  0x3a   : > { %v1523_v46 = vpack.c.bf16 %v971_v42, %v970_v41  ;;  %v1524_v47 = vpack.c.bf16 %v973_v44, %v972_v43  ;;  %v974_v49 = vld [vmem:[%s10479_s6 + $0x110] sm:$0xff]  ;;  %v975_v50 = vld [vmem:[%s10479_s6 + $0x118] sm:$0xff]  ;;  %v976_v51 = vld [vmem:[%s10479_s6 + $0x120] sm:$0xff] }
  0x3b   : > { %9270 = vmatmul.mubr.msk.bf16.gmra.mrb[8].mxu0 %vm1532_vm3, %v1513_v53  ;;  %v977_v52 = vld [vmem:[%s10479_s6 + $0x128] sm:$0xff]  ;;  %v1525_v53 = vpack.c.bf16 %v975_v50, %v974_v49  ;;  %v978_v55 = vld [vmem:[%s10479_s6 + $0x130] sm:$0xff]  ;;  %v980_v57 = vld [vmem:[%s10479_s6 + $0x140] sm:$0xff] }
  0x3c   : > { %9273 = vmatprep.mubr.msk.bf16.mxu0 %vm1532_vm3, %v1514_v56  ;;  %v1526_v54 = vpack.c.bf16 %v977_v52, %v976_v51  ;;  %v979_v56 = vld [vmem:[%s10479_s6 + $0x138] sm:$0xff]  ;;  %v981_v58 = vld [vmem:[%s10479_s6 + $0x148] sm:$0xff]  ;;  %v982_v0 = vld [vmem:[%s10479_s6 + $0x150] sm:$0xff]  ;;  %s10663_s0 = scalar_lea.vmem %s13039_s9, %s10467_s28  ;;  %s13040_s9 = sld [smem:[#allocation147_spill]] }
  0x3d   : > { %v1527_v59 = vpack.c.bf16 %v979_v56, %v978_v55  ;;  %v1528_v60 = vpack.c.bf16 %v981_v58, %v980_v57  ;;  %v10229_v63 = vld [vmem:[%s13018_s11 + $0x8] sm:$0xff]   ;;  %v984_v2 = vld [vmem:[%s10479_s6 + $0x160] sm:$0xff]  ;;  %v986_v9 = vld [vmem:[%s10479_s6 + $0x170] sm:$0xff]  ;;  %s13184_s28 = sld [smem:[#allocation148_spill]] }
  0x3e   : > { %9223 = vmatprep.subr.bf16.mxu1 %v10229_v63  ;;  %v985_v3 = vld [vmem:[%s10479_s6 + $0x168] sm:$0xff]  ;;  %v10638_v16 = vld [vmem:[%s13037_s10] sm:$0xff]   ;;  %v2761_v20 = vld [vmem:[%s10645_s8 + $0x10] sm:$0xff] }
  0x3f   : > { %9202 = vmatmul.mubr.msk.bf16.gmra.mrb[12].mxu1 %vm1011_vm2, %v10519_v45  ;;  %v1530_v6 = vpack.c.bf16 %v985_v3, %v984_v2  ;;  %v2759_v21 = vld [vmem:[%s10645_s8] sm:$0xff]  ;;  %2778 = vperm.xlu1 %10226, %v2761_v20   ;;  %v2762_v23 = vld [vmem:[%s10645_s8 + $0x18] sm:$0xff]  ;;  %v2760_v24 = vld [vmem:[%s10645_s8 + $0x8] sm:$0xff] }
  0x40   : > { %9205 = vmatprep.mubr.msk.bf16.mxu1 %vm1011_vm2, %v10524_v48  ;;  %9224 = vmatpush3.bf16.msra.mxu1 %v10229_v63  ;;  %v2764_v26 = vld [vmem:[%s10645_s8 + $0x28] sm:$0xff]  ;;  %v2763_v27 = vld [vmem:[%s10645_s8 + $0x20] sm:$0xff]  ;;  %v2770_v34 = vld [vmem:[%s10645_s8 + $0x58] sm:$0xff] }
  0x41   : > { %2772 = vperm.xlu0 %10225, %v2759_v21   ;;  %v2768_v30 = vld [vmem:[%s10645_s8 + $0x48] sm:$0xff]  ;;  %v2767_v31 = vld [vmem:[%s10645_s8 + $0x40] sm:$0xff]  ;;  %v2769_v35 = vld [vmem:[%s10645_s8 + $0x50] sm:$0xff] }
  0x42   : > { %v2670_v37 = vld [vmem:[%s10663_s0 + $0x8] sm:$0xff]  ;;  %v2669_v38 = vld [vmem:[%s10663_s0] sm:$0xff]  ;;  %v2676_v43 = vld [vmem:[%s10663_s0 + $0x38] sm:$0xff] }
  0x43   : > { %9274 = vmatmul.mubr.msk.bf16.gmra.mrb[12].mxu0 %vm1532_vm3, %v1515_v1  ;;  %v983_v1 = vld [vmem:[%s10479_s6 + $0x158] sm:$0xff]  ;;  %2781 = vperm.xlu1 %10226, %v2762_v23   ;;  %v2674_v41 = vld [vmem:[%s10663_s0 + $0x28] sm:$0xff]  ;;  %v2673_v42 = vld [vmem:[%s10663_s0 + $0x20] sm:$0xff] }
  0x44   : > { %9277 = vmatprep.mubr.msk.bf16.mxu0 %vm1532_vm3, %v1516_v4  ;;  %v10230_v4 = vld [vmem:[%s13018_s11 + $0x10] ss:$0 sps:$4 sm:$0xff]   ;;  %v1529_v5 = vpack.c.bf16 %v983_v1, %v982_v0  ;;  %v2680_v49 = vld [vmem:[%s10663_s0 + $0x58] sm:$0xff]  ;;  %v3557_v51 = vld [vmem:[%s10645_s8 + $0xc8] sm:$0xff] }
  0x45   : > { %10200 = vmatprep.subr.msk.bf16.mxu1 %vm1342_vm4, %v10230_v4  ;;  %v1344_v7 = vsel %vm1342_vm4, %v10230_v4, 0  ;;  %2775 = vperm.xlu0 %10225, %v2760_v24   ;;  %v2675_v44 = vld [vmem:[%s10663_s0 + $0x30] sm:$0xff]  ;;  %v3556_v52 = vld [vmem:[%s10645_s8 + $0xc0] sm:$0xff]  ;;  %v3559_v55 = vld [vmem:[%s10645_s8 + $0xd8] sm:$0xff] }
  0x46   : > { %9226 = vmatpush3.bf16.msra.mxu1 %v1344_v7  ;;  %v2679_v50 = vld [vmem:[%s10663_s0 + $0x50] sm:$0xff]  ;;  %v3561_v63 = vld [vmem:[%s10645_s8 + $0xe8] sm:$0xff]  ;;  %v3560_v0 = vld [vmem:[%s10645_s8 + $0xe0] sm:$0xff] }
  0x47   : > { %9206 = vmatmul.mubr.msk.bf16.gmra.mrb[16].mxu1 %vm1011_vm2, %v10541_v61  ;;  %9309 = vmatprep.subr.bf16.mxu1 %v10638_v16  ;;  %v3558_v56 = vld [vmem:[%s10645_s8 + $0xd0] sm:$0xff] }
  0x48   : > { %9209 = vmatprep.mubr.msk.bf16.mxu1 %vm1011_vm2, %v10544_v62  ;;  %2787 = vperm.xlu1 %10226, %v2764_v26   ;;  %v10233_v17 = vld [vmem:[%s13037_s10 + $0x10] ss:$0 sps:$4 sm:$0xff]   ;;  %v3565_v26 = vld [vmem:[%s10645_s8 + $0x108] sm:$0xff] }
  0x49   : > { %2784 = vperm.xlu0 %10225, %v2763_v27  }
  0x4b   : > { %9278 = vmatmul.mubr.msk.bf16.gmra.mrb[16].mxu0 %vm1532_vm3, %v1517_v14  ;;  %v987_v14 = vld [vmem:[%s10479_s6 + $0x178] sm:$0xff]  ;;  %s8166_s6 = sshll.u32 %s10424_s4, 2 }
  0x4c   : > { %9281 = vmatprep.mubr.msk.bf16.mxu0 %vm1532_vm3, %v1518_v15  ;;  %v1531_v15 = vpack.c.bf16 %v987_v14, %v986_v9  ;;  %v3563_v9 = vld [vmem:[%s10645_s8 + $0xf8] sm:$0xff]  ;;  %v3562_v14 = vld [vmem:[%s10645_s8 + $0xf0] sm:$0xff]  ;;  %p897_p5 = scmp.lt.s32.totalorder %s8166_s6, 7 }
  0x4e   : > { %s13350_s6 = smov (!%p897_p5, %s8166_s6), 7 }
  0x4f   : > { %9210 = vmatmul.mubr.msk.bf16.gmra.mrb[20].mxu1 %vm1011_vm2, %v10559_v10 }
  0x50   : > { %9213 = vmatprep.mubr.msk.bf16.mxu1 %vm1011_vm2, %v10562_v11 }
  0x53   : > { %9282 = vmatmul.mubr.msk.bf16.gmra.mrb[20].mxu0 %vm1532_vm3, %v1519_v28  ;;  %v2766_v28 = vld [vmem:[%s10645_s8 + $0x38] sm:$0xff] }
  0x54   : > { %9285 = vmatprep.mubr.msk.bf16.mxu0 %vm1532_vm3, %v1520_v29  ;;  %v2765_v29 = vld [vmem:[%s10645_s8 + $0x30] sm:$0xff]  ;;  %2793 = vperm.xlu1 %10226, %v2766_v28  }
  0x55   : > { %2790 = vperm.xlu0 %10225, %v2765_v29  }
  0x57   : > { %9214 = vmatmul.mubr.msk.bf16.gmra.mrb[24].mxu1 %vm1011_vm2, %v10573_v22 }
  0x58   : > { %9217 = vmatprep.mubr.msk.bf16.mxu1 %vm1011_vm2, %v10578_v25  ;;  %2799 = vperm.xlu1 %10226, %v2768_v30  }
  0x59   : > { %2796 = vperm.xlu0 %10225, %v2767_v31   ;;  %v3564_v31 = vld [vmem:[%s10645_s8 + $0x100] sm:$0xff] }
  0x5b   : > { %9286 = vmatmul.mubr.msk.bf16.gmra.mrb[24].mxu0 %vm1532_vm3, %v1521_v39  ;;  %v2672_v39 = vld [vmem:[%s10663_s0 + $0x18] sm:$0xff] }
  0x5c   : > { %9289 = vmatprep.mubr.msk.bf16.mxu0 %vm1532_vm3, %v1522_v40  ;;  %2805 = vperm.xlu1 %10226, %v2770_v34   ;;  %v2671_v40 = vld [vmem:[%s10663_s0 + $0x10] sm:$0xff] }
  0x5d   : > { %2802 = vperm.xlu0 %10225, %v2769_v35  }
  0x5f   : > { %9218 = vmatmul.mubr.msk.bf16.gmra.mrb[28].mxu1 %vm1011_vm2, %v10589_v32 }
  0x60   : > { %2685 = vperm.xlu1 %10226, %v2670_v37  }
  0x61   : > { %2682 = vperm.xlu0 %10225, %v2669_v38  }
  0x63   : > { %9290 = vmatmul.mubr.msk.bf16.gmra.mrb[28].mxu0 %vm1532_vm3, %v1523_v46  ;;  %v2678_v46 = vld [vmem:[%s10663_s0 + $0x48] sm:$0xff] }
  0x64   : > { %9293 = vmatprep.mubr.msk.bf16.mxu0 %vm1532_vm3, %v1524_v47  ;;  %2691 = vperm.xlu1 %10226, %v2672_v39   ;;  %v2677_v47 = vld [vmem:[%s10663_s0 + $0x40] sm:$0xff] }
  0x65   : > { %2688 = vperm.xlu0 %10225, %v2671_v40  }
  0x68   : > { %2697 = vperm.xlu1 %10226, %v2674_v41   ;;  %v1999_v41 = vsel %vm1342_vm4, %v10233_v17, 0 }
  0x69   : > { %2694 = vperm.xlu0 %10225, %v2673_v42   ;;  %v10701_v42 = vld [vmem:[%s13040_s9] sm:$0xff]  }
  0x6b   : > { %9294 = vmatmul.mubr.msk.bf16.gmra.mrb[32].mxu0 %vm1532_vm3, %v1525_v53 }
  0x6c   : > { %9297 = vmatprep.mubr.msk.bf16.mxu0 %vm1532_vm3, %v1526_v54  ;;  %2703 = vperm.xlu1 %10226, %v2676_v43  }
  0x6d   : > { %2700 = vperm.xlu0 %10225, %v2675_v44  }
  0x70   : > { %2709 = vperm.xlu1 %10226, %v2678_v46  }
  0x71   : > { %2706 = vperm.xlu0 %10225, %v2677_v47  }
  0x73   : > { %9298 = vmatmul.mubr.msk.bf16.gmra.mrb[36].mxu0 %vm1532_vm3, %v1527_v59 }
  0x74   : > { %9301 = vmatprep.mubr.msk.bf16.mxu0 %vm1532_vm3, %v1528_v60  ;;  %2715 = vperm.xlu1 %10226, %v2680_v49  }
  0x75   : > { %2712 = vperm.xlu0 %10225, %v2679_v50   ;;  %v3567_v50 = vld [vmem:[%s10645_s8 + $0x118] sm:$0xff] }
  0x78   : > { %3572 = vperm.xlu1 %10226, %v3557_v51   ;;  %v3566_v51 = vld [vmem:[%s10645_s8 + $0x110] sm:$0xff] }
  0x79   : > { %3569 = vperm.xlu0 %10225, %v3556_v52  }
  0x7b   : > { %9302 = vmatmul.mubr.msk.bf16.gmra.mrb[40].mxu0 %vm1532_vm3, %v1529_v5  ;;  %v10232_v5 = vld [vmem:[%s13037_s10 + $0x8] sm:$0xff]  }
  0x7c   : > { %9305 = vmatprep.mubr.msk.bf16.mxu0 %vm1532_vm3, %v1530_v6  ;;  %3578 = vperm.xlu1 %10226, %v3559_v55  }
  0x7d   : > { %3575 = vperm.xlu0 %10225, %v3558_v56  }
  0x80   : > { %3584 = vperm.xlu1 %10226, %v3561_v63  }
  0x81   : > { %3581 = vperm.xlu0 %10225, %v3560_v0   ;;  %v3466_v0 = vld [vmem:[%s10663_s0 + $0xc0] sm:$0xff] }
  0x83   : > { %9306 = vmatmul.mubr.msk.bf16.gmra.mrb[44].mxu0 %vm1532_vm3, %v1531_v15 }
  0x84   : > { %3590 = vperm.xlu1 %10226, %v3563_v9  }
  0x85   : > { %3587 = vperm.xlu0 %10225, %v3562_v14  }
  0x88   : > { %3596 = vperm.xlu1 %10226, %v3565_v26  }
  0x89   : > { %3593 = vperm.xlu0 %10225, %v3564_v31  }
  0x8c   : > { %3602 = vperm.xlu1 %10226, %v3567_v50  }
  0x8d   : > { %3599 = vperm.xlu0 %10225, %v3566_v51  }
  0x91   : > { %3479 = vperm.xlu0 %10225, %v3466_v0   ;;  %v3159_v0 = vld [vmem:[%s10645_s8 + $0x68] sm:$0xff] }
  0xfa   : > { %v9191_v53 = vpop.f32.mrb[0].mxu1 }
  0xfb   : > { %v1098_v54 = vpop.f32.mrb[1].mxu1  ;;  %v1227_v58 = vmax.f32 %v9191_v53, 0.0 }
  0xfc   : > { %v9192_v57 = vpop.f32.mrb[2].mxu1  ;;  %v1225_v1 = vmax.f32 %v1098_v54, 0.0  ;;  %v10235_v54 = vld [vmem:[%s13041_s29] sm:$0xff]  }
  0xfd   : > { %v1228_v59 = vmax.f32 %v9192_v57, 0.0  ;;  %v1101_v60 = vpop.f32.mrb[3].mxu1  ;;  %9363 = vmatprep.subr.bf16.mxu0 %v10235_v54 }
  0xfe   : > { %v1226_v2 = vmax.f32 %v1101_v60, 0.0  ;;  %v9263_v24 = vpop.f32.mrb[0].mxu0  ;;  %9364 = vmatpush3.bf16.msra.mxu0 %v10235_v54  ;;  %v3473_v54 = vld [vmem:[%s10663_s0 + $0xf8] sm:$0xff] }
  0xff   : > { %v1263_v3 = vpack.c.bf16 %v1228_v59, %v1227_v58  ;;  %v1836_v29 = vmax.f32 %v9263_v24, 0.0  ;;  %v1643_v30 = vpop.f32.mrb[1].mxu0  ;;  %v3467_v58 = vld [vmem:[%s10663_s0 + $0xc8] sm:$0xff] }
 0x100   : > { %v1262_v4 = vpack.c.bf16 %v1226_v2, %v1225_v1  ;;  %v1834_v35 = vmax.f32 %v1643_v30, 0.0  ;;  %3482 = vperm.xlu1 %10226, %v3467_v58   ;;  %v3471_v30 = vld [vmem:[%s10663_s0 + $0xe8] sm:$0xff] }
 0x101   : > { %v10237_v58 = vld [vmem:[%s13041_s29 + $0x8] sm:$0xff]  }
 0x102   : > { %v9195_v6 = vpop.f32.mrb[4].mxu1  ;;  %9227 = vmatprep.mubr.msk.bf16.mxu1 %vm1293_vm5, %v1262_v4  ;;  %9365 = vmatprep.subr.bf16.mxu0 %v10237_v58 }
 0x103   : > { %v1114_v7 = vpop.f32.mrb[5].mxu1  ;;  %9228 = vmatmul.mubr.msk.bf16.vlgmr.msra.gmra.mrb[32].mxu1 %vm1293_vm5, %v1263_v3  ;;  %v1231_v20 = vmax.f32 %v9195_v6, 0.0  ;;  %9366 = vmatpush3.bf16.msra.mxu0 %v10237_v58 }
 0x104   : > { %v9196_v15 = vpop.f32.mrb[6].mxu1  ;;  %9310 = vmatpush3.bf16.msra.mxu1 %v10638_v16  ;;  %v1229_v27 = vmax.f32 %v1114_v7, 0.0  ;;  %v9264_v16 = vpop.f32.mrb[2].mxu0 }
 0x105   : > { %v1232_v21 = vmax.f32 %v9196_v15, 0.0  ;;  %v1117_v23 = vpop.f32.mrb[7].mxu1  ;;  %9311 = vmatprep.subr.bf16.mxu1 %v10232_v5  ;;  %v1837_v38 = vmax.f32 %v9264_v16, 0.0  ;;  %v1646_v39 = vpop.f32.mrb[3].mxu0  ;;  %v3470_v16 = vld [vmem:[%s10663_s0 + $0xe0] sm:$0xff] }
 0x106   : > { %v1230_v28 = vmax.f32 %v1117_v23, 0.0  ;;  %v1835_v40 = vmax.f32 %v1646_v39, 0.0  ;;  %v9267_v57 = vpop.f32.mrb[4].mxu0  ;;  %v3468_v23 = vld [vmem:[%s10663_s0 + $0xd0] sm:$0xff] }
 0x107   : > { %v1265_v34 = vpack.c.bf16 %v1232_v21, %v1231_v20  ;;  %v10704_v44 = vpack.c.bf16 %v1837_v38, %v1836_v29  ;;  %v1840_v60 = vmax.f32 %v9267_v57, 0.0  ;;  %v1659_v63 = vpop.f32.mrb[5].mxu0  ;;  %v3469_v21 = vld [vmem:[%s10663_s0 + $0xd8] sm:$0xff]  ;;  %3485 = vperm.xlu0 %10225, %v3468_v23  }
 0x108   : > { %v1264_v37 = vpack.c.bf16 %v1230_v28, %v1229_v27  ;;  %9312 = vmatpush3.bf16.msra.mxu1 %v10232_v5  ;;  %v10707_v49 = vpack.c.bf16 %v1835_v40, %v1834_v35  ;;  %v1838_v2 = vmax.f32 %v1659_v63, 0.0  ;;  %v9268_v3 = vpop.f32.mrb[6].mxu0  ;;  %3488 = vperm.xlu1 %10226, %v3469_v21  }
 0x109   : > { %10202 = vmatprep.subr.msk.bf16.mxu1 %vm1342_vm4, %v10233_v17  ;;  %v1841_v5 = vmax.f32 %v9268_v3, 0.0  ;;  %v1662_v6 = vpop.f32.mrb[7].mxu0 }
 0x10a   : > { %v9199_v43 = vpop.f32.mrb[8].mxu1  ;;  %9231 = vmatprep.mubr.msk.bf16.mxu1 %vm1293_vm5, %v1264_v37  ;;  %v1839_v7 = vmax.f32 %v1662_v6, 0.0 }
 0x10b   : > { %v1235_v46 = vmax.f32 %v9199_v43, 0.0  ;;  %v1130_v47 = vpop.f32.mrb[9].mxu1  ;;  %9232 = vmatmul.mubr.msk.bf16.gmra.mrb[36].mxu1 %vm1293_vm5, %v1265_v34  ;;  %v10718_v14 = vpack.c.bf16 %v1841_v5, %v1840_v60  ;;  %3491 = vperm.xlu0 %10225, %v3470_v16  }
 0x10c   : > { %v1233_v52 = vmax.f32 %v1130_v47, 0.0  ;;  %v9200_v53 = vpop.f32.mrb[10].mxu1  ;;  %9314 = vmatpush3.bf16.msra.mxu1 %v1999_v41  ;;  %v10721_v20 = vpack.c.bf16 %v1839_v7, %v1838_v2  ;;  %3494 = vperm.xlu1 %10226, %v3471_v30  }
 0x10d   : > { %v1236_v55 = vmax.f32 %v9200_v53, 0.0  ;;  %v1133_v56 = vpop.f32.mrb[11].mxu1  ;;  %9401 = vmatprep.subr.bf16.mxu1 %v10701_v42 }
 0x10e   : > { %v1234_v59 = vmax.f32 %v1133_v56, 0.0  ;;  %v9271_v29 = vpop.f32.mrb[8].mxu0 }
 0x10f   : > { %v1267_v1 = vpack.c.bf16 %v1236_v55, %v1235_v46  ;;  %v1844_v34 = vmax.f32 %v9271_v29, 0.0  ;;  %v1675_v35 = vpop.f32.mrb[9].mxu0  ;;  %v3472_v55 = vld [vmem:[%s10663_s0 + $0xf0] sm:$0xff] }
 0x110   : > { %v1266_v4 = vpack.c.bf16 %v1234_v59, %v1233_v52  ;;  %v1842_v38 = vmax.f32 %v1675_v35, 0.0  ;;  %v9272_v39 = vpop.f32.mrb[10].mxu0  ;;  %3500 = vperm.xlu1 %10226, %v3473_v54   ;;  %3497 = vperm.xlu0 %10225, %v3472_v55  }
 0x111   : > { %v1845_v41 = vmax.f32 %v9272_v39, 0.0  ;;  %v1678_v43 = vpop.f32.mrb[11].mxu0 }
 0x112   : > { %v9203_v9 = vpop.f32.mrb[12].mxu1  ;;  %9235 = vmatprep.mubr.msk.bf16.mxu1 %vm1293_vm5, %v1266_v4  ;;  %v1843_v46 = vmax.f32 %v1678_v43, 0.0  ;;  %v3158_v4 = vld [vmem:[%s10645_s8 + $0x60] sm:$0xff] }
 0x113   : > { %v1239_v15 = vmax.f32 %v9203_v9, 0.0  ;;  %v1146_v17 = vpop.f32.mrb[13].mxu1  ;;  %9236 = vmatmul.mubr.msk.bf16.gmra.mrb[40].mxu1 %vm1293_vm5, %v1267_v1  ;;  %v10728_v50 = vpack.c.bf16 %v1845_v41, %v1844_v34 }
 0x114   : > { %v1237_v24 = vmax.f32 %v1146_v17, 0.0  ;;  %v9204_v26 = vpop.f32.mrb[14].mxu1  ;;  %v10731_v53 = vpack.c.bf16 %v1843_v46, %v1842_v38  ;;  %3174 = vperm.xlu1 %10226, %v3159_v0   ;;  %3171 = vperm.xlu0 %10225, %v3158_v4  }
 0x115   : > { %v1240_v27 = vmax.f32 %v9204_v26, 0.0  ;;  %v1149_v28 = vpop.f32.mrb[15].mxu1 }
 0x116   : > { %v1238_v31 = vmax.f32 %v1149_v28, 0.0  ;;  %v9275_v63 = vpop.f32.mrb[12].mxu0 }
 0x117   : > { %v1269_v37 = vpack.c.bf16 %v1240_v27, %v1239_v15  ;;  %v1848_v2 = vmax.f32 %v9275_v63, 0.0  ;;  %v1691_v3 = vpop.f32.mrb[13].mxu0 }
 0x118   : > { %v1268_v40 = vpack.c.bf16 %v1238_v31, %v1237_v24  ;;  %v1846_v6 = vmax.f32 %v1691_v3, 0.0  ;;  %v9276_v7 = vpop.f32.mrb[14].mxu0 }
 0x119   : > { %v1849_v15 = vmax.f32 %v9276_v7, 0.0  ;;  %v1694_v17 = vpop.f32.mrb[15].mxu0 }
 0x11a   : > { %9239 = vmatprep.mubr.msk.bf16.mxu1 %vm1293_vm5, %v1268_v40  ;;  %v9207_v47 = vpop.f32.mrb[16].mxu1  ;;  %v1847_v21 = vmax.f32 %v1694_v17, 0.0 }
 0x11b   : > { %9240 = vmatmul.mubr.msk.bf16.gmra.mrb[44].mxu1 %vm1293_vm5, %v1269_v37  ;;  %v1243_v51 = vmax.f32 %v9207_v47, 0.0  ;;  %v1162_v52 = vpop.f32.mrb[17].mxu1  ;;  %v10741_v24 = vpack.c.bf16 %v1849_v15, %v1848_v2 }
 0x11c   : > { %v1241_v56 = vmax.f32 %v1162_v52, 0.0  ;;  %v9208_v57 = vpop.f32.mrb[18].mxu1  ;;  %v10744_v28 = vpack.c.bf16 %v1847_v21, %v1846_v6 }
 0x11d   : > { %v1244_v59 = vmax.f32 %v9208_v57, 0.0  ;;  %v1165_v60 = vpop.f32.mrb[19].mxu1 }
 0x11e   : > { %v1242_v1 = vmax.f32 %v1165_v60, 0.0  ;;  %v9279_v35 = vpop.f32.mrb[16].mxu0 }
 0x11f   : > { %v1271_v5 = vpack.c.bf16 %v1244_v59, %v1243_v51  ;;  %v1852_v37 = vmax.f32 %v9279_v35, 0.0  ;;  %v1707_v38 = vpop.f32.mrb[17].mxu0 }
 0x120   : > { %v1270_v9 = vpack.c.bf16 %v1242_v1, %v1241_v56  ;;  %v1850_v40 = vmax.f32 %v1707_v38, 0.0  ;;  %v9280_v41 = vpop.f32.mrb[18].mxu0 }
 0x121   : > { %v1853_v46 = vmax.f32 %v9280_v41, 0.0  ;;  %v1710_v47 = vpop.f32.mrb[19].mxu0 }
 0x122   : > { %v9211_v23 = vpop.f32.mrb[20].mxu1  ;;  %9243 = vmatprep.mubr.msk.bf16.mxu1 %vm1293_vm5, %v1270_v9  ;;  %v1851_v51 = vmax.f32 %v1710_v47, 0.0 }
 0x123   : > { %v1247_v26 = vmax.f32 %v9211_v23, 0.0  ;;  %v1178_v27 = vpop.f32.mrb[21].mxu1  ;;  %9244 = vmatmul.mubr.msk.bf16.gmra.mrb[48].mxu1 %vm1293_vm5, %v1271_v5  ;;  %v10747_v54 = vpack.c.bf16 %v1853_v46, %v1852_v37 }
 0x124   : > { %v1245_v29 = vmax.f32 %v1178_v27, 0.0  ;;  %v9212_v30 = vpop.f32.mrb[22].mxu1  ;;  %v10750_v57 = vpack.c.bf16 %v1851_v51, %v1850_v40 }
 0x125   : > { %v1248_v31 = vmax.f32 %v9212_v30, 0.0  ;;  %v1181_v34 = vpop.f32.mrb[23].mxu1 }
 0x126   : > { %v1246_v16 = vmax.f32 %v1181_v34, 0.0  ;;  %v9283_v0 = vpop.f32.mrb[20].mxu0 }
 0x127   : > { %v1273_v39 = vpack.c.bf16 %v1248_v31, %v1247_v26  ;;  %v1856_v2 = vmax.f32 %v9283_v0, 0.0  ;;  %v1723_v3 = vpop.f32.mrb[21].mxu0 }
 0x128   : > { %v1272_v43 = vpack.c.bf16 %v1246_v16, %v1245_v29  ;;  %v1854_v5 = vmax.f32 %v1723_v3, 0.0  ;;  %v9284_v6 = vpop.f32.mrb[22].mxu0 }
 0x129   : > { %v1857_v9 = vmax.f32 %v9284_v6, 0.0  ;;  %v1726_v15 = vpop.f32.mrb[23].mxu0 }
 0x12a   : > { %9247 = vmatprep.mubr.msk.bf16.mxu1 %vm1293_vm5, %v1272_v43  ;;  %v9215_v52 = vpop.f32.mrb[24].mxu1  ;;  %v1855_v17 = vmax.f32 %v1726_v15, 0.0 }
 0x12b   : > { %9248 = vmatmul.mubr.msk.bf16.gmra.mrb[52].mxu1 %vm1293_vm5, %v1273_v39  ;;  %v1251_v55 = vmax.f32 %v9215_v52, 0.0  ;;  %v1194_v56 = vpop.f32.mrb[25].mxu1  ;;  %v10753_v23 = vpack.c.bf16 %v1857_v9, %v1856_v2 }
 0x12c   : > { %v1249_v58 = vmax.f32 %v1194_v56, 0.0  ;;  %v9216_v59 = vpop.f32.mrb[26].mxu1  ;;  %v10756_v29 = vpack.c.bf16 %v1855_v17, %v1854_v5 }
 0x12d   : > { %v1252_v60 = vmax.f32 %v9216_v59, 0.0  ;;  %v1197_v63 = vpop.f32.mrb[27].mxu1 }
 0x12e   : > { %v1250_v1 = vmax.f32 %v1197_v63, 0.0  ;;  %v9287_v16 = vpop.f32.mrb[24].mxu0 }
 0x12f   : > { %v1275_v4 = vpack.c.bf16 %v1252_v60, %v1251_v55  ;;  %v1860_v38 = vmax.f32 %v9287_v16, 0.0  ;;  %v1739_v39 = vpop.f32.mrb[25].mxu0 }
 0x130   : > { %v1274_v7 = vpack.c.bf16 %v1250_v1, %v1249_v58  ;;  %v1858_v41 = vmax.f32 %v1739_v39, 0.0  ;;  %v9288_v43 = vpop.f32.mrb[26].mxu0 }
 0x131   : > { %v1861_v47 = vmax.f32 %v9288_v43, 0.0  ;;  %v1742_v51 = vpop.f32.mrb[27].mxu0 }
 0x132   : > { %v9219_v21 = vpop.f32.mrb[28].mxu1  ;;  %9251 = vmatprep.mubr.msk.bf16.mxu1 %vm1293_vm5, %v1274_v7  ;;  %v1859_v52 = vmax.f32 %v1742_v51, 0.0 }
 0x133   : > { %v1255_v26 = vmax.f32 %v9219_v21, 0.0  ;;  %v1210_v27 = vpop.f32.mrb[29].mxu1  ;;  %9252 = vmatmul.mubr.msk.bf16.gmra.mrb[56].mxu1 %vm1293_vm5, %v1275_v4  ;;  %v10759_v55 = vpack.c.bf16 %v1861_v47, %v1860_v38  ;;  %v10236_v4 = vld [vmem:[%s13040_s9 + $0x8] sm:$0xff]  }
 0x134   : > { %v1253_v30 = vmax.f32 %v1210_v27, 0.0  ;;  %v9220_v31 = vpop.f32.mrb[30].mxu1  ;;  %v10762_v56 = vpack.c.bf16 %v1859_v52, %v1858_v41  ;;  %v3474_v41 = vld [vmem:[%s10663_s0 + $0x100] sm:$0xff]  ;;  %v10239_v52 = vld [vmem:[%s13040_s9 + $0x10] ss:$0 sps:$4 sm:$0xff]  }
 0x135   : > { %v1256_v34 = vmax.f32 %v9220_v31, 0.0  ;;  %v1213_v35 = vpop.f32.mrb[31].mxu1  ;;  %3503 = vperm.xlu0 %10225, %v3474_v41   ;;  %v2779_v41 = vpop.permute.xlu1 %2778 }
 0x136   : > { %v1254_v37 = vmax.f32 %v1213_v35, 0.0  ;;  %v9291_v58 = vpop.f32.mrb[28].mxu0 }
 0x137   : > { %v1277_v40 = vpack.c.bf16 %v1256_v34, %v1255_v26  ;;  %v1864_v59 = vmax.f32 %v9291_v58, 0.0  ;;  %v1755_v60 = vpop.f32.mrb[29].mxu0 }
 0x138   : > { %v1276_v46 = vpack.c.bf16 %v1254_v37, %v1253_v30  ;;  %v1862_v63 = vmax.f32 %v1755_v60, 0.0  ;;  %v9292_v0 = vpop.f32.mrb[30].mxu0 }
 0x139   : > { %v1865_v1 = vmax.f32 %v9292_v0, 0.0  ;;  %v1758_v2 = vpop.f32.mrb[31].mxu0  ;;  %v3161_v0 = vld [vmem:[%s10645_s8 + $0x78] sm:$0xff] }
 0x13a   : > { %9255 = vmatprep.mubr.msk.bf16.mxu1 %vm1293_vm5, %v1276_v46  ;;  %v1863_v3 = vmax.f32 %v1758_v2, 0.0 }
 0x13b   : > { %9256 = vmatmul.mubr.msk.bf16.gmra.mrb[60].mxu1 %vm1293_vm5, %v1277_v40  ;;  %v10769_v5 = vpack.c.bf16 %v1865_v1, %v1864_v59  ;;  %v3160_v1 = vld [vmem:[%s10645_s8 + $0x70] sm:$0xff] }
 0x13c   : > { %9315 = vmatprep.mubr.msk.bf16.mxu1 %vm1293_vm5, %v10707_v49  ;;  %v10773_v6 = vpack.c.bf16 %v1863_v3, %v1862_v63  ;;  %v2506_v63 = vsel %vm1342_vm4, %v10239_v52, 0  ;;  %3177 = vperm.xlu0 %10225, %v3160_v1  }
 0x13e   : > { %v9295_v49 = vpop.f32.mrb[32].mxu0 }
 0x13f   : > { %v1868_v7 = vmax.f32 %v9295_v49, 0.0  ;;  %v1771_v9 = vpop.f32.mrb[33].mxu0  ;;  %v3477_v49 = vld [vmem:[%s10663_s0 + $0x118] sm:$0xff] }
 0x140   : > { %v1866_v15 = vmax.f32 %v1771_v9, 0.0  ;;  %v9296_v17 = vpop.f32.mrb[34].mxu0 }
 0x141   : > { %v1869_v21 = vmax.f32 %v9296_v17, 0.0  ;;  %v1774_v26 = vpop.f32.mrb[35].mxu0 }
 0x142   : > { %v1867_v27 = vmax.f32 %v1774_v26, 0.0 }
 0x143   : > { %9316 = vmatmul.mubr.msk.bf16.vlgmr.msra.gmra.mrb[64].mxu1 %vm1293_vm5, %v10704_v44  ;;  %v10778_v30 = vpack.c.bf16 %v1869_v21, %v1868_v7  ;;  %v3476_v7 = vld [vmem:[%s10663_s0 + $0x110] sm:$0xff] }
 0x144   : > { %9319 = vmatprep.mubr.msk.bf16.mxu1 %vm1293_vm5, %v10721_v20  ;;  %9402 = vmatpush3.bf16.msra.mxu1 %v10701_v42  ;;  %v10782_v44 = vpack.c.bf16 %v1867_v27, %v1866_v15 }
 0x145   : > { %9403 = vmatprep.subr.bf16.mxu1 %v10236_v4  ;;  %3509 = vperm.xlu0 %10225, %v3476_v7  }
 0x146   : > { %v9299_v42 = vpop.f32.mrb[36].mxu0 }
 0x147   : > { %v1872_v20 = vmax.f32 %v9299_v42, 0.0  ;;  %v1787_v31 = vpop.f32.mrb[37].mxu0  ;;  %v3163_v42 = vld [vmem:[%s10645_s8 + $0x88] sm:$0xff] }
 0x148   : > { %9404 = vmatpush3.bf16.msra.mxu1 %v10236_v4  ;;  %v1870_v34 = vmax.f32 %v1787_v31, 0.0  ;;  %v9300_v35 = vpop.f32.mrb[38].mxu0 }
 0x149   : > { %v1873_v16 = vmax.f32 %v9300_v35, 0.0  ;;  %v1790_v37 = vpop.f32.mrb[39].mxu0  ;;  %10204 = vmatprep.subr.msk.bf16.mxu1 %vm1342_vm4, %v10239_v52  ;;  %v3164_v35 = vld [vmem:[%s10645_s8 + $0x90] sm:$0xff] }
 0x14a   : > { %v1871_v38 = vmax.f32 %v1790_v37, 0.0  ;;  %v3166_v37 = vld [vmem:[%s10645_s8 + $0xa0] sm:$0xff] }
 0x14b   : > { %9320 = vmatmul.mubr.msk.bf16.gmra.mrb[68].mxu1 %vm1293_vm5, %v10718_v14  ;;  %v10786_v39 = vpack.c.bf16 %v1873_v16, %v1872_v20  ;;  %v3162_v20 = vld [vmem:[%s10645_s8 + $0x80] sm:$0xff]  ;;  %v3167_v16 = vld [vmem:[%s10645_s8 + $0xa8] sm:$0xff] }
 0x14c   : > { %9323 = vmatprep.mubr.msk.bf16.mxu1 %vm1293_vm5, %v10731_v53  ;;  %v10790_v14 = vpack.c.bf16 %v1871_v38, %v1870_v34  ;;  %v3475_v53 = vld [vmem:[%s10663_s0 + $0x108] sm:$0xff]  ;;  %9406 = vmatpush3.bf16.msra.mxu1 %v2506_v63  ;;  %v3165_v34 = vld [vmem:[%s10645_s8 + $0x98] sm:$0xff] }
 0x14d   : > { %3506 = vperm.xlu1 %10226, %v3475_v53   ;;  %3183 = vperm.xlu0 %10225, %v3162_v20   ;;  %v3069_v38 = vld [vmem:[%s10663_s0 + $0x68] sm:$0xff]  ;;  %v3070_v53 = vld [vmem:[%s10663_s0 + $0x70] sm:$0xff] }
 0x14e   : > { %v9303_v40 = vpop.f32.mrb[40].mxu0  ;;  %v3078_v20 = vld [vmem:[%s10663_s0 + $0xb0] sm:$0xff] }
 0x14f   : > { %v1876_v43 = vmax.f32 %v9303_v40, 0.0  ;;  %v1803_v46 = vpop.f32.mrb[41].mxu0  ;;  %v3068_v40 = vld [vmem:[%s10663_s0 + $0x60] sm:$0xff] }
 0x150   : > { %v1874_v47 = vmax.f32 %v1803_v46, 0.0  ;;  %v9304_v51 = vpop.f32.mrb[42].mxu0 }
 0x151   : > { %v1806_v58 = vpop.f32.mrb[43].mxu0  ;;  %3180 = vperm.xlu1 %10226, %v3161_v0   ;;  %3189 = vperm.xlu0 %10225, %v3164_v35   ;;  %v3074_v0 = vld [vmem:[%s10663_s0 + $0x90] sm:$0xff] }
 0x152   : > { %v1875_v59 = vmax.f32 %v1806_v58, 0.0 }
 0x153   : > { %9324 = vmatmul.mubr.msk.bf16.gmra.mrb[72].mxu1 %vm1293_vm5, %v10728_v50  ;;  %v10238_v50 = vld [vmem:[%s13041_s29 + $0x10] ss:$0 sps:$4 sm:$0xff]  }
 0x154   : > { %9327 = vmatprep.mubr.msk.bf16.mxu1 %vm1293_vm5, %v10744_v28  ;;  %v1877_v28 = vmax.f32 %v9304_v51, 0.0  ;;  %10203 = vmatprep.subr.msk.bf16.mxu0 %vm1342_vm4, %v10238_v50  ;;  %v2322_v60 = vsel %vm1342_vm4, %v10238_v50, 0  ;;  %v10812_v3 = vpack.c.bf16 %v1875_v59, %v1874_v47  ;;  %v3073_v47 = vld [vmem:[%s10663_s0 + $0x88] sm:$0xff]  ;;  %v2782_v51 = vpop.permute.xlu1 %2781  ;;  %v12879_v50 = vmov 0.0  }
 0x155   : > { %9368 = vmatpush3.bf16.msra.mxu0 %v2322_v60  ;;  %3512 = vperm.xlu1 %10226, %v3477_v49  }
 0x156   : > { %v10808_v2 = vpack.c.bf16 %v1877_v28, %v1876_v43  ;;  %v9307_v4 = vpop.f32.mrb[44].mxu0  ;;  %3195 = vperm.xlu0 %10225, %v3166_v37   ;;  %v2773_v43 = vpop.permute.xlu0 %2772  ;;  %v3955_v37 = vld [vmem:[%s10645_s8 + $0x128] sm:$0xff] }
 0x157   : > { %v1880_v9 = vmax.f32 %v9307_v4, 0.0  ;;  %v1819_v15 = vpop.f32.mrb[45].mxu0 }
 0x158   : > { %v1878_v17 = vmax.f32 %v1819_v15, 0.0  ;;  %v9308_v21 = vpop.f32.mrb[46].mxu0  ;;  %v2788_v1 = vpop.permute.xlu1 %2787  ;;  %v3076_v15 = vld [vmem:[%s10663_s0 + $0xa0] sm:$0xff] }
 0x159   : > { %v1822_v26 = vpop.f32.mrb[47].mxu0  ;;  %3186 = vperm.xlu1 %10226, %v3163_v42   ;;  %v3079_v42 = vld [vmem:[%s10663_s0 + $0xb8] sm:$0xff] }
 0x15a   : > { %v1879_v27 = vmax.f32 %v1822_v26, 0.0 }
 0x15b   : > { %9328 = vmatmul.mubr.msk.bf16.gmra.mrb[76].mxu1 %vm1293_vm5, %v10741_v24  ;;  %v1881_v24 = vmax.f32 %v9308_v21, 0.0 }
 0x15c   : > { %9331 = vmatprep.mubr.msk.bf16.mxu1 %vm1293_vm5, %v10750_v57  ;;  %v10824_v31 = vpack.c.bf16 %v1879_v27, %v1878_v17  ;;  %v2794_v17 = vpop.permute.xlu1 %2793 }
 0x15d   : > { %v10820_v57 = vpack.c.bf16 %v1881_v24, %v1880_v9  ;;  %3192 = vperm.xlu1 %10226, %v3165_v34   ;;  %v3077_v9 = vld [vmem:[%s10663_s0 + $0xa8] sm:$0xff] }
 0x160   : > { %v2800_v34 = vpop.permute.xlu1 %2799 }
 0x161   : > { %3198 = vperm.xlu1 %10226, %v3167_v16  }
 0x163   : > { %9332 = vmatmul.mubr.msk.bf16.gmra.mrb[80].mxu1 %vm1293_vm5, %v10747_v54  ;;  %v3169_v54 = vld [vmem:[%s10645_s8 + $0xb8] sm:$0xff] }
 0x164   : > { %9335 = vmatprep.mubr.msk.bf16.mxu1 %vm1293_vm5, %v10756_v29  ;;  %v3168_v29 = vld [vmem:[%s10645_s8 + $0xb0] sm:$0xff] }
 0x165   : > { %3204 = vperm.xlu1 %10226, %v3169_v54   ;;  %3201 = vperm.xlu0 %10225, %v3168_v29   ;;  %v3954_v54 = vld [vmem:[%s10645_s8 + $0x120] sm:$0xff]  ;;  %v2806_v29 = vpop.permute.xlu1 %2805 }
 0x169   : > { %3084 = vperm.xlu1 %10226, %v3069_v38   ;;  %3081 = vperm.xlu0 %10225, %v3068_v40  }
 0x16b   : > { %9336 = vmatmul.mubr.msk.bf16.gmra.mrb[84].mxu1 %vm1293_vm5, %v10753_v23  ;;  %v3071_v23 = vld [vmem:[%s10663_s0 + $0x78] sm:$0xff] }
 0x16c   : > { %9339 = vmatprep.mubr.msk.bf16.mxu1 %vm1293_vm5, %v10762_v56  ;;  %v12867_v56 = vlaneseq }
 0x16d   : > { %3090 = vperm.xlu1 %10226, %v3071_v23   ;;  %3087 = vperm.xlu0 %10225, %v3070_v53  }
 0x16e   : > { %v10847_v46 = vand.u32 127, %v12867_v56 }
 0x170   : > { %vm2809_vm6 = vcmp.eq.s32.totalorder %v2779_v41, %v10847_v46  ;;  %vm2807_vm7 = vcmp.eq.s32.totalorder %v2773_v43, %v10847_v46  ;;  %vm2810_vm8 = vcmp.eq.s32.totalorder %v2782_v51, %v10847_v46  ;;  %vm2812_vm10 = vcmp.eq.s32.totalorder %v2788_v1, %v10847_v46  ;;  %v3957_v41 = vld [vmem:[%s10645_s8 + $0x138] sm:$0xff]  ;;  %v3956_v43 = vld [vmem:[%s10645_s8 + $0x130] sm:$0xff] }
 0x171   : > { %v10854_v52 = vsel %vm2809_vm6, 1.0, %v12879_v50  ;;  %v10857_v28 = vsel %vm2807_vm7, 1.0, %v12879_v50  ;;  %3096 = vperm.xlu1 %10226, %v3073_v47   ;;  %v10864_v58 = vsel %vm2810_vm8, 1.0, %v12879_v50  ;;  %v10880_v49 = vsel %vm2812_vm10, 1.0, %v12879_v50  ;;  %v2686_v47 = vpop.permute.xlu1 %2685 }
 0x172   : > { %vm2814_vm12 = vcmp.eq.s32.totalorder %v2794_v17, %v10847_v46  ;;  %vm2816_vm14 = vcmp.eq.s32.totalorder %v2800_v34, %v10847_v46  ;;  %vm2818_vm1 = vcmp.eq.s32.totalorder %v2806_v29, %v10847_v46  ;;  %vm2718_vm6 = vcmp.eq.s32.totalorder %v2686_v47, %v10847_v46  ;;  %v3961_v17 = vld [vmem:[%s10645_s8 + $0x158] sm:$0xff] }
 0x173   : > { %9340 = vmatmul.mubr.msk.bf16.gmra.mrb[88].mxu1 %vm1293_vm5, %v10759_v55  ;;  %v3072_v55 = vld [vmem:[%s10663_s0 + $0x80] sm:$0xff]  ;;  %v10894_v24 = vsel %vm2814_vm12, 1.0, %v12879_v50  ;;  %v10908_v35 = vsel %vm2816_vm14, 1.0, %v12879_v50  ;;  %v10922_v40 = vsel %vm2818_vm1, 1.0, %v12879_v50  ;;  %v3965_v47 = vld [vmem:[%s10645_s8 + $0x178] sm:$0xff] }
 0x174   : > { %9343 = vmatprep.mubr.msk.bf16.mxu1 %vm1293_vm5, %v10773_v6  ;;  %v2776_v6 = vpop.permute.xlu0 %2775  ;;  %3093 = vperm.xlu0 %10225, %v3072_v55   ;;  %v10936_v55 = vsel %vm2718_vm6, 1.0, %v12879_v50 }
 0x175   : > { %vm2808_vm9 = vcmp.eq.s32.totalorder %v2776_v6, %v10847_v46  ;;  %v3959_v6 = vld [vmem:[%s10645_s8 + $0x148] sm:$0xff] }
 0x176   : > { %v10867_v59 = vsel %vm2808_vm9, 1.0, %v12879_v50 }
 0x178   : > { %v2785_v4 = vpop.permute.xlu0 %2784  ;;  %3099 = vperm.xlu0 %10225, %v3074_v0   ;;  %v2692_v0 = vpop.permute.xlu1 %2691 }
 0x179   : > { %vm2811_vm11 = vcmp.eq.s32.totalorder %v2785_v4, %v10847_v46  ;;  %vm2720_vm8 = vcmp.eq.s32.totalorder %v2692_v0, %v10847_v46 }
 0x17a   : > { %v10950_v4 = vsel %vm2720_vm8, 1.0, %v12879_v50 }
 0x17b   : > { %9344 = vmatmul.mubr.msk.bf16.gmra.mrb[92].mxu1 %vm1293_vm5, %v10769_v5  ;;  %v3075_v5 = vld [vmem:[%s10663_s0 + $0x98] sm:$0xff] }
 0x17c   : > { %9347 = vmatprep.mubr.msk.bf16.mxu1 %vm1293_vm5, %v10782_v44  ;;  %3102 = vperm.xlu1 %10226, %v3075_v5   ;;  %v10883_v44 = vsel %vm2811_vm11, 1.0, %v12879_v50  ;;  %v2791_v21 = vpop.permute.xlu0 %2790  ;;  %v3958_v5 = vld [vmem:[%s10645_s8 + $0x140] sm:$0xff] }
 0x17d   : > { %vm2813_vm13 = vcmp.eq.s32.totalorder %v2791_v21, %v10847_v46  ;;  %3105 = vperm.xlu0 %10225, %v3076_v15   ;;  %v3960_v21 = vld [vmem:[%s10645_s8 + $0x150] sm:$0xff] }
 0x17e   : > { %v10897_v26 = vsel %vm2813_vm13, 1.0, %v12879_v50 }
 0x180   : > { %3108 = vperm.xlu1 %10226, %v3077_v9  }
 0x181   : > { %3111 = vperm.xlu0 %10225, %v3078_v20  }
 0x183   : > { %9348 = vmatmul.mubr.msk.bf16.gmra.mrb[96].mxu1 %vm1293_vm5, %v10778_v30  ;;  %v2797_v30 = vpop.permute.xlu0 %2796 }
 0x184   : > { %9351 = vmatprep.mubr.msk.bf16.mxu1 %vm1293_vm5, %v10790_v14  ;;  %vm2815_vm15 = vcmp.eq.s32.totalorder %v2797_v30, %v10847_v46  ;;  %3114 = vperm.xlu1 %10226, %v3079_v42   ;;  %v2698_v42 = vpop.permute.xlu1 %2697  ;;  %v3963_v30 = vld [vmem:[%s10645_s8 + $0x168] sm:$0xff] }
 0x185   : > { %v10911_v16 = vsel %vm2815_vm15, 1.0, %v12879_v50  ;;  %3967 = vperm.xlu0 %10225, %v3954_v54   ;;  %vm2722_vm10 = vcmp.eq.s32.totalorder %v2698_v42, %v10847_v46 }
 0x186   : > { %v10964_v20 = vsel %vm2722_vm10, 1.0, %v12879_v50 }
 0x187   : > { %v2803_v38 = vpop.permute.xlu0 %2802 }
 0x188   : > { %vm2817_vm3 = vcmp.eq.s32.totalorder %v2803_v38, %v10847_v46  ;;  %3970 = vperm.xlu1 %10226, %v3955_v37   ;;  %v3962_v37 = vld [vmem:[%s10645_s8 + $0x160] sm:$0xff]  ;;  %v2704_v54 = vpop.permute.xlu1 %2703 }
 0x189   : > { %v10925_v23 = vsel %vm2817_vm3, 1.0, %v12879_v50  ;;  %3973 = vperm.xlu0 %10225, %v3956_v43   ;;  %vm2724_vm12 = vcmp.eq.s32.totalorder %v2704_v54, %v10847_v46 }
 0x18a   : > { %v10978_v38 = vsel %vm2724_vm12, 1.0, %v12879_v50 }
 0x18b   : > { %9352 = vmatmul.mubr.msk.bf16.gmra.mrb[100].mxu1 %vm1293_vm5, %v10786_v39  ;;  %v2683_v39 = vpop.permute.xlu0 %2682 }
 0x18c   : > { %9355 = vmatprep.mubr.msk.bf16.mxu1 %vm1293_vm5, %v10812_v3  ;;  %vm2717_vm7 = vcmp.eq.s32.totalorder %v2683_v39, %v10847_v46  ;;  %3976 = vperm.xlu1 %10226, %v3957_v41   ;;  %v3964_v39 = vld [vmem:[%s10645_s8 + $0x170] sm:$0xff] }
 0x18d   : > { %v10939_v51 = vsel %vm2717_vm7, 1.0, %v12879_v50  ;;  %3979 = vperm.xlu0 %10225, %v3958_v5  }
 0x18f   : > { %v2689_v1 = vpop.permute.xlu0 %2688 }
 0x190   : > { %vm2719_vm9 = vcmp.eq.s32.totalorder %v2689_v1, %v10847_v46  ;;  %3982 = vperm.xlu1 %10226, %v3959_v6   ;;  %v2710_v6 = vpop.permute.xlu1 %2709 }
 0x191   : > { %v10953_v9 = vsel %vm2719_vm9, 1.0, %v12879_v50  ;;  %3985 = vperm.xlu0 %10225, %v3960_v21   ;;  %vm2726_vm14 = vcmp.eq.s32.totalorder %v2710_v6, %v10847_v46  ;;  %v3864_v21 = vld [vmem:[%s10663_s0 + $0x120] sm:$0xff] }
 0x193   : > { %9356 = vmatmul.mubr.msk.bf16.gmra.mrb[104].mxu1 %vm1293_vm5, %v10808_v2  ;;  %v2695_v2 = vpop.permute.xlu0 %2694 }
 0x194   : > { %9359 = vmatprep.mubr.msk.bf16.mxu1 %vm1293_vm5, %v10824_v31  ;;  %vm2721_vm11 = vcmp.eq.s32.totalorder %v2695_v2, %v10847_v46  ;;  %3988 = vperm.xlu1 %10226, %v3961_v17   ;;  %v3865_v17 = vld [vmem:[%s10663_s0 + $0x128] sm:$0xff]  ;;  %v2716_v42 = vpop.permute.xlu1 %2715 }
 0x195   : > { %v10967_v34 = vsel %vm2721_vm11, 1.0, %v12879_v50  ;;  %3991 = vperm.xlu0 %10225, %v3962_v37   ;;  %vm2728_vm1 = vcmp.eq.s32.totalorder %v2716_v42, %v10847_v46  ;;  %v3869_v42 = vld [vmem:[%s10663_s0 + $0x148] sm:$0xff] }
 0x197   : > { %v2701_v29 = vpop.permute.xlu0 %2700 }
 0x198   : > { %vm2723_vm13 = vcmp.eq.s32.totalorder %v2701_v29, %v10847_v46  ;;  %3994 = vperm.xlu1 %10226, %v3963_v30   ;;  %v11002_v30 = vsel %vm2728_vm1, 1.0, %v12879_v50  ;;  %v3867_v29 = vld [vmem:[%s10663_s0 + $0x138] sm:$0xff] }
 0x199   : > { %v10981_v41 = vsel %vm2723_vm13, 1.0, %v12879_v50  ;;  %3997 = vperm.xlu0 %10225, %v3964_v39   ;;  %v3573_v39 = vpop.permute.xlu1 %3572 }
 0x19a   : > { %vm3605_vm6 = vcmp.eq.s32.totalorder %v3573_v39, %v10847_v46 }
 0x19b   : > { %9360 = vmatmul.mubr.msk.bf16.gmra.mrb[108].mxu1 %vm1293_vm5, %v10820_v57  ;;  %v2707_v5 = vpop.permute.xlu0 %2706  ;;  %v10990_v57 = vsel %vm2726_vm14, 1.0, %v12879_v50 }
 0x19c   : > { %vm2725_vm15 = vcmp.eq.s32.totalorder %v2707_v5, %v10847_v46  ;;  %4000 = vperm.xlu1 %10226, %v3965_v47   ;;  %v3866_v47 = vld [vmem:[%s10663_s0 + $0x130] sm:$0xff]  ;;  %v11014_v5 = vsel %vm3605_vm6, 1.0, %v12879_v50 }
 0x19d   : > { %v10993_v0 = vsel %vm2725_vm15, 1.0, %v12879_v50  ;;  %3877 = vperm.xlu0 %10225, %v3864_v21   ;;  %v3579_v56 = vpop.permute.xlu1 %3578  ;;  %v3870_v21 = vld [vmem:[%s10663_s0 + $0x150] sm:$0xff] }
 0x19e   : > { %vm3607_vm8 = vcmp.eq.s32.totalorder %v3579_v56, %v10847_v46 }
 0x19f   : > { %v2713_v2 = vpop.permute.xlu0 %2712 }
 0x1a0   : > { %vm2727_vm3 = vcmp.eq.s32.totalorder %v2713_v2, %v10847_v46  ;;  %3880 = vperm.xlu1 %10226, %v3865_v17   ;;  %v3868_v2 = vld [vmem:[%s10663_s0 + $0x140] sm:$0xff] }
 0x1a1   : > { %v11005_v37 = vsel %vm2727_vm3, 1.0, %v12879_v50  ;;  %3883 = vperm.xlu0 %10225, %v3866_v47   ;;  %v3585_v1 = vpop.permute.xlu1 %3584  ;;  %v3872_v47 = vld [vmem:[%s10663_s0 + $0x160] sm:$0xff] }
 0x1a2   : > { %vm3609_vm10 = vcmp.eq.s32.totalorder %v3585_v1, %v10847_v46 }
 0x1a3   : > { %v3570_v6 = vpop.permute.xlu0 %3569  ;;  %v11038_v56 = vsel %vm3609_vm10, 1.0, %v12879_v50 }
 0x1a4   : > { %vm3604_vm7 = vcmp.eq.s32.totalorder %v3570_v6, %v10847_v46  ;;  %3886 = vperm.xlu1 %10226, %v3867_v29   ;;  %v11026_v29 = vsel %vm3607_vm8, 1.0, %v12879_v50  ;;  %v3871_v6 = vld [vmem:[%s10663_s0 + $0x158] sm:$0xff]  ;;  %13043 = vst [vmem:[#allocation21_spill] sm:$0xff] %v11038_v56 }
 0x1a5   : > { %v11017_v17 = vsel %vm3604_vm7, 1.0, %v12879_v50  ;;  %3889 = vperm.xlu0 %10225, %v3868_v2   ;;  %v3873_v2 = vld [vmem:[%s10663_s0 + $0x168] sm:$0xff]  ;;  %v3591_v31 = vpop.permute.xlu1 %3590 }
 0x1a6   : > { %vm3611_vm12 = vcmp.eq.s32.totalorder %v3591_v31, %v10847_v46 }
 0x1a7   : > { %v3576_v54 = vpop.permute.xlu0 %3575 }
 0x1a8   : > { %vm3606_vm9 = vcmp.eq.s32.totalorder %v3576_v54, %v10847_v46  ;;  %3892 = vperm.xlu1 %10226, %v3869_v42   ;;  %v3874_v42 = vld [vmem:[%s10663_s0 + $0x170] sm:$0xff] }
 0x1a9   : > { %v11029_v39 = vsel %vm3606_vm9, 1.0, %v12879_v50  ;;  %3895 = vperm.xlu0 %10225, %v3870_v21   ;;  %v3597_v3 = vpop.permute.xlu1 %3596 }
 0x1aa   : > { %13042 = vst [vmem:[#allocation20_spill] sm:$0xff] %v11029_v39  ;;  %vm3613_vm14 = vcmp.eq.s32.totalorder %v3597_v3, %v10847_v46 }
 0x1ab   : > { %v3582_v43 = vpop.permute.xlu0 %3581 }
 0x1ac   : > { %vm3608_vm11 = vcmp.eq.s32.totalorder %v3582_v43, %v10847_v46  ;;  %3898 = vperm.xlu1 %10226, %v3871_v6   ;;  %v11050_v43 = vsel %vm3611_vm12, 1.0, %v12879_v50  ;;  %v3875_v6 = vld [vmem:[%s10663_s0 + $0x178] sm:$0xff]  ;;  %s12273_s0 = scalar_lea.vmem %s13279_s2, %s13350_s6  ;;  %s13344_s2 = sshll.u32 %s13346_s5, 3 }
 0x1ad   : > { %v11041_v54 = vsel %vm3608_vm11, 1.0, %v12879_v50  ;;  %13045 = vst [vmem:[#allocation23_spill] sm:$0xff] %v11050_v43  ;;  %3901 = vperm.xlu0 %10225, %v3872_v47   ;;  %s12797_s1 = scalar_lea.vmem %s12861_s27, %s13344_s2 }
 0x1ae   : > { %13044 = vst [vmem:[#allocation22_spill] sm:$0xff] %v11041_v54 }
 0x1af   : > { %v3588_v15 = vpop.permute.xlu0 %3587 }
 0x1b0   : > { %vm3610_vm13 = vcmp.eq.s32.totalorder %v3588_v15, %v10847_v46  ;;  %3904 = vperm.xlu1 %10226, %v3873_v2   ;;  %v11062_v15 = vsel %vm3613_vm14, 1.0, %v12879_v50  ;;  %v3603_v2 = vpop.permute.xlu1 %3602 }
 0x1b1   : > { %v11053_v1 = vsel %vm3610_vm13, 1.0, %v12879_v50  ;;  %13047 = vst [vmem:[#allocation25_spill] sm:$0xff] %v11062_v15  ;;  %3907 = vperm.xlu0 %10225, %v3874_v42   ;;  %vm3615_vm1 = vcmp.eq.s32.totalorder %v3603_v2, %v10847_v46 }
 0x1b2   : > { %13046 = vst [vmem:[#allocation24_spill] sm:$0xff] %v11053_v1  ;;  %v11072_v3 = vsel %vm3615_vm1, 1.0, %v12879_v50 }
 0x1b3   : > { %v3594_v53 = vpop.permute.xlu0 %3593  ;;  %13049 = vst [vmem:[#allocation27_spill] sm:$0xff] %v11072_v3 }
 0x1b4   : > { %vm3612_vm15 = vcmp.eq.s32.totalorder %v3594_v53, %v10847_v46  ;;  %3910 = vperm.xlu1 %10226, %v3875_v6   ;;  %v3483_v14 = vpop.permute.xlu1 %3482 }
 0x1b5   : > { %v11065_v31 = vsel %vm3612_vm15, 1.0, %v12879_v50  ;;  %vm3515_vm6 = vcmp.eq.s32.totalorder %v3483_v14, %v10847_v46 }
 0x1b6   : > { %13048 = vst [vmem:[#allocation26_spill] sm:$0xff] %v11065_v31  ;;  %v11082_v47 = vsel %vm3515_vm6, 1.0, %v12879_v50 }
 0x1b7   : > { %v3600_v21 = vpop.permute.xlu0 %3599  ;;  %13051 = vst [vmem:[#allocation29_spill] sm:$0xff] %v11082_v47 }
 0x1b8   : > { %vm3614_vm3 = vcmp.eq.s32.totalorder %v3600_v21, %v10847_v46  ;;  %v3489_v27 = vpop.permute.xlu1 %3488 }
 0x1b9   : > { %v11075_v53 = vsel %vm3614_vm3, 1.0, %v12879_v50  ;;  %vm3517_vm8 = vcmp.eq.s32.totalorder %v3489_v27, %v10847_v46 }
 0x1ba   : > { %13050 = vst [vmem:[#allocation28_spill] sm:$0xff] %v11075_v53  ;;  %v11092_v6 = vsel %vm3517_vm8, 1.0, %v12879_v50  ;;  %vm2857_vm8 = vcmask 523264  }
 0x1bb   : > { %v3480_v42 = vpop.permute.xlu0 %3479  ;;  %13053 = vst [vmem:[#allocation31_spill] sm:$0xff] %v11092_v6 }
 0x1bc   : > { %vm3514_vm7 = vcmp.eq.s32.totalorder %v3480_v42, %v10847_v46  ;;  %v3495_v60 = vpop.permute.xlu1 %3494 }
 0x1bd   : > { %v11085_v21 = vsel %vm3514_vm7, 1.0, %v12879_v50  ;;  %vm3519_vm10 = vcmp.eq.s32.totalorder %v3495_v60, %v10847_v46 }
 0x1be   : > { %13052 = vst [vmem:[#allocation30_spill] sm:$0xff] %v11085_v21  ;;  %v11102_v2 = vsel %vm3519_vm10, 1.0, %v12879_v50 }
 0x1bf   : > { %v3486_v7 = vpop.permute.xlu0 %3485  ;;  %13055 = vst [vmem:[#allocation33_spill] sm:$0xff] %v11102_v2 }
 0x1c0   : > { %vm3516_vm9 = vcmp.eq.s32.totalorder %v3486_v7, %v10847_v46  ;;  %v3501_v32 = vpop.permute.xlu1 %3500 }
 0x1c1   : > { %v11095_v14 = vsel %vm3516_vm9, 1.0, %v12879_v50  ;;  %vm3521_vm12 = vcmp.eq.s32.totalorder %v3501_v32, %v10847_v46 }
 0x1c2   : > { %13054 = vst [vmem:[#allocation32_spill] sm:$0xff] %v11095_v14  ;;  %v11112_v42 = vsel %vm3521_vm12, 1.0, %v12879_v50 }
 0x1c3   : > { %v3492_v63 = vpop.permute.xlu0 %3491  ;;  %13057 = vst [vmem:[#allocation35_spill] sm:$0xff] %v11112_v42 }
 0x1c4   : > { %vm3518_vm11 = vcmp.eq.s32.totalorder %v3492_v63, %v10847_v46  ;;  %v11119_v22 = vpop.permute.xlu1 %3174 }
 0x1c5   : > { %v11105_v7 = vsel %vm3518_vm11, 1.0, %v12879_v50  ;;  %vm3207_vm6 = vcmp.eq.s32.totalorder %v11119_v22, %v10847_v46 }
 0x1c6   : > { %13056 = vst [vmem:[#allocation34_spill] sm:$0xff] %v11105_v7 }
 0x1c7   : > { %v3498_v25 = vpop.permute.xlu0 %3497 }
 0x1c8   : > { %vm3520_vm13 = vcmp.eq.s32.totalorder %v3498_v25, %v10847_v46 }
 0x1c9   : > { %v11115_v60 = vsel %vm3520_vm13, 1.0, %v12879_v50 }
 0x1ca   : > { %13058 = vst [vmem:[#allocation36_spill] sm:$0xff] %v11115_v60 }
 0x1cb   : > { %v11121_v11 = vpop.permute.xlu0 %3171 }
 0x1cc   : > { %v3507_v27 = vpop.permute.xlu1 %3506  ;;  %vm3206_vm7 = vcmp.eq.s32.totalorder %v11121_v11, %v10847_v46 }
 0x1cd   : > { %vm3523_vm14 = vcmp.eq.s32.totalorder %v3507_v27, %v10847_v46 }
 0x1ce   : > { %v11130_v32 = vsel %vm3523_vm14, 1.0, %v12879_v50 }
 0x1cf   : > { %v3504_v10 = vpop.permute.xlu0 %3503  ;;  %13061 = vst [vmem:[#allocation39_spill] sm:$0xff] %v11130_v32 }
 0x1d0   : > { %vm3522_vm15 = vcmp.eq.s32.totalorder %v3504_v10, %v10847_v46  ;;  %v11149_v36 = vpop.permute.xlu1 %3180 }
 0x1d1   : > { %v11133_v61 = vsel %vm3522_vm15, 1.0, %v12879_v50  ;;  %vm3209_vm9 = vcmp.eq.s32.totalorder %v11149_v36, %v10847_v46 }
 0x1d2   : > { %13062 = vst [vmem:[#allocation40_spill] sm:$0xff] %v11133_v61 }
 0x1d3   : > { %v11151_v33 = vpop.permute.xlu0 %3177 }
 0x1d4   : > { %v3513_v50 = vpop.permute.xlu1 %3512  ;;  %vm3208_vm10 = vcmp.eq.s32.totalorder %v11151_v33, %v10847_v46 }
 0x1d5   : > { %vm3525_vm1 = vcmp.eq.s32.totalorder %v3513_v50, %v10847_v46 }
 0x1d6   : > { %v11123_v62 = vpop.f32.mrb[32].mxu1  ;;  %v11169_v8 = vsel %vm3525_vm1, 1.0, %v13070_v12 }
 0x1d7   : > { %13059 = vst [vmem:[#allocation37_spill] sm:$0xff] %v11123_v62  ;;  %v11127_v25 = vpop.f32.mrb[33].mxu1  ;;  %v3510_v18 = vpop.permute.xlu0 %3509  ;;  %13071 = vst [vmem:[#allocation48_spill] sm:$0xff] %v11169_v8 }
 0x1d8   : > { %13060 = vst [vmem:[#allocation38_spill] sm:$0xff] %v11127_v25  ;;  %v11135_v63 = vpop.f32.mrb[34].mxu1  ;;  %vm3524_vm3 = vcmp.eq.s32.totalorder %v3510_v18, %v10847_v46 }
 0x1d9   : > { %13063 = vst [vmem:[#allocation41_spill] sm:$0xff] %v11135_v63  ;;  %v11141_v45 = vpack.c.bf16 %v11135_v63, %v11123_v62  ;;  %v11143_v27 = vpop.f32.mrb[35].mxu1 }
 0x1da   : > { %13065 = vst [vmem:[#allocation43_spill] sm:$0xff] %v11143_v27  ;;  %v11147_v10 = vpack.c.bf16 %v11143_v27, %v11127_v25  ;;  %v11179_v25 = vsel %vm3524_vm3, 1.0, %v13070_v12 }
 0x1db   : > { %13064 = vst [vmem:[#allocation42_spill] sm:$0xff] %v11141_v45  ;;  %13074 = vst [vmem:[#allocation51_spill] sm:$0xff] %v11179_v25 }
 0x1dc   : > { %13066 = vst [vmem:[#allocation44_spill] sm:$0xff] %v11147_v10  ;;  %9369 = vmatprep.mubr.msk.bf16.mxu0 %vm1293_vm5, %v11147_v10  ;;  %9407 = vmatprep.mubr.msk.bf16.mxu1 %vm1293_vm5, %v11147_v10 }
 0x1dd   : > { %9370 = vmatmul.mubr.msk.bf16.vlgmr.msra.gmra.mrb[48].mxu0 %vm1293_vm5, %v11141_v45  ;;  %9408 = vmatmul.mubr.msk.bf16.vlgmr.msra.gmra.mrb[112].mxu1 %vm1293_vm5, %v11141_v45 }
 0x1de   : > { %v11161_v48 = vpop.f32.mrb[36].mxu1 }
 0x1df   : > { %13067 = vst [vmem:[#allocation45_spill] sm:$0xff] %v11161_v48  ;;  %v11163_v19 = vpop.f32.mrb[37].mxu1 }
 0x1e0   : > { %13068 = vst [vmem:[#allocation46_spill] sm:$0xff] %v11163_v19  ;;  %v11166_v13 = vpop.f32.mrb[38].mxu1 }
 0x1e1   : > { %13069 = vst [vmem:[#allocation47_spill] sm:$0xff] %v11166_v13  ;;  %v11174_v27 = vpack.c.bf16 %v11166_v13, %v11161_v48  ;;  %v11176_v63 = vpop.f32.mrb[39].mxu1 }
 0x1e2   : > { %13073 = vst [vmem:[#allocation50_spill] sm:$0xff] %v11176_v63  ;;  %v11183_v50 = vpack.c.bf16 %v11176_v63, %v11163_v19 }
 0x1e3   : > { %13072 = vst [vmem:[#allocation49_spill] sm:$0xff] %v11174_v27 }
 0x1e4   : > { %13075 = vst [vmem:[#allocation52_spill] sm:$0xff] %v11183_v50  ;;  %9373 = vmatprep.mubr.msk.bf16.mxu0 %vm1293_vm5, %v11183_v50  ;;  %9411 = vmatprep.mubr.msk.bf16.mxu1 %vm1293_vm5, %v11183_v50 }
 0x1e5   : > { %9374 = vmatmul.mubr.msk.bf16.gmra.mrb[52].mxu0 %vm1293_vm5, %v11174_v27  ;;  %9412 = vmatmul.mubr.msk.bf16.gmra.mrb[116].mxu1 %vm1293_vm5, %v11174_v27 }
 0x1e6   : > { %v11195_v18 = vpop.f32.mrb[40].mxu1 }
 0x1e7   : > { %13076 = vst [vmem:[#allocation53_spill] sm:$0xff] %v11195_v18  ;;  %v11197_v13 = vpop.f32.mrb[41].mxu1 }
 0x1e8   : > { %13077 = vst [vmem:[#allocation54_spill] sm:$0xff] %v11197_v13  ;;  %v11199_v63 = vpop.f32.mrb[42].mxu1 }
 0x1e9   : > { %13078 = vst [vmem:[#allocation55_spill] sm:$0xff] %v11199_v63  ;;  %v11203_v62 = vpack.c.bf16 %v11199_v63, %v11195_v18  ;;  %v11205_v19 = vpop.f32.mrb[43].mxu1 }
 0x1ea   : > { %13080 = vst [vmem:[#allocation57_spill] sm:$0xff] %v11205_v19  ;;  %v11209_v48 = vpack.c.bf16 %v11205_v19, %v11197_v13 }
 0x1eb   : > { %13079 = vst [vmem:[#allocation56_spill] sm:$0xff] %v11203_v62 }
 0x1ec   : > { %13081 = vst [vmem:[#allocation58_spill] sm:$0xff] %v11209_v48  ;;  %9415 = vmatprep.mubr.msk.bf16.mxu1 %vm1293_vm5, %v11209_v48  ;;  %9377 = vmatprep.mubr.msk.bf16.mxu0 %vm1293_vm5, %v11209_v48 }
 0x1ed   : > { %9416 = vmatmul.mubr.msk.bf16.gmra.mrb[120].mxu1 %vm1293_vm5, %v11203_v62  ;;  %9378 = vmatmul.mubr.msk.bf16.gmra.mrb[56].mxu0 %vm1293_vm5, %v11203_v62 }
 0x1ee   : > { %v11219_v63 = vpop.f32.mrb[44].mxu1 }
 0x1ef   : > { %13082 = vst [vmem:[#allocation59_spill] sm:$0xff] %v11219_v63  ;;  %v11221_v18 = vpop.f32.mrb[45].mxu1 }
 0x1f0   : > { %13083 = vst [vmem:[#allocation60_spill] sm:$0xff] %v11221_v18  ;;  %v11223_v27 = vpop.f32.mrb[46].mxu1 }
 0x1f1   : > { %13084 = vst [vmem:[#allocation61_spill] sm:$0xff] %v11223_v27  ;;  %v11227_v19 = vpack.c.bf16 %v11223_v27, %v11219_v63  ;;  %v11229_v13 = vpop.f32.mrb[47].mxu1 }
 0x1f2   : > { %13086 = vst [vmem:[#allocation63_spill] sm:$0xff] %v11229_v13  ;;  %v11233_v48 = vpack.c.bf16 %v11229_v13, %v11221_v18 }
 0x1f3   : > { %13085 = vst [vmem:[#allocation62_spill] sm:$0xff] %v11227_v19 }
 0x1f4   : > { %13087 = vst [vmem:[#allocation64_spill] sm:$0xff] %v11233_v48  ;;  %9419 = vmatprep.mubr.msk.bf16.mxu1 %vm1293_vm5, %v11233_v48  ;;  %9381 = vmatprep.mubr.msk.bf16.mxu0 %vm1293_vm5, %v11233_v48 }
 0x1f5   : > { %9420 = vmatmul.mubr.msk.bf16.gmra.mrb[124].mxu1 %vm1293_vm5, %v11227_v19  ;;  %9382 = vmatmul.mubr.msk.bf16.gmra.mrb[60].mxu0 %vm1293_vm5, %v11227_v19 }
 0x1f6   : > { %v11243_v27 = vpop.f32.mrb[48].mxu1 }
 0x1f7   : > { %13088 = vst [vmem:[#allocation65_spill] sm:$0xff] %v11243_v27  ;;  %v11245_v63 = vpop.f32.mrb[49].mxu1 }
 0x1f8   : > { %13089 = vst [vmem:[#allocation66_spill] sm:$0xff] %v11245_v63  ;;  %v11247_v62 = vpop.f32.mrb[50].mxu1 }
 0x1f9   : > { %13090 = vst [vmem:[#allocation67_spill] sm:$0xff] %v11247_v62  ;;  %v11251_v13 = vpack.c.bf16 %v11247_v62, %v11243_v27  ;;  %v11253_v18 = vpop.f32.mrb[51].mxu1 }
 0x1fa   : > { %13092 = vst [vmem:[#allocation69_spill] sm:$0xff] %v11253_v18  ;;  %v11257_v48 = vpack.c.bf16 %v11253_v18, %v11245_v63 }
 0x1fb   : > { %13091 = vst [vmem:[#allocation68_spill] sm:$0xff] %v11251_v13 }
 0x1fc   : > { %13093 = vst [vmem:[#allocation70_spill] sm:$0xff] %v11257_v48  ;;  %9385 = vmatprep.mubr.msk.bf16.mxu0 %vm1293_vm5, %v11257_v48  ;;  %9423 = vmatprep.mubr.msk.bf16.mxu1 %vm1293_vm5, %v11257_v48 }
 0x1fd   : > { %9386 = vmatmul.mubr.msk.bf16.gmra.mrb[64].mxu0 %vm1293_vm5, %v11251_v13  ;;  %9424 = vmatmul.mubr.msk.bf16.gmra.mrb[128].mxu1 %vm1293_vm5, %v11251_v13 }
 0x1fe   : > { %v11267_v62 = vpop.f32.mrb[52].mxu1 }
 0x1ff   : > { %13094 = vst [vmem:[#allocation71_spill] sm:$0xff] %v11267_v62  ;;  %v11269_v27 = vpop.f32.mrb[53].mxu1 }
 0x200   : > { %13095 = vst [vmem:[#allocation72_spill] sm:$0xff] %v11269_v27  ;;  %v11271_v19 = vpop.f32.mrb[54].mxu1 }
 0x201   : > { %13096 = vst [vmem:[#allocation73_spill] sm:$0xff] %v11271_v19  ;;  %v11275_v18 = vpack.c.bf16 %v11271_v19, %v11267_v62  ;;  %v11277_v63 = vpop.f32.mrb[55].mxu1 }
 0x202   : > { %13098 = vst [vmem:[#allocation75_spill] sm:$0xff] %v11277_v63  ;;  %v11281_v48 = vpack.c.bf16 %v11277_v63, %v11269_v27 }
 0x203   : > { %13097 = vst [vmem:[#allocation74_spill] sm:$0xff] %v11275_v18 }
 0x204   : > { %13099 = vst [vmem:[#allocation76_spill] sm:$0xff] %v11281_v48  ;;  %9389 = vmatprep.mubr.msk.bf16.mxu0 %vm1293_vm5, %v11281_v48  ;;  %9427 = vmatprep.mubr.msk.bf16.mxu1 %vm1293_vm5, %v11281_v48 }
 0x205   : > { %9390 = vmatmul.mubr.msk.bf16.gmra.mrb[68].mxu0 %vm1293_vm5, %v11275_v18  ;;  %9428 = vmatmul.mubr.msk.bf16.gmra.mrb[132].mxu1 %vm1293_vm5, %v11275_v18 }
 0x206   : > { %v11291_v19 = vpop.f32.mrb[56].mxu1 }
 0x207   : > { %13100 = vst [vmem:[#allocation77_spill] sm:$0xff] %v11291_v19  ;;  %v11293_v62 = vpop.f32.mrb[57].mxu1 }
 0x208   : > { %13101 = vst [vmem:[#allocation78_spill] sm:$0xff] %v11293_v62  ;;  %v11295_v13 = vpop.f32.mrb[58].mxu1 }
 0x209   : > { %13102 = vst [vmem:[#allocation79_spill] sm:$0xff] %v11295_v13  ;;  %v11299_v63 = vpack.c.bf16 %v11295_v13, %v11291_v19  ;;  %v11301_v27 = vpop.f32.mrb[59].mxu1 }
 0x20a   : > { %13104 = vst [vmem:[#allocation81_spill] sm:$0xff] %v11301_v27  ;;  %v11305_v48 = vpack.c.bf16 %v11301_v27, %v11293_v62 }
 0x20b   : > { %13103 = vst [vmem:[#allocation80_spill] sm:$0xff] %v11299_v63 }
 0x20c   : > { %13105 = vst [vmem:[#allocation82_spill] sm:$0xff] %v11305_v48  ;;  %9431 = vmatprep.mubr.msk.bf16.mxu1 %vm1293_vm5, %v11305_v48  ;;  %9393 = vmatprep.mubr.msk.bf16.mxu0 %vm1293_vm5, %v11305_v48 }
 0x20d   : > { %9432 = vmatmul.mubr.msk.bf16.gmra.mrb[136].mxu1 %vm1293_vm5, %v11299_v63  ;;  %9394 = vmatmul.mubr.msk.bf16.gmra.mrb[72].mxu0 %vm1293_vm5, %v11299_v63 }
 0x20e   : > { %v11315_v13 = vpop.f32.mrb[60].mxu1 }
 0x20f   : > { %13106 = vst [vmem:[#allocation83_spill] sm:$0xff] %v11315_v13  ;;  %v11317_v19 = vpop.f32.mrb[61].mxu1 }
 0x210   : > { %13107 = vst [vmem:[#allocation84_spill] sm:$0xff] %v11317_v19  ;;  %v11319_v18 = vpop.f32.mrb[62].mxu1 }
 0x211   : > { %13108 = vst [vmem:[#allocation85_spill] sm:$0xff] %v11319_v18  ;;  %v11323_v27 = vpack.c.bf16 %v11319_v18, %v11315_v13  ;;  %v11325_v62 = vpop.f32.mrb[63].mxu1 }
 0x212   : > { %13110 = vst [vmem:[#allocation87_spill] sm:$0xff] %v11325_v62  ;;  %v11329_v48 = vpack.c.bf16 %v11325_v62, %v11317_v19 }
 0x213   : > { %13109 = vst [vmem:[#allocation86_spill] sm:$0xff] %v11323_v27 }
 0x214   : > { %13111 = vst [vmem:[#allocation88_spill] sm:$0xff] %v11329_v48  ;;  %9435 = vmatprep.mubr.msk.bf16.mxu1 %vm1293_vm5, %v11329_v48  ;;  %9397 = vmatprep.mubr.msk.bf16.mxu0 %vm1293_vm5, %v11329_v48 }
 0x215   : > { %9436 = vmatmul.mubr.msk.bf16.gmra.mrb[140].mxu1 %vm1293_vm5, %v11323_v27  ;;  %9398 = vmatmul.mubr.msk.bf16.gmra.mrb[76].mxu0 %vm1293_vm5, %v11323_v27 }
 0x216   : > { %v11339_v18 = vpop.f32.mrb[64].mxu1 }
 0x217   : > { %13112 = vst [vmem:[#allocation89_spill] sm:$0xff] %v11339_v18  ;;  %v11341_v13 = vpop.f32.mrb[65].mxu1 }
 0x218   : > { %13113 = vst [vmem:[#allocation90_spill] sm:$0xff] %v11341_v13  ;;  %v11343_v63 = vpop.f32.mrb[66].mxu1 }
 0x219   : > { %13114 = vst [vmem:[#allocation91_spill] sm:$0xff] %v11343_v63  ;;  %v11347_v19 = vpop.f32.mrb[67].mxu1 }
 0x21a   : > { %13115 = vst [vmem:[#allocation92_spill] sm:$0xff] %v11347_v19 }
 0x21e   : > { %v11351_v50 = vpop.f32.mrb[68].mxu1 }
 0x21f   : > { %13116 = vst [vmem:[#allocation93_spill] sm:$0xff] %v11351_v50  ;;  %v11353_v45 = vpop.f32.mrb[69].mxu1 }
 0x220   : > { %13117 = vst [vmem:[#allocation94_spill] sm:$0xff] %v11353_v45  ;;  %v11355_v10 = vpop.f32.mrb[70].mxu1 }
 0x221   : > { %13118 = vst [vmem:[#allocation95_spill] sm:$0xff] %v11355_v10  ;;  %v11359_v25 = vpop.f32.mrb[71].mxu1 }
 0x222   : > { %13119 = vst [vmem:[#allocation96_spill] sm:$0xff] %v11359_v25 }
 0x226   : > { %v11363_v62 = vpop.f32.mrb[72].mxu1 }
 0x227   : > { %13120 = vst [vmem:[#allocation97_spill] sm:$0xff] %v11363_v62  ;;  %v11365_v18 = vpop.f32.mrb[73].mxu1 }
 0x228   : > { %13121 = vst [vmem:[#allocation98_spill] sm:$0xff] %v11365_v18  ;;  %v11367_v63 = vpop.f32.mrb[74].mxu1  ;;  %v8342_v18 = vsel %vm3206_vm7, 1.0, %v13070_v12 }
 0x229   : > { %13122 = vst [vmem:[#allocation99_spill] sm:$0xff] %v11367_v63  ;;  %v11371_v13 = vpop.f32.mrb[75].mxu1  ;;  %v8343_v63 = vsel %vm3207_vm6, 1.0, %v13070_v12 }
 0x22a   : > { %13123 = vst [vmem:[#allocation100_spill] sm:$0xff] %v11371_v13  ;;  %v3242_v13 = vpack.c.bf16 %v8343_v63, %v8342_v18 }
 0x22c   : > { %9487 = vmatprep.mubr.msk.bf16.mxu1 %vm2857_vm8, %v3242_v13 }
 0x22e   : > { %v11375_v27 = vpop.f32.mrb[76].mxu1 }
 0x22f   : > { %13124 = vst [vmem:[#allocation101_spill] sm:$0xff] %v11375_v27  ;;  %v11377_v50 = vpop.f32.mrb[77].mxu1  ;;  %v13132_v27 = vpack.c.bf16 %v10867_v59, %v10857_v28 }
 0x230   : > { %13125 = vst [vmem:[#allocation102_spill] sm:$0xff] %v11377_v50  ;;  %v11383_v8 = vpop.f32.mrb[78].mxu1 }
 0x231   : > { %13126 = vst [vmem:[#allocation103_spill] sm:$0xff] %v11383_v8  ;;  %v11387_v62 = vpop.f32.mrb[79].mxu1  ;;  %9447 = vmatprep.mubr.msk.bf16.mxu0 %vm2857_vm8, %v13132_v27 }
 0x232   : > { %13127 = vst [vmem:[#allocation104_spill] sm:$0xff] %v11387_v62 }
 0x236   : > { %v11393_v10 = vpop.f32.mrb[80].mxu1 }
 0x237   : > { %13128 = vst [vmem:[#allocation105_spill] sm:$0xff] %v11393_v10  ;;  %v11395_v22 = vpop.f32.mrb[81].mxu1 }
 0x238   : > { %13129 = vst [vmem:[#allocation106_spill] sm:$0xff] %v11395_v22  ;;  %v11397_v11 = vpop.f32.mrb[82].mxu1 }
 0x239   : > { %13130 = vst [vmem:[#allocation107_spill] sm:$0xff] %v11397_v11  ;;  %v11401_v48 = vpop.f32.mrb[83].mxu1 }
 0x23a   : > { %13131 = vst [vmem:[#allocation108_spill] sm:$0xff] %v11401_v48 }
 0x23e   : > { %v11410_v63 = vpop.f32.mrb[84].mxu1 }
 0x23f   : > { %13133 = vst [vmem:[#allocation109_spill] sm:$0xff] %v11410_v63  ;;  %v11412_v18 = vpop.f32.mrb[85].mxu1 }
 0x240   : > { %13134 = vst [vmem:[#allocation110_spill] sm:$0xff] %v11412_v18  ;;  %v11414_v8 = vpop.f32.mrb[86].mxu1 }
 0x241   : > { %13135 = vst [vmem:[#allocation111_spill] sm:$0xff] %v11414_v8  ;;  %v11418_v10 = vpop.f32.mrb[87].mxu1 }
 0x242   : > { %13136 = vst [vmem:[#allocation112_spill] sm:$0xff] %v11418_v10 }
 0x246   : > { %v11422_v11 = vpop.f32.mrb[88].mxu1 }
 0x247   : > { %13137 = vst [vmem:[#allocation113_spill] sm:$0xff] %v11422_v11  ;;  %v11424_v28 = vpop.f32.mrb[89].mxu1 }
 0x248   : > { %13138 = vst [vmem:[#allocation114_spill] sm:$0xff] %v11424_v28  ;;  %v11426_v59 = vpop.f32.mrb[90].mxu1 }
 0x249   : > { %13139 = vst [vmem:[#allocation115_spill] sm:$0xff] %v11426_v59  ;;  %v11430_v27 = vpop.f32.mrb[91].mxu1 }
 0x24a   : > { %13140 = vst [vmem:[#allocation116_spill] sm:$0xff] %v11430_v27  ;;  %v11494_v27 = vpop.permute.xlu1 %3186 }
 0x24b   : > { %vm3211_vm11 = vcmp.eq.s32.totalorder %v11494_v27, %v10847_v46 }
 0x24e   : > { %v11434_v45 = vpop.f32.mrb[92].mxu1 }
 0x24f   : > { %13141 = vst [vmem:[#allocation117_spill] sm:$0xff] %v11434_v45  ;;  %v11436_v63 = vpop.f32.mrb[93].mxu1 }
 0x250   : > { %13142 = vst [vmem:[#allocation118_spill] sm:$0xff] %v11436_v63  ;;  %v11438_v8 = vpop.f32.mrb[94].mxu1 }
 0x251   : > { %13143 = vst [vmem:[#allocation119_spill] sm:$0xff] %v11438_v8  ;;  %v11442_v18 = vpop.f32.mrb[95].mxu1 }
 0x252   : > { %13144 = vst [vmem:[#allocation120_spill] sm:$0xff] %v11442_v18 }
 0x256   : > { %v11446_v13 = vpop.f32.mrb[96].mxu1 }
 0x257   : > { %13145 = vst [vmem:[#allocation121_spill] sm:$0xff] %v11446_v13  ;;  %v11448_v11 = vpop.f32.mrb[97].mxu1 }
 0x258   : > { %13146 = vst [vmem:[#allocation122_spill] sm:$0xff] %v11448_v11  ;;  %v11450_v59 = vpop.f32.mrb[98].mxu1 }
 0x259   : > { %13147 = vst [vmem:[#allocation123_spill] sm:$0xff] %v11450_v59  ;;  %v11454_v28 = vpop.f32.mrb[99].mxu1 }
 0x25a   : > { %13148 = vst [vmem:[#allocation124_spill] sm:$0xff] %v11454_v28 }
 0x25e   : > { %v11458_v19 = vpop.f32.mrb[100].mxu1 }
 0x25f   : > { %13149 = vst [vmem:[#allocation125_spill] sm:$0xff] %v11458_v19  ;;  %v11460_v45 = vpop.f32.mrb[101].mxu1 }
 0x260   : > { %13150 = vst [vmem:[#allocation126_spill] sm:$0xff] %v11460_v45  ;;  %v11462_v8 = vpop.f32.mrb[102].mxu1 }
 0x261   : > { %13151 = vst [vmem:[#allocation127_spill] sm:$0xff] %v11462_v8  ;;  %v11466_v63 = vpop.f32.mrb[103].mxu1 }
 0x262   : > { %13152 = vst [vmem:[#allocation128_spill] sm:$0xff] %v11466_v63 }
 0x266   : > { %v11470_v22 = vpop.f32.mrb[104].mxu1 }
 0x267   : > { %13153 = vst [vmem:[#allocation129_spill] sm:$0xff] %v11470_v22  ;;  %v11472_v13 = vpop.f32.mrb[105].mxu1  ;;  %v11496_v22 = vpop.permute.xlu0 %3183 }
 0x268   : > { %13154 = vst [vmem:[#allocation130_spill] sm:$0xff] %v11472_v13  ;;  %v11474_v59 = vpop.f32.mrb[106].mxu1  ;;  %vm3210_vm12 = vcmp.eq.s32.totalorder %v11496_v22, %v10847_v46 }
 0x269   : > { %13155 = vst [vmem:[#allocation131_spill] sm:$0xff] %v11474_v59  ;;  %v11478_v11 = vpop.f32.mrb[107].mxu1  ;;  %v11498_v59 = vpop.permute.xlu1 %3192  ;;  %v8346_v27 = vsel %vm3210_vm12, 1.0, %v13070_v12 }
 0x26a   : > { %13156 = vst [vmem:[#allocation132_spill] sm:$0xff] %v11478_v11  ;;  %vm3213_vm13 = vcmp.eq.s32.totalorder %v11498_v59, %v10847_v46 }
 0x26b   : > { %v11500_v28 = vpop.permute.xlu0 %3189 }
 0x26c   : > { %vm3212_vm14 = vcmp.eq.s32.totalorder %v11500_v28, %v10847_v46 }
 0x26d   : > { %v11502_v13 = vpop.permute.xlu1 %3198 }
 0x26e   : > { %v11482_v10 = vpop.f32.mrb[108].mxu1  ;;  %vm3215_vm15 = vcmp.eq.s32.totalorder %v11502_v13, %v10847_v46 }
 0x26f   : > { %13157 = vst [vmem:[#allocation133_spill] sm:$0xff] %v11482_v10  ;;  %v11484_v19 = vpop.f32.mrb[109].mxu1  ;;  %v11504_v11 = vpop.permute.xlu0 %3195  ;;  %v8351_v13 = vsel %vm3215_vm15, 1.0, %v13070_v12 }
 0x270   : > { %13158 = vst [vmem:[#allocation134_spill] sm:$0xff] %v11484_v19  ;;  %v11486_v8 = vpop.f32.mrb[110].mxu1  ;;  %vm3214_vm1 = vcmp.eq.s32.totalorder %v11504_v11, %v10847_v46 }
 0x271   : > { %13159 = vst [vmem:[#allocation135_spill] sm:$0xff] %v11486_v8  ;;  %v11490_v45 = vpop.f32.mrb[111].mxu1  ;;  %v11506_v48 = vpop.permute.xlu1 %3204  ;;  %v8350_v11 = vsel %vm3214_vm1, 1.0, %v13070_v12 }
 0x272   : > { %13160 = vst [vmem:[#allocation136_spill] sm:$0xff] %v11490_v45  ;;  %vm3217_vm3 = vcmp.eq.s32.totalorder %v11506_v48, %v10847_v46 }
 0x273   : > { %v11508_v18 = vpop.permute.xlu0 %3201 }
 0x274   : > { %vm3216_vm6 = vcmp.eq.s32.totalorder %v11508_v18, %v10847_v46 }
 0x275   : > { %v11510_v10 = vpop.permute.xlu1 %3084 }
 0x276   : > { %vm3117_vm7 = vcmp.eq.s32.totalorder %v11510_v10, %v10847_v46 }
 0x277   : > { %v11512_v8 = vpop.permute.xlu0 %3081 }
 0x279   : > { %v11514_v14 = vpop.permute.xlu1 %3090 }
 0x27b   : > { %v11516_v6 = vpop.permute.xlu0 %3087 }
 0x2b0   : > { %v9371_v63 = vpop.f32.mrb[48].mxu0  ;;  %v9409_v19 = vpop.f32.mrb[112].mxu1 }
 0x2b1   : > { %v2358_v45 = vpop.f32.mrb[49].mxu0  ;;  %v2542_v50 = vpop.f32.mrb[113].mxu1 }
 0x2b2   : > { %v9372_v62 = vpop.f32.mrb[50].mxu0  ;;  %v9410_v25 = vpop.f32.mrb[114].mxu1 }
 0x2b3   : > { %v2854_v61 = vpack.c.bf16 %v9410_v25, %v9409_v19  ;;  %v2361_v32 = vpop.f32.mrb[51].mxu0  ;;  %v2545_v60 = vpop.f32.mrb[115].mxu1  ;;  %v2850_v42 = vpack.c.bf16 %v9372_v62, %v9371_v63 }
 0x2b4   : > { %v2853_v7 = vpack.c.bf16 %v2545_v60, %v2542_v50  ;;  %v2849_v2 = vpack.c.bf16 %v2361_v32, %v2358_v45  ;;  %v11520_v32 = vpop.permute.xlu1 %3096  ;;  %v11522_v50 = vpop.permute.xlu0 %3093 }
 0x2b5   : > { %vm3121_vm12 = vcmp.eq.s32.totalorder %v11520_v32, %v10847_v46 }
 0x2b6   : > { %9439 = vmatprep.subr.bf16.mxu0 %v2853_v7 }
 0x2b7   : > { %9440 = vmatpush3.bf16.msra.mxu0 %v2853_v7 }
 0x2b8   : > { %v9375_v21 = vpop.f32.mrb[52].mxu0  ;;  %v9413_v47 = vpop.f32.mrb[116].mxu1  ;;  %9441 = vmatprep.subr.bf16.mxu0 %v2854_v61 }
 0x2b9   : > { %v2374_v53 = vpop.f32.mrb[53].mxu0  ;;  %v2558_v3 = vpop.f32.mrb[117].mxu1 }
 0x2ba   : > { %v9376_v31 = vpop.f32.mrb[54].mxu0  ;;  %v9414_v15 = vpop.f32.mrb[118].mxu1 }
 0x2bb   : > { %v2856_v1 = vpack.c.bf16 %v9414_v15, %v9413_v47  ;;  %v2377_v19 = vpop.f32.mrb[55].mxu0  ;;  %v2561_v25 = vpop.f32.mrb[119].mxu1  ;;  %9442 = vmatpush3.bf16.msra.mxu0 %v2854_v61  ;;  %v11518_v62 = vpack.c.bf16 %v9376_v31, %v9375_v21  ;;  %v13161_v21 = vpack.c.bf16 %v10864_v58, %v10854_v52 }
 0x2bc   : > { %v2855_v45 = vpack.c.bf16 %v2561_v25, %v2558_v3  ;;  %v2851_v60 = vpack.c.bf16 %v2377_v19, %v2374_v53  ;;  %v11532_v19 = vpop.permute.xlu1 %3102  ;;  %v11534_v25 = vpop.permute.xlu0 %3099 }
 0x2bd   : > { %vm3122_vm15 = vcmp.eq.s32.totalorder %v11534_v25, %v10847_v46 }
 0x2be   : > { %9443 = vmatprep.subr.bf16.mxu0 %v2855_v45 }
 0x2bf   : > { %9444 = vmatpush3.bf16.msra.mxu0 %v2855_v45 }
 0x2c0   : > { %v9417_v7 = vpop.f32.mrb[120].mxu1  ;;  %9445 = vmatprep.subr.bf16.mxu0 %v2856_v1  ;;  %v9379_v63 = vpop.f32.mrb[56].mxu0 }
 0x2c1   : > { %v2574_v43 = vpop.f32.mrb[121].mxu1  ;;  %v2390_v54 = vpop.f32.mrb[57].mxu0 }
 0x2c2   : > { %v9418_v56 = vpop.f32.mrb[122].mxu1  ;;  %v9380_v15 = vpop.f32.mrb[58].mxu0 }
 0x2c3   : > { %v3253_v47 = vpack.c.bf16 %v9418_v56, %v9417_v7  ;;  %v2577_v39 = vpop.f32.mrb[123].mxu1  ;;  %9446 = vmatpush3.bf16.msra.mxu0 %v2856_v1  ;;  %v11524_v61 = vpack.c.bf16 %v9380_v15, %v9379_v63  ;;  %v2393_v31 = vpop.f32.mrb[59].mxu0  ;;  %v13162_v56 = vpack.c.bf16 %v10880_v49, %v10883_v44  ;;  %v13163_v44 = vpack.c.bf16 %v10894_v24, %v10897_v26 }
 0x2c4   : > { %v3252_v3 = vpack.c.bf16 %v2577_v39, %v2574_v43  ;;  %9459 = vmatprep.subr.bf16.mxu0 %v2849_v2  ;;  %v11526_v53 = vpack.c.bf16 %v2393_v31, %v2390_v54 }
 0x2c6   : > { %9448 = vmatmul.mubr.msk.bf16.vlgmr.msra.gmra.mrb[80].mxu0 %vm2857_vm8, %v13161_v21  ;;  %9479 = vmatprep.subr.bf16.mxu1 %v3252_v3  ;;  %v8347_v21 = vsel %vm3211_vm11, 1.0, %v13070_v12  ;;  %vm3118_vm11 = vcmp.eq.s32.totalorder %v11516_v6, %v10847_v46 }
 0x2c7   : > { %9451 = vmatprep.mubr.msk.bf16.mxu0 %vm2857_vm8, %v13162_v56  ;;  %9460 = vmatpush3.bf16.msra.mxu0 %v2849_v2  ;;  %v11552_v2 = vpop.permute.xlu1 %3108  ;;  %v8332_v32 = vsel %vm3118_vm11, 1.0, %v13070_v12 }
 0x2c8   : > { %9480 = vmatpush3.bf16.msra.mxu1 %v3252_v3  ;;  %v9421_v39 = vpop.f32.mrb[124].mxu1  ;;  %9461 = vmatprep.subr.bf16.mxu0 %v2850_v42  ;;  %v9383_v54 = vpop.f32.mrb[60].mxu0  ;;  %v8345_v3 = vsel %vm3209_vm9, 1.0, %v13070_v12  ;;  %vm3116_vm9 = vcmp.eq.s32.totalorder %v11512_v8, %v10847_v46  ;;  %v8353_v8 = vsel %vm3217_vm3, 1.0, %v13070_v12  ;;  %vm3125_vm1 = vcmp.eq.s32.totalorder %v11552_v2, %v10847_v46 }
 0x2c9   : > { %v2590_v43 = vpop.f32.mrb[125].mxu1  ;;  %9481 = vmatprep.subr.bf16.mxu1 %v3253_v47  ;;  %v2406_v52 = vpop.f32.mrb[61].mxu0 }
 0x2ca   : > { %v9422_v58 = vpop.f32.mrb[126].mxu1  ;;  %v9384_v1 = vpop.f32.mrb[62].mxu0 }
 0x2cb   : > { %v3255_v45 = vpack.c.bf16 %v9422_v58, %v9421_v39  ;;  %v2593_v7 = vpop.f32.mrb[127].mxu1  ;;  %9462 = vmatpush3.bf16.msra.mxu0 %v2850_v42  ;;  %v11540_v63 = vpack.c.bf16 %v9384_v1, %v9383_v54  ;;  %v2409_v15 = vpop.f32.mrb[63].mxu0  ;;  %v3244_v1 = vpack.c.bf16 %v8347_v21, %v8346_v27 }
 0x2cc   : > { %v3254_v31 = vpack.c.bf16 %v2593_v7, %v2590_v43  ;;  %9482 = vmatpush3.bf16.msra.mxu1 %v3253_v47  ;;  %9463 = vmatprep.subr.bf16.mxu0 %v2851_v60  ;;  %v11542_v49 = vpack.c.bf16 %v2409_v15, %v2406_v52  ;;  %v11554_v42 = vpop.permute.xlu0 %3105  ;;  %v13164_v47 = vpack.c.bf16 %v10908_v35, %v10911_v16  ;;  %v8344_v35 = vsel %vm3208_vm10, 1.0, %v13070_v12 }
 0x2cd   : > { %v3243_v58 = vpack.c.bf16 %v8345_v3, %v8344_v35  ;;  %v13165_v7 = vpack.c.bf16 %v10922_v40, %v10925_v23  ;;  %v13166_v15 = vpack.c.bf16 %v10936_v55, %v10939_v51  ;;  %v8349_v55 = vsel %vm3213_vm13, 1.0, %v13070_v12 }
 0x2ce   : > { %9452 = vmatmul.mubr.msk.bf16.gmra.mrb[84].mxu0 %vm2857_vm8, %v13163_v44  ;;  %9483 = vmatprep.subr.bf16.mxu1 %v3254_v31  ;;  %v8348_v51 = vsel %vm3212_vm14, 1.0, %v13070_v12  ;;  %v3246_v35 = vpack.c.bf16 %v8351_v13, %v8350_v11  ;;  %vm3119_vm10 = vcmp.eq.s32.totalorder %v11514_v14, %v10847_v46  ;;  %vm3120_vm13 = vcmp.eq.s32.totalorder %v11522_v50, %v10847_v46 }
 0x2cf   : > { %9455 = vmatprep.mubr.msk.bf16.mxu0 %vm2857_vm8, %v13164_v47  ;;  %9464 = vmatpush3.bf16.msra.mxu0 %v2851_v60  ;;  %v3245_v3 = vpack.c.bf16 %v8349_v55, %v8348_v51  ;;  %v8335_v50 = vsel %vm3121_vm12, 1.0, %v13070_v12  ;;  %vm3123_vm14 = vcmp.eq.s32.totalorder %v11532_v19, %v10847_v46  ;;  %vm3124_vm3 = vcmp.eq.s32.totalorder %v11554_v42, %v10847_v46 }
 0x2d0   : > { %9484 = vmatpush3.bf16.msra.mxu1 %v3254_v31  ;;  %9465 = vmatprep.subr.bf16.mxu0 %v11518_v62  ;;  %v9387_v33 = vpop.f32.mrb[64].mxu0  ;;  %v9425_v36 = vpop.f32.mrb[128].mxu1  ;;  %v8339_v19 = vsel %vm3125_vm1, 1.0, %v13070_v12 }
 0x2d1   : > { %9485 = vmatprep.subr.bf16.mxu1 %v3255_v45  ;;  %v2422_v24 = vpop.f32.mrb[65].mxu0  ;;  %v2606_v26 = vpop.f32.mrb[129].mxu1 }
 0x2d2   : > { %v9388_v16 = vpop.f32.mrb[66].mxu0  ;;  %v9426_v60 = vpop.f32.mrb[130].mxu1 }
 0x2d3   : > { %9466 = vmatpush3.bf16.msra.mxu0 %v11518_v62  ;;  %v11570_v22 = vpack.c.bf16 %v9388_v16, %v9387_v33  ;;  %v11572_v56 = vpack.c.bf16 %v9426_v60, %v9425_v36  ;;  %v2425_v39 = vpop.f32.mrb[67].mxu0  ;;  %v2609_v54 = vpop.f32.mrb[131].mxu1  ;;  %v13167_v16 = vpack.c.bf16 %v10950_v4, %v10953_v9  ;;  %v13168_v4 = vpack.c.bf16 %v10964_v20, %v10967_v34 }
 0x2d4   : > { %9486 = vmatpush3.bf16.msra.mxu1 %v3255_v45  ;;  %v11574_v43 = vpack.c.bf16 %v2425_v39, %v2422_v24  ;;  %v3650_v52 = vpack.c.bf16 %v2609_v54, %v2606_v26  ;;  %v11585_v62 = vpop.permute.xlu1 %3114  ;;  %v11587_v45 = vpop.permute.xlu0 %3111  ;;  %v8352_v20 = vsel %vm3216_vm6, 1.0, %v13070_v12  ;;  %v8330_v54 = vsel %vm3116_vm9, 1.0, %v13070_v12 }
 0x2d5   : > { %9499 = vmatprep.subr.bf16.mxu1 %v11526_v53  ;;  %v3247_v18 = vpack.c.bf16 %v8353_v8, %v8352_v20  ;;  %vm3127_vm6 = vcmp.eq.s32.totalorder %v11585_v62, %v10847_v46 }
 0x2d6   : > { %9456 = vmatmul.mubr.msk.bf16.gmra.mrb[88].mxu0 %vm2857_vm8, %v13165_v7  ;;  %9519 = vmatprep.subr.bf16.mxu0 %v3650_v52 }
 0x2d7   : > { %9488 = vmatmul.mubr.msk.bf16.vlgmr.msra.gmra.mrb[144].mxu1 %vm2857_vm8, %v3243_v58  ;;  %9467 = vmatprep.mubr.msk.bf16.mxu0 %vm2857_vm8, %v13166_v15 }
 0x2d8   : > { %9491 = vmatprep.mubr.msk.bf16.mxu1 %vm2857_vm8, %v3244_v1  ;;  %9500 = vmatpush3.bf16.msra.mxu1 %v11526_v53  ;;  %v9391_v40 = vpop.f32.mrb[68].mxu0  ;;  %v9429_v23 = vpop.f32.mrb[132].mxu1 }
 0x2d9   : > { %9501 = vmatprep.subr.bf16.mxu1 %v11524_v61  ;;  %v2438_v28 = vpop.f32.mrb[69].mxu0  ;;  %v2622_v59 = vpop.f32.mrb[133].mxu1 }
 0x2da   : > { %v9392_v31 = vpop.f32.mrb[70].mxu0  ;;  %v9430_v44 = vpop.f32.mrb[134].mxu1 }
 0x2db   : > { %v11605_v47 = vpack.c.bf16 %v9392_v31, %v9391_v40  ;;  %v11607_v33 = vpack.c.bf16 %v9430_v44, %v9429_v23  ;;  %v2441_v53 = vpop.f32.mrb[71].mxu0  ;;  %v2625_v36 = vpop.f32.mrb[135].mxu1  ;;  %v13169_v23 = vpack.c.bf16 %v10978_v38, %v10981_v41  ;;  %v13170_v38 = vpack.c.bf16 %v10990_v57, %v10993_v0 }
 0x2dc   : > { %9502 = vmatpush3.bf16.msra.mxu1 %v11524_v61  ;;  %v11610_v24 = vpack.c.bf16 %v2441_v53, %v2438_v28  ;;  %v3652_v26 = vpack.c.bf16 %v2625_v36, %v2622_v59  ;;  %v11621_v60 = vpop.permute.xlu1 %3970  ;;  %v11623_v61 = vpop.permute.xlu0 %3967  ;;  %v8333_v59 = vsel %vm3119_vm10, 1.0, %v13070_v12  ;;  %v8334_v57 = vsel %vm3120_vm13, 1.0, %v13070_v12 }
 0x2dd   : > { %9503 = vmatprep.subr.bf16.mxu1 %v11542_v49  ;;  %v3153_v36 = vpack.c.bf16 %v8333_v59, %v8332_v32  ;;  %vm4003_vm9 = vcmp.eq.s32.totalorder %v11621_v60, %v10847_v46  ;;  %vm4002_vm10 = vcmp.eq.s32.totalorder %v11623_v61, %v10847_v46  ;;  %v13178_v61 = vld [vmem:[#allocation23_spill] sm:$0xff]  ;;  %v13188_v59 = vld [vmem:[#allocation29_spill] sm:$0xff] }
 0x2de   : > { %9468 = vmatmul.mubr.msk.bf16.vlgmr.msra.gmra.mrb[80].mxu0 %vm2857_vm8, %v13167_v16  ;;  %v13171_v16 = vpack.c.bf16 %v11002_v30, %v11005_v37  ;;  %v8337_v30 = vsel %vm3123_vm14, 1.0, %v13070_v12  ;;  %v8336_v37 = vsel %vm3122_vm15, 1.0, %v13070_v12  ;;  %v8415_v8 = vsel %vm4003_vm9, 1.0, %v13070_v12 }
 0x2df   : > { %9492 = vmatmul.mubr.msk.bf16.gmra.mrb[148].mxu1 %vm2857_vm8, %v3245_v3  ;;  %9520 = vmatpush3.bf16.msra.mxu0 %v3650_v52  ;;  %v3155_v2 = vpack.c.bf16 %v8337_v30, %v8336_v37  ;;  %v8414_v20 = vsel %vm4002_vm10, 1.0, %v13070_v12 }
 0x2e0   : > { %9471 = vmatprep.mubr.msk.bf16.mxu0 %vm2857_vm8, %v13168_v4  ;;  %9495 = vmatprep.mubr.msk.bf16.mxu1 %vm2857_vm8, %v3246_v35  ;;  %v9433_v9 = vpop.f32.mrb[136].mxu1  ;;  %v9395_v21 = vpop.f32.mrb[72].mxu0  ;;  %v13173_v4 = vld [vmem:[#allocation20_spill] sm:$0xff] }
 0x2e1   : > { %9504 = vmatpush3.bf16.msra.mxu1 %v11542_v49  ;;  %9521 = vmatprep.subr.bf16.mxu0 %v11572_v56  ;;  %v2638_v27 = vpop.f32.mrb[137].mxu1  ;;  %v2454_v39 = vpop.f32.mrb[73].mxu0  ;;  %v8331_v49 = vsel %vm3117_vm7, 1.0, %v13070_v12  ;;  %vm3126_vm7 = vcmp.eq.s32.totalorder %v11587_v45, %v10847_v46 }
 0x2e2   : > { %9505 = vmatprep.subr.bf16.mxu1 %v11540_v63  ;;  %v9434_v34 = vpop.f32.mrb[138].mxu1  ;;  %v9396_v10 = vpop.f32.mrb[74].mxu0  ;;  %v3152_v40 = vpack.c.bf16 %v8331_v49, %v8330_v54  ;;  %v4038_v49 = vpack.c.bf16 %v8415_v8, %v8414_v20 }
 0x2e3   : > { %9522 = vmatpush3.bf16.msra.mxu0 %v11572_v56  ;;  %v4049_v52 = vpack.c.bf16 %v9434_v34, %v9433_v9  ;;  %v2641_v58 = vpop.f32.mrb[139].mxu1  ;;  %v11649_v1 = vpack.c.bf16 %v9396_v10, %v9395_v21  ;;  %v2457_v48 = vpop.f32.mrb[75].mxu0  ;;  %v13174_v9 = vpack.c.bf16 %v11026_v29, %v13173_v4  ;;  %v13175_v21 = vld [vmem:[#allocation21_spill] sm:$0xff]  ;;  %v8341_v29 = vsel %vm3127_vm6, 1.0, %v13070_v12  ;;  %v13179_v34 = vld [vmem:[#allocation24_spill] sm:$0xff] }
 0x2e4   : > { %9523 = vmatprep.subr.bf16.mxu0 %v3652_v26  ;;  %v4048_v7 = vpack.c.bf16 %v2641_v58, %v2638_v27  ;;  %v11651_v15 = vpack.c.bf16 %v2457_v48, %v2454_v39  ;;  %v11662_v56 = vpop.permute.xlu1 %3976  ;;  %v11664_v28 = vpop.permute.xlu0 %3973  ;;  %v13176_v27 = vld [vmem:[#allocation22_spill] sm:$0xff]  ;;  %v13180_v10 = vpack.c.bf16 %v13178_v61, %v13179_v34  ;;  %v13198_v4 = vld [vmem:[#allocation36_spill] sm:$0xff] }
 0x2e5   : > { %9506 = vmatpush3.bf16.msra.mxu1 %v11540_v63  ;;  %v13177_v39 = vpack.c.bf16 %v13175_v21, %v13176_v27  ;;  %vm4005_vm11 = vcmp.eq.s32.totalorder %v11662_v56, %v10847_v46  ;;  %vm4004_vm12 = vcmp.eq.s32.totalorder %v11664_v28, %v10847_v46  ;;  %v13182_v58 = vld [vmem:[#allocation26_spill] sm:$0xff]  ;;  %v13200_v27 = vld [vmem:[#allocation39_spill] sm:$0xff] }
 0x2e6   : > { %9472 = vmatmul.mubr.msk.bf16.gmra.mrb[84].mxu0 %vm2857_vm8, %v13169_v23  ;;  %9559 = vmatprep.subr.bf16.mxu1 %v4048_v7 }
 0x2e7   : > { %9496 = vmatmul.mubr.msk.bf16.gmra.mrb[152].mxu1 %vm2857_vm8, %v3247_v18  ;;  %9524 = vmatpush3.bf16.msra.mxu0 %v3652_v26  ;;  %v3154_v26 = vpack.c.bf16 %v8335_v50, %v8334_v57  ;;  %v8416_v18 = vsel %vm4004_vm12, 1.0, %v13070_v12 }
 0x2e8   : > { %9475 = vmatprep.mubr.msk.bf16.mxu0 %vm2857_vm8, %v13170_v38  ;;  %9507 = vmatprep.mubr.msk.bf16.mxu1 %vm2857_vm8, %v3152_v40  ;;  %v9437_v41 = vpop.f32.mrb[140].mxu1  ;;  %v9399_v6 = vpop.f32.mrb[76].mxu0 }
 0x2e9   : > { %9525 = vmatprep.subr.bf16.mxu0 %v11607_v33  ;;  %v2654_v14 = vpop.f32.mrb[141].mxu1  ;;  %v2470_v63 = vpop.f32.mrb[77].mxu0 }
 0x2ea   : > { %v9438_v55 = vpop.f32.mrb[142].mxu1  ;;  %v9400_v51 = vpop.f32.mrb[78].mxu0 }
 0x2eb   : > { %9526 = vmatpush3.bf16.msra.mxu0 %v11607_v33  ;;  %v4051_v0 = vpack.c.bf16 %v9438_v55, %v9437_v41  ;;  %v2657_v31 = vpop.f32.mrb[143].mxu1  ;;  %v11682_v44 = vpack.c.bf16 %v9400_v51, %v9399_v6  ;;  %v2473_v13 = vpop.f32.mrb[79].mxu0  ;;  %v13172_v33 = vpack.c.bf16 %v11014_v5, %v11017_v17  ;;  %v8338_v5 = vsel %vm3124_vm3, 1.0, %v13070_v12  ;;  %v13185_v6 = vld [vmem:[#allocation27_spill] sm:$0xff] }
 0x2ec   : > { %9539 = vmatprep.subr.bf16.mxu0 %v11574_v43  ;;  %v4050_v11 = vpack.c.bf16 %v2657_v31, %v2654_v14  ;;  %v11685_v53 = vpack.c.bf16 %v2473_v13, %v2470_v63  ;;  %v3983_v3 = vpop.permute.xlu1 %3982  ;;  %v3980_v35 = vpop.permute.xlu0 %3979  ;;  %v3156_v42 = vpack.c.bf16 %v8339_v19, %v8338_v5  ;;  %v13186_v14 = vld [vmem:[#allocation28_spill] sm:$0xff]  ;;  %v10242_v5 = vld [vmem:[%s13184_s28 + $0x10] ss:$0 sps:$4 sm:$0xff]  }
 0x2ed   : > { %vm4007_vm13 = vcmp.eq.s32.totalorder %v3983_v3, %v10847_v46  ;;  %vm4006_vm14 = vcmp.eq.s32.totalorder %v3980_v35, %v10847_v46  ;;  %v13187_v63 = vpack.c.bf16 %v13185_v6, %v13186_v14  ;;  %v10241_v3 = vld [vmem:[%s13184_s28 + $0x8] sm:$0xff]   ;;  %v13195_v35 = vld [vmem:[#allocation34_spill] sm:$0xff]  ;;  %v4427_v21 = vsel %vm1342_vm4, %v10242_v5, 0 }
 0x2ee   : > { %9476 = vmatmul.mubr.msk.bf16.gmra.mrb[88].mxu0 %vm2857_vm8, %v13171_v16  ;;  %v8419_v40 = vsel %vm4007_vm13, 1.0, %v13070_v12  ;;  %v8418_v23 = vsel %vm4006_vm14, 1.0, %v13070_v12  ;;  %v13210_v6 = vld [vmem:[#allocation89_spill] sm:$0xff] }
 0x2ef   : > { %9508 = vmatmul.mubr.msk.bf16.vlgmr.msra.gmra.mrb[144].mxu1 %vm2857_vm8, %v3153_v36  ;;  %9527 = vmatprep.mubr.msk.bf16.mxu0 %vm2857_vm8, %v13172_v33  ;;  %v4040_v28 = vpack.c.bf16 %v8419_v40, %v8418_v23  ;;  %v13191_v36 = vld [vmem:[#allocation31_spill] sm:$0xff] }
 0x2f0   : > { %9511 = vmatprep.mubr.msk.bf16.mxu1 %vm2857_vm8, %v3154_v26  ;;  %9560 = vmatpush3.bf16.msra.mxu1 %v4048_v7  ;;  %v11709_v17 = vpop.permute.xlu1 %3988  ;;  %v11711_v25 = vpop.permute.xlu0 %3985  ;;  %v10240_v7 = vld [vmem:[%s13184_s28] sm:$0xff]  }
 0x2f1   : > { %9561 = vmatprep.subr.bf16.mxu1 %v4049_v52  ;;  %vm4009_vm15 = vcmp.eq.s32.totalorder %v11709_v17, %v10847_v46  ;;  %vm4008_vm1 = vcmp.eq.s32.totalorder %v11711_v25, %v10847_v46 }
 0x2f2   : > { %v8421_v55 = vsel %vm4009_vm15, 1.0, %v13070_v12  ;;  %v8420_v51 = vsel %vm4008_vm1, 1.0, %v13070_v12 }
 0x2f3   : > { %v4041_v13 = vpack.c.bf16 %v8421_v55, %v8420_v51 }
 0x2f4   : > { %9562 = vmatpush3.bf16.msra.mxu1 %v4049_v52  ;;  %v3995_v62 = vpop.permute.xlu1 %3994  ;;  %v3992_v45 = vpop.permute.xlu0 %3991  ;;  %v13181_v52 = vld [vmem:[#allocation25_spill] sm:$0xff] }
 0x2f5   : > { %9563 = vmatprep.subr.bf16.mxu1 %v4050_v11  ;;  %v13183_v48 = vpack.c.bf16 %v13181_v52, %v13182_v58  ;;  %vm4011_vm3 = vcmp.eq.s32.totalorder %v3995_v62, %v10847_v46  ;;  %vm4010_vm6 = vcmp.eq.s32.totalorder %v3992_v45, %v10847_v46  ;;  %v13206_v52 = vld [vmem:[#allocation92_spill] sm:$0xff]  ;;  %v13207_v58 = vld [vmem:[#allocation90_spill] sm:$0xff] }
 0x2f6   : > { %9528 = vmatmul.mubr.msk.bf16.vlgmr.msra.gmra.mrb[92].mxu0 %vm2857_vm8, %v13174_v9  ;;  %v8423_v50 = vsel %vm4011_vm3, 1.0, %v13070_v12  ;;  %v8422_v57 = vsel %vm4010_vm6, 1.0, %v13070_v12 }
 0x2f7   : > { %9512 = vmatmul.mubr.msk.bf16.gmra.mrb[148].mxu1 %vm2857_vm8, %v3155_v2  ;;  %9540 = vmatpush3.bf16.msra.mxu0 %v11574_v43  ;;  %v8340_v43 = vsel %vm3126_vm7, 1.0, %v13070_v12 }
 0x2f8   : > { %9515 = vmatprep.mubr.msk.bf16.mxu1 %vm2857_vm8, %v3156_v42  ;;  %9531 = vmatprep.mubr.msk.bf16.mxu0 %vm2857_vm8, %v13177_v39  ;;  %v3157_v60 = vpack.c.bf16 %v8341_v29, %v8340_v43  ;;  %v3998_v54 = vpop.permute.xlu0 %3997  ;;  %v13197_v42 = vld [vmem:[#allocation35_spill] sm:$0xff] }
 0x2f9   : > { %9541 = vmatprep.subr.bf16.mxu0 %v11570_v22  ;;  %9564 = vmatpush3.bf16.msra.mxu1 %v4050_v11  ;;  %v4042_v11 = vpack.c.bf16 %v8423_v50, %v8422_v57  ;;  %vm4012_vm9 = vcmp.eq.s32.totalorder %v3998_v54, %v10847_v46  ;;  %v13199_v9 = vpack.c.bf16 %v13197_v42, %v13198_v4  ;;  %v13215_v50 = vld [vmem:[#allocation95_spill] sm:$0xff]  ;;  %v13216_v57 = vld [vmem:[#allocation93_spill] sm:$0xff] }
 0x2fa   : > { %9565 = vmatprep.subr.bf16.mxu1 %v4051_v0  ;;  %v8424_v30 = vsel %vm4012_vm9, 1.0, %v13070_v12  ;;  %v13239_v4 = vld [vmem:[#allocation111_spill] sm:$0xff] }
 0x2fb   : > { %9542 = vmatpush3.bf16.msra.mxu0 %v11570_v22  ;;  %v4001_v22 = vpop.permute.xlu1 %4000 }
 0x2fc   : > { %9543 = vmatprep.subr.bf16.mxu0 %v11610_v24  ;;  %v3878_v41 = vpop.permute.xlu0 %3877  ;;  %vm4013_vm7 = vcmp.eq.s32.totalorder %v4001_v22, %v10847_v46  ;;  %v13204_v22 = vld [vmem:[#allocation51_spill] sm:$0xff] }
 0x2fd   : > { %9566 = vmatpush3.bf16.msra.mxu1 %v4051_v0  ;;  %v8425_v33 = vsel %vm4013_vm7, 1.0, %v13070_v12 }
 0x2fe   : > { %9532 = vmatmul.mubr.msk.bf16.gmra.mrb[96].mxu0 %vm2857_vm8, %v13180_v10  ;;  %9579 = vmatprep.subr.bf16.mxu1 %v11651_v15 }
 0x2ff   : > { %9516 = vmatmul.mubr.msk.bf16.gmra.mrb[152].mxu1 %vm2857_vm8, %v3157_v60  ;;  %9544 = vmatpush3.bf16.msra.mxu0 %v11610_v24  ;;  %v8417_v24 = vsel %vm4005_vm11, 1.0, %v13070_v12  ;;  %v3881_v38 = vpop.permute.xlu1 %3880  ;;  %vm3912_vm11 = vcmp.eq.s32.totalorder %v3878_v41, %v10847_v46  ;;  %v13209_v41 = vld [vmem:[#allocation91_spill] sm:$0xff] }
 0x300   : > { %9535 = vmatprep.mubr.msk.bf16.mxu0 %vm2857_vm8, %v13183_v48  ;;  %9545 = vmatprep.subr.bf16.mxu0 %v11605_v47  ;;  %v4039_v56 = vpack.c.bf16 %v8417_v24, %v8416_v18  ;;  %v3884_v31 = vpop.permute.xlu0 %3883  ;;  %vm3913_vm10 = vcmp.eq.s32.totalorder %v3881_v38, %v10847_v46  ;;  %v8402_v25 = vsel %vm3912_vm11, 1.0, %v13070_v12  ;;  %v13208_v48 = vpack.c.bf16 %v13206_v52, %v13207_v58  ;;  %v13258_v52 = vld [vmem:[#allocation121_spill] sm:$0xff] }
 0x301   : > { %9567 = vmatprep.mubr.msk.bf16.mxu1 %vm2857_vm8, %v4038_v49  ;;  %v8403_v17 = vsel %vm3913_vm10, 1.0, %v13070_v12  ;;  %vm3914_vm13 = vcmp.eq.s32.totalorder %v3884_v31, %v10847_v46  ;;  %v13203_v49 = vld [vmem:[#allocation48_spill] sm:$0xff]  ;;  %v13211_v14 = vpack.c.bf16 %v13209_v41, %v13210_v6  ;;  %v13219_v31 = vld [vmem:[#allocation98_spill] sm:$0xff]  ;;  %v13269_v41 = vld [vmem:[#allocation131_spill] sm:$0xff] }
 0x302   : > { %v3948_v2 = vpack.c.bf16 %v8403_v17, %v8402_v25  ;;  %v8404_v45 = vsel %vm3914_vm13, 1.0, %v13070_v12  ;;  %v13205_v54 = vpack.c.bf16 %v13203_v49, %v13204_v22  ;;  %v13234_v17 = vld [vmem:[#allocation105_spill] sm:$0xff]  ;;  %v13255_v49 = vld [vmem:[#allocation122_spill] sm:$0xff] }
 0x303   : > { %9546 = vmatpush3.bf16.msra.mxu0 %v11605_v47  ;;  %v13189_v47 = vld [vmem:[#allocation30_spill] sm:$0xff]  ;;  %v3887_v0 = vpop.permute.xlu1 %3886  ;;  %v13270_v6 = vld [vmem:[#allocation129_spill] sm:$0xff] }
 0x304   : > { %9599 = vmatprep.subr.bf16.mxu0 %v10240_v7  ;;  %v13190_v32 = vpack.c.bf16 %v13188_v59, %v13189_v47  ;;  %v3890_v19 = vpop.permute.xlu0 %3889  ;;  %vm3915_vm12 = vcmp.eq.s32.totalorder %v3887_v0, %v10847_v46  ;;  %v13213_v59 = vld [vmem:[#allocation94_spill] sm:$0xff]  ;;  %v13217_v0 = vpack.c.bf16 %v13215_v50, %v13216_v57  ;;  %v10244_v57 = vld [vmem:[%s12847_s13 + $0x8] sm:$0xff]  }
 0x305   : > { %vm3916_vm15 = vcmp.eq.s32.totalorder %v3890_v19, %v10847_v46  ;;  %v8405_v62 = vsel %vm3915_vm12, 1.0, %v13070_v12  ;;  %vm5938_vm12 = vcmask 785408  }
 0x306   : > { %9536 = vmatmul.mubr.msk.bf16.gmra.mrb[100].mxu0 %vm2857_vm8, %v13187_v63  ;;  %v8406_v20 = vsel %vm3916_vm15, 1.0, %v13070_v12  ;;  %v3949_v60 = vpack.c.bf16 %v8405_v62, %v8404_v45  ;;  %v13212_v63 = vld [vmem:[#allocation96_spill] sm:$0xff] }
 0x307   : > { %9568 = vmatmul.mubr.msk.bf16.vlgmr.msra.gmra.mrb[156].mxu1 %vm2857_vm8, %v4039_v56  ;;  %9547 = vmatprep.mubr.msk.bf16.mxu0 %vm2857_vm8, %v13190_v32  ;;  %v3893_v37 = vpop.permute.xlu1 %3892  ;;  %v13214_v47 = vpack.c.bf16 %v13212_v63, %v13213_v59  ;;  %v13248_v45 = vld [vmem:[#allocation120_spill] sm:$0xff]  ;;  %v13273_v59 = vld [vmem:[#allocation134_spill] sm:$0xff] }
 0x308   : > { %9571 = vmatprep.mubr.msk.bf16.mxu1 %vm2857_vm8, %v4040_v28  ;;  %9580 = vmatpush3.bf16.msra.mxu1 %v11651_v15  ;;  %v13192_v15 = vld [vmem:[#allocation32_spill] sm:$0xff]  ;;  %vm3917_vm14 = vcmp.eq.s32.totalorder %v3893_v37, %v10847_v46  ;;  %v3896_v43 = vpop.permute.xlu0 %3895  ;;  %v13231_v37 = vld [vmem:[#allocation106_spill] sm:$0xff] }
 0x309   : > { %9581 = vmatprep.subr.bf16.mxu1 %v11649_v1  ;;  %v13193_v26 = vpack.c.bf16 %v13191_v36, %v13192_v15  ;;  %v8407_v8 = vsel %vm3917_vm14, 1.0, %v13070_v12  ;;  %vm3918_vm3 = vcmp.eq.s32.totalorder %v3896_v43, %v10847_v46  ;;  %v13222_v36 = vld [vmem:[#allocation97_spill] sm:$0xff]  ;;  %v13272_v63 = vld [vmem:[#allocation136_spill] sm:$0xff] }
 0x30a   : > { %v3950_v61 = vpack.c.bf16 %v8407_v8, %v8406_v20  ;;  %v8408_v24 = vsel %vm3918_vm3, 1.0, %v13070_v12  ;;  %v13246_v43 = vld [vmem:[#allocation113_spill] sm:$0xff]  ;;  %v13249_v8 = vld [vmem:[#allocation118_spill] sm:$0xff] }
 0x30b   : > { %v3899_v29 = vpop.permute.xlu1 %3898  ;;  %v13250_v20 = vpack.c.bf16 %v13248_v45, %v13249_v8 }
 0x30c   : > { %9582 = vmatpush3.bf16.msra.mxu1 %v11649_v1  ;;  %v13194_v1 = vld [vmem:[#allocation33_spill] sm:$0xff]  ;;  %v3902_v10 = vpop.permute.xlu0 %3901  ;;  %vm3919_vm1 = vcmp.eq.s32.totalorder %v3899_v29, %v10847_v46  ;;  %v13245_v29 = vld [vmem:[#allocation115_spill] sm:$0xff] }
 0x30d   : > { %9583 = vmatprep.subr.bf16.mxu1 %v11685_v53  ;;  %v13196_v16 = vpack.c.bf16 %v13194_v1, %v13195_v35  ;;  %vm3920_vm7 = vcmp.eq.s32.totalorder %v3902_v10, %v10847_v46  ;;  %v13227_v35 = vld [vmem:[#allocation103_spill] sm:$0xff]  ;;  %v13247_v62 = vpack.c.bf16 %v13245_v29, %v13246_v43  ;;  %v13254_v10 = vld [vmem:[#allocation124_spill] sm:$0xff] }
 0x30e   : > { %9548 = vmatmul.mubr.msk.bf16.vlgmr.msra.gmra.mrb[92].mxu0 %vm2857_vm8, %v13193_v26  ;;  %v8410_v40 = vsel %vm3920_vm7, 1.0, %v13070_v12  ;;  %v13224_v26 = vld [vmem:[#allocation104_spill] sm:$0xff]  ;;  %v13256_v22 = vpack.c.bf16 %v13254_v10, %v13255_v49 }
 0x30f   : > { %9572 = vmatmul.mubr.msk.bf16.gmra.mrb[160].mxu1 %vm2857_vm8, %v4041_v13  ;;  %9551 = vmatprep.mubr.msk.bf16.mxu0 %vm2857_vm8, %v13196_v16  ;;  %v3905_v34 = vpop.permute.xlu1 %3904  ;;  %v13228_v16 = vld [vmem:[#allocation101_spill] sm:$0xff] }
 0x310   : > { %9575 = vmatprep.mubr.msk.bf16.mxu1 %vm2857_vm8, %v4042_v11  ;;  %9584 = vmatpush3.bf16.msra.mxu1 %v11685_v53  ;;  %v4043_v53 = vpack.c.bf16 %v8425_v33, %v8424_v30  ;;  %vm3921_vm6 = vcmp.eq.s32.totalorder %v3905_v34, %v10847_v46  ;;  %v3908_v56 = vpop.permute.xlu0 %3907  ;;  %v13221_v11 = vld [vmem:[#allocation99_spill] sm:$0xff]  ;;  %v13229_v33 = vpack.c.bf16 %v13227_v35, %v13228_v16  ;;  %v13230_v30 = vld [vmem:[#allocation108_spill] sm:$0xff] }
 0x311   : > { %9585 = vmatprep.subr.bf16.mxu1 %v11682_v44  ;;  %9600 = vmatpush3.bf16.msra.mxu0 %v10240_v7  ;;  %v8409_v7 = vsel %vm3919_vm1, 1.0, %v13070_v12  ;;  %v8411_v18 = vsel %vm3921_vm6, 1.0, %v13070_v12  ;;  %vm3922_vm10 = vcmp.eq.s32.totalorder %v3908_v56, %v10847_v46  ;;  %v13223_v15 = vpack.c.bf16 %v13221_v11, %v13222_v36  ;;  %v13266_v56 = vld [vmem:[#allocation132_spill] sm:$0xff] }
 0x312   : > { %9601 = vmatprep.subr.bf16.mxu0 %v10241_v3  ;;  %v3951_v28 = vpack.c.bf16 %v8409_v7, %v8408_v24  ;;  %v3952_v38 = vpack.c.bf16 %v8411_v18, %v8410_v40  ;;  %v8412_v55 = vsel %vm3922_vm10, 1.0, %v13070_v12  ;;  %v13232_v19 = vpack.c.bf16 %v13230_v30, %v13231_v37  ;;  %v13261_v7 = vld [vmem:[#allocation126_spill] sm:$0xff]  ;;  %v13263_v18 = vld [vmem:[#allocation127_spill] sm:$0xff]  ;;  %v13264_v40 = vld [vmem:[#allocation125_spill] sm:$0xff] }
 0x313   : > { %v3911_v23 = vpop.permute.xlu1 %3910 }
 0x314   : > { %9586 = vmatpush3.bf16.msra.mxu1 %v11682_v44  ;;  %v13201_v44 = vld [vmem:[#allocation40_spill] sm:$0xff]  ;;  %vm3923_vm9 = vcmp.eq.s32.totalorder %v3911_v23, %v10847_v46  ;;  %v13265_v23 = vpack.c.bf16 %v13263_v18, %v13264_v40 }
 0x315   : > { %9602 = vmatpush3.bf16.msra.mxu0 %v10241_v3  ;;  %v13202_v39 = vpack.c.bf16 %v13200_v27, %v13201_v44  ;;  %v8413_v32 = vsel %vm3923_vm9, 1.0, %v13070_v12  ;;  %v13218_v46 = vld [vmem:[#allocation100_spill] sm:$0xff]  ;;  %v13225_v3 = vld [vmem:[#allocation102_spill] sm:$0xff] }
 0x316   : > { %9552 = vmatmul.mubr.msk.bf16.gmra.mrb[96].mxu0 %vm2857_vm8, %v13199_v9  ;;  %10205 = vmatprep.subr.msk.bf16.mxu0 %vm1342_vm4, %v10242_v5  ;;  %v3953_v51 = vpack.c.bf16 %v8413_v32, %v8412_v55  ;;  %v13220_v13 = vpack.c.bf16 %v13218_v46, %v13219_v31  ;;  %v13226_v1 = vpack.c.bf16 %v13224_v26, %v13225_v3  ;;  %v13233_v5 = vld [vmem:[#allocation107_spill] sm:$0xff]  ;;  %v13240_v9 = vld [vmem:[#allocation109_spill] sm:$0xff]  ;;  %v13242_v27 = vld [vmem:[#allocation116_spill] sm:$0xff] }
 0x317   : > { %9576 = vmatmul.mubr.msk.bf16.gmra.mrb[164].mxu1 %vm2857_vm8, %v4043_v53  ;;  %9555 = vmatprep.mubr.msk.bf16.mxu0 %vm2857_vm8, %v13202_v39  ;;  %v13235_v25 = vpack.c.bf16 %v13233_v5, %v13234_v17  ;;  %v13236_v53 = vld [vmem:[#allocation112_spill] sm:$0xff]  ;;  %v13243_v44 = vld [vmem:[#allocation114_spill] sm:$0xff]  ;;  %v13275_v55 = vld [vmem:[#allocation135_spill] sm:$0xff] }
 0x318   : > { %9587 = vmatprep.mubr.msk.bf16.mxu1 %vm2857_vm8, %v3948_v2  ;;  %v13237_v2 = vld [vmem:[#allocation110_spill] sm:$0xff]  ;;  %v13244_v39 = vpack.c.bf16 %v13242_v27, %v13243_v44  ;;  %v10243_v32 = vld [vmem:[%s12847_s13] sm:$0xff]  }
 0x319   : > { %9604 = vmatpush3.bf16.msra.mxu0 %v4427_v21  ;;  %v13238_v42 = vpack.c.bf16 %v13236_v53, %v13237_v2  ;;  %v13241_v21 = vpack.c.bf16 %v13239_v4, %v13240_v9  ;;  %9653 = vmatprep.subr.bf16.mxu1 %v10243_v32  ;;  %v10246_v44 = vld [vmem:[%s12849_s15] sm:$0xff]  }
 0x31a   : > { %9707 = vmatprep.subr.bf16.mxu0 %v10246_v44  ;;  %v12014_v18 = vld [vmem:[%s12846_s12] ss:$0 sm:$0xff] }
 0x31e   : > { %9556 = vmatmul.mubr.msk.bf16.gmra.mrb[100].mxu0 %vm2857_vm8, %v13205_v54  ;;  %v13257_v54 = vld [vmem:[#allocation123_spill] sm:$0xff] }
 0x31f   : > { %9588 = vmatmul.mubr.msk.bf16.vlgmr.msra.gmra.mrb[156].mxu1 %vm2857_vm8, %v3949_v60  ;;  %9605 = vmatprep.mubr.msk.bf16.mxu0 %vm1293_vm5, %v13208_v48  ;;  %v13251_v60 = vld [vmem:[#allocation119_spill] sm:$0xff]  ;;  %v13259_v58 = vpack.c.bf16 %v13257_v54, %v13258_v52  ;;  %v13260_v48 = vld [vmem:[#allocation128_spill] sm:$0xff] }
 0x320   : > { %9591 = vmatprep.mubr.msk.bf16.mxu1 %vm2857_vm8, %v3950_v61  ;;  %v13252_v61 = vld [vmem:[#allocation117_spill] sm:$0xff]  ;;  %v13262_v24 = vpack.c.bf16 %v13260_v48, %v13261_v7  ;;  %9654 = vmatpush3.bf16.msra.mxu1 %v10243_v32 }
 0x321   : > { %v13253_v34 = vpack.c.bf16 %v13251_v60, %v13252_v61  ;;  %9655 = vmatprep.subr.bf16.mxu1 %v10244_v57 }
 0x324   : > { %9656 = vmatpush3.bf16.msra.mxu1 %v10244_v57 }
 0x326   : > { %9606 = vmatmul.mubr.msk.bf16.vlgmr.msra.gmra.mrb[104].mxu0 %vm1293_vm5, %v13211_v14  ;;  %v13271_v14 = vpack.c.bf16 %v13269_v41, %v13270_v6 }
 0x327   : > { %9592 = vmatmul.mubr.msk.bf16.gmra.mrb[160].mxu1 %vm2857_vm8, %v3951_v28  ;;  %9609 = vmatprep.mubr.msk.bf16.mxu0 %vm1293_vm5, %v13214_v47  ;;  %v13267_v28 = vld [vmem:[#allocation130_spill] sm:$0xff]  ;;  %v13274_v47 = vpack.c.bf16 %v13272_v63, %v13273_v59 }
 0x328   : > { %9595 = vmatprep.mubr.msk.bf16.mxu1 %vm2857_vm8, %v3952_v38  ;;  %v13268_v38 = vpack.c.bf16 %v13266_v56, %v13267_v28  ;;  %9708 = vmatpush3.bf16.msra.mxu0 %v10246_v44 }
 0x32e   : > { %9610 = vmatmul.mubr.msk.bf16.gmra.mrb[108].mxu0 %vm1293_vm5, %v13217_v0  ;;  %v10245_v0 = vld [vmem:[%s12847_s13 + $0x10] ss:$0 sps:$4 sm:$0xff]  }
 0x32f   : > { %9596 = vmatmul.mubr.msk.bf16.gmra.mrb[164].mxu1 %vm2857_vm8, %v3953_v51  ;;  %9613 = vmatprep.mubr.msk.bf16.mxu0 %vm1293_vm5, %v13220_v13  ;;  %v13276_v51 = vld [vmem:[#allocation133_spill] sm:$0xff]  ;;  %v4929_v46 = vsel %vm1342_vm4, %v10245_v0, 0 }
 0x330   : > { %v13277_v50 = vpack.c.bf16 %v13275_v55, %v13276_v51  ;;  %10206 = vmatprep.subr.msk.bf16.mxu1 %vm1342_vm4, %v10245_v0 }
 0x331   : > { %9658 = vmatpush3.bf16.msra.mxu1 %v4929_v46 }
 0x336   : > { %9614 = vmatmul.mubr.msk.bf16.gmra.mrb[112].mxu0 %vm1293_vm5, %v13223_v15 }
 0x337   : > { %9617 = vmatprep.mubr.msk.bf16.mxu0 %vm1293_vm5, %v13226_v1 }
 0x33e   : > { %9618 = vmatmul.mubr.msk.bf16.gmra.mrb[116].mxu0 %vm1293_vm5, %v13229_v33 }
 0x33f   : > { %9621 = vmatprep.mubr.msk.bf16.mxu0 %vm1293_vm5, %v13232_v19 }
 0x346   : > { %9622 = vmatmul.mubr.msk.bf16.gmra.mrb[120].mxu0 %vm1293_vm5, %v13235_v25 }
 0x347   : > { %9625 = vmatprep.mubr.msk.bf16.mxu0 %vm1293_vm5, %v13238_v42 }
 0x34e   : > { %9626 = vmatmul.mubr.msk.bf16.gmra.mrb[124].mxu0 %vm1293_vm5, %v13241_v21 }
 0x34f   : > { %9629 = vmatprep.mubr.msk.bf16.mxu0 %vm1293_vm5, %v13244_v39  ;;  %v10247_v39 = vld [vmem:[%s12849_s15 + $0x8] sm:$0xff]  }
 0x350   : > { %9709 = vmatprep.subr.bf16.mxu0 %v10247_v39 }
 0x351   : > { %9710 = vmatpush3.bf16.msra.mxu0 %v10247_v39 }
 0x356   : > { %9630 = vmatmul.mubr.msk.bf16.gmra.mrb[128].mxu0 %vm1293_vm5, %v13247_v62 }
 0x357   : > { %9633 = vmatprep.mubr.msk.bf16.mxu0 %vm1293_vm5, %v13250_v20 }
 0x35e   : > { %9634 = vmatmul.mubr.msk.bf16.gmra.mrb[132].mxu0 %vm1293_vm5, %v13253_v34 }
 0x35f   : > { %9637 = vmatprep.mubr.msk.bf16.mxu0 %vm1293_vm5, %v13256_v22 }
 0x366   : > { %9638 = vmatmul.mubr.msk.bf16.gmra.mrb[136].mxu0 %vm1293_vm5, %v13259_v58 }
 0x367   : > { %9641 = vmatprep.mubr.msk.bf16.mxu0 %vm1293_vm5, %v13262_v24 }
 0x36e   : > { %9642 = vmatmul.mubr.msk.bf16.gmra.mrb[140].mxu0 %vm1293_vm5, %v13265_v23 }
 0x36f   : > { %9645 = vmatprep.mubr.msk.bf16.mxu0 %vm1293_vm5, %v13268_v38 }
 0x376   : > { %9646 = vmatmul.mubr.msk.bf16.gmra.mrb[144].mxu0 %vm1293_vm5, %v13271_v14 }
 0x377   : > { %9649 = vmatprep.mubr.msk.bf16.mxu0 %vm1293_vm5, %v13274_v47 }
 0x37e   : > { %9650 = vmatmul.mubr.msk.bf16.gmra.mrb[148].mxu0 %vm1293_vm5, %v13277_v50 }
 0x3b1   : > { %v9469_v31 = vpop.f32.mrb[80].mxu0 }
 0x3b2   : > { %3058 = vst.msk [vmem:[#allocation2 + $0x10] sm:$0xff] %vm1293_vm5, %v9469_v31  ;;  %v3009_v13 = vpop.f32.mrb[81].mxu0 }
 0x3b3   : > { %3056 = vst.msk [vmem:[#allocation2] sm:$0xff] %vm1293_vm5, %v3009_v13  ;;  %v9470_v11 = vpop.f32.mrb[82].mxu0 }
 0x3b4   : > { %3059 = vst.msk [vmem:[#allocation2 + $0x18] sm:$0xff] %vm1293_vm5, %v9470_v11  ;;  %v3012_v36 = vpop.f32.mrb[83].mxu0 }
 0x3b5   : > { %3057 = vst.msk [vmem:[#allocation2 + $0x8] sm:$0xff] %vm1293_vm5, %v3012_v36 }
 0x3b9   : > { %v9473_v15 = vpop.f32.mrb[84].mxu0  ;;  %v4264_v7 = vld [vmem:[#allocation2 + $0x10] sm:$0xff] }
 0x3ba   : > { %3062 = vst.msk [vmem:[#allocation2 + $0x30] sm:$0xff] %vm1293_vm5, %v9473_v15  ;;  %v3025_v26 = vpop.f32.mrb[85].mxu0  ;;  %v4262_v56 = vld [vmem:[#allocation2] sm:$0xff] }
 0x3bb   : > { %3060 = vst.msk [vmem:[#allocation2 + $0x20] sm:$0xff] %vm1293_vm5, %v3025_v26  ;;  %v9474_v3 = vpop.f32.mrb[86].mxu0  ;;  %v4265_v6 = vld [vmem:[#allocation2 + $0x18] sm:$0xff] }
 0x3bc   : > { %3063 = vst.msk [vmem:[#allocation2 + $0x38] sm:$0xff] %vm1293_vm5, %v9474_v3  ;;  %v3028_v1 = vpop.f32.mrb[87].mxu0  ;;  %v4263_v32 = vld [vmem:[#allocation2 + $0x8] sm:$0xff] }
 0x3bd   : > { %3061 = vst.msk [vmem:[#allocation2 + $0x28] sm:$0xff] %vm1293_vm5, %v3028_v1 }
 0x3c1   : > { %v9477_v35 = vpop.f32.mrb[88].mxu0  ;;  %v4268_v15 = vld [vmem:[#allocation2 + $0x30] sm:$0xff] }
 0x3c2   : > { %3066 = vst.msk [vmem:[#allocation2 + $0x50] sm:$0xff] %vm1293_vm5, %v9477_v35  ;;  %v9509_v16 = vpop.f32.mrb[144].mxu1  ;;  %v3041_v33 = vpop.f32.mrb[89].mxu0 }
 0x3c3   : > { %3456 = vst.msk [vmem:[#allocation2 + $0x70] sm:$0xff] %vm1293_vm5, %v9509_v16  ;;  %3064 = vst.msk [vmem:[#allocation2 + $0x40] sm:$0xff] %vm1293_vm5, %v3041_v33  ;;  %v3407_v30 = vpop.f32.mrb[145].mxu1  ;;  %v9478_v37 = vpop.f32.mrb[90].mxu0  ;;  %v4266_v16 = vld [vmem:[#allocation2 + $0x20] sm:$0xff] }
 0x3c4   : > { %3454 = vst.msk [vmem:[#allocation2 + $0x60] sm:$0xff] %vm1293_vm5, %v3407_v30  ;;  %3067 = vst.msk [vmem:[#allocation2 + $0x58] sm:$0xff] %vm1293_vm5, %v9478_v37  ;;  %v9510_v19 = vpop.f32.mrb[146].mxu1  ;;  %v3044_v5 = vpop.f32.mrb[91].mxu0 }
 0x3c5   : > { %3457 = vst.msk [vmem:[#allocation2 + $0x78] sm:$0xff] %vm1293_vm5, %v9510_v19  ;;  %3065 = vst.msk [vmem:[#allocation2 + $0x48] sm:$0xff] %vm1293_vm5, %v3044_v5  ;;  %v3410_v17 = vpop.f32.mrb[147].mxu1  ;;  %v4269_v5 = vld [vmem:[#allocation2 + $0x38] sm:$0xff] }
 0x3c6   : > { %3455 = vst.msk [vmem:[#allocation2 + $0x68] sm:$0xff] %vm1293_vm5, %v3410_v17 }
 0x3ca   : > { %v9513_v25 = vpop.f32.mrb[148].mxu1 }
 0x3cb   : > { %3460 = vst.msk [vmem:[#allocation2 + $0x90] sm:$0xff] %vm1293_vm5, %v9513_v25  ;;  %v3423_v53 = vpop.f32.mrb[149].mxu1 }
 0x3cc   : > { %3458 = vst.msk [vmem:[#allocation2 + $0x80] sm:$0xff] %vm1293_vm5, %v3423_v53  ;;  %v9514_v2 = vpop.f32.mrb[150].mxu1 }
 0x3cd   : > { %3461 = vst.msk [vmem:[#allocation2 + $0x98] sm:$0xff] %vm1293_vm5, %v9514_v2  ;;  %v3426_v42 = vpop.f32.mrb[151].mxu1 }
 0x3ce   : > { %3459 = vst.msk [vmem:[#allocation2 + $0x88] sm:$0xff] %vm1293_vm5, %v3426_v42  ;;  %v4267_v42 = vld [vmem:[#allocation2 + $0x28] sm:$0xff] }
 0x3d2   : > { %v9517_v4 = vpop.f32.mrb[152].mxu1 }
 0x3d3   : > { %3464 = vst.msk [vmem:[#allocation2 + $0xb0] sm:$0xff] %vm1293_vm5, %v9517_v4  ;;  %v3439_v9 = vpop.f32.mrb[153].mxu1 }
 0x3d4   : > { %3462 = vst.msk [vmem:[#allocation2 + $0xa0] sm:$0xff] %vm1293_vm5, %v3439_v9  ;;  %v9518_v21 = vpop.f32.mrb[154].mxu1 }
 0x3d5   : > { %3465 = vst.msk [vmem:[#allocation2 + $0xb8] sm:$0xff] %vm1293_vm5, %v9518_v21  ;;  %v3442_v27 = vpop.f32.mrb[155].mxu1 }
 0x3d6   : > { %3463 = vst.msk [vmem:[#allocation2 + $0xa8] sm:$0xff] %vm1293_vm5, %v3442_v27 }
 0x3e1   : > { %v9549_v29 = vpop.f32.mrb[92].mxu0 }
 0x3e2   : > { %3854 = vst.msk [vmem:[#allocation2 + $0xd0] sm:$0xff] %vm1293_vm5, %v9549_v29  ;;  %v3805_v43 = vpop.f32.mrb[93].mxu0 }
 0x3e3   : > { %3852 = vst.msk [vmem:[#allocation2 + $0xc0] sm:$0xff] %vm1293_vm5, %v3805_v43  ;;  %v9550_v62 = vpop.f32.mrb[94].mxu0 }
 0x3e4   : > { %3855 = vst.msk [vmem:[#allocation2 + $0xd8] sm:$0xff] %vm1293_vm5, %v9550_v62  ;;  %v3808_v45 = vpop.f32.mrb[95].mxu0 }
 0x3e5   : > { %3853 = vst.msk [vmem:[#allocation2 + $0xc8] sm:$0xff] %vm1293_vm5, %v3808_v45 }
 0x3e9   : > { %v9553_v8 = vpop.f32.mrb[96].mxu0 }
 0x3ea   : > { %3858 = vst.msk [vmem:[#allocation2 + $0xf0] sm:$0xff] %vm1293_vm5, %v9553_v8  ;;  %v3821_v20 = vpop.f32.mrb[97].mxu0  ;;  %v4272_v8 = vld [vmem:[#allocation2 + $0x50] sm:$0xff] }
 0x3eb   : > { %3856 = vst.msk [vmem:[#allocation2 + $0xe0] sm:$0xff] %vm1293_vm5, %v3821_v20  ;;  %v9554_v60 = vpop.f32.mrb[98].mxu0 }
 0x3ec   : > { %3859 = vst.msk [vmem:[#allocation2 + $0xf8] sm:$0xff] %vm1293_vm5, %v9554_v60  ;;  %v3824_v61 = vpop.f32.mrb[99].mxu0 }
 0x3ed   : > { %3857 = vst.msk [vmem:[#allocation2 + $0xe8] sm:$0xff] %vm1293_vm5, %v3824_v61 }
 0x3f1   : > { %v9557_v34 = vpop.f32.mrb[100].mxu0 }
 0x3f2   : > { %3862 = vst.msk [vmem:[#allocation2 + $0x110] sm:$0xff] %vm1293_vm5, %v9557_v34  ;;  %v9589_v10 = vpop.f32.mrb[156].mxu1  ;;  %v3837_v49 = vpop.f32.mrb[101].mxu0  ;;  %v4270_v34 = vld [vmem:[#allocation2 + $0x40] sm:$0xff] }
 0x3f3   : > { %4252 = vst.msk [vmem:[#allocation2 + $0x130] sm:$0xff] %vm1293_vm5, %v9589_v10  ;;  %3860 = vst.msk [vmem:[#allocation2 + $0x100] sm:$0xff] %vm1293_vm5, %v3837_v49  ;;  %v4203_v22 = vpop.f32.mrb[157].mxu1  ;;  %v9558_v54 = vpop.f32.mrb[102].mxu0 }
 0x3f4   : > { %4250 = vst.msk [vmem:[#allocation2 + $0x120] sm:$0xff] %vm1293_vm5, %v4203_v22  ;;  %3863 = vst.msk [vmem:[#allocation2 + $0x118] sm:$0xff] %vm1293_vm5, %v9558_v54  ;;  %v9590_v52 = vpop.f32.mrb[158].mxu1  ;;  %v3840_v58 = vpop.f32.mrb[103].mxu0  ;;  %v4273_v54 = vld [vmem:[#allocation2 + $0x58] sm:$0xff] }
 0x3f5   : > { %4253 = vst.msk [vmem:[#allocation2 + $0x138] sm:$0xff] %vm1293_vm5, %v9590_v52  ;;  %3861 = vst.msk [vmem:[#allocation2 + $0x108] sm:$0xff] %vm1293_vm5, %v3840_v58  ;;  %v4206_v48 = vpop.f32.mrb[159].mxu1 }
 0x3f6   : > { %4251 = vst.msk [vmem:[#allocation2 + $0x128] sm:$0xff] %vm1293_vm5, %v4206_v48 }
 0x3f9   : > { %v9607_v24 = vpop.f32.mrb[104].mxu0 }
 0x3fa   : > { %v9593_v40 = vpop.f32.mrb[160].mxu1  ;;  %v4656_v23 = vadd.f32 %v9607_v24, %v4264_v7  ;;  %v4463_v28 = vpop.f32.mrb[105].mxu0  ;;  %v4271_v7 = vld [vmem:[#allocation2 + $0x48] sm:$0xff] }
 0x3fb   : > { %4256 = vst.msk [vmem:[#allocation2 + $0x150] sm:$0xff] %vm1293_vm5, %v9593_v40  ;;  %v4219_v38 = vpop.f32.mrb[161].mxu1  ;;  %v4654_v41 = vadd.f32 %v4463_v28, %v4262_v56  ;;  %v9608_v14 = vpop.f32.mrb[106].mxu0 }
 0x3fc   : > { %v4711_v63 = vadd.f32 %v12014_v18, %v4656_v23  ;;  %4254 = vst.msk [vmem:[#allocation2 + $0x140] sm:$0xff] %vm1293_vm5, %v4219_v38  ;;  %v9594_v59 = vpop.f32.mrb[162].mxu1  ;;  %v4657_v47 = vadd.f32 %v9608_v14, %v4265_v6  ;;  %v4466_v55 = vpop.f32.mrb[107].mxu0 }
 0x3fd   : > { %v4709_v51 = vadd.f32 %v12014_v18, %v4654_v41  ;;  %4257 = vst.msk [vmem:[#allocation2 + $0x158] sm:$0xff] %vm1293_vm5, %v9594_v59  ;;  %v4222_v50 = vpop.f32.mrb[163].mxu1  ;;  %v4655_v57 = vadd.f32 %v4466_v55, %v4263_v32  ;;  %v4274_v55 = vld [vmem:[#allocation2 + $0x60] sm:$0xff] }
 0x3fe   : > { %v4712_v0 = vadd.f32 %v12014_v18, %v4657_v47  ;;  %4255 = vst.msk [vmem:[#allocation2 + $0x148] sm:$0xff] %vm1293_vm5, %v4222_v50  ;;  %v4759_v31 = vmax.f32 %v4711_v63, 0.0  ;;  %v4276_v63 = vld [vmem:[#allocation2 + $0x70] sm:$0xff] }
 0x3ff   : > { %v4710_v46 = vadd.f32 %v12014_v18, %v4655_v57  ;;  %v4757_v11 = vmax.f32 %v4709_v51, 0.0 }
 0x400   : > { %v4760_v13 = vmax.f32 %v4712_v0, 0.0  ;;  %v4277_v0 = vld [vmem:[#allocation2 + $0x78] sm:$0xff] }
 0x401   : > { %v4758_v36 = vmax.f32 %v4710_v46, 0.0  ;;  %v9611_v26 = vpop.f32.mrb[108].mxu0 }
 0x402   : > { %v4811_v3 = vpack.c.bf16 %v4760_v13, %v4759_v31  ;;  %v9597_v1 = vpop.f32.mrb[164].mxu1  ;;  %v4660_v35 = vadd.f32 %v9611_v26, %v4268_v15  ;;  %v4479_v33 = vpop.f32.mrb[109].mxu0 }
 0x403   : > { %v4810_v30 = vpack.c.bf16 %v4758_v36, %v4757_v11  ;;  %4260 = vst.msk [vmem:[#allocation2 + $0x170] sm:$0xff] %vm1293_vm5, %v9597_v1  ;;  %v4235_v37 = vpop.f32.mrb[165].mxu1  ;;  %v4658_v19 = vadd.f32 %v4479_v33, %v4266_v16  ;;  %v9612_v17 = vpop.f32.mrb[110].mxu0  ;;  %v4275_v11 = vld [vmem:[#allocation2 + $0x68] sm:$0xff] }
 0x404   : > { %v4715_v25 = vadd.f32 %v12014_v18, %v4660_v35  ;;  %4258 = vst.msk [vmem:[#allocation2 + $0x160] sm:$0xff] %vm1293_vm5, %v4235_v37  ;;  %v9598_v53 = vpop.f32.mrb[166].mxu1  ;;  %v4661_v2 = vadd.f32 %v9612_v17, %v4269_v5  ;;  %v4482_v4 = vpop.f32.mrb[111].mxu0  ;;  %v4280_v37 = vld [vmem:[#allocation2 + $0x90] sm:$0xff] }
 0x405   : > { %v4713_v9 = vadd.f32 %v12014_v18, %v4658_v19  ;;  %4261 = vst.msk [vmem:[#allocation2 + $0x178] sm:$0xff] %vm1293_vm5, %v9598_v53  ;;  %v4238_v21 = vpop.f32.mrb[167].mxu1  ;;  %v4659_v27 = vadd.f32 %v4482_v4, %v4267_v42  ;;  %9659 = vmatprep.mubr.msk.bf16.mxu1 %vm1293_vm5, %v4810_v30  ;;  %v4281_v4 = vld [vmem:[#allocation2 + $0x98] sm:$0xff] }
 0x406   : > { %v4716_v44 = vadd.f32 %v12014_v18, %v4661_v2  ;;  %4259 = vst.msk [vmem:[#allocation2 + $0x168] sm:$0xff] %vm1293_vm5, %v4238_v21  ;;  %9660 = vmatmul.mubr.msk.bf16.vlgmr.msra.gmra.mrb[168].mxu1 %vm1293_vm5, %v4811_v3  ;;  %v4763_v29 = vmax.f32 %v4715_v25, 0.0  ;;  %v4278_v25 = vld [vmem:[#allocation2 + $0x80] sm:$0xff] }
 0x407   : > { %v4714_v39 = vadd.f32 %v12014_v18, %v4659_v27  ;;  %v4761_v62 = vmax.f32 %v4713_v9, 0.0 }
 0x408   : > { %v4764_v43 = vmax.f32 %v4716_v44, 0.0  ;;  %v4279_v44 = vld [vmem:[#allocation2 + $0x88] sm:$0xff] }
 0x409   : > { %v4762_v45 = vmax.f32 %v4714_v39, 0.0  ;;  %v9615_v20 = vpop.f32.mrb[112].mxu0 }
 0x40a   : > { %v4813_v60 = vpack.c.bf16 %v4764_v43, %v4763_v29  ;;  %v4664_v61 = vadd.f32 %v9615_v20, %v4272_v8  ;;  %v4495_v10 = vpop.f32.mrb[113].mxu0 }
 0x40b   : > { %v4812_v49 = vpack.c.bf16 %v4762_v45, %v4761_v62  ;;  %v4662_v22 = vadd.f32 %v4495_v10, %v4270_v34  ;;  %v9616_v52 = vpop.f32.mrb[114].mxu0  ;;  %v4284_v34 = vld [vmem:[#allocation2 + $0xb0] sm:$0xff] }
 0x40c   : > { %v4719_v58 = vadd.f32 %v12014_v18, %v4664_v61  ;;  %v4665_v48 = vadd.f32 %v9616_v52, %v4273_v54  ;;  %v4498_v24 = vpop.f32.mrb[115].mxu0  ;;  %v4282_v54 = vld [vmem:[#allocation2 + $0xa0] sm:$0xff] }
 0x40d   : > { %v4717_v40 = vadd.f32 %v12014_v18, %v4662_v22  ;;  %v4663_v23 = vadd.f32 %v4498_v24, %v4271_v7  ;;  %9663 = vmatprep.mubr.msk.bf16.mxu1 %vm1293_vm5, %v4812_v49  ;;  %v4285_v7 = vld [vmem:[#allocation2 + $0xb8] sm:$0xff] }
 0x40e   : > { %v4720_v56 = vadd.f32 %v12014_v18, %v4665_v48  ;;  %9664 = vmatmul.mubr.msk.bf16.gmra.mrb[172].mxu1 %vm1293_vm5, %v4813_v60  ;;  %v4767_v38 = vmax.f32 %v4719_v58, 0.0 }
 0x40f   : > { %v4718_v28 = vadd.f32 %v12014_v18, %v4663_v23  ;;  %v4765_v6 = vmax.f32 %v4717_v40, 0.0 }
 0x410   : > { %v4768_v41 = vmax.f32 %v4720_v56, 0.0  ;;  %v4283_v56 = vld [vmem:[#allocation2 + $0xa8] sm:$0xff] }
 0x411   : > { %v4766_v14 = vmax.f32 %v4718_v28, 0.0  ;;  %v9619_v59 = vpop.f32.mrb[116].mxu0 }
 0x412   : > { %v4815_v47 = vpack.c.bf16 %v4768_v41, %v4767_v38  ;;  %v4668_v32 = vadd.f32 %v9619_v59, %v4276_v63  ;;  %v4511_v51 = vpop.f32.mrb[117].mxu0 }
 0x413   : > { %v4814_v50 = vpack.c.bf16 %v4766_v14, %v4765_v6  ;;  %v4666_v57 = vadd.f32 %v4511_v51, %v4274_v55  ;;  %v9620_v46 = vpop.f32.mrb[118].mxu0  ;;  %v4288_v55 = vld [vmem:[#allocation2 + $0xd0] sm:$0xff] }
 0x414   : > { %v4723_v31 = vadd.f32 %v12014_v18, %v4668_v32  ;;  %v4669_v13 = vadd.f32 %v9620_v46, %v4277_v0  ;;  %v4514_v36 = vpop.f32.mrb[119].mxu0  ;;  %v4286_v0 = vld [vmem:[#allocation2 + $0xc0] sm:$0xff] }
 0x415   : > { %v4721_v15 = vadd.f32 %v12014_v18, %v4666_v57  ;;  %v4667_v26 = vadd.f32 %v4514_v36, %v4275_v11  ;;  %9667 = vmatprep.mubr.msk.bf16.mxu1 %vm1293_vm5, %v4814_v50  ;;  %v4289_v11 = vld [vmem:[#allocation2 + $0xd8] sm:$0xff] }
 0x416   : > { %v4724_v3 = vadd.f32 %v12014_v18, %v4669_v13  ;;  %9668 = vmatmul.mubr.msk.bf16.gmra.mrb[176].mxu1 %vm1293_vm5, %v4815_v47  ;;  %v4771_v35 = vmax.f32 %v4723_v31, 0.0 }
 0x417   : > { %v4722_v1 = vadd.f32 %v12014_v18, %v4667_v26  ;;  %v4769_v33 = vmax.f32 %v4721_v15, 0.0 }
 0x418   : > { %v4772_v16 = vmax.f32 %v4724_v3, 0.0  ;;  %v4287_v3 = vld [vmem:[#allocation2 + $0xc8] sm:$0xff] }
 0x419   : > { %v4770_v30 = vmax.f32 %v4722_v1, 0.0  ;;  %v9623_v19 = vpop.f32.mrb[120].mxu0 }
 0x41a   : > { %v4817_v5 = vpack.c.bf16 %v4772_v16, %v4771_v35  ;;  %v4672_v17 = vadd.f32 %v9623_v19, %v4280_v37  ;;  %v4527_v53 = vpop.f32.mrb[121].mxu0 }
 0x41b   : > { %v4816_v2 = vpack.c.bf16 %v4770_v30, %v4769_v33  ;;  %v4670_v42 = vadd.f32 %v4527_v53, %v4278_v25  ;;  %v9624_v9 = vpop.f32.mrb[122].mxu0  ;;  %v4292_v25 = vld [vmem:[#allocation2 + $0xf0] sm:$0xff] }
 0x41c   : > { %v4727_v21 = vadd.f32 %v12014_v18, %v4672_v17  ;;  %v4673_v27 = vadd.f32 %v9624_v9, %v4281_v4  ;;  %v4530_v39 = vpop.f32.mrb[123].mxu0  ;;  %v4290_v4 = vld [vmem:[#allocation2 + $0xe0] sm:$0xff] }
 0x41d   : > { %v4725_v29 = vadd.f32 %v12014_v18, %v4670_v42  ;;  %v4671_v43 = vadd.f32 %v4530_v39, %v4279_v44  ;;  %9671 = vmatprep.mubr.msk.bf16.mxu1 %vm1293_vm5, %v4816_v2  ;;  %v4293_v44 = vld [vmem:[#allocation2 + $0xf8] sm:$0xff] }
 0x41e   : > { %v4728_v62 = vadd.f32 %v12014_v18, %v4673_v27  ;;  %9672 = vmatmul.mubr.msk.bf16.gmra.mrb[180].mxu1 %vm1293_vm5, %v4817_v5  ;;  %v4775_v8 = vmax.f32 %v4727_v21, 0.0 }
 0x41f   : > { %v4726_v45 = vadd.f32 %v12014_v18, %v4671_v43  ;;  %v4773_v60 = vmax.f32 %v4725_v29, 0.0 }
 0x420   : > { %v4776_v20 = vmax.f32 %v4728_v62, 0.0  ;;  %v4291_v62 = vld [vmem:[#allocation2 + $0xe8] sm:$0xff] }
 0x421   : > { %v4774_v61 = vmax.f32 %v4726_v45, 0.0  ;;  %v9627_v10 = vpop.f32.mrb[124].mxu0 }
 0x422   : > { %v4819_v49 = vpack.c.bf16 %v4776_v20, %v4775_v8  ;;  %v4676_v22 = vadd.f32 %v9627_v10, %v4284_v34  ;;  %v4543_v52 = vpop.f32.mrb[125].mxu0 }
 0x423   : > { %v4818_v58 = vpack.c.bf16 %v4774_v61, %v4773_v60  ;;  %v4674_v48 = vadd.f32 %v4543_v52, %v4282_v54  ;;  %v9628_v24 = vpop.f32.mrb[126].mxu0  ;;  %v4296_v54 = vld [vmem:[#allocation2 + $0x110] sm:$0xff] }
 0x424   : > { %v4731_v40 = vadd.f32 %v12014_v18, %v4676_v22  ;;  %v4677_v23 = vadd.f32 %v9628_v24, %v4285_v7  ;;  %v4546_v28 = vpop.f32.mrb[127].mxu0  ;;  %v4294_v7 = vld [vmem:[#allocation2 + $0x100] sm:$0xff] }
 0x425   : > { %v4729_v38 = vadd.f32 %v12014_v18, %v4674_v48  ;;  %v4675_v41 = vadd.f32 %v4546_v28, %v4283_v56  ;;  %9675 = vmatprep.mubr.msk.bf16.mxu1 %vm1293_vm5, %v4818_v58  ;;  %v4297_v56 = vld [vmem:[#allocation2 + $0x118] sm:$0xff] }
 0x426   : > { %v4732_v6 = vadd.f32 %v12014_v18, %v4677_v23  ;;  %9676 = vmatmul.mubr.msk.bf16.gmra.mrb[184].mxu1 %vm1293_vm5, %v4819_v49  ;;  %v4779_v63 = vmax.f32 %v4731_v40, 0.0 }
 0x427   : > { %v4730_v14 = vadd.f32 %v12014_v18, %v4675_v41  ;;  %v4777_v47 = vmax.f32 %v4729_v38, 0.0 }
 0x428   : > { %v4780_v59 = vmax.f32 %v4732_v6, 0.0  ;;  %v4295_v6 = vld [vmem:[#allocation2 + $0x108] sm:$0xff] }
 0x429   : > { %v4778_v32 = vmax.f32 %v4730_v14, 0.0  ;;  %v9631_v51 = vpop.f32.mrb[128].mxu0 }
 0x42a   : > { %v4821_v50 = vpack.c.bf16 %v4780_v59, %v4779_v63  ;;  %v4680_v57 = vadd.f32 %v9631_v51, %v4288_v55  ;;  %v4559_v46 = vpop.f32.mrb[129].mxu0 }
 0x42b   : > { %v4820_v31 = vpack.c.bf16 %v4778_v32, %v4777_v47  ;;  %v4678_v13 = vadd.f32 %v4559_v46, %v4286_v0  ;;  %v9632_v36 = vpop.f32.mrb[130].mxu0  ;;  %v4300_v0 = vld [vmem:[#allocation2 + $0x130] sm:$0xff] }
 0x42c   : > { %v4735_v15 = vadd.f32 %v12014_v18, %v4680_v57  ;;  %v4681_v26 = vadd.f32 %v9632_v36, %v4289_v11  ;;  %v4562_v1 = vpop.f32.mrb[131].mxu0  ;;  %v4298_v11 = vld [vmem:[#allocation2 + $0x120] sm:$0xff] }
 0x42d   : > { %v4733_v35 = vadd.f32 %v12014_v18, %v4678_v13  ;;  %v4679_v16 = vadd.f32 %v4562_v1, %v4287_v3  ;;  %9679 = vmatprep.mubr.msk.bf16.mxu1 %vm1293_vm5, %v4820_v31  ;;  %v4301_v3 = vld [vmem:[#allocation2 + $0x138] sm:$0xff] }
 0x42e   : > { %v4736_v33 = vadd.f32 %v12014_v18, %v4681_v26  ;;  %9680 = vmatmul.mubr.msk.bf16.gmra.mrb[188].mxu1 %vm1293_vm5, %v4821_v50  ;;  %v4783_v37 = vmax.f32 %v4735_v15, 0.0 }
 0x42f   : > { %v4734_v30 = vadd.f32 %v12014_v18, %v4679_v16  ;;  %v4781_v5 = vmax.f32 %v4733_v35, 0.0 }
 0x430   : > { %v4784_v19 = vmax.f32 %v4736_v33, 0.0  ;;  %v4299_v33 = vld [vmem:[#allocation2 + $0x128] sm:$0xff] }
 0x431   : > { %v4782_v17 = vmax.f32 %v4734_v30, 0.0  ;;  %v9635_v53 = vpop.f32.mrb[132].mxu0 }
 0x432   : > { %v4823_v2 = vpack.c.bf16 %v4784_v19, %v4783_v37  ;;  %v4684_v42 = vadd.f32 %v9635_v53, %v4292_v25  ;;  %v4575_v9 = vpop.f32.mrb[133].mxu0 }
 0x433   : > { %v4822_v21 = vpack.c.bf16 %v4782_v17, %v4781_v5  ;;  %v4682_v27 = vadd.f32 %v4575_v9, %v4290_v4  ;;  %v9636_v39 = vpop.f32.mrb[134].mxu0  ;;  %v4304_v4 = vld [vmem:[#allocation2 + $0x150] sm:$0xff] }
 0x434   : > { %v4739_v29 = vadd.f32 %v12014_v18, %v4684_v42  ;;  %v4685_v43 = vadd.f32 %v9636_v39, %v4293_v44  ;;  %v4578_v45 = vpop.f32.mrb[135].mxu0  ;;  %v4302_v44 = vld [vmem:[#allocation2 + $0x140] sm:$0xff] }
 0x435   : > { %v4737_v8 = vadd.f32 %v12014_v18, %v4682_v27  ;;  %v4683_v20 = vadd.f32 %v4578_v45, %v4291_v62  ;;  %9683 = vmatprep.mubr.msk.bf16.mxu1 %vm1293_vm5, %v4822_v21  ;;  %v4305_v62 = vld [vmem:[#allocation2 + $0x158] sm:$0xff] }
 0x436   : > { %v4740_v60 = vadd.f32 %v12014_v18, %v4685_v43  ;;  %9684 = vmatmul.mubr.msk.bf16.gmra.mrb[192].mxu1 %vm1293_vm5, %v4823_v2  ;;  %v4787_v34 = vmax.f32 %v4739_v29, 0.0 }
 0x437   : > { %v4738_v61 = vadd.f32 %v12014_v18, %v4683_v20  ;;  %v4785_v49 = vmax.f32 %v4737_v8, 0.0 }
 0x438   : > { %v4788_v10 = vmax.f32 %v4740_v60, 0.0  ;;  %v4303_v60 = vld [vmem:[#allocation2 + $0x148] sm:$0xff] }
 0x439   : > { %v4786_v22 = vmax.f32 %v4738_v61, 0.0  ;;  %v9639_v52 = vpop.f32.mrb[136].mxu0 }
 0x43a   : > { %v4825_v58 = vpack.c.bf16 %v4788_v10, %v4787_v34  ;;  %v4688_v48 = vadd.f32 %v9639_v52, %v4296_v54  ;;  %v4591_v24 = vpop.f32.mrb[137].mxu0 }
 0x43b   : > { %v4824_v40 = vpack.c.bf16 %v4786_v22, %v4785_v49  ;;  %v4686_v23 = vadd.f32 %v4591_v24, %v4294_v7  ;;  %v9640_v28 = vpop.f32.mrb[138].mxu0  ;;  %v4308_v7 = vld [vmem:[#allocation2 + $0x170] sm:$0xff] }
 0x43c   : > { %v4743_v38 = vadd.f32 %v12014_v18, %v4688_v48  ;;  %v4689_v41 = vadd.f32 %v9640_v28, %v4297_v56  ;;  %v4594_v14 = vpop.f32.mrb[139].mxu0  ;;  %v4306_v56 = vld [vmem:[#allocation2 + $0x160] sm:$0xff] }
 0x43d   : > { %v4741_v63 = vadd.f32 %v12014_v18, %v4686_v23  ;;  %v4687_v59 = vadd.f32 %v4594_v14, %v4295_v6  ;;  %9687 = vmatprep.mubr.msk.bf16.mxu1 %vm1293_vm5, %v4824_v40  ;;  %v4309_v6 = vld [vmem:[#allocation2 + $0x178] sm:$0xff] }
 0x43e   : > { %v4744_v47 = vadd.f32 %v12014_v18, %v4689_v41  ;;  %9688 = vmatmul.mubr.msk.bf16.gmra.mrb[196].mxu1 %vm1293_vm5, %v4825_v58  ;;  %v4791_v55 = vmax.f32 %v4743_v38, 0.0 }
 0x43f   : > { %v4742_v32 = vadd.f32 %v12014_v18, %v4687_v59  ;;  %v4789_v50 = vmax.f32 %v4741_v63, 0.0 }
 0x440   : > { %v4792_v51 = vmax.f32 %v4744_v47, 0.0  ;;  %v4307_v47 = vld [vmem:[#allocation2 + $0x168] sm:$0xff] }
 0x441   : > { %v4790_v57 = vmax.f32 %v4742_v32, 0.0  ;;  %v9643_v46 = vpop.f32.mrb[140].mxu0 }
 0x442   : > { %v4827_v31 = vpack.c.bf16 %v4792_v51, %v4791_v55  ;;  %v4692_v13 = vadd.f32 %v9643_v46, %v4300_v0  ;;  %v4607_v36 = vpop.f32.mrb[141].mxu0 }
 0x443   : > { %v4826_v15 = vpack.c.bf16 %v4790_v57, %v4789_v50  ;;  %v4690_v26 = vadd.f32 %v4607_v36, %v4298_v11  ;;  %v9644_v1 = vpop.f32.mrb[142].mxu0 }
 0x444   : > { %v4747_v35 = vadd.f32 %v12014_v18, %v4692_v13  ;;  %v4693_v16 = vadd.f32 %v9644_v1, %v4301_v3  ;;  %v4610_v30 = vpop.f32.mrb[143].mxu0  ;;  %v10250_v3 = vld [vmem:[%s12852_s18 + $0x8] sm:$0xff]   ;;  %v12110_v1 = vld [vmem:[%s12848_s14] ss:$0 sm:$0xff] }
 0x445   : > { %v4745_v37 = vadd.f32 %v12014_v18, %v4690_v26  ;;  %v4691_v19 = vadd.f32 %v4610_v30, %v4299_v33  ;;  %9691 = vmatprep.mubr.msk.bf16.mxu1 %vm1293_vm5, %v4826_v15  ;;  %v10248_v15 = vld [vmem:[%s12849_s15 + $0x10] ss:$0 sps:$4 sm:$0xff]  }
 0x446   : > { %v4748_v5 = vadd.f32 %v12014_v18, %v4693_v16  ;;  %9692 = vmatmul.mubr.msk.bf16.gmra.mrb[200].mxu1 %vm1293_vm5, %v4827_v31  ;;  %v4795_v25 = vmax.f32 %v4747_v35, 0.0  ;;  %10207 = vmatprep.subr.msk.bf16.mxu0 %vm1342_vm4, %v10248_v15  ;;  %v5328_v26 = vsel %vm1342_vm4, %v10248_v15, 0 }
 0x447   : > { %v4746_v17 = vadd.f32 %v12014_v18, %v4691_v19  ;;  %v4793_v2 = vmax.f32 %v4745_v37, 0.0  ;;  %9712 = vmatpush3.bf16.msra.mxu0 %v5328_v26 }
 0x448   : > { %v4796_v53 = vmax.f32 %v4748_v5, 0.0 }
 0x449   : > { %v4794_v42 = vmax.f32 %v4746_v17, 0.0  ;;  %v9647_v9 = vpop.f32.mrb[144].mxu0 }
 0x44a   : > { %v4829_v21 = vpack.c.bf16 %v4796_v53, %v4795_v25  ;;  %v4696_v27 = vadd.f32 %v9647_v9, %v4304_v4  ;;  %v4623_v39 = vpop.f32.mrb[145].mxu0 }
 0x44b   : > { %v4828_v29 = vpack.c.bf16 %v4794_v42, %v4793_v2  ;;  %v4694_v43 = vadd.f32 %v4623_v39, %v4302_v44  ;;  %v9648_v45 = vpop.f32.mrb[146].mxu0 }
 0x44c   : > { %v4751_v8 = vadd.f32 %v12014_v18, %v4696_v27  ;;  %v4697_v20 = vadd.f32 %v9648_v45, %v4305_v62  ;;  %v4626_v61 = vpop.f32.mrb[147].mxu0 }
 0x44d   : > { %v4749_v34 = vadd.f32 %v12014_v18, %v4694_v43  ;;  %v4695_v10 = vadd.f32 %v4626_v61, %v4303_v60  ;;  %9695 = vmatprep.mubr.msk.bf16.mxu1 %vm1293_vm5, %v4828_v29 }
 0x44e   : > { %v4752_v49 = vadd.f32 %v12014_v18, %v4697_v20  ;;  %9696 = vmatmul.mubr.msk.bf16.gmra.mrb[204].mxu1 %vm1293_vm5, %v4829_v21  ;;  %v4799_v54 = vmax.f32 %v4751_v8, 0.0 }
 0x44f   : > { %v4750_v22 = vadd.f32 %v12014_v18, %v4695_v10  ;;  %v4797_v58 = vmax.f32 %v4749_v34, 0.0 }
 0x450   : > { %v4800_v52 = vmax.f32 %v4752_v49, 0.0 }
 0x451   : > { %v4798_v48 = vmax.f32 %v4750_v22, 0.0  ;;  %v9651_v24 = vpop.f32.mrb[148].mxu0 }
 0x452   : > { %v4831_v40 = vpack.c.bf16 %v4800_v52, %v4799_v54  ;;  %v4700_v23 = vadd.f32 %v9651_v24, %v4308_v7  ;;  %v4639_v28 = vpop.f32.mrb[149].mxu0 }
 0x453   : > { %v4830_v38 = vpack.c.bf16 %v4798_v48, %v4797_v58  ;;  %v4698_v41 = vadd.f32 %v4639_v28, %v4306_v56  ;;  %v9652_v14 = vpop.f32.mrb[150].mxu0 }
 0x454   : > { %v4755_v63 = vadd.f32 %v12014_v18, %v4700_v23  ;;  %v4701_v59 = vadd.f32 %v9652_v14, %v4309_v6  ;;  %v4642_v32 = vpop.f32.mrb[151].mxu0 }
 0x455   : > { %v4753_v55 = vadd.f32 %v12014_v18, %v4698_v41  ;;  %v4699_v51 = vadd.f32 %v4642_v32, %v4307_v47  ;;  %9699 = vmatprep.mubr.msk.bf16.mxu1 %vm1293_vm5, %v4830_v38 }
 0x456   : > { %v4756_v50 = vadd.f32 %v12014_v18, %v4701_v59  ;;  %9700 = vmatmul.mubr.msk.bf16.gmra.mrb[208].mxu1 %vm1293_vm5, %v4831_v40  ;;  %v4803_v0 = vmax.f32 %v4755_v63, 0.0 }
 0x457   : > { %v4754_v57 = vadd.f32 %v12014_v18, %v4699_v51  ;;  %v4801_v31 = vmax.f32 %v4753_v55, 0.0  ;;  %v10249_v18 = vld [vmem:[%s12852_s18] sm:$0xff]  }
 0x458   : > { %v4804_v46 = vmax.f32 %v4756_v50, 0.0  ;;  %9761 = vmatprep.subr.bf16.mxu1 %v10249_v18 }
 0x459   : > { %v4802_v13 = vmax.f32 %v4754_v57, 0.0  ;;  %9762 = vmatpush3.bf16.msra.mxu1 %v10249_v18 }
 0x45a   : > { %v4833_v11 = vpack.c.bf16 %v4804_v46, %v4803_v0  ;;  %9763 = vmatprep.subr.bf16.mxu1 %v10250_v3 }
 0x45b   : > { %v4832_v36 = vpack.c.bf16 %v4802_v13, %v4801_v31 }
 0x45d   : > { %9703 = vmatprep.mubr.msk.bf16.mxu1 %vm1293_vm5, %v4832_v36  ;;  %9764 = vmatpush3.bf16.msra.mxu1 %v10250_v3 }
 0x45e   : > { %9704 = vmatmul.mubr.msk.bf16.gmra.mrb[212].mxu1 %vm1293_vm5, %v4833_v11 }
 0x4d9   : > { %v9661_v35 = vpop.f32.mrb[168].mxu1 }
 0x4da   : > { %v4974_v16 = vadd.f32 %v9661_v35, %v12110_v1  ;;  %v4965_v33 = vpop.f32.mrb[169].mxu1 }
 0x4db   : > { %v4966_v30 = vadd.f32 %v12110_v1, %v4965_v33  ;;  %v9662_v37 = vpop.f32.mrb[170].mxu1 }
 0x4dc   : > { %v4977_v19 = vadd.f32 %v9662_v37, %v12110_v1  ;;  %v4968_v5 = vpop.f32.mrb[171].mxu1  ;;  %v5158_v25 = vmax.f32 %v4974_v16, 0.0 }
 0x4dd   : > { %v4969_v17 = vadd.f32 %v12110_v1, %v4968_v5  ;;  %v5156_v2 = vmax.f32 %v4966_v30, 0.0 }
 0x4de   : > { %v5159_v53 = vmax.f32 %v4977_v19, 0.0 }
 0x4df   : > { %v5157_v42 = vmax.f32 %v4969_v17, 0.0 }
 0x4e0   : > { %v5210_v4 = vpack.c.bf16 %v5159_v53, %v5158_v25 }
 0x4e1   : > { %v5209_v9 = vpack.c.bf16 %v5157_v42, %v5156_v2  ;;  %v9665_v21 = vpop.f32.mrb[172].mxu1 }
 0x4e2   : > { %v4990_v27 = vadd.f32 %v9665_v21, %v12110_v1  ;;  %v4981_v44 = vpop.f32.mrb[173].mxu1 }
 0x4e3   : > { %v4982_v39 = vadd.f32 %v12110_v1, %v4981_v44  ;;  %v9666_v29 = vpop.f32.mrb[174].mxu1  ;;  %9713 = vmatprep.mubr.msk.bf16.mxu0 %vm1293_vm5, %v5209_v9 }
 0x4e4   : > { %v4993_v43 = vadd.f32 %v9666_v29, %v12110_v1  ;;  %v4984_v62 = vpop.f32.mrb[175].mxu1  ;;  %9714 = vmatmul.mubr.msk.bf16.vlgmr.msra.gmra.mrb[152].mxu0 %vm1293_vm5, %v5210_v4  ;;  %v5162_v8 = vmax.f32 %v4990_v27, 0.0 }
 0x4e5   : > { %v4985_v45 = vadd.f32 %v12110_v1, %v4984_v62  ;;  %v5160_v60 = vmax.f32 %v4982_v39, 0.0 }
 0x4e6   : > { %v5163_v20 = vmax.f32 %v4993_v43, 0.0 }
 0x4e7   : > { %v5161_v61 = vmax.f32 %v4985_v45, 0.0 }
 0x4e8   : > { %v5212_v34 = vpack.c.bf16 %v5163_v20, %v5162_v8 }
 0x4e9   : > { %v5211_v10 = vpack.c.bf16 %v5161_v61, %v5160_v60  ;;  %v9669_v49 = vpop.f32.mrb[176].mxu1 }
 0x4ea   : > { %v5006_v22 = vadd.f32 %v9669_v49, %v12110_v1  ;;  %v4997_v54 = vpop.f32.mrb[177].mxu1 }
 0x4eb   : > { %v4998_v52 = vadd.f32 %v12110_v1, %v4997_v54  ;;  %v9670_v58 = vpop.f32.mrb[178].mxu1  ;;  %9717 = vmatprep.mubr.msk.bf16.mxu0 %vm1293_vm5, %v5211_v10 }
 0x4ec   : > { %v5009_v48 = vadd.f32 %v9670_v58, %v12110_v1  ;;  %v5000_v7 = vpop.f32.mrb[179].mxu1  ;;  %9718 = vmatmul.mubr.msk.bf16.gmra.mrb[156].mxu0 %vm1293_vm5, %v5212_v34  ;;  %v5166_v40 = vmax.f32 %v5006_v22, 0.0 }
 0x4ed   : > { %v5001_v24 = vadd.f32 %v12110_v1, %v5000_v7  ;;  %v5164_v56 = vmax.f32 %v4998_v52, 0.0 }
 0x4ee   : > { %v5167_v23 = vmax.f32 %v5009_v48, 0.0 }
 0x4ef   : > { %v5165_v28 = vmax.f32 %v5001_v24, 0.0 }
 0x4f0   : > { %v5214_v38 = vpack.c.bf16 %v5167_v23, %v5166_v40 }
 0x4f1   : > { %v5213_v41 = vpack.c.bf16 %v5165_v28, %v5164_v56  ;;  %v9673_v6 = vpop.f32.mrb[180].mxu1 }
 0x4f2   : > { %v5022_v14 = vadd.f32 %v9673_v6, %v12110_v1  ;;  %v5013_v63 = vpop.f32.mrb[181].mxu1 }
 0x4f3   : > { %v5014_v59 = vadd.f32 %v12110_v1, %v5013_v63  ;;  %v9674_v47 = vpop.f32.mrb[182].mxu1  ;;  %9721 = vmatprep.mubr.msk.bf16.mxu0 %vm1293_vm5, %v5213_v41 }
 0x4f4   : > { %v5025_v32 = vadd.f32 %v9674_v47, %v12110_v1  ;;  %v5016_v55 = vpop.f32.mrb[183].mxu1  ;;  %9722 = vmatmul.mubr.msk.bf16.gmra.mrb[160].mxu0 %vm1293_vm5, %v5214_v38  ;;  %v5170_v50 = vmax.f32 %v5022_v14, 0.0 }
 0x4f5   : > { %v5017_v51 = vadd.f32 %v12110_v1, %v5016_v55  ;;  %v5168_v0 = vmax.f32 %v5014_v59, 0.0 }
 0x4f6   : > { %v5171_v57 = vmax.f32 %v5025_v32, 0.0 }
 0x4f7   : > { %v5169_v46 = vmax.f32 %v5017_v51, 0.0 }
 0x4f8   : > { %v5216_v31 = vpack.c.bf16 %v5171_v57, %v5170_v50 }
 0x4f9   : > { %v5215_v13 = vpack.c.bf16 %v5169_v46, %v5168_v0  ;;  %v9677_v11 = vpop.f32.mrb[184].mxu1 }
 0x4fa   : > { %v5038_v36 = vadd.f32 %v9677_v11, %v12110_v1  ;;  %v5029_v15 = vpop.f32.mrb[185].mxu1 }
 0x4fb   : > { %v5030_v26 = vadd.f32 %v12110_v1, %v5029_v15  ;;  %v9678_v18 = vpop.f32.mrb[186].mxu1  ;;  %9725 = vmatprep.mubr.msk.bf16.mxu0 %vm1293_vm5, %v5215_v13 }
 0x4fc   : > { %v5041_v3 = vadd.f32 %v9678_v18, %v12110_v1  ;;  %v5032_v35 = vpop.f32.mrb[187].mxu1  ;;  %9726 = vmatmul.mubr.msk.bf16.gmra.mrb[164].mxu0 %vm1293_vm5, %v5216_v31  ;;  %v5174_v33 = vmax.f32 %v5038_v36, 0.0 }
 0x4fd   : > { %v5033_v16 = vadd.f32 %v12110_v1, %v5032_v35  ;;  %v5172_v37 = vmax.f32 %v5030_v26, 0.0 }
 0x4fe   : > { %v5175_v30 = vmax.f32 %v5041_v3, 0.0 }
 0x4ff   : > { %v5173_v19 = vmax.f32 %v5033_v16, 0.0 }
 0x500   : > { %v5218_v5 = vpack.c.bf16 %v5175_v30, %v5174_v33 }
 0x501   : > { %v5217_v17 = vpack.c.bf16 %v5173_v19, %v5172_v37  ;;  %v9681_v25 = vpop.f32.mrb[188].mxu1 }
 0x502   : > { %v5054_v53 = vadd.f32 %v9681_v25, %v12110_v1  ;;  %v5045_v2 = vpop.f32.mrb[189].mxu1 }
 0x503   : > { %v5046_v42 = vadd.f32 %v12110_v1, %v5045_v2  ;;  %v9682_v4 = vpop.f32.mrb[190].mxu1  ;;  %9729 = vmatprep.mubr.msk.bf16.mxu0 %vm1293_vm5, %v5217_v17 }
 0x504   : > { %v5057_v9 = vadd.f32 %v9682_v4, %v12110_v1  ;;  %v5048_v21 = vpop.f32.mrb[191].mxu1  ;;  %9730 = vmatmul.mubr.msk.bf16.gmra.mrb[168].mxu0 %vm1293_vm5, %v5218_v5  ;;  %v5178_v44 = vmax.f32 %v5054_v53, 0.0 }
 0x505   : > { %v5049_v27 = vadd.f32 %v12110_v1, %v5048_v21  ;;  %v5176_v29 = vmax.f32 %v5046_v42, 0.0 }
 0x506   : > { %v5179_v39 = vmax.f32 %v5057_v9, 0.0 }
 0x507   : > { %v5177_v43 = vmax.f32 %v5049_v27, 0.0 }
 0x508   : > { %v5220_v62 = vpack.c.bf16 %v5179_v39, %v5178_v44 }
 0x509   : > { %v5219_v45 = vpack.c.bf16 %v5177_v43, %v5176_v29  ;;  %v9685_v8 = vpop.f32.mrb[192].mxu1 }
 0x50a   : > { %v5070_v20 = vadd.f32 %v9685_v8, %v12110_v1  ;;  %v5061_v60 = vpop.f32.mrb[193].mxu1 }
 0x50b   : > { %v5062_v61 = vadd.f32 %v12110_v1, %v5061_v60  ;;  %v9686_v34 = vpop.f32.mrb[194].mxu1  ;;  %9733 = vmatprep.mubr.msk.bf16.mxu0 %vm1293_vm5, %v5219_v45 }
 0x50c   : > { %v5073_v10 = vadd.f32 %v9686_v34, %v12110_v1  ;;  %v5064_v49 = vpop.f32.mrb[195].mxu1  ;;  %9734 = vmatmul.mubr.msk.bf16.gmra.mrb[172].mxu0 %vm1293_vm5, %v5220_v62  ;;  %v5182_v54 = vmax.f32 %v5070_v20, 0.0 }
 0x50d   : > { %v5065_v22 = vadd.f32 %v12110_v1, %v5064_v49  ;;  %v5180_v58 = vmax.f32 %v5062_v61, 0.0 }
 0x50e   : > { %v5183_v52 = vmax.f32 %v5073_v10, 0.0 }
 0x50f   : > { %v5181_v48 = vmax.f32 %v5065_v22, 0.0 }
 0x510   : > { %v5222_v7 = vpack.c.bf16 %v5183_v52, %v5182_v54 }
 0x511   : > { %v5221_v24 = vpack.c.bf16 %v5181_v48, %v5180_v58  ;;  %v9689_v40 = vpop.f32.mrb[196].mxu1 }
 0x512   : > { %v5086_v23 = vadd.f32 %v9689_v40, %v12110_v1  ;;  %v5077_v56 = vpop.f32.mrb[197].mxu1 }
 0x513   : > { %v5078_v28 = vadd.f32 %v12110_v1, %v5077_v56  ;;  %v9690_v38 = vpop.f32.mrb[198].mxu1  ;;  %9737 = vmatprep.mubr.msk.bf16.mxu0 %vm1293_vm5, %v5221_v24 }
 0x514   : > { %v5089_v41 = vadd.f32 %v9690_v38, %v12110_v1  ;;  %v5080_v6 = vpop.f32.mrb[199].mxu1  ;;  %9738 = vmatmul.mubr.msk.bf16.gmra.mrb[176].mxu0 %vm1293_vm5, %v5222_v7  ;;  %v5186_v63 = vmax.f32 %v5086_v23, 0.0 }
 0x515   : > { %v5081_v14 = vadd.f32 %v12110_v1, %v5080_v6  ;;  %v5184_v47 = vmax.f32 %v5078_v28, 0.0 }
 0x516   : > { %v5187_v59 = vmax.f32 %v5089_v41, 0.0 }
 0x517   : > { %v5185_v32 = vmax.f32 %v5081_v14, 0.0 }
 0x518   : > { %v5224_v55 = vpack.c.bf16 %v5187_v59, %v5186_v63  ;;  %v10251_v63 = vld [vmem:[%s12852_s18 + $0x10] ss:$0 sps:$4 sm:$0xff]  }
 0x519   : > { %v5223_v51 = vpack.c.bf16 %v5185_v32, %v5184_v47  ;;  %v9693_v50 = vpop.f32.mrb[200].mxu1  ;;  %10208 = vmatprep.subr.msk.bf16.mxu1 %vm1342_vm4, %v10251_v63  ;;  %v5672_v59 = vsel %vm1342_vm4, %v10251_v63, 0  ;;  %v12192_v47 = vld [vmem:[%s12850_s16] ss:$0 sm:$0xff] }
 0x51a   : > { %v5102_v57 = vadd.f32 %v9693_v50, %v12110_v1  ;;  %v5093_v0 = vpop.f32.mrb[201].mxu1  ;;  %9766 = vmatpush3.bf16.msra.mxu1 %v5672_v59 }
 0x51b   : > { %v5094_v46 = vadd.f32 %v12110_v1, %v5093_v0  ;;  %v9694_v31 = vpop.f32.mrb[202].mxu1  ;;  %9741 = vmatprep.mubr.msk.bf16.mxu0 %vm1293_vm5, %v5223_v51 }
 0x51c   : > { %v5105_v13 = vadd.f32 %v9694_v31, %v12110_v1  ;;  %v5096_v11 = vpop.f32.mrb[203].mxu1  ;;  %9742 = vmatmul.mubr.msk.bf16.gmra.mrb[180].mxu0 %vm1293_vm5, %v5224_v55  ;;  %v5190_v15 = vmax.f32 %v5102_v57, 0.0 }
 0x51d   : > { %v5097_v36 = vadd.f32 %v12110_v1, %v5096_v11  ;;  %v5188_v18 = vmax.f32 %v5094_v46, 0.0 }
 0x51e   : > { %v5191_v26 = vmax.f32 %v5105_v13, 0.0 }
 0x51f   : > { %v5189_v3 = vmax.f32 %v5097_v36, 0.0 }
 0x520   : > { %v5226_v35 = vpack.c.bf16 %v5191_v26, %v5190_v15 }
 0x521   : > { %v5225_v16 = vpack.c.bf16 %v5189_v3, %v5188_v18  ;;  %v9697_v33 = vpop.f32.mrb[204].mxu1 }
 0x522   : > { %v5118_v30 = vadd.f32 %v9697_v33, %v12110_v1  ;;  %v5109_v37 = vpop.f32.mrb[205].mxu1 }
 0x523   : > { %v5110_v19 = vadd.f32 %v12110_v1, %v5109_v37  ;;  %v9698_v5 = vpop.f32.mrb[206].mxu1  ;;  %9745 = vmatprep.mubr.msk.bf16.mxu0 %vm1293_vm5, %v5225_v16 }
 0x524   : > { %v5121_v17 = vadd.f32 %v9698_v5, %v12110_v1  ;;  %v5112_v25 = vpop.f32.mrb[207].mxu1  ;;  %9746 = vmatmul.mubr.msk.bf16.gmra.mrb[184].mxu0 %vm1293_vm5, %v5226_v35  ;;  %v5194_v2 = vmax.f32 %v5118_v30, 0.0 }
 0x525   : > { %v5113_v53 = vadd.f32 %v12110_v1, %v5112_v25  ;;  %v5192_v4 = vmax.f32 %v5110_v19, 0.0 }
 0x526   : > { %v5195_v42 = vmax.f32 %v5121_v17, 0.0 }
 0x527   : > { %v5193_v9 = vmax.f32 %v5113_v53, 0.0 }
 0x528   : > { %v5228_v21 = vpack.c.bf16 %v5195_v42, %v5194_v2 }
 0x529   : > { %v5227_v27 = vpack.c.bf16 %v5193_v9, %v5192_v4  ;;  %v9701_v44 = vpop.f32.mrb[208].mxu1 }
 0x52a   : > { %v5134_v39 = vadd.f32 %v9701_v44, %v12110_v1  ;;  %v5125_v29 = vpop.f32.mrb[209].mxu1 }
 0x52b   : > { %v5126_v43 = vadd.f32 %v12110_v1, %v5125_v29  ;;  %v9702_v62 = vpop.f32.mrb[210].mxu1  ;;  %9749 = vmatprep.mubr.msk.bf16.mxu0 %vm1293_vm5, %v5227_v27 }
 0x52c   : > { %v5137_v45 = vadd.f32 %v9702_v62, %v12110_v1  ;;  %v5128_v8 = vpop.f32.mrb[211].mxu1  ;;  %9750 = vmatmul.mubr.msk.bf16.gmra.mrb[188].mxu0 %vm1293_vm5, %v5228_v21  ;;  %v5198_v60 = vmax.f32 %v5134_v39, 0.0 }
 0x52d   : > { %v5129_v20 = vadd.f32 %v12110_v1, %v5128_v8  ;;  %v5196_v34 = vmax.f32 %v5126_v43, 0.0 }
 0x52e   : > { %v5199_v61 = vmax.f32 %v5137_v45, 0.0 }
 0x52f   : > { %v5197_v10 = vmax.f32 %v5129_v20, 0.0 }
 0x530   : > { %v5230_v49 = vpack.c.bf16 %v5199_v61, %v5198_v60 }
 0x531   : > { %v5229_v22 = vpack.c.bf16 %v5197_v10, %v5196_v34  ;;  %v9705_v54 = vpop.f32.mrb[212].mxu1 }
 0x532   : > { %v5150_v52 = vadd.f32 %v9705_v54, %v12110_v1  ;;  %v5141_v58 = vpop.f32.mrb[213].mxu1 }
 0x533   : > { %v5142_v48 = vadd.f32 %v12110_v1, %v5141_v58  ;;  %v9706_v7 = vpop.f32.mrb[214].mxu1  ;;  %9753 = vmatprep.mubr.msk.bf16.mxu0 %vm1293_vm5, %v5229_v22 }
 0x534   : > { %v5153_v24 = vadd.f32 %v9706_v7, %v12110_v1  ;;  %v5144_v40 = vpop.f32.mrb[215].mxu1  ;;  %9754 = vmatmul.mubr.msk.bf16.gmra.mrb[192].mxu0 %vm1293_vm5, %v5230_v49  ;;  %v5202_v56 = vmax.f32 %v5150_v52, 0.0 }
 0x535   : > { %v5145_v23 = vadd.f32 %v12110_v1, %v5144_v40  ;;  %v5200_v38 = vmax.f32 %v5142_v48, 0.0 }
 0x536   : > { %v5203_v28 = vmax.f32 %v5153_v24, 0.0 }
 0x537   : > { %v5201_v41 = vmax.f32 %v5145_v23, 0.0 }
 0x538   : > { %v5232_v6 = vpack.c.bf16 %v5203_v28, %v5202_v56 }
 0x539   : > { %v5231_v14 = vpack.c.bf16 %v5201_v41, %v5200_v38 }
 0x53b   : > { %9757 = vmatprep.mubr.msk.bf16.mxu0 %vm1293_vm5, %v5231_v14 }
 0x53c   : > { %9758 = vmatmul.mubr.msk.bf16.gmra.mrb[196].mxu0 %vm1293_vm5, %v5232_v6 }
 0x5b7   : > { %v9715_v1 = vpop.f32.mrb[152].mxu0 }
 0x5b8   : > { %v5364_v32 = vpop.f32.mrb[153].mxu0  ;;  %v5373_v51 = vadd.f32 %v9715_v1, %v12192_v47 }
 0x5b9   : > { %v9716_v55 = vpop.f32.mrb[154].mxu0  ;;  %v5365_v0 = vadd.f32 %v12192_v47, %v5364_v32 }
 0x5ba   : > { %v5376_v50 = vadd.f32 %v9716_v55, %v12192_v47  ;;  %v5367_v57 = vpop.f32.mrb[155].mxu0 }
 0x5bb   : > { %v5368_v46 = vadd.f32 %v12192_v47, %v5367_v57 }
 0x5bc   : > { %v5561_v31 = vpack.c.bf16 %v5376_v50, %v5373_v51 }
 0x5bd   : > { %v5560_v13 = vpack.c.bf16 %v5368_v46, %v5365_v0 }
 0x5bf   : > { %v9719_v11 = vpop.f32.mrb[156].mxu0  ;;  %9767 = vmatprep.mubr.msk.bf16.mxu1 %vm1293_vm5, %v5560_v13 }
 0x5c0   : > { %v5380_v36 = vpop.f32.mrb[157].mxu0  ;;  %9768 = vmatmul.mubr.msk.bf16.vlgmr.msra.gmra.mrb[216].mxu1 %vm1293_vm5, %v5561_v31  ;;  %v5389_v26 = vadd.f32 %v9719_v11, %v12192_v47 }
 0x5c1   : > { %v9720_v15 = vpop.f32.mrb[158].mxu0  ;;  %v5381_v35 = vadd.f32 %v12192_v47, %v5380_v36 }
 0x5c2   : > { %v5392_v18 = vadd.f32 %v9720_v15, %v12192_v47  ;;  %v5383_v3 = vpop.f32.mrb[159].mxu0 }
 0x5c3   : > { %v5384_v16 = vadd.f32 %v12192_v47, %v5383_v3 }
 0x5c4   : > { %v5563_v33 = vpack.c.bf16 %v5392_v18, %v5389_v26 }
 0x5c5   : > { %v5562_v30 = vpack.c.bf16 %v5384_v16, %v5381_v35 }
 0x5c7   : > { %v9723_v37 = vpop.f32.mrb[160].mxu0  ;;  %9771 = vmatprep.mubr.msk.bf16.mxu1 %vm1293_vm5, %v5562_v30 }
 0x5c8   : > { %v5396_v19 = vpop.f32.mrb[161].mxu0  ;;  %9772 = vmatmul.mubr.msk.bf16.gmra.mrb[220].mxu1 %vm1293_vm5, %v5563_v33  ;;  %v5405_v17 = vadd.f32 %v9723_v37, %v12192_v47 }
 0x5c9   : > { %v9724_v5 = vpop.f32.mrb[162].mxu0  ;;  %v5397_v2 = vadd.f32 %v12192_v47, %v5396_v19 }
 0x5ca   : > { %v5408_v25 = vadd.f32 %v9724_v5, %v12192_v47  ;;  %v5399_v53 = vpop.f32.mrb[163].mxu0 }
 0x5cb   : > { %v5400_v42 = vadd.f32 %v12192_v47, %v5399_v53 }
 0x5cc   : > { %v5565_v4 = vpack.c.bf16 %v5408_v25, %v5405_v17 }
 0x5cd   : > { %v5564_v9 = vpack.c.bf16 %v5400_v42, %v5397_v2 }
 0x5cf   : > { %v9727_v21 = vpop.f32.mrb[164].mxu0  ;;  %9775 = vmatprep.mubr.msk.bf16.mxu1 %vm1293_vm5, %v5564_v9 }
 0x5d0   : > { %v5412_v27 = vpop.f32.mrb[165].mxu0  ;;  %9776 = vmatmul.mubr.msk.bf16.gmra.mrb[224].mxu1 %vm1293_vm5, %v5565_v4  ;;  %v5421_v39 = vadd.f32 %v9727_v21, %v12192_v47 }
 0x5d1   : > { %v9728_v44 = vpop.f32.mrb[166].mxu0  ;;  %v5413_v62 = vadd.f32 %v12192_v47, %v5412_v27 }
 0x5d2   : > { %v5424_v29 = vadd.f32 %v9728_v44, %v12192_v47  ;;  %v5415_v43 = vpop.f32.mrb[167].mxu0 }
 0x5d3   : > { %v5416_v45 = vadd.f32 %v12192_v47, %v5415_v43 }
 0x5d4   : > { %v5567_v8 = vpack.c.bf16 %v5424_v29, %v5421_v39 }
 0x5d5   : > { %v5566_v20 = vpack.c.bf16 %v5416_v45, %v5413_v62 }
 0x5d7   : > { %v9731_v60 = vpop.f32.mrb[168].mxu0  ;;  %9779 = vmatprep.mubr.msk.bf16.mxu1 %vm1293_vm5, %v5566_v20 }
 0x5d8   : > { %v5428_v61 = vpop.f32.mrb[169].mxu0  ;;  %9780 = vmatmul.mubr.msk.bf16.gmra.mrb[228].mxu1 %vm1293_vm5, %v5567_v8  ;;  %v5437_v10 = vadd.f32 %v9731_v60, %v12192_v47 }
 0x5d9   : > { %v9732_v34 = vpop.f32.mrb[170].mxu0  ;;  %v5429_v54 = vadd.f32 %v12192_v47, %v5428_v61 }
 0x5da   : > { %v5440_v49 = vadd.f32 %v9732_v34, %v12192_v47  ;;  %v5431_v22 = vpop.f32.mrb[171].mxu0 }
 0x5db   : > { %v5432_v52 = vadd.f32 %v12192_v47, %v5431_v22 }
 0x5dc   : > { %v5569_v58 = vpack.c.bf16 %v5440_v49, %v5437_v10 }
 0x5dd   : > { %v5568_v48 = vpack.c.bf16 %v5432_v52, %v5429_v54 }
 0x5df   : > { %v9735_v7 = vpop.f32.mrb[172].mxu0  ;;  %9783 = vmatprep.mubr.msk.bf16.mxu1 %vm1293_vm5, %v5568_v48 }
 0x5e0   : > { %v5444_v24 = vpop.f32.mrb[173].mxu0  ;;  %9784 = vmatmul.mubr.msk.bf16.gmra.mrb[232].mxu1 %vm1293_vm5, %v5569_v58  ;;  %v5453_v23 = vadd.f32 %v9735_v7, %v12192_v47 }
 0x5e1   : > { %v9736_v40 = vpop.f32.mrb[174].mxu0  ;;  %v5445_v38 = vadd.f32 %v12192_v47, %v5444_v24 }
 0x5e2   : > { %v5456_v56 = vadd.f32 %v9736_v40, %v12192_v47  ;;  %v5447_v28 = vpop.f32.mrb[175].mxu0 }
 0x5e3   : > { %v5448_v41 = vadd.f32 %v12192_v47, %v5447_v28 }
 0x5e4   : > { %v5571_v6 = vpack.c.bf16 %v5456_v56, %v5453_v23 }
 0x5e5   : > { %v5570_v14 = vpack.c.bf16 %v5448_v41, %v5445_v38 }
 0x5e7   : > { %v9739_v63 = vpop.f32.mrb[176].mxu0  ;;  %9787 = vmatprep.mubr.msk.bf16.mxu1 %vm1293_vm5, %v5570_v14 }
 0x5e8   : > { %v5460_v59 = vpop.f32.mrb[177].mxu0  ;;  %9788 = vmatmul.mubr.msk.bf16.gmra.mrb[236].mxu1 %vm1293_vm5, %v5571_v6  ;;  %v5469_v32 = vadd.f32 %v9739_v63, %v12192_v47  ;;  %v13278_v6 = vlaneseq  ;;  %v12279_v63 = vld [vmem:[%s12273_s0] ss:$0 sm:$0xff] }
 0x5e9   : > { %v9740_v1 = vpop.f32.mrb[178].mxu0  ;;  %v5461_v50 = vadd.f32 %v12192_v47, %v5460_v59 }
 0x5ea   : > { %v5472_v55 = vadd.f32 %v9740_v1, %v12192_v47  ;;  %v5463_v51 = vpop.f32.mrb[179].mxu0  ;;  %v12268_v14 = vshrl.u32 %v13278_v6, 7 }
 0x5eb   : > { %v5464_v57 = vadd.f32 %v12192_v47, %v5463_v51 }
 0x5ec   : > { %v5573_v0 = vpack.c.bf16 %v5472_v55, %v5469_v32  ;;  %vm5904_vm8 = vcmp.eq.s32.totalorder %v12279_v63, %v12268_v14  ;;  %v12289_v55 = vadd.s32 48, %v12268_v14  ;;  %v12292_v51 = vadd.s32 56, %v12268_v14 }
 0x5ed   : > { %v5572_v46 = vpack.c.bf16 %v5464_v57, %v5461_v50  ;;  %v8550_v59 = vsel %vm5904_vm8, 1.0, %v13070_v12  ;;  %v12295_v50 = vld [vmem:[%s12273_s0 + $0x3] ss:$0 sm:$0xff] }
 0x5ee   : > { %vm6286_vm13 = vcmp.eq.s32.totalorder %v12295_v50, %v12289_v55  ;;  %vm6287_vm14 = vcmp.eq.s32.totalorder %v12295_v50, %v12292_v51  ;;  %vm5910_vm10 = vcmp.eq.s32.totalorder %v12279_v63, %v12289_v55  ;;  %vm5911_vm8 = vcmp.eq.s32.totalorder %v12279_v63, %v12292_v51 }
 0x5ef   : > { %v9743_v31 = vpop.f32.mrb[180].mxu0  ;;  %9791 = vmatprep.mubr.msk.bf16.mxu1 %vm1293_vm5, %v5572_v46  ;;  %v12302_v57 = vsel %vm6286_vm13, 1.0, %v13070_v12 }
 0x5f0   : > { %v5476_v13 = vpop.f32.mrb[181].mxu0  ;;  %9792 = vmatmul.mubr.msk.bf16.gmra.mrb[240].mxu1 %vm1293_vm5, %v5573_v0  ;;  %v5485_v36 = vadd.f32 %v9743_v31, %v12192_v47  ;;  %v12305_v0 = vsel %vm6287_vm14, 1.0, %v13070_v12  ;;  %v12310_v31 = vld [vmem:[%s12273_s0 + $0x1] ss:$0 sm:$0xff] }
 0x5f1   : > { %v9744_v11 = vpop.f32.mrb[182].mxu0  ;;  %v5477_v18 = vadd.f32 %v12192_v47, %v5476_v13  ;;  %v6307_v46 = vpack.c.bf16 %v12305_v0, %v12302_v57  ;;  %vm6030_vm15 = vcmp.eq.s32.totalorder %v12310_v31, %v12268_v14  ;;  %v13292_v57 = vld [vmem:[#allocation82_spill] sm:$0xff]  ;;  %v13293_v0 = vld [vmem:[#allocation80_spill] sm:$0xff] }
 0x5f2   : > { %v5488_v15 = vadd.f32 %v9744_v11, %v12192_v47  ;;  %v5479_v26 = vpop.f32.mrb[183].mxu0  ;;  %v8564_v13 = vsel %vm6030_vm15, 1.0, %v13070_v12 }
 0x5f3   : > { %v5480_v3 = vadd.f32 %v12192_v47, %v5479_v26 }
 0x5f4   : > { %v5575_v35 = vpack.c.bf16 %v5488_v15, %v5485_v36 }
 0x5f5   : > { %v5574_v16 = vpack.c.bf16 %v5480_v3, %v5477_v18 }
 0x5f7   : > { %v9747_v33 = vpop.f32.mrb[184].mxu0  ;;  %9795 = vmatprep.mubr.msk.bf16.mxu1 %vm1293_vm5, %v5574_v16 }
 0x5f8   : > { %v5492_v30 = vpop.f32.mrb[185].mxu0  ;;  %9796 = vmatmul.mubr.msk.bf16.gmra.mrb[244].mxu1 %vm1293_vm5, %v5575_v35  ;;  %v5501_v19 = vadd.f32 %v9747_v33, %v12192_v47 }
 0x5f9   : > { %v9748_v37 = vpop.f32.mrb[186].mxu0  ;;  %v5493_v25 = vadd.f32 %v12192_v47, %v5492_v30 }
 0x5fa   : > { %v5504_v5 = vadd.f32 %v9748_v37, %v12192_v47  ;;  %v5495_v17 = vpop.f32.mrb[187].mxu0 }
 0x5fb   : > { %v5496_v53 = vadd.f32 %v12192_v47, %v5495_v17 }
 0x5fc   : > { %v5577_v2 = vpack.c.bf16 %v5504_v5, %v5501_v19 }
 0x5fd   : > { %v5576_v42 = vpack.c.bf16 %v5496_v53, %v5493_v25  ;;  %v12320_v53 = vadd.s32 16, %v12268_v14 }
 0x5ff   : > { %v9751_v4 = vpop.f32.mrb[188].mxu0  ;;  %9799 = vmatprep.mubr.msk.bf16.mxu1 %vm1293_vm5, %v5576_v42  ;;  %vm5906_vm3 = vcmp.eq.s32.totalorder %v12279_v63, %v12320_v53  ;;  %vm6032_vm14 = vcmp.eq.s32.totalorder %v12310_v31, %v12320_v53 }
 0x600   : > { %v5508_v9 = vpop.f32.mrb[189].mxu0  ;;  %9800 = vmatmul.mubr.msk.bf16.gmra.mrb[248].mxu1 %vm1293_vm5, %v5577_v2  ;;  %v5517_v27 = vadd.f32 %v9751_v4, %v12192_v47  ;;  %v12323_v2 = vadd.s32 24, %v12268_v14  ;;  %v12326_v4 = vadd.s32 32, %v12268_v14 }
 0x601   : > { %v9752_v21 = vpop.f32.mrb[190].mxu0  ;;  %v5509_v29 = vadd.f32 %v12192_v47, %v5508_v9  ;;  %v12329_v9 = vadd.s32 40, %v12268_v14 }
 0x602   : > { %v5520_v44 = vadd.f32 %v9752_v21, %v12192_v47  ;;  %v5511_v39 = vpop.f32.mrb[191].mxu0  ;;  %vm5907_vm6 = vcmp.eq.s32.totalorder %v12279_v63, %v12323_v2  ;;  %vm5908_vm7 = vcmp.eq.s32.totalorder %v12279_v63, %v12326_v4  ;;  %vm6033_vm15 = vcmp.eq.s32.totalorder %v12310_v31, %v12323_v2 }
 0x603   : > { %v5512_v43 = vadd.f32 %v12192_v47, %v5511_v39  ;;  %vm5909_vm9 = vcmp.eq.s32.totalorder %v12279_v63, %v12329_v9 }
 0x604   : > { %v5579_v62 = vpack.c.bf16 %v5520_v44, %v5517_v27 }
 0x605   : > { %v5578_v45 = vpack.c.bf16 %v5512_v43, %v5509_v29  ;;  %v8552_v29 = vsel %vm5906_vm3, 1.0, %v13070_v12  ;;  %v8553_v43 = vsel %vm5907_vm6, 1.0, %v13070_v12  ;;  %vm6035_vm3 = vcmp.eq.s32.totalorder %v12310_v31, %v12329_v9 }
 0x606   : > { %vm6036_vm6 = vcmp.eq.s32.totalorder %v12310_v31, %v12289_v55 }
 0x607   : > { %v9755_v8 = vpop.f32.mrb[192].mxu0  ;;  %9803 = vmatprep.mubr.msk.bf16.mxu1 %vm1293_vm5, %v5578_v45  ;;  %v8554_v45 = vsel %vm5908_vm7, 1.0, %v13070_v12  ;;  %vm6037_vm7 = vcmp.eq.s32.totalorder %v12310_v31, %v12292_v51 }
 0x608   : > { %v5524_v20 = vpop.f32.mrb[193].mxu0  ;;  %9804 = vmatmul.mubr.msk.bf16.gmra.mrb[252].mxu1 %vm1293_vm5, %v5579_v62  ;;  %v5533_v61 = vadd.f32 %v9755_v8, %v12192_v47  ;;  %v8555_v8 = vsel %vm5909_vm9, 1.0, %v13070_v12  ;;  %vm6280_vm9 = vcmp.eq.s32.totalorder %v12295_v50, %v12268_v14 }
 0x609   : > { %v9756_v60 = vpop.f32.mrb[194].mxu0  ;;  %v5525_v49 = vadd.f32 %v12192_v47, %v5524_v20 }
 0x60a   : > { %v5536_v34 = vadd.f32 %v9756_v60, %v12192_v47  ;;  %v5527_v10 = vpop.f32.mrb[195].mxu0 }
 0x60b   : > { %v5528_v22 = vadd.f32 %v12192_v47, %v5527_v10 }
 0x60c   : > { %v5581_v54 = vpack.c.bf16 %v5536_v34, %v5533_v61  ;;  %v5929_v61 = vpack.c.bf16 %v8553_v43, %v8552_v29  ;;  %v12344_v34 = vld [vmem:[%s12273_s0 + $0x2] ss:$0 sm:$0xff] }
 0x60d   : > { %v5580_v52 = vpack.c.bf16 %v5528_v22, %v5525_v49  ;;  %v5930_v22 = vpack.c.bf16 %v8555_v8, %v8554_v45 }
 0x60f   : > { %v9759_v58 = vpop.f32.mrb[196].mxu0  ;;  %9807 = vmatprep.mubr.msk.bf16.mxu1 %vm1293_vm5, %v5580_v52  ;;  %v8556_v52 = vsel %vm5910_vm10, 1.0, %v13070_v12 }
 0x610   : > { %v5540_v48 = vpop.f32.mrb[197].mxu0  ;;  %9808 = vmatmul.mubr.msk.bf16.gmra.mrb[0].mxu1 %vm1293_vm5, %v5581_v54  ;;  %v5549_v24 = vadd.f32 %v9759_v58, %v12192_v47  ;;  %v8557_v58 = vsel %vm5911_vm8, 1.0, %v13070_v12  ;;  %vm6157_vm8 = vcmp.eq.s32.totalorder %v12344_v34, %v12320_v53 }
 0x611   : > { %v9760_v7 = vpop.f32.mrb[198].mxu0  ;;  %v5541_v56 = vadd.f32 %v12192_v47, %v5540_v48 }
 0x612   : > { %v5552_v40 = vadd.f32 %v9760_v7, %v12192_v47  ;;  %v5543_v23 = vpop.f32.mrb[199].mxu0 }
 0x613   : > { %v5544_v28 = vadd.f32 %v12192_v47, %v5543_v23  ;;  %v12276_v47 = vadd.s32 8, %v12268_v14 }
 0x614   : > { %v5583_v38 = vpack.c.bf16 %v5552_v40, %v5549_v24 }
 0x615   : > { %v5582_v41 = vpack.c.bf16 %v5544_v28, %v5541_v56  ;;  %vm5905_vm11 = vcmp.eq.s32.totalorder %v12279_v63, %v12276_v47  ;;  %vm6031_vm1 = vcmp.eq.s32.totalorder %v12310_v31, %v12276_v47  ;;  %vm6156_vm13 = vcmp.eq.s32.totalorder %v12344_v34, %v12276_v47 }
 0x616   : > { %v8551_v1 = vsel %vm5905_vm11, 1.0, %v13070_v12  ;;  %v8565_v11 = vsel %vm6031_vm1, 1.0, %v13070_v12  ;;  %vm6155_vm11 = vcmp.eq.s32.totalorder %v12344_v34, %v12268_v14  ;;  %v8579_v24 = vsel %vm6156_vm13, 1.0, %v13070_v12 }
 0x617   : > { %9811 = vmatprep.mubr.msk.bf16.mxu1 %vm1293_vm5, %v5582_v41  ;;  %v5928_v32 = vpack.c.bf16 %v8551_v1, %v8550_v59  ;;  %v6054_v36 = vpack.c.bf16 %v8565_v11, %v8564_v13  ;;  %v8578_v7 = vsel %vm6155_vm11, 1.0, %v13070_v12  ;;  %v5931_v56 = vpack.c.bf16 %v8557_v58, %v8556_v52 }
 0x618   : > { %9812 = vmatmul.mubr.msk.bf16.gmra.mrb[4].mxu1 %vm1293_vm5, %v5583_v38  ;;  %v6179_v41 = vpack.c.bf16 %v8579_v24, %v8578_v7  ;;  %vm6034_vm1 = vcmp.eq.s32.totalorder %v12310_v31, %v12326_v4  ;;  %vm6281_vm10 = vcmp.eq.s32.totalorder %v12295_v50, %v12276_v47  ;;  %v8592_v31 = vsel %vm6280_vm9, 1.0, %v13070_v12 }
 0x619   : > { %9827 = vmatprep.mubr.msk.bf16.mxu0 %vm5938_vm12, %v5928_v32  ;;  %9847 = vmatprep.mubr.msk.bf16.mxu1 %vm5938_vm12, %v6054_v36  ;;  %v8566_v36 = vsel %vm6032_vm14, 1.0, %v13070_v12  ;;  %vm6158_vm11 = vcmp.eq.s32.totalorder %v12344_v34, %v12323_v2  ;;  %vm6159_vm13 = vcmp.eq.s32.totalorder %v12344_v34, %v12326_v4  ;;  %vm6160_vm14 = vcmp.eq.s32.totalorder %v12344_v34, %v12329_v9 }
 0x61a   : > { %v8582_v58 = vsel %vm6159_vm13, 1.0, %v13070_v12  ;;  %vm6285_vm9 = vcmp.eq.s32.totalorder %v12295_v50, %v12329_v9  ;;  %v13283_v9 = vld [vmem:[#allocation49_spill] sm:$0xff] }
 0x693   : > { %v9769_v15 = vpop.f32.mrb[216].mxu1 }
 0x694   : > { %v5708_v26 = vpop.f32.mrb[217].mxu1 }
 0x695   : > { %v9770_v18 = vpop.f32.mrb[218].mxu1 }
 0x696   : > { %v5933_v3 = vpack.c.bf16 %v9770_v18, %v9769_v15  ;;  %v5711_v35 = vpop.f32.mrb[219].mxu1  ;;  %v8567_v15 = vsel %vm6033_vm15, 1.0, %v13070_v12  ;;  %v8568_v18 = vsel %vm6034_vm1, 1.0, %v13070_v12  ;;  %vm6161_vm15 = vcmp.eq.s32.totalorder %v12344_v34, %v12289_v55  ;;  %v10254_v55 = vld [vmem:[%s12851_s17 + $0x10] ss:$0 sps:$4 sm:$0xff]  }
 0x697   : > { %v5932_v16 = vpack.c.bf16 %v5711_v35, %v5708_v26  ;;  %vm6162_vm1 = vcmp.eq.s32.totalorder %v12344_v34, %v12292_v51 }
 0x699   : > { %9815 = vmatprep.subr.bf16.mxu0 %v5932_v16 }
 0x69a   : > { %9816 = vmatpush3.bf16.msra.mxu0 %v5932_v16 }
 0x69b   : > { %v9773_v33 = vpop.f32.mrb[220].mxu1  ;;  %9817 = vmatprep.subr.bf16.mxu0 %v5933_v3 }
 0x69c   : > { %v5724_v30 = vpop.f32.mrb[221].mxu1 }
 0x69d   : > { %v9774_v37 = vpop.f32.mrb[222].mxu1 }
 0x69e   : > { %v5935_v19 = vpack.c.bf16 %v9774_v37, %v9773_v33  ;;  %v5727_v5 = vpop.f32.mrb[223].mxu1  ;;  %9818 = vmatpush3.bf16.msra.mxu0 %v5933_v3  ;;  %v8569_v3 = vsel %vm6035_vm3, 1.0, %v13070_v12  ;;  %v6055_v33 = vpack.c.bf16 %v8567_v15, %v8566_v36  ;;  %v13280_v36 = vld [vmem:[#allocation44_spill] sm:$0xff]  ;;  %vm6282_vm3 = vcmp.eq.s32.totalorder %v12295_v50, %v12320_v53 }
 0x69f   : > { %v5934_v17 = vpack.c.bf16 %v5727_v5, %v5724_v30 }
 0x6a1   : > { %9819 = vmatprep.subr.bf16.mxu0 %v5934_v17 }
 0x6a2   : > { %9820 = vmatpush3.bf16.msra.mxu0 %v5934_v17  ;;  %v8570_v17 = vsel %vm6036_vm6, 1.0, %v13070_v12  ;;  %vm6283_vm6 = vcmp.eq.s32.totalorder %v12295_v50, %v12323_v2 }
 0x6a3   : > { %v9777_v25 = vpop.f32.mrb[224].mxu1  ;;  %9821 = vmatprep.subr.bf16.mxu0 %v5935_v19  ;;  %v8595_v53 = vsel %vm6283_vm6, 1.0, %v13070_v12 }
 0x6a4   : > { %v5740_v42 = vpop.f32.mrb[225].mxu1 }
 0x6a5   : > { %v9778_v21 = vpop.f32.mrb[226].mxu1 }
 0x6a6   : > { %v5937_v27 = vpack.c.bf16 %v9778_v21, %v9777_v25  ;;  %v5743_v44 = vpop.f32.mrb[227].mxu1  ;;  %9822 = vmatpush3.bf16.msra.mxu0 %v5935_v19  ;;  %v6056_v19 = vpack.c.bf16 %v8569_v3, %v8568_v18  ;;  %v8571_v25 = vsel %vm6037_vm7, 1.0, %v13070_v12  ;;  %v8593_v21 = vsel %vm6281_vm10, 1.0, %v13070_v12 }
 0x6a7   : > { %v5936_v39 = vpack.c.bf16 %v5743_v44, %v5740_v42  ;;  %v6057_v44 = vpack.c.bf16 %v8571_v25, %v8570_v17  ;;  %v6304_v29 = vpack.c.bf16 %v8593_v21, %v8592_v31  ;;  %vm6284_vm7 = vcmp.eq.s32.totalorder %v12295_v50, %v12326_v4  ;;  %v13285_v17 = vld [vmem:[#allocation56_spill] sm:$0xff]  ;;  %v13287_v25 = vld [vmem:[#allocation62_spill] sm:$0xff] }
 0x6a8   : > { %v8596_v2 = vsel %vm6284_vm7, 1.0, %v13070_v12  ;;  %v8597_v4 = vsel %vm6285_vm9, 1.0, %v13070_v12  ;;  %v13289_v31 = vld [vmem:[#allocation68_spill] sm:$0xff] }
 0x6a9   : > { %9823 = vmatprep.subr.bf16.mxu0 %v5936_v39  ;;  %v6306_v50 = vpack.c.bf16 %v8597_v4, %v8596_v2  ;;  %v13290_v21 = vld [vmem:[#allocation76_spill] sm:$0xff] }
 0x6aa   : > { %9824 = vmatpush3.bf16.msra.mxu0 %v5936_v39 }
 0x6ab   : > { %v9781_v62 = vpop.f32.mrb[228].mxu1  ;;  %9825 = vmatprep.subr.bf16.mxu0 %v5937_v27 }
 0x6ac   : > { %v5756_v20 = vpop.f32.mrb[229].mxu1 }
 0x6ad   : > { %v9782_v60 = vpop.f32.mrb[230].mxu1 }
 0x6ae   : > { %v6059_v10 = vpack.c.bf16 %v9782_v60, %v9781_v62  ;;  %v5759_v49 = vpop.f32.mrb[231].mxu1  ;;  %9826 = vmatpush3.bf16.msra.mxu0 %v5937_v27 }
 0x6af   : > { %v6058_v54 = vpack.c.bf16 %v5759_v49, %v5756_v20  ;;  %v8581_v49 = vsel %vm6158_vm11, 1.0, %v13070_v12 }
 0x6b1   : > { %9835 = vmatprep.subr.bf16.mxu1 %v6058_v54  ;;  %9828 = vmatmul.mubr.msk.bf16.vlgmr.msra.gmra.mrb[200].mxu0 %vm5938_vm12, %v5929_v61 }
 0x6b2   : > { %9836 = vmatpush3.bf16.msra.mxu1 %v6058_v54  ;;  %9831 = vmatprep.mubr.msk.bf16.mxu0 %vm5938_vm12, %v5930_v22  ;;  %v10252_v54 = vld [vmem:[%s12851_s17] sm:$0xff]  }
 0x6b3   : > { %v9785_v48 = vpop.f32.mrb[232].mxu1  ;;  %9837 = vmatprep.subr.bf16.mxu1 %v6059_v10 }
 0x6b4   : > { %v5772_v40 = vpop.f32.mrb[233].mxu1 }
 0x6b5   : > { %v9786_v23 = vpop.f32.mrb[234].mxu1 }
 0x6b6   : > { %v6061_v28 = vpack.c.bf16 %v9786_v23, %v9785_v48  ;;  %v5775_v38 = vpop.f32.mrb[235].mxu1  ;;  %9838 = vmatpush3.bf16.msra.mxu1 %v6059_v10  ;;  %v8580_v10 = vsel %vm6157_vm8, 1.0, %v13070_v12  ;;  %v8583_v48 = vsel %vm6160_vm14, 1.0, %v13070_v12 }
 0x6b7   : > { %v6060_v6 = vpack.c.bf16 %v5775_v38, %v5772_v40  ;;  %v6180_v24 = vpack.c.bf16 %v8581_v49, %v8580_v10  ;;  %v10253_v38 = vld [vmem:[%s12851_s17 + $0x8] sm:$0xff]  }
 0x6b9   : > { %9839 = vmatprep.subr.bf16.mxu1 %v6060_v6  ;;  %9832 = vmatmul.mubr.msk.bf16.gmra.mrb[204].mxu0 %vm5938_vm12, %v5931_v56 }
 0x6ba   : > { %9840 = vmatpush3.bf16.msra.mxu1 %v6060_v6  ;;  %9867 = vmatprep.mubr.msk.bf16.mxu0 %vm5938_vm12, %v6179_v41  ;;  %v8584_v41 = vsel %vm6161_vm15, 1.0, %v13070_v12  ;;  %v8585_v6 = vsel %vm6162_vm1, 1.0, %v13070_v12 }
 0x6bb   : > { %v9789_v63 = vpop.f32.mrb[236].mxu1  ;;  %9841 = vmatprep.subr.bf16.mxu1 %v6061_v28 }
 0x6bc   : > { %v5788_v59 = vpop.f32.mrb[237].mxu1 }
 0x6bd   : > { %v9790_v1 = vpop.f32.mrb[238].mxu1 }
 0x6be   : > { %v6063_v32 = vpack.c.bf16 %v9790_v1, %v9789_v63  ;;  %v5791_v13 = vpop.f32.mrb[239].mxu1  ;;  %9842 = vmatpush3.bf16.msra.mxu1 %v6061_v28  ;;  %v6181_v28 = vpack.c.bf16 %v8583_v48, %v8582_v58 }
 0x6bf   : > { %v6062_v11 = vpack.c.bf16 %v5791_v13, %v5788_v59  ;;  %v6182_v59 = vpack.c.bf16 %v8585_v6, %v8584_v41 }
 0x6c1   : > { %9843 = vmatprep.subr.bf16.mxu1 %v6062_v11 }
 0x6c2   : > { %9844 = vmatpush3.bf16.msra.mxu1 %v6062_v11  ;;  %v6452_v11 = vsel %vm1342_vm4, %v10254_v55, 0 }
 0x6c3   : > { %v9793_v26 = vpop.f32.mrb[240].mxu1  ;;  %9845 = vmatprep.subr.bf16.mxu1 %v6063_v32 }
 0x6c4   : > { %v5804_v35 = vpop.f32.mrb[241].mxu1 }
 0x6c5   : > { %v9794_v16 = vpop.f32.mrb[242].mxu1 }
 0x6c6   : > { %v6184_v30 = vpack.c.bf16 %v9794_v16, %v9793_v26  ;;  %v5807_v37 = vpop.f32.mrb[243].mxu1  ;;  %9846 = vmatpush3.bf16.msra.mxu1 %v6063_v32 }
 0x6c7   : > { %v6183_v5 = vpack.c.bf16 %v5807_v37, %v5804_v35  ;;  %v8594_v37 = vsel %vm6282_vm3, 1.0, %v13070_v12  ;;  %v13286_v12 = vld [vmem:[#allocation64_spill] sm:$0xff] }
 0x6c9   : > { %9855 = vmatprep.subr.bf16.mxu0 %v6183_v5  ;;  %9848 = vmatmul.mubr.msk.bf16.vlgmr.msra.gmra.mrb[8].mxu1 %vm5938_vm12, %v6055_v33  ;;  %v13281_v33 = vld [vmem:[#allocation42_spill] sm:$0xff] }
 0x6ca   : > { %9856 = vmatpush3.bf16.msra.mxu0 %v6183_v5  ;;  %9851 = vmatprep.mubr.msk.bf16.mxu1 %vm5938_vm12, %v6056_v19  ;;  %v6305_v19 = vpack.c.bf16 %v8595_v53, %v8594_v37  ;;  %v13284_v5 = vld [vmem:[#allocation58_spill] sm:$0xff] }
 0x6cb   : > { %v9797_v42 = vpop.f32.mrb[244].mxu1  ;;  %9857 = vmatprep.subr.bf16.mxu0 %v6184_v30 }
 0x6cc   : > { %v5820_v14 = vpop.f32.mrb[245].mxu1 }
 0x6cd   : > { %v9798_v27 = vpop.f32.mrb[246].mxu1 }
 0x6ce   : > { %v6186_v47 = vpack.c.bf16 %v9798_v27, %v9797_v42  ;;  %v5823_v39 = vpop.f32.mrb[247].mxu1  ;;  %9858 = vmatpush3.bf16.msra.mxu0 %v6184_v30  ;;  %v13282_v30 = vld [vmem:[#allocation52_spill] sm:$0xff]  ;;  %v13288_v42 = vld [vmem:[#allocation70_spill] sm:$0xff] }
 0x6cf   : > { %v6185_v43 = vpack.c.bf16 %v5823_v39, %v5820_v14  ;;  %v13291_v14 = vld [vmem:[#allocation74_spill] sm:$0xff] }
 0x6d0   : > { %v13295_v27 = vld [vmem:[#allocation86_spill] sm:$0xff] }
 0x6d1   : > { %9859 = vmatprep.subr.bf16.mxu0 %v6185_v43  ;;  %9852 = vmatmul.mubr.msk.bf16.gmra.mrb[12].mxu1 %vm5938_vm12, %v6057_v44  ;;  %v10255_v44 = vld [vmem:[%s12854_s20] sm:$0xff]   ;;  %v10257_v39 = vld [vmem:[%s12854_s20 + $0x10] ss:$0 sps:$4 sm:$0xff]  }
 0x6d2   : > { %9860 = vmatpush3.bf16.msra.mxu0 %v6185_v43  ;;  %9887 = vmatprep.mubr.msk.bf16.mxu1 %vm5938_vm12, %v6304_v29  ;;  %v6778_v29 = vsel %vm1342_vm4, %v10257_v39, 0 }
 0x6d3   : > { %v9801_v62 = vpop.f32.mrb[248].mxu1  ;;  %9861 = vmatprep.subr.bf16.mxu0 %v6186_v47 }
 0x6d4   : > { %v5836_v45 = vpop.f32.mrb[249].mxu1 }
 0x6d5   : > { %v9802_v8 = vpop.f32.mrb[250].mxu1 }
 0x6d6   : > { %v6188_v20 = vpack.c.bf16 %v9802_v8, %v9801_v62  ;;  %v5839_v60 = vpop.f32.mrb[251].mxu1  ;;  %9862 = vmatpush3.bf16.msra.mxu0 %v6186_v47  ;;  %v10256_v47 = vld [vmem:[%s12854_s20 + $0x8] sm:$0xff]  }
 0x6d7   : > { %v6187_v61 = vpack.c.bf16 %v5839_v60, %v5836_v45 }
 0x6d9   : > { %9863 = vmatprep.subr.bf16.mxu0 %v6187_v61 }
 0x6da   : > { %9864 = vmatpush3.bf16.msra.mxu0 %v6187_v61 }
 0x6db   : > { %v9805_v22 = vpop.f32.mrb[252].mxu1  ;;  %9865 = vmatprep.subr.bf16.mxu0 %v6188_v20 }
 0x6dc   : > { %v5852_v52 = vpop.f32.mrb[253].mxu1 }
 0x6dd   : > { %v9806_v7 = vpop.f32.mrb[254].mxu1 }
 0x6de   : > { %v6309_v40 = vpack.c.bf16 %v9806_v7, %v9805_v22  ;;  %v5855_v23 = vpop.f32.mrb[255].mxu1  ;;  %9866 = vmatpush3.bf16.msra.mxu0 %v6188_v20  ;;  %v10258_v20 = vld [vmem:[%s12856_s22] sm:$0xff]  }
 0x6df   : > { %v6308_v56 = vpack.c.bf16 %v5855_v23, %v5852_v52  ;;  %9895 = vmatprep.subr.bf16.mxu0 %v10252_v54 }
 0x6e1   : > { %9868 = vmatmul.mubr.msk.bf16.vlgmr.msra.gmra.mrb[208].mxu0 %vm5938_vm12, %v6180_v24  ;;  %9875 = vmatprep.subr.bf16.mxu1 %v6308_v56 }
 0x6e2   : > { %9876 = vmatpush3.bf16.msra.mxu1 %v6308_v56  ;;  %9896 = vmatpush3.bf16.msra.mxu0 %v10252_v54 }
 0x6e3   : > { %v9809_v63 = vpop.f32.mrb[0].mxu1  ;;  %9877 = vmatprep.subr.bf16.mxu1 %v6309_v40  ;;  %9871 = vmatprep.mubr.msk.bf16.mxu0 %vm5938_vm12, %v6181_v28 }
 0x6e4   : > { %v5868_v51 = vpop.f32.mrb[1].mxu1  ;;  %9897 = vmatprep.subr.bf16.mxu0 %v10253_v38 }
 0x6e5   : > { %v9810_v34 = vpop.f32.mrb[2].mxu1 }
 0x6e6   : > { %v6311_v1 = vpack.c.bf16 %v9810_v34, %v9809_v63  ;;  %v5871_v32 = vpop.f32.mrb[3].mxu1  ;;  %9878 = vmatpush3.bf16.msra.mxu1 %v6309_v40  ;;  %9898 = vmatpush3.bf16.msra.mxu0 %v10253_v38 }
 0x6e7   : > { %v6310_v13 = vpack.c.bf16 %v5871_v32, %v5868_v51  ;;  %10209 = vmatprep.subr.msk.bf16.mxu0 %vm1342_vm4, %v10254_v55 }
 0x6e9   : > { %9872 = vmatmul.mubr.msk.bf16.gmra.mrb[212].mxu0 %vm5938_vm12, %v6182_v59  ;;  %9879 = vmatprep.subr.bf16.mxu1 %v6310_v13  ;;  %v12513_v59 = vld [vmem:[%s12853_s19] ss:$0 sm:$0xff] }
 0x6ea   : > { %9880 = vmatpush3.bf16.msra.mxu1 %v6310_v13  ;;  %9901 = vmatprep.mubr.msk.bf16.mxu0 %vm1293_vm5, %v13280_v36 }
 0x6eb   : > { %v9813_v15 = vpop.f32.mrb[4].mxu1  ;;  %9881 = vmatprep.subr.bf16.mxu1 %v6311_v1  ;;  %9900 = vmatpush3.bf16.msra.mxu0 %v6452_v11 }
 0x6ec   : > { %v5884_v26 = vpop.f32.mrb[5].mxu1  ;;  %9971 = vmatprep.subr.bf16.mxu0 %v10258_v20 }
 0x6ed   : > { %v9814_v18 = vpop.f32.mrb[6].mxu1 }
 0x6ee   : > { %v6313_v3 = vpack.c.bf16 %v9814_v18, %v9813_v15  ;;  %v5887_v35 = vpop.f32.mrb[7].mxu1  ;;  %9882 = vmatpush3.bf16.msra.mxu1 %v6311_v1 }
 0x6ef   : > { %v6312_v16 = vpack.c.bf16 %v5887_v35, %v5884_v26 }
 0x6f1   : > { %9883 = vmatprep.subr.bf16.mxu1 %v6312_v16  ;;  %9902 = vmatmul.mubr.msk.bf16.vlgmr.msra.gmra.mrb[216].mxu0 %vm1293_vm5, %v13281_v33 }
 0x6f2   : > { %9884 = vmatpush3.bf16.msra.mxu1 %v6312_v16  ;;  %9905 = vmatprep.mubr.msk.bf16.mxu0 %vm1293_vm5, %v13282_v30 }
 0x6f3   : > { %9885 = vmatprep.subr.bf16.mxu1 %v6313_v3  ;;  %9972 = vmatpush3.bf16.msra.mxu0 %v10258_v20 }
 0x6f6   : > { %9886 = vmatpush3.bf16.msra.mxu1 %v6313_v3 }
 0x6f7   : > { %9933 = vmatprep.subr.bf16.mxu1 %v10255_v44 }
 0x6f9   : > { %9906 = vmatmul.mubr.msk.bf16.gmra.mrb[220].mxu0 %vm1293_vm5, %v13283_v9  ;;  %9888 = vmatmul.mubr.msk.bf16.vlgmr.msra.gmra.mrb[16].mxu1 %vm5938_vm12, %v6305_v19 }
 0x6fa   : > { %9909 = vmatprep.mubr.msk.bf16.mxu0 %vm1293_vm5, %v13284_v5  ;;  %9891 = vmatprep.mubr.msk.bf16.mxu1 %vm5938_vm12, %v6306_v50 }
 0x6fb   : > { %9934 = vmatpush3.bf16.msra.mxu1 %v10255_v44 }
 0x6fc   : > { %9935 = vmatprep.subr.bf16.mxu1 %v10256_v47 }
 0x6ff   : > { %9936 = vmatpush3.bf16.msra.mxu1 %v10256_v47 }
 0x700   : > { %10210 = vmatprep.subr.msk.bf16.mxu1 %vm1342_vm4, %v10257_v39 }
 0x701   : > { %9910 = vmatmul.mubr.msk.bf16.gmra.mrb[224].mxu0 %vm1293_vm5, %v13285_v17  ;;  %9892 = vmatmul.mubr.msk.bf16.gmra.mrb[20].mxu1 %vm5938_vm12, %v6307_v46  ;;  %v13294_v46 = vld [vmem:[#allocation88_spill] sm:$0xff] }
 0x702   : > { %9913 = vmatprep.mubr.msk.bf16.mxu0 %vm1293_vm5, %v13286_v12 }
 0x703   : > { %9938 = vmatpush3.bf16.msra.mxu1 %v6778_v29 }
 0x709   : > { %9914 = vmatmul.mubr.msk.bf16.gmra.mrb[228].mxu0 %vm1293_vm5, %v13287_v25 }
 0x70a   : > { %9917 = vmatprep.mubr.msk.bf16.mxu0 %vm1293_vm5, %v13288_v42 }
 0x711   : > { %9918 = vmatmul.mubr.msk.bf16.gmra.mrb[232].mxu0 %vm1293_vm5, %v13289_v31 }
 0x712   : > { %9921 = vmatprep.mubr.msk.bf16.mxu0 %vm1293_vm5, %v13290_v21 }
 0x719   : > { %9922 = vmatmul.mubr.msk.bf16.gmra.mrb[236].mxu0 %vm1293_vm5, %v13291_v14 }
 0x71a   : > { %9925 = vmatprep.mubr.msk.bf16.mxu0 %vm1293_vm5, %v13292_v57 }
 0x721   : > { %9926 = vmatmul.mubr.msk.bf16.gmra.mrb[240].mxu0 %vm1293_vm5, %v13293_v0 }
 0x722   : > { %9929 = vmatprep.mubr.msk.bf16.mxu0 %vm1293_vm5, %v13294_v46 }
 0x729   : > { %9930 = vmatmul.mubr.msk.bf16.gmra.mrb[244].mxu0 %vm1293_vm5, %v13295_v27 }
 0x784   : > { %v9829_v43 = vpop.f32.mrb[200].mxu0 }
 0x785   : > { %6018 = vst.msk [vmem:[#allocation3 + $0x10] sm:$0xff] %vm1293_vm5, %v9829_v43  ;;  %v5985_v62 = vpop.f32.mrb[201].mxu0 }
 0x786   : > { %6016 = vst.msk [vmem:[#allocation3] sm:$0xff] %vm1293_vm5, %v5985_v62  ;;  %v9830_v45 = vpop.f32.mrb[202].mxu0 }
 0x787   : > { %6019 = vst.msk [vmem:[#allocation3 + $0x18] sm:$0xff] %vm1293_vm5, %v9830_v45  ;;  %v5988_v8 = vpop.f32.mrb[203].mxu0 }
 0x788   : > { %6017 = vst.msk [vmem:[#allocation3 + $0x8] sm:$0xff] %vm1293_vm5, %v5988_v8 }
 0x78c   : > { %v9833_v60 = vpop.f32.mrb[204].mxu0  ;;  %v6406_v51 = vld [vmem:[#allocation3 + $0x10] sm:$0xff] }
 0x78d   : > { %6022 = vst.msk [vmem:[#allocation3 + $0x30] sm:$0xff] %vm1293_vm5, %v9833_v60  ;;  %v6001_v61 = vpop.f32.mrb[205].mxu0  ;;  %v6404_v13 = vld [vmem:[#allocation3] sm:$0xff] }
 0x78e   : > { %6020 = vst.msk [vmem:[#allocation3 + $0x20] sm:$0xff] %vm1293_vm5, %v6001_v61  ;;  %v9834_v10 = vpop.f32.mrb[206].mxu0  ;;  %v6407_v36 = vld [vmem:[#allocation3 + $0x18] sm:$0xff] }
 0x78f   : > { %6023 = vst.msk [vmem:[#allocation3 + $0x38] sm:$0xff] %vm1293_vm5, %v9834_v10  ;;  %v6004_v49 = vpop.f32.mrb[207].mxu0  ;;  %v6405_v35 = vld [vmem:[#allocation3 + $0x8] sm:$0xff] }
 0x790   : > { %6021 = vst.msk [vmem:[#allocation3 + $0x28] sm:$0xff] %vm1293_vm5, %v6004_v49 }
 0x794   : > { %v6410_v50 = vld [vmem:[#allocation3 + $0x30] sm:$0xff] }
 0x795   : > { %v6408_v42 = vld [vmem:[#allocation3 + $0x20] sm:$0xff] }
 0x796   : > { %v6411_v57 = vld [vmem:[#allocation3 + $0x38] sm:$0xff] }
 0x797   : > { %v6409_v39 = vld [vmem:[#allocation3 + $0x28] sm:$0xff] }
 0x79c   : > { %v9849_v22 = vpop.f32.mrb[8].mxu1 }
 0x79d   : > { %6143 = vst.msk [vmem:[#allocation3 + $0x50] sm:$0xff] %vm1293_vm5, %v9849_v22  ;;  %v6110_v54 = vpop.f32.mrb[9].mxu1 }
 0x79e   : > { %6141 = vst.msk [vmem:[#allocation3 + $0x40] sm:$0xff] %vm1293_vm5, %v6110_v54  ;;  %v9850_v52 = vpop.f32.mrb[10].mxu1 }
 0x79f   : > { %6144 = vst.msk [vmem:[#allocation3 + $0x58] sm:$0xff] %vm1293_vm5, %v9850_v52  ;;  %v6113_v58 = vpop.f32.mrb[11].mxu1 }
 0x7a0   : > { %6142 = vst.msk [vmem:[#allocation3 + $0x48] sm:$0xff] %vm1293_vm5, %v6113_v58 }
 0x7a4   : > { %v9853_v48 = vpop.f32.mrb[12].mxu1  ;;  %v6414_v20 = vld [vmem:[#allocation3 + $0x50] sm:$0xff] }
 0x7a5   : > { %6147 = vst.msk [vmem:[#allocation3 + $0x70] sm:$0xff] %vm1293_vm5, %v9853_v48  ;;  %v6126_v7 = vpop.f32.mrb[13].mxu1  ;;  %v6412_v10 = vld [vmem:[#allocation3 + $0x40] sm:$0xff] }
 0x7a6   : > { %6145 = vst.msk [vmem:[#allocation3 + $0x60] sm:$0xff] %vm1293_vm5, %v6126_v7  ;;  %v9854_v24 = vpop.f32.mrb[14].mxu1 }
 0x7a7   : > { %6148 = vst.msk [vmem:[#allocation3 + $0x78] sm:$0xff] %vm1293_vm5, %v9854_v24  ;;  %v6129_v40 = vpop.f32.mrb[15].mxu1 }
 0x7a8   : > { %6146 = vst.msk [vmem:[#allocation3 + $0x68] sm:$0xff] %vm1293_vm5, %v6129_v40 }
 0x7b4   : > { %v9869_v23 = vpop.f32.mrb[208].mxu0 }
 0x7b5   : > { %6268 = vst.msk [vmem:[#allocation3 + $0x90] sm:$0xff] %vm1293_vm5, %v9869_v23  ;;  %v6235_v56 = vpop.f32.mrb[209].mxu0 }
 0x7b6   : > { %6266 = vst.msk [vmem:[#allocation3 + $0x80] sm:$0xff] %vm1293_vm5, %v6235_v56  ;;  %v9870_v28 = vpop.f32.mrb[210].mxu0  ;;  %v6415_v56 = vld [vmem:[#allocation3 + $0x58] sm:$0xff] }
 0x7b7   : > { %6269 = vst.msk [vmem:[#allocation3 + $0x98] sm:$0xff] %vm1293_vm5, %v9870_v28  ;;  %v6238_v38 = vpop.f32.mrb[211].mxu0 }
 0x7b8   : > { %6267 = vst.msk [vmem:[#allocation3 + $0x88] sm:$0xff] %vm1293_vm5, %v6238_v38 }
 0x7bc   : > { %v9873_v41 = vpop.f32.mrb[212].mxu0 }
 0x7bd   : > { %6272 = vst.msk [vmem:[#allocation3 + $0xb0] sm:$0xff] %vm1293_vm5, %v9873_v41  ;;  %v6251_v6 = vpop.f32.mrb[213].mxu0 }
 0x7be   : > { %6270 = vst.msk [vmem:[#allocation3 + $0xa0] sm:$0xff] %vm1293_vm5, %v6251_v6  ;;  %v9874_v63 = vpop.f32.mrb[214].mxu0 }
 0x7bf   : > { %6273 = vst.msk [vmem:[#allocation3 + $0xb8] sm:$0xff] %vm1293_vm5, %v9874_v63  ;;  %v6254_v55 = vpop.f32.mrb[215].mxu0 }
 0x7c0   : > { %6271 = vst.msk [vmem:[#allocation3 + $0xa8] sm:$0xff] %vm1293_vm5, %v6254_v55  ;;  %v6413_v55 = vld [vmem:[#allocation3 + $0x48] sm:$0xff] }
 0x7c4   : > { %v9903_v34 = vpop.f32.mrb[216].mxu0 }
 0x7c5   : > { %v6497_v1 = vadd.f32 %v9903_v34, %v6406_v51  ;;  %v6488_v32 = vpop.f32.mrb[217].mxu0 }
 0x7c6   : > { %v6489_v11 = vadd.f32 %v6488_v32, %v6404_v13  ;;  %v9904_v15 = vpop.f32.mrb[218].mxu0 }
 0x7c7   : > { %v6624_v26 = vadd.f32 %v12513_v59, %v6497_v1  ;;  %v6500_v18 = vadd.f32 %v9904_v15, %v6407_v36  ;;  %v6491_v3 = vpop.f32.mrb[219].mxu0 }
 0x7c8   : > { %v6622_v16 = vadd.f32 %v12513_v59, %v6489_v11  ;;  %v6492_v33 = vadd.f32 %v6491_v3, %v6405_v35  ;;  %v6418_v11 = vld [vmem:[#allocation3 + $0x70] sm:$0xff] }
 0x7c9   : > { %v6625_v30 = vadd.f32 %v12513_v59, %v6500_v18  ;;  %v6656_v53 = vmax.f32 %v6624_v26, 0.0  ;;  %v6416_v26 = vld [vmem:[#allocation3 + $0x60] sm:$0xff] }
 0x7ca   : > { %v6623_v37 = vadd.f32 %v12513_v59, %v6492_v33  ;;  %v6654_v4 = vmax.f32 %v6622_v16, 0.0 }
 0x7cb   : > { %v6657_v2 = vmax.f32 %v6625_v30, 0.0 }
 0x7cc   : > { %v6655_v19 = vmax.f32 %v6623_v37, 0.0  ;;  %v9907_v9 = vpop.f32.mrb[220].mxu0  ;;  %v9889_v5 = vpop.f32.mrb[16].mxu1 }
 0x7cd   : > { %v6692_v17 = vpack.c.bf16 %v6657_v2, %v6656_v53  ;;  %v6513_v12 = vadd.f32 %v9907_v9, %v6410_v50  ;;  %v6504_v25 = vpop.f32.mrb[221].mxu0  ;;  %6393 = vst.msk [vmem:[#allocation3 + $0xd0] sm:$0xff] %vm1293_vm5, %v9889_v5  ;;  %v6360_v31 = vpop.f32.mrb[17].mxu1  ;;  %v6419_v2 = vld [vmem:[#allocation3 + $0x78] sm:$0xff]  ;;  %v6417_v5 = vld [vmem:[#allocation3 + $0x68] sm:$0xff] }
 0x7ce   : > { %v6691_v21 = vpack.c.bf16 %v6655_v19, %v6654_v4  ;;  %v6505_v14 = vadd.f32 %v6504_v25, %v6408_v42  ;;  %v9908_v0 = vpop.f32.mrb[222].mxu0  ;;  %6391 = vst.msk [vmem:[#allocation3 + $0xc0] sm:$0xff] %vm1293_vm5, %v6360_v31  ;;  %v9890_v46 = vpop.f32.mrb[18].mxu1 }
 0x7cf   : > { %v6628_v27 = vadd.f32 %v12513_v59, %v6513_v12  ;;  %v6516_v44 = vadd.f32 %v9908_v0, %v6411_v57  ;;  %v6507_v47 = vpop.f32.mrb[223].mxu0  ;;  %6394 = vst.msk [vmem:[#allocation3 + $0xd8] sm:$0xff] %vm1293_vm5, %v9890_v46  ;;  %v6363_v29 = vpop.f32.mrb[19].mxu1  ;;  %v6422_v0 = vld [vmem:[#allocation3 + $0x90] sm:$0xff] }
 0x7d0   : > { %v6626_v43 = vadd.f32 %v12513_v59, %v6505_v14  ;;  %v6508_v62 = vadd.f32 %v6507_v47, %v6409_v39  ;;  %9939 = vmatprep.mubr.msk.bf16.mxu1 %vm1293_vm5, %v6691_v21  ;;  %6392 = vst.msk [vmem:[#allocation3 + $0xc8] sm:$0xff] %vm1293_vm5, %v6363_v29  ;;  %v6420_v39 = vld [vmem:[#allocation3 + $0x80] sm:$0xff] }
 0x7d1   : > { %v6629_v45 = vadd.f32 %v12513_v59, %v6516_v44  ;;  %9940 = vmatmul.mubr.msk.bf16.vlgmr.msra.gmra.mrb[24].mxu1 %vm1293_vm5, %v6692_v17  ;;  %v6660_v60 = vmax.f32 %v6628_v27, 0.0 }
 0x7d2   : > { %v6627_v8 = vadd.f32 %v12513_v59, %v6508_v62  ;;  %v6658_v49 = vmax.f32 %v6626_v43, 0.0  ;;  %v6423_v62 = vld [vmem:[#allocation3 + $0x98] sm:$0xff] }
 0x7d3   : > { %v6661_v61 = vmax.f32 %v6629_v45, 0.0 }
 0x7d4   : > { %v6659_v22 = vmax.f32 %v6627_v8, 0.0  ;;  %v9911_v54 = vpop.f32.mrb[224].mxu0  ;;  %v9893_v52 = vpop.f32.mrb[20].mxu1 }
 0x7d5   : > { %v6694_v58 = vpack.c.bf16 %v6661_v61, %v6660_v60  ;;  %v6529_v48 = vadd.f32 %v9911_v54, %v6414_v20  ;;  %v6520_v7 = vpop.f32.mrb[225].mxu0  ;;  %6397 = vst.msk [vmem:[#allocation3 + $0xf0] sm:$0xff] %vm1293_vm5, %v9893_v52  ;;  %v6376_v24 = vpop.f32.mrb[21].mxu1  ;;  %v6421_v61 = vld [vmem:[#allocation3 + $0x88] sm:$0xff] }
 0x7d6   : > { %v6693_v40 = vpack.c.bf16 %v6659_v22, %v6658_v49  ;;  %v6521_v23 = vadd.f32 %v6520_v7, %v6412_v10  ;;  %v9912_v28 = vpop.f32.mrb[226].mxu0  ;;  %6395 = vst.msk [vmem:[#allocation3 + $0xe0] sm:$0xff] %vm1293_vm5, %v6376_v24  ;;  %v9894_v38 = vpop.f32.mrb[22].mxu1  ;;  %v6426_v24 = vld [vmem:[#allocation3 + $0xb0] sm:$0xff] }
 0x7d7   : > { %v6632_v41 = vadd.f32 %v12513_v59, %v6529_v48  ;;  %v6532_v6 = vadd.f32 %v9912_v28, %v6415_v56  ;;  %v6523_v63 = vpop.f32.mrb[227].mxu0  ;;  %6398 = vst.msk [vmem:[#allocation3 + $0xf8] sm:$0xff] %vm1293_vm5, %v9894_v38  ;;  %v6379_v51 = vpop.f32.mrb[23].mxu1  ;;  %v6424_v38 = vld [vmem:[#allocation3 + $0xa0] sm:$0xff] }
 0x7d8   : > { %v6630_v34 = vadd.f32 %v12513_v59, %v6521_v23  ;;  %v6524_v1 = vadd.f32 %v6523_v63, %v6413_v55  ;;  %9943 = vmatprep.mubr.msk.bf16.mxu1 %vm1293_vm5, %v6693_v40  ;;  %6396 = vst.msk [vmem:[#allocation3 + $0xe8] sm:$0xff] %vm1293_vm5, %v6379_v51  ;;  %v6427_v63 = vld [vmem:[#allocation3 + $0xb8] sm:$0xff] }
 0x7d9   : > { %v6633_v32 = vadd.f32 %v12513_v59, %v6532_v6  ;;  %9944 = vmatmul.mubr.msk.bf16.gmra.mrb[28].mxu1 %vm1293_vm5, %v6694_v58  ;;  %v6664_v36 = vmax.f32 %v6632_v41, 0.0 }
 0x7da   : > { %v6631_v13 = vadd.f32 %v12513_v59, %v6524_v1  ;;  %v6662_v18 = vmax.f32 %v6630_v34, 0.0 }
 0x7db   : > { %v6665_v15 = vmax.f32 %v6633_v32, 0.0  ;;  %v6425_v32 = vld [vmem:[#allocation3 + $0xa8] sm:$0xff] }
 0x7dc   : > { %v6663_v3 = vmax.f32 %v6631_v13, 0.0  ;;  %v9915_v35 = vpop.f32.mrb[228].mxu0 }
 0x7dd   : > { %v6696_v16 = vpack.c.bf16 %v6665_v15, %v6664_v36  ;;  %v6545_v33 = vadd.f32 %v9915_v35, %v6418_v11  ;;  %v6536_v30 = vpop.f32.mrb[229].mxu0  ;;  %v6428_v35 = vld [vmem:[#allocation3 + $0xc0] sm:$0xff] }
 0x7de   : > { %v6695_v37 = vpack.c.bf16 %v6663_v3, %v6662_v18  ;;  %v6537_v53 = vadd.f32 %v6536_v30, %v6416_v26  ;;  %v9916_v4 = vpop.f32.mrb[230].mxu0  ;;  %v6430_v26 = vld [vmem:[#allocation3 + $0xd0] sm:$0xff] }
 0x7df   : > { %v6636_v19 = vadd.f32 %v12513_v59, %v6545_v33  ;;  %v6548_v50 = vadd.f32 %v9916_v4, %v6419_v2  ;;  %v6539_v9 = vpop.f32.mrb[231].mxu0 }
 0x7e0   : > { %v6634_v17 = vadd.f32 %v12513_v59, %v6537_v53  ;;  %v6540_v12 = vadd.f32 %v6539_v9, %v6417_v5  ;;  %9947 = vmatprep.mubr.msk.bf16.mxu1 %vm1293_vm5, %v6695_v37 }
 0x7e1   : > { %v6637_v25 = vadd.f32 %v12513_v59, %v6548_v50  ;;  %9948 = vmatmul.mubr.msk.bf16.gmra.mrb[32].mxu1 %vm1293_vm5, %v6696_v16  ;;  %v6668_v31 = vmax.f32 %v6636_v19, 0.0  ;;  %v6431_v50 = vld [vmem:[#allocation3 + $0xd8] sm:$0xff] }
 0x7e2   : > { %v6635_v42 = vadd.f32 %v12513_v59, %v6540_v12  ;;  %v6666_v14 = vmax.f32 %v6634_v17, 0.0 }
 0x7e3   : > { %v6669_v21 = vmax.f32 %v6637_v25, 0.0  ;;  %v6429_v25 = vld [vmem:[#allocation3 + $0xc8] sm:$0xff] }
 0x7e4   : > { %v6667_v57 = vmax.f32 %v6635_v42, 0.0  ;;  %v9919_v46 = vpop.f32.mrb[232].mxu0 }
 0x7e5   : > { %v6698_v27 = vpack.c.bf16 %v6669_v21, %v6668_v31  ;;  %v6561_v44 = vadd.f32 %v9919_v46, %v6422_v0  ;;  %v6552_v47 = vpop.f32.mrb[233].mxu0 }
 0x7e6   : > { %v6697_v29 = vpack.c.bf16 %v6667_v57, %v6666_v14  ;;  %v6553_v43 = vadd.f32 %v6552_v47, %v6420_v39  ;;  %v9920_v45 = vpop.f32.mrb[234].mxu0  ;;  %v6434_v57 = vld [vmem:[#allocation3 + $0xf0] sm:$0xff] }
 0x7e7   : > { %v6640_v8 = vadd.f32 %v12513_v59, %v6561_v44  ;;  %v6564_v20 = vadd.f32 %v9920_v45, %v6423_v62  ;;  %v6555_v60 = vpop.f32.mrb[235].mxu0 }
 0x7e8   : > { %v6638_v10 = vadd.f32 %v12513_v59, %v6553_v43  ;;  %v6556_v49 = vadd.f32 %v6555_v60, %v6421_v61  ;;  %9951 = vmatprep.mubr.msk.bf16.mxu1 %vm1293_vm5, %v6697_v29 }
 0x7e9   : > { %v6641_v22 = vadd.f32 %v12513_v59, %v6564_v20  ;;  %9952 = vmatmul.mubr.msk.bf16.gmra.mrb[36].mxu1 %vm1293_vm5, %v6698_v27  ;;  %v6672_v52 = vmax.f32 %v6640_v8, 0.0  ;;  %v6432_v27 = vld [vmem:[#allocation3 + $0xe0] sm:$0xff]  ;;  %v6435_v20 = vld [vmem:[#allocation3 + $0xf8] sm:$0xff] }
 0x7ea   : > { %v6639_v54 = vadd.f32 %v12513_v59, %v6556_v49  ;;  %v6670_v48 = vmax.f32 %v6638_v10, 0.0 }
 0x7eb   : > { %v6673_v58 = vmax.f32 %v6641_v22, 0.0  ;;  %v6433_v22 = vld [vmem:[#allocation3 + $0xe8] sm:$0xff] }
 0x7ec   : > { %v6671_v7 = vmax.f32 %v6639_v54, 0.0  ;;  %v9923_v40 = vpop.f32.mrb[236].mxu0 }
 0x7ed   : > { %v6700_v23 = vpack.c.bf16 %v6673_v58, %v6672_v52  ;;  %v6577_v56 = vadd.f32 %v9923_v40, %v6426_v24  ;;  %v6568_v28 = vpop.f32.mrb[237].mxu0 }
 0x7ee   : > { %v6699_v41 = vpack.c.bf16 %v6671_v7, %v6670_v48  ;;  %v6569_v6 = vadd.f32 %v6568_v28, %v6424_v38  ;;  %v9924_v55 = vpop.f32.mrb[238].mxu0  ;;  %v10259_v38 = vld [vmem:[%s12856_s22 + $0x8] sm:$0xff]  }
 0x7ef   : > { %v6644_v51 = vadd.f32 %v12513_v59, %v6577_v56  ;;  %v6580_v34 = vadd.f32 %v9924_v55, %v6427_v63  ;;  %v6571_v1 = vpop.f32.mrb[239].mxu0  ;;  %9973 = vmatprep.subr.bf16.mxu0 %v10259_v38  ;;  %v12585_v63 = vld [vmem:[%s12855_s21] ss:$0 sm:$0xff] }
 0x7f0   : > { %v6642_v13 = vadd.f32 %v12513_v59, %v6569_v6  ;;  %v6572_v11 = vadd.f32 %v6571_v1, %v6425_v32  ;;  %9955 = vmatprep.mubr.msk.bf16.mxu1 %vm1293_vm5, %v6699_v41  ;;  %9974 = vmatpush3.bf16.msra.mxu0 %v10259_v38  ;;  %v10261_v6 = vld [vmem:[%s12858_s24] sm:$0xff]  }
 0x7f1   : > { %v6645_v36 = vadd.f32 %v12513_v59, %v6580_v34  ;;  %9956 = vmatmul.mubr.msk.bf16.gmra.mrb[40].mxu1 %vm1293_vm5, %v6700_v23  ;;  %v6676_v18 = vmax.f32 %v6644_v51, 0.0  ;;  %10009 = vmatprep.subr.bf16.mxu1 %v10261_v6 }
 0x7f2   : > { %v6643_v15 = vadd.f32 %v12513_v59, %v6572_v11  ;;  %v6674_v16 = vmax.f32 %v6642_v13, 0.0  ;;  %10010 = vmatpush3.bf16.msra.mxu1 %v10261_v6 }
 0x7f3   : > { %v6677_v3 = vmax.f32 %v6645_v36, 0.0 }
 0x7f4   : > { %v6675_v33 = vmax.f32 %v6643_v15, 0.0  ;;  %v9927_v30 = vpop.f32.mrb[240].mxu0 }
 0x7f5   : > { %v6702_v37 = vpack.c.bf16 %v6677_v3, %v6676_v18  ;;  %v6593_v53 = vadd.f32 %v9927_v30, %v6430_v26  ;;  %v6584_v2 = vpop.f32.mrb[241].mxu0 }
 0x7f6   : > { %v6701_v4 = vpack.c.bf16 %v6675_v33, %v6674_v16  ;;  %v6585_v19 = vadd.f32 %v6584_v2, %v6428_v35  ;;  %v9928_v9 = vpop.f32.mrb[242].mxu0 }
 0x7f7   : > { %v6648_v5 = vadd.f32 %v12513_v59, %v6593_v53  ;;  %v6596_v17 = vadd.f32 %v9928_v9, %v6431_v50  ;;  %v6587_v12 = vpop.f32.mrb[243].mxu0 }
 0x7f8   : > { %v6646_v42 = vadd.f32 %v12513_v59, %v6585_v19  ;;  %v6588_v31 = vadd.f32 %v6587_v12, %v6429_v25  ;;  %9959 = vmatprep.mubr.msk.bf16.mxu1 %vm1293_vm5, %v6701_v4 }
 0x7f9   : > { %v6649_v21 = vadd.f32 %v12513_v59, %v6596_v17  ;;  %9960 = vmatmul.mubr.msk.bf16.gmra.mrb[44].mxu1 %vm1293_vm5, %v6702_v37  ;;  %v6680_v0 = vmax.f32 %v6648_v5, 0.0 }
 0x7fa   : > { %v6647_v14 = vadd.f32 %v12513_v59, %v6588_v31  ;;  %v6678_v44 = vmax.f32 %v6646_v42, 0.0 }
 0x7fb   : > { %v6681_v46 = vmax.f32 %v6649_v21, 0.0 }
 0x7fc   : > { %v6679_v47 = vmax.f32 %v6647_v14, 0.0  ;;  %v9931_v39 = vpop.f32.mrb[244].mxu0 }
 0x7fd   : > { %v6704_v29 = vpack.c.bf16 %v6681_v46, %v6680_v0  ;;  %v6609_v43 = vadd.f32 %v9931_v39, %v6434_v57  ;;  %v6600_v62 = vpop.f32.mrb[245].mxu0 }
 0x7fe   : > { %v6703_v45 = vpack.c.bf16 %v6679_v47, %v6678_v44  ;;  %v6601_v8 = vadd.f32 %v6600_v62, %v6432_v27  ;;  %v9932_v60 = vpop.f32.mrb[246].mxu0 }
 0x7ff   : > { %v6652_v61 = vadd.f32 %v12513_v59, %v6609_v43  ;;  %v6612_v10 = vadd.f32 %v9932_v60, %v6435_v20  ;;  %v6603_v49 = vpop.f32.mrb[247].mxu0 }
 0x800   : > { %v6650_v54 = vadd.f32 %v12513_v59, %v6601_v8  ;;  %v6604_v52 = vadd.f32 %v6603_v49, %v6433_v22  ;;  %9963 = vmatprep.mubr.msk.bf16.mxu1 %vm1293_vm5, %v6703_v45 }
 0x801   : > { %v6653_v58 = vadd.f32 %v12513_v59, %v6612_v10  ;;  %9964 = vmatmul.mubr.msk.bf16.gmra.mrb[48].mxu1 %vm1293_vm5, %v6704_v29  ;;  %v6684_v7 = vmax.f32 %v6652_v61, 0.0 }
 0x802   : > { %v6651_v48 = vadd.f32 %v12513_v59, %v6604_v52  ;;  %v6682_v40 = vmax.f32 %v6650_v54, 0.0  ;;  %v10260_v59 = vld [vmem:[%s12856_s22 + $0x10] ss:$0 sps:$4 sm:$0xff]  }
 0x803   : > { %v6685_v24 = vmax.f32 %v6653_v58, 0.0  ;;  %10211 = vmatprep.subr.msk.bf16.mxu0 %vm1342_vm4, %v10260_v59  ;;  %v7065_v41 = vsel %vm1342_vm4, %v10260_v59, 0 }
 0x804   : > { %v6683_v23 = vmax.f32 %v6651_v48, 0.0  ;;  %9976 = vmatpush3.bf16.msra.mxu0 %v7065_v41 }
 0x805   : > { %v6706_v56 = vpack.c.bf16 %v6685_v24, %v6684_v7 }
 0x806   : > { %v6705_v28 = vpack.c.bf16 %v6683_v23, %v6682_v40 }
 0x808   : > { %9967 = vmatprep.mubr.msk.bf16.mxu1 %vm1293_vm5, %v6705_v28 }
 0x809   : > { %9968 = vmatmul.mubr.msk.bf16.gmra.mrb[52].mxu1 %vm1293_vm5, %v6706_v56 }
 0x8a4   : > { %v9941_v55 = vpop.f32.mrb[24].mxu1 }
 0x8a5   : > { %v6823_v51 = vadd.f32 %v9941_v55, %v12585_v63  ;;  %v6814_v34 = vpop.f32.mrb[25].mxu1 }
 0x8a6   : > { %v6815_v1 = vadd.f32 %v12585_v63, %v6814_v34  ;;  %v9942_v32 = vpop.f32.mrb[26].mxu1 }
 0x8a7   : > { %v6826_v13 = vadd.f32 %v9942_v32, %v12585_v63  ;;  %v6817_v11 = vpop.f32.mrb[27].mxu1  ;;  %v6943_v15 = vmax.f32 %v6823_v51, 0.0 }
 0x8a8   : > { %v6818_v36 = vadd.f32 %v12585_v63, %v6817_v11  ;;  %v6941_v18 = vmax.f32 %v6815_v1, 0.0 }
 0x8a9   : > { %v6944_v26 = vmax.f32 %v6826_v13, 0.0 }
 0x8aa   : > { %v6942_v3 = vmax.f32 %v6818_v36, 0.0 }
 0x8ab   : > { %v6979_v35 = vpack.c.bf16 %v6944_v26, %v6943_v15 }
 0x8ac   : > { %v6978_v16 = vpack.c.bf16 %v6942_v3, %v6941_v18  ;;  %v9945_v33 = vpop.f32.mrb[28].mxu1 }
 0x8ad   : > { %v6839_v30 = vadd.f32 %v9945_v33, %v12585_v63  ;;  %v6830_v37 = vpop.f32.mrb[29].mxu1 }
 0x8ae   : > { %v6831_v53 = vadd.f32 %v12585_v63, %v6830_v37  ;;  %v9946_v2 = vpop.f32.mrb[30].mxu1  ;;  %9977 = vmatprep.mubr.msk.bf16.mxu0 %vm1293_vm5, %v6978_v16 }
 0x8af   : > { %v6842_v4 = vadd.f32 %v9946_v2, %v12585_v63  ;;  %v6833_v19 = vpop.f32.mrb[31].mxu1  ;;  %9978 = vmatmul.mubr.msk.bf16.vlgmr.msra.gmra.mrb[248].mxu0 %vm1293_vm5, %v6979_v35  ;;  %v6947_v9 = vmax.f32 %v6839_v30, 0.0 }
 0x8b0   : > { %v6834_v50 = vadd.f32 %v12585_v63, %v6833_v19  ;;  %v6945_v17 = vmax.f32 %v6831_v53, 0.0 }
 0x8b1   : > { %v6948_v5 = vmax.f32 %v6842_v4, 0.0 }
 0x8b2   : > { %v6946_v12 = vmax.f32 %v6834_v50, 0.0 }
 0x8b3   : > { %v6981_v25 = vpack.c.bf16 %v6948_v5, %v6947_v9 }
 0x8b4   : > { %v6980_v42 = vpack.c.bf16 %v6946_v12, %v6945_v17  ;;  %v9949_v31 = vpop.f32.mrb[32].mxu1 }
 0x8b5   : > { %v6855_v21 = vadd.f32 %v9949_v31, %v12585_v63  ;;  %v6846_v14 = vpop.f32.mrb[33].mxu1 }
 0x8b6   : > { %v6847_v57 = vadd.f32 %v12585_v63, %v6846_v14  ;;  %v9950_v0 = vpop.f32.mrb[34].mxu1  ;;  %9981 = vmatprep.mubr.msk.bf16.mxu0 %vm1293_vm5, %v6980_v42 }
 0x8b7   : > { %v6858_v46 = vadd.f32 %v9950_v0, %v12585_v63  ;;  %v6849_v27 = vpop.f32.mrb[35].mxu1  ;;  %9982 = vmatmul.mubr.msk.bf16.gmra.mrb[252].mxu0 %vm1293_vm5, %v6981_v25  ;;  %v6951_v47 = vmax.f32 %v6855_v21, 0.0 }
 0x8b8   : > { %v6850_v44 = vadd.f32 %v12585_v63, %v6849_v27  ;;  %v6949_v29 = vmax.f32 %v6847_v57, 0.0 }
 0x8b9   : > { %v6952_v39 = vmax.f32 %v6858_v46, 0.0 }
 0x8ba   : > { %v6950_v43 = vmax.f32 %v6850_v44, 0.0 }
 0x8bb   : > { %v6983_v62 = vpack.c.bf16 %v6952_v39, %v6951_v47 }
 0x8bc   : > { %v6982_v45 = vpack.c.bf16 %v6950_v43, %v6949_v29  ;;  %v9953_v8 = vpop.f32.mrb[36].mxu1 }
 0x8bd   : > { %v6871_v20 = vadd.f32 %v9953_v8, %v12585_v63  ;;  %v6862_v60 = vpop.f32.mrb[37].mxu1 }
 0x8be   : > { %v6863_v61 = vadd.f32 %v12585_v63, %v6862_v60  ;;  %v9954_v10 = vpop.f32.mrb[38].mxu1  ;;  %9985 = vmatprep.mubr.msk.bf16.mxu0 %vm1293_vm5, %v6982_v45 }
 0x8bf   : > { %v6874_v49 = vadd.f32 %v9954_v10, %v12585_v63  ;;  %v6865_v22 = vpop.f32.mrb[39].mxu1  ;;  %9986 = vmatmul.mubr.msk.bf16.gmra.mrb[0].mxu0 %vm1293_vm5, %v6983_v62  ;;  %v6955_v52 = vmax.f32 %v6871_v20, 0.0 }
 0x8c0   : > { %v6866_v54 = vadd.f32 %v12585_v63, %v6865_v22  ;;  %v6953_v48 = vmax.f32 %v6863_v61, 0.0 }
 0x8c1   : > { %v6956_v58 = vmax.f32 %v6874_v49, 0.0 }
 0x8c2   : > { %v6954_v7 = vmax.f32 %v6866_v54, 0.0  ;;  %v10262_v54 = vld [vmem:[%s12858_s24 + $0x8] sm:$0xff]  }
 0x8c3   : > { %v6985_v24 = vpack.c.bf16 %v6956_v58, %v6955_v52  ;;  %10011 = vmatprep.subr.bf16.mxu1 %v10262_v54  ;;  %v10264_v58 = vld [vmem:[%s12859_s25] sm:$0xff]  }
 0x8c4   : > { %v6984_v40 = vpack.c.bf16 %v6954_v7, %v6953_v48  ;;  %v9957_v23 = vpop.f32.mrb[40].mxu1  ;;  %10012 = vmatpush3.bf16.msra.mxu1 %v10262_v54  ;;  %10047 = vmatprep.subr.bf16.mxu0 %v10264_v58  ;;  %v12649_v48 = vld [vmem:[%s12857_s23] ss:$0 sm:$0xff] }
 0x8c5   : > { %v6887_v56 = vadd.f32 %v9957_v23, %v12585_v63  ;;  %v6878_v28 = vpop.f32.mrb[41].mxu1  ;;  %10048 = vmatpush3.bf16.msra.mxu0 %v10264_v58  ;;  %v13305_v58 = vld [vmem:[#allocation54_spill] sm:$0xff] }
 0x8c6   : > { %v6879_v38 = vadd.f32 %v12585_v63, %v6878_v28  ;;  %v9958_v59 = vpop.f32.mrb[42].mxu1  ;;  %9989 = vmatprep.mubr.msk.bf16.mxu0 %vm1293_vm5, %v6984_v40  ;;  %v13296_v28 = vld [vmem:[#allocation37_spill] sm:$0xff] }
 0x8c7   : > { %v6890_v41 = vadd.f32 %v9958_v59, %v12585_v63  ;;  %v6881_v6 = vpop.f32.mrb[43].mxu1  ;;  %9990 = vmatmul.mubr.msk.bf16.gmra.mrb[4].mxu0 %vm1293_vm5, %v6985_v24  ;;  %v6959_v51 = vmax.f32 %v6887_v56, 0.0 }
 0x8c8   : > { %v6882_v55 = vadd.f32 %v12585_v63, %v6881_v6  ;;  %v6957_v1 = vmax.f32 %v6879_v38, 0.0  ;;  %v7230_v38 = vmul.f32 0.5, %v13296_v28 }
 0x8c9   : > { %v6960_v34 = vmax.f32 %v6890_v41, 0.0 }
 0x8ca   : > { %v6958_v32 = vmax.f32 %v6882_v55, 0.0  ;;  %v13297_v55 = vld [vmem:[#allocation38_spill] sm:$0xff] }
 0x8cb   : > { %v6987_v13 = vpack.c.bf16 %v6960_v34, %v6959_v51  ;;  %v7228_v51 = vmul.f32 0.5, %v13297_v55 }
 0x8cc   : > { %v6986_v11 = vpack.c.bf16 %v6958_v32, %v6957_v1  ;;  %v9961_v36 = vpop.f32.mrb[44].mxu1 }
 0x8cd   : > { %v6903_v15 = vadd.f32 %v9961_v36, %v12585_v63  ;;  %v6894_v26 = vpop.f32.mrb[45].mxu1 }
 0x8ce   : > { %v6895_v18 = vadd.f32 %v12585_v63, %v6894_v26  ;;  %v9962_v3 = vpop.f32.mrb[46].mxu1  ;;  %9993 = vmatprep.mubr.msk.bf16.mxu0 %vm1293_vm5, %v6986_v11  ;;  %v13299_v26 = vld [vmem:[#allocation43_spill] sm:$0xff] }
 0x8cf   : > { %v6906_v35 = vadd.f32 %v9962_v3, %v12585_v63  ;;  %v6897_v16 = vpop.f32.mrb[47].mxu1  ;;  %9994 = vmatmul.mubr.msk.bf16.gmra.mrb[8].mxu0 %vm1293_vm5, %v6987_v13  ;;  %v6963_v30 = vmax.f32 %v6903_v15, 0.0  ;;  %v13298_v13 = vld [vmem:[#allocation41_spill] sm:$0xff] }
 0x8d0   : > { %v6898_v33 = vadd.f32 %v12585_v63, %v6897_v16  ;;  %v6961_v53 = vmax.f32 %v6895_v18, 0.0  ;;  %v7231_v11 = vmul.f32 0.5, %v13298_v13  ;;  %v7229_v18 = vmul.f32 0.5, %v13299_v26 }
 0x8d1   : > { %v6964_v37 = vmax.f32 %v6906_v35, 0.0 }
 0x8d2   : > { %v6962_v2 = vmax.f32 %v6898_v33, 0.0 }
 0x8d3   : > { %v6989_v4 = vpack.c.bf16 %v6964_v37, %v6963_v30 }
 0x8d4   : > { %v6988_v19 = vpack.c.bf16 %v6962_v2, %v6961_v53  ;;  %v9965_v50 = vpop.f32.mrb[48].mxu1 }
 0x8d5   : > { %v6919_v9 = vadd.f32 %v9965_v50, %v12585_v63  ;;  %v6910_v5 = vpop.f32.mrb[49].mxu1  ;;  %v13300_v50 = vld [vmem:[#allocation45_spill] sm:$0xff] }
 0x8d6   : > { %v6911_v17 = vadd.f32 %v12585_v63, %v6910_v5  ;;  %v9966_v12 = vpop.f32.mrb[50].mxu1  ;;  %9997 = vmatprep.mubr.msk.bf16.mxu0 %vm1293_vm5, %v6988_v19 }
 0x8d7   : > { %v6922_v25 = vadd.f32 %v9966_v12, %v12585_v63  ;;  %v6913_v42 = vpop.f32.mrb[51].mxu1  ;;  %9998 = vmatmul.mubr.msk.bf16.gmra.mrb[12].mxu0 %vm1293_vm5, %v6989_v4  ;;  %v6967_v21 = vmax.f32 %v6919_v9, 0.0  ;;  %v7234_v9 = vmul.f32 0.5, %v13300_v50 }
 0x8d8   : > { %v6914_v31 = vadd.f32 %v12585_v63, %v6913_v42  ;;  %v6965_v57 = vmax.f32 %v6911_v17, 0.0 }
 0x8d9   : > { %v6968_v14 = vmax.f32 %v6922_v25, 0.0  ;;  %v13301_v25 = vld [vmem:[#allocation46_spill] sm:$0xff] }
 0x8da   : > { %v6966_v0 = vmax.f32 %v6914_v31, 0.0  ;;  %v7232_v42 = vmul.f32 0.5, %v13301_v25 }
 0x8db   : > { %v6991_v46 = vpack.c.bf16 %v6968_v14, %v6967_v21 }
 0x8dc   : > { %v6990_v27 = vpack.c.bf16 %v6966_v0, %v6965_v57  ;;  %v9969_v44 = vpop.f32.mrb[52].mxu1  ;;  %v13302_v57 = vld [vmem:[#allocation47_spill] sm:$0xff] }
 0x8dd   : > { %v6935_v47 = vadd.f32 %v9969_v44, %v12585_v63  ;;  %v6926_v39 = vpop.f32.mrb[53].mxu1  ;;  %v7235_v0 = vmul.f32 0.5, %v13302_v57  ;;  %v13303_v44 = vld [vmem:[#allocation50_spill] sm:$0xff] }
 0x8de   : > { %v6927_v29 = vadd.f32 %v12585_v63, %v6926_v39  ;;  %v9970_v43 = vpop.f32.mrb[54].mxu1  ;;  %10001 = vmatprep.mubr.msk.bf16.mxu0 %vm1293_vm5, %v6990_v27 }
 0x8df   : > { %v6938_v62 = vadd.f32 %v9970_v43, %v12585_v63  ;;  %v6929_v45 = vpop.f32.mrb[55].mxu1  ;;  %10002 = vmatmul.mubr.msk.bf16.gmra.mrb[16].mxu0 %vm1293_vm5, %v6991_v46  ;;  %v6971_v20 = vmax.f32 %v6935_v47, 0.0  ;;  %v7233_v47 = vmul.f32 0.5, %v13303_v44 }
 0x8e0   : > { %v6930_v8 = vadd.f32 %v12585_v63, %v6929_v45  ;;  %v6969_v61 = vmax.f32 %v6927_v29, 0.0  ;;  %v10263_v63 = vld [vmem:[%s12858_s24 + $0x10] ss:$0 sps:$4 sm:$0xff]  }
 0x8e1   : > { %v6972_v60 = vmax.f32 %v6938_v62, 0.0  ;;  %10212 = vmatprep.subr.msk.bf16.mxu1 %vm1342_vm4, %v10263_v63  ;;  %v7409_v52 = vsel %vm1342_vm4, %v10263_v63, 0 }
 0x8e2   : > { %v6970_v10 = vmax.f32 %v6930_v8, 0.0  ;;  %10014 = vmatpush3.bf16.msra.mxu1 %v7409_v52 }
 0x8e3   : > { %v6993_v49 = vpack.c.bf16 %v6972_v60, %v6971_v20 }
 0x8e4   : > { %v6992_v22 = vpack.c.bf16 %v6970_v10, %v6969_v61 }
 0x8e6   : > { %10005 = vmatprep.mubr.msk.bf16.mxu0 %vm1293_vm5, %v6992_v22 }
 0x8e7   : > { %10006 = vmatmul.mubr.msk.bf16.gmra.mrb[20].mxu0 %vm1293_vm5, %v6993_v49  ;;  %v13304_v49 = vld [vmem:[#allocation53_spill] sm:$0xff] }
 0x8e8   : > { %v7238_v22 = vmul.f32 0.5, %v13304_v49 }
 0x982   : > { %v9979_v7 = vpop.f32.mrb[248].mxu0 }
 0x983   : > { %v7110_v24 = vadd.f32 %v9979_v7, %v12649_v48  ;;  %v7101_v40 = vpop.f32.mrb[249].mxu0  ;;  %v7236_v7 = vmul.f32 0.5, %v13305_v58 }
 0x984   : > { %v7102_v23 = vadd.f32 %v12649_v48, %v7101_v40  ;;  %v9980_v56 = vpop.f32.mrb[250].mxu0 }
 0x985   : > { %v7262_v59 = vmul.f32 0.5, %v7110_v24  ;;  %v7113_v41 = vadd.f32 %v9980_v56, %v12649_v48  ;;  %v7104_v6 = vpop.f32.mrb[251].mxu0  ;;  %v13306_v56 = vld [vmem:[#allocation55_spill] sm:$0xff] }
 0x986   : > { %v7260_v34 = vmul.f32 0.5, %v7102_v23  ;;  %v7105_v1 = vadd.f32 %v12649_v48, %v7104_v6  ;;  %v7239_v28 = vmul.f32 0.5, %v13306_v56 }
 0x987   : > { %v7294_v32 = vadd.f32 %v7262_v59, %v7230_v38  ;;  %v7263_v36 = vmul.f32 0.5, %v7113_v41  ;;  %v13307_v41 = vld [vmem:[#allocation57_spill] sm:$0xff] }
 0x988   : > { %v7292_v15 = vadd.f32 %v7260_v34, %v7228_v51  ;;  %v7261_v3 = vmul.f32 0.5, %v7105_v1  ;;  %v7237_v6 = vmul.f32 0.5, %v13307_v41 }
 0x989   : > { %v7295_v35 = vadd.f32 %v7263_v36, %v7231_v11 }
 0x98a   : > { %v7293_v16 = vadd.f32 %v7261_v3, %v7229_v18  ;;  %v9983_v33 = vpop.f32.mrb[252].mxu0  ;;  %v13308_v18 = vld [vmem:[#allocation59_spill] sm:$0xff] }
 0x98b   : > { %v7330_v30 = vpack.c.bf16 %v7295_v35, %v7294_v32  ;;  %v7126_v37 = vadd.f32 %v9983_v33, %v12649_v48  ;;  %v7117_v53 = vpop.f32.mrb[253].mxu0  ;;  %v7242_v3 = vmul.f32 0.5, %v13308_v18 }
 0x98c   : > { %v7329_v2 = vpack.c.bf16 %v7293_v16, %v7292_v15  ;;  %v7118_v4 = vadd.f32 %v12649_v48, %v7117_v53  ;;  %v9984_v19 = vpop.f32.mrb[254].mxu0 }
 0x98d   : > { %v7266_v5 = vmul.f32 0.5, %v7126_v37  ;;  %v7129_v17 = vadd.f32 %v9984_v19, %v12649_v48  ;;  %v7120_v12 = vpop.f32.mrb[255].mxu0  ;;  %v13310_v19 = vld [vmem:[#allocation61_spill] sm:$0xff] }
 0x98e   : > { %v7264_v31 = vmul.f32 0.5, %v7118_v4  ;;  %v7121_v21 = vadd.f32 %v12649_v48, %v7120_v12  ;;  %10015 = vmatprep.mubr.msk.bf16.mxu1 %vm1293_vm5, %v7329_v2  ;;  %v7243_v50 = vmul.f32 0.5, %v13310_v19 }
 0x98f   : > { %v7298_v14 = vadd.f32 %v7266_v5, %v7234_v9  ;;  %v7267_v46 = vmul.f32 0.5, %v7129_v17  ;;  %10016 = vmatmul.mubr.msk.bf16.vlgmr.msra.gmra.mrb[56].mxu1 %vm1293_vm5, %v7330_v30  ;;  %v13309_v30 = vld [vmem:[#allocation60_spill] sm:$0xff]  ;;  %v13311_v17 = vld [vmem:[#allocation63_spill] sm:$0xff] }
 0x990   : > { %v7296_v27 = vadd.f32 %v7264_v31, %v7232_v42  ;;  %v7265_v39 = vmul.f32 0.5, %v7121_v21  ;;  %v7240_v37 = vmul.f32 0.5, %v13309_v30  ;;  %v7241_v12 = vmul.f32 0.5, %v13311_v17 }
 0x991   : > { %v7299_v29 = vadd.f32 %v7267_v46, %v7235_v0 }
 0x992   : > { %v7297_v43 = vadd.f32 %v7265_v39, %v7233_v47  ;;  %v9987_v62 = vpop.f32.mrb[0].mxu0  ;;  %v13312_v47 = vld [vmem:[#allocation65_spill] sm:$0xff] }
 0x993   : > { %v7332_v45 = vpack.c.bf16 %v7299_v29, %v7298_v14  ;;  %v7142_v8 = vadd.f32 %v9987_v62, %v12649_v48  ;;  %v7133_v20 = vpop.f32.mrb[1].mxu0  ;;  %v7246_v39 = vmul.f32 0.5, %v13312_v47 }
 0x994   : > { %v7331_v60 = vpack.c.bf16 %v7297_v43, %v7296_v27  ;;  %v7134_v61 = vadd.f32 %v12649_v48, %v7133_v20  ;;  %v9988_v10 = vpop.f32.mrb[2].mxu0 }
 0x995   : > { %v7270_v54 = vmul.f32 0.5, %v7142_v8  ;;  %v7145_v63 = vadd.f32 %v9988_v10, %v12649_v48  ;;  %v7136_v52 = vpop.f32.mrb[3].mxu0  ;;  %v13314_v10 = vld [vmem:[#allocation67_spill] sm:$0xff] }
 0x996   : > { %v7268_v24 = vmul.f32 0.5, %v7134_v61  ;;  %v7137_v40 = vadd.f32 %v12649_v48, %v7136_v52  ;;  %10019 = vmatprep.mubr.msk.bf16.mxu1 %vm1293_vm5, %v7331_v60  ;;  %v7247_v49 = vmul.f32 0.5, %v13314_v10 }
 0x997   : > { %v7302_v23 = vadd.f32 %v7270_v54, %v7238_v22  ;;  %v7271_v38 = vmul.f32 0.5, %v7145_v63  ;;  %10020 = vmatmul.mubr.msk.bf16.gmra.mrb[60].mxu1 %vm1293_vm5, %v7332_v45  ;;  %v13313_v45 = vld [vmem:[#allocation66_spill] sm:$0xff]  ;;  %v13315_v63 = vld [vmem:[#allocation69_spill] sm:$0xff] }
 0x998   : > { %v7300_v59 = vadd.f32 %v7268_v24, %v7236_v7  ;;  %v7269_v55 = vmul.f32 0.5, %v7137_v40  ;;  %v7244_v8 = vmul.f32 0.5, %v13313_v45  ;;  %v7245_v52 = vmul.f32 0.5, %v13315_v63 }
 0x999   : > { %v7303_v51 = vadd.f32 %v7271_v38, %v7239_v28 }
 0x99a   : > { %v7301_v34 = vadd.f32 %v7269_v55, %v7237_v6  ;;  %v9991_v1 = vpop.f32.mrb[4].mxu0  ;;  %v13316_v6 = vld [vmem:[#allocation71_spill] sm:$0xff] }
 0x99b   : > { %v7334_v32 = vpack.c.bf16 %v7303_v51, %v7302_v23  ;;  %v7158_v13 = vadd.f32 %v9991_v1, %v12649_v48  ;;  %v7149_v11 = vpop.f32.mrb[5].mxu0  ;;  %v7250_v55 = vmul.f32 0.5, %v13316_v6 }
 0x99c   : > { %v7333_v36 = vpack.c.bf16 %v7301_v34, %v7300_v59  ;;  %v7150_v15 = vadd.f32 %v12649_v48, %v7149_v11  ;;  %v9992_v26 = vpop.f32.mrb[6].mxu0 }
 0x99d   : > { %v7274_v35 = vmul.f32 0.5, %v7158_v13  ;;  %v7161_v16 = vadd.f32 %v9992_v26, %v12649_v48  ;;  %v7152_v33 = vpop.f32.mrb[7].mxu0  ;;  %v13318_v26 = vld [vmem:[#allocation73_spill] sm:$0xff] }
 0x99e   : > { %v7272_v53 = vmul.f32 0.5, %v7150_v15  ;;  %v7153_v2 = vadd.f32 %v12649_v48, %v7152_v33  ;;  %10023 = vmatprep.mubr.msk.bf16.mxu1 %vm1293_vm5, %v7333_v36  ;;  %v7251_v18 = vmul.f32 0.5, %v13318_v26  ;;  %v10266_v26 = vld [vmem:[%s12859_s25 + $0x10] ss:$0 sps:$4 sm:$0xff]  }
 0x99f   : > { %v7306_v4 = vadd.f32 %v7274_v35, %v7242_v3  ;;  %v7275_v9 = vmul.f32 0.5, %v7161_v16  ;;  %10024 = vmatmul.mubr.msk.bf16.gmra.mrb[64].mxu1 %vm1293_vm5, %v7334_v32  ;;  %v13317_v32 = vld [vmem:[#allocation72_spill] sm:$0xff]  ;;  %v13319_v16 = vld [vmem:[#allocation75_spill] sm:$0xff] }
 0x9a0   : > { %v7304_v5 = vadd.f32 %v7272_v53, %v7240_v37  ;;  %v7273_v25 = vmul.f32 0.5, %v7153_v2  ;;  %v7248_v13 = vmul.f32 0.5, %v13317_v32  ;;  %v7249_v33 = vmul.f32 0.5, %v13319_v16 }
 0x9a1   : > { %v7307_v42 = vadd.f32 %v7275_v9, %v7243_v50 }
 0x9a2   : > { %v7305_v31 = vadd.f32 %v7273_v25, %v7241_v12  ;;  %v9995_v21 = vpop.f32.mrb[8].mxu0  ;;  %v13320_v12 = vld [vmem:[#allocation77_spill] sm:$0xff] }
 0x9a3   : > { %v7336_v14 = vpack.c.bf16 %v7307_v42, %v7306_v4  ;;  %v7174_v57 = vadd.f32 %v9995_v21, %v12649_v48  ;;  %v7165_v0 = vpop.f32.mrb[9].mxu0  ;;  %v7254_v25 = vmul.f32 0.5, %v13320_v12 }
 0x9a4   : > { %v7335_v46 = vpack.c.bf16 %v7305_v31, %v7304_v5  ;;  %v7166_v27 = vadd.f32 %v12649_v48, %v7165_v0  ;;  %v9996_v44 = vpop.f32.mrb[10].mxu0 }
 0x9a5   : > { %v7278_v29 = vmul.f32 0.5, %v7174_v57  ;;  %v7177_v43 = vadd.f32 %v9996_v44, %v12649_v48  ;;  %v7168_v62 = vpop.f32.mrb[11].mxu0  ;;  %v13322_v44 = vld [vmem:[#allocation79_spill] sm:$0xff] }
 0x9a6   : > { %v7276_v20 = vmul.f32 0.5, %v7166_v27  ;;  %v7169_v60 = vadd.f32 %v12649_v48, %v7168_v62  ;;  %10027 = vmatprep.mubr.msk.bf16.mxu1 %vm1293_vm5, %v7335_v46  ;;  %v7255_v47 = vmul.f32 0.5, %v13322_v44 }
 0x9a7   : > { %v7310_v61 = vadd.f32 %v7278_v29, %v7246_v39  ;;  %v7279_v22 = vmul.f32 0.5, %v7177_v43  ;;  %10028 = vmatmul.mubr.msk.bf16.gmra.mrb[68].mxu1 %vm1293_vm5, %v7336_v14  ;;  %v13321_v14 = vld [vmem:[#allocation78_spill] sm:$0xff]  ;;  %v13323_v43 = vld [vmem:[#allocation81_spill] sm:$0xff] }
 0x9a8   : > { %v7308_v54 = vadd.f32 %v7276_v20, %v7244_v8  ;;  %v7277_v58 = vmul.f32 0.5, %v7169_v60  ;;  %v7252_v57 = vmul.f32 0.5, %v13321_v14  ;;  %v7253_v62 = vmul.f32 0.5, %v13323_v43 }
 0x9a9   : > { %v7311_v7 = vadd.f32 %v7279_v22, %v7247_v49 }
 0x9aa   : > { %v7309_v24 = vadd.f32 %v7277_v58, %v7245_v52  ;;  %v9999_v40 = vpop.f32.mrb[12].mxu0  ;;  %v13324_v52 = vld [vmem:[#allocation83_spill] sm:$0xff] }
 0x9ab   : > { %v7338_v23 = vpack.c.bf16 %v7311_v7, %v7310_v61  ;;  %v7190_v56 = vadd.f32 %v9999_v40, %v12649_v48  ;;  %v7181_v28 = vpop.f32.mrb[13].mxu0  ;;  %v7258_v58 = vmul.f32 0.5, %v13324_v52 }
 0x9ac   : > { %v7337_v38 = vpack.c.bf16 %v7309_v24, %v7308_v54  ;;  %v7182_v59 = vadd.f32 %v12649_v48, %v7181_v28  ;;  %v10000_v41 = vpop.f32.mrb[14].mxu0 }
 0x9ad   : > { %v7282_v51 = vmul.f32 0.5, %v7190_v56  ;;  %v7193_v34 = vadd.f32 %v10000_v41, %v12649_v48  ;;  %v7184_v1 = vpop.f32.mrb[15].mxu0  ;;  %v13326_v41 = vld [vmem:[#allocation85_spill] sm:$0xff] }
 0x9ae   : > { %v7280_v11 = vmul.f32 0.5, %v7182_v59  ;;  %v7185_v36 = vadd.f32 %v12649_v48, %v7184_v1  ;;  %10031 = vmatprep.mubr.msk.bf16.mxu1 %vm1293_vm5, %v7337_v38  ;;  %v7259_v6 = vmul.f32 0.5, %v13326_v41 }
 0x9af   : > { %v7314_v15 = vadd.f32 %v7282_v51, %v7250_v55  ;;  %v7283_v3 = vmul.f32 0.5, %v7193_v34  ;;  %10032 = vmatmul.mubr.msk.bf16.gmra.mrb[72].mxu1 %vm1293_vm5, %v7338_v23  ;;  %v13325_v23 = vld [vmem:[#allocation84_spill] sm:$0xff]  ;;  %v13327_v34 = vld [vmem:[#allocation87_spill] sm:$0xff] }
 0x9b0   : > { %v7312_v35 = vadd.f32 %v7280_v11, %v7248_v13  ;;  %v7281_v30 = vmul.f32 0.5, %v7185_v36  ;;  %v7256_v56 = vmul.f32 0.5, %v13325_v23  ;;  %v7257_v1 = vmul.f32 0.5, %v13327_v34 }
 0x9b1   : > { %v7315_v37 = vadd.f32 %v7283_v3, %v7251_v18  ;;  %v7689_v18 = vsel %vm1342_vm4, %v10266_v26, 0  ;;  %v10267_v3 = vld [vmem:[%s12860_s26] sm:$0x7f]  }
 0x9b2   : > { %v7313_v53 = vadd.f32 %v7281_v30, %v7249_v33  ;;  %v10003_v2 = vpop.f32.mrb[16].mxu0 }
 0x9b3   : > { %v7340_v4 = vpack.c.bf16 %v7315_v37, %v7314_v15  ;;  %v7206_v19 = vadd.f32 %v10003_v2, %v12649_v48  ;;  %v7197_v50 = vpop.f32.mrb[17].mxu0 }
 0x9b4   : > { %v7339_v9 = vpack.c.bf16 %v7313_v53, %v7312_v35  ;;  %v7198_v5 = vadd.f32 %v12649_v48, %v7197_v50  ;;  %v10004_v17 = vpop.f32.mrb[18].mxu0 }
 0x9b5   : > { %v7286_v42 = vmul.f32 0.5, %v7206_v19  ;;  %v7209_v31 = vadd.f32 %v10004_v17, %v12649_v48  ;;  %v7200_v21 = vpop.f32.mrb[19].mxu0 }
 0x9b6   : > { %v7284_v0 = vmul.f32 0.5, %v7198_v5  ;;  %v7201_v46 = vadd.f32 %v12649_v48, %v7200_v21  ;;  %10035 = vmatprep.mubr.msk.bf16.mxu1 %vm1293_vm5, %v7339_v9  ;;  %v7860_v9 = vsel %vm1060_vm0, %v10267_v3, 0 }
 0x9b7   : > { %v7318_v27 = vadd.f32 %v7286_v42, %v7254_v25  ;;  %v7287_v39 = vmul.f32 0.5, %v7209_v31  ;;  %10036 = vmatmul.mubr.msk.bf16.gmra.mrb[76].mxu1 %vm1293_vm5, %v7340_v4 }
 0x9b8   : > { %v7316_v29 = vadd.f32 %v7284_v0, %v7252_v57  ;;  %v7285_v45 = vmul.f32 0.5, %v7201_v46 }
 0x9b9   : > { %v7319_v8 = vadd.f32 %v7287_v39, %v7255_v47 }
 0x9ba   : > { %v7317_v20 = vadd.f32 %v7285_v45, %v7253_v62  ;;  %v10007_v60 = vpop.f32.mrb[20].mxu0 }
 0x9bb   : > { %v7342_v61 = vpack.c.bf16 %v7319_v8, %v7318_v27  ;;  %v7222_v10 = vadd.f32 %v10007_v60, %v12649_v48  ;;  %v7213_v49 = vpop.f32.mrb[21].mxu0 }
 0x9bc   : > { %v7341_v22 = vpack.c.bf16 %v7317_v20, %v7316_v29  ;;  %v7214_v54 = vadd.f32 %v12649_v48, %v7213_v49  ;;  %v10008_v63 = vpop.f32.mrb[22].mxu0 }
 0x9bd   : > { %v7290_v7 = vmul.f32 0.5, %v7222_v10  ;;  %v7225_v24 = vadd.f32 %v10008_v63, %v12649_v48  ;;  %v7216_v40 = vpop.f32.mrb[23].mxu0 }
 0x9be   : > { %v7288_v28 = vmul.f32 0.5, %v7214_v54  ;;  %v7217_v38 = vadd.f32 %v12649_v48, %v7216_v40  ;;  %10039 = vmatprep.mubr.msk.bf16.mxu1 %vm1293_vm5, %v7341_v22  ;;  %v10265_v48 = vld [vmem:[%s12859_s25 + $0x8] sm:$0xff]  }
 0x9bf   : > { %v7322_v59 = vadd.f32 %v7290_v7, %v7258_v58  ;;  %v7291_v55 = vmul.f32 0.5, %v7225_v24  ;;  %10040 = vmatmul.mubr.msk.bf16.gmra.mrb[80].mxu1 %vm1293_vm5, %v7342_v61  ;;  %10049 = vmatprep.subr.bf16.mxu0 %v10265_v48 }
 0x9c0   : > { %v7320_v51 = vadd.f32 %v7288_v28, %v7256_v56  ;;  %v7289_v32 = vmul.f32 0.5, %v7217_v38  ;;  %10050 = vmatpush3.bf16.msra.mxu0 %v10265_v48 }
 0x9c1   : > { %v7323_v13 = vadd.f32 %v7291_v55, %v7259_v6  ;;  %10213 = vmatprep.subr.msk.bf16.mxu0 %vm1342_vm4, %v10266_v26 }
 0x9c2   : > { %v7321_v11 = vadd.f32 %v7289_v32, %v7257_v1 }
 0x9c3   : > { %v7344_v36 = vpack.c.bf16 %v7323_v13, %v7322_v59 }
 0x9c4   : > { %v7343_v15 = vpack.c.bf16 %v7321_v11, %v7320_v51  ;;  %10052 = vmatpush3.bf16.msra.mxu0 %v7689_v18 }
 0x9c5   : > { %10214 = vmatprep.subr.msk.bf16.mxu0 %vm1060_vm0, %v10267_v3 }
 0x9c6   : > { %10043 = vmatprep.mubr.msk.bf16.mxu1 %vm1293_vm5, %v7343_v15 }
 0x9c7   : > { %10044 = vmatmul.mubr.msk.bf16.gmra.mrb[84].mxu1 %vm1293_vm5, %v7344_v36 }
 0xa62   : > { %v10017_v35 = vpop.f32.mrb[56].mxu1 }
 0xa63   : > { %v7445_v16 = vpop.f32.mrb[57].mxu1  ;;  %v7574_v30 = vmax.f32 %v10017_v35, 0.0 }
 0xa64   : > { %v10018_v33 = vpop.f32.mrb[58].mxu1  ;;  %v7572_v2 = vmax.f32 %v7445_v16, 0.0 }
 0xa65   : > { %v7575_v37 = vmax.f32 %v10018_v33, 0.0  ;;  %v7448_v53 = vpop.f32.mrb[59].mxu1 }
 0xa66   : > { %v7573_v4 = vmax.f32 %v7448_v53, 0.0 }
 0xa67   : > { %v7610_v19 = vpack.c.bf16 %v7575_v37, %v7574_v30 }
 0xa68   : > { %v7609_v50 = vpack.c.bf16 %v7573_v4, %v7572_v2 }
 0xa6a   : > { %v10021_v5 = vpop.f32.mrb[60].mxu1  ;;  %10053 = vmatprep.mubr.msk.bf16.mxu0 %vm1293_vm5, %v7609_v50 }
 0xa6b   : > { %v7461_v17 = vpop.f32.mrb[61].mxu1  ;;  %10054 = vmatmul.mubr.msk.bf16.vlgmr.msra.gmra.mrb[24].mxu0 %vm1293_vm5, %v7610_v19  ;;  %v7578_v25 = vmax.f32 %v10021_v5, 0.0 }
 0xa6c   : > { %v10022_v12 = vpop.f32.mrb[62].mxu1  ;;  %10086 = vmatpush3.bf16.msra.mxu0 %v7860_v9  ;;  %v7576_v21 = vmax.f32 %v7461_v17, 0.0 }
 0xa6d   : > { %v7579_v42 = vmax.f32 %v10022_v12, 0.0  ;;  %v7464_v31 = vpop.f32.mrb[63].mxu1 }
 0xa6e   : > { %v7577_v14 = vmax.f32 %v7464_v31, 0.0 }
 0xa6f   : > { %v7612_v57 = vpack.c.bf16 %v7579_v42, %v7578_v25 }
 0xa70   : > { %v7611_v0 = vpack.c.bf16 %v7577_v14, %v7576_v21  ;;  %v13328_v21 = vld [vmem:[#allocation4_spill] sm:$0xff]  ;;  %v13329_v14 = vld [vmem:[#allocation5_spill] sm:$0xff] }
 0xa72   : > { %v10025_v46 = vpop.f32.mrb[64].mxu1  ;;  %10057 = vmatprep.mubr.msk.bf16.mxu0 %vm1293_vm5, %v7611_v0  ;;  %v13331_v0 = vld [vmem:[#allocation7_spill] sm:$0xff] }
 0xa73   : > { %v7477_v27 = vpop.f32.mrb[65].mxu1  ;;  %10058 = vmatmul.mubr.msk.bf16.gmra.mrb[28].mxu0 %vm1293_vm5, %v7612_v57  ;;  %v7582_v47 = vmax.f32 %v10025_v46, 0.0  ;;  %v13330_v57 = vld [vmem:[#allocation6_spill] sm:$0xff]  ;;  %v13332_v46 = vld [vmem:[#allocation8_spill] sm:$0xff] }
 0xa74   : > { %v10026_v44 = vpop.f32.mrb[66].mxu1  ;;  %v7580_v43 = vmax.f32 %v7477_v27, 0.0  ;;  %v13333_v27 = vld [vmem:[#allocation9_spill] sm:$0xff] }
 0xa75   : > { %v7583_v39 = vmax.f32 %v10026_v44, 0.0  ;;  %v7480_v29 = vpop.f32.mrb[67].mxu1  ;;  %v13334_v44 = vld [vmem:[#allocation10_spill] sm:$0xff] }
 0xa76   : > { %v7581_v62 = vmax.f32 %v7480_v29, 0.0  ;;  %v13337_v29 = vld [vmem:[#allocation13_spill] sm:$0xff] }
 0xa77   : > { %v7614_v45 = vpack.c.bf16 %v7583_v39, %v7582_v47  ;;  %v13335_v47 = vld [vmem:[#allocation11_spill] sm:$0xff]  ;;  %v13336_v39 = vld [vmem:[#allocation12_spill] sm:$0xff] }
 0xa78   : > { %v7613_v8 = vpack.c.bf16 %v7581_v62, %v7580_v43  ;;  %v13338_v43 = vld [vmem:[#allocation14_spill] sm:$0xff]  ;;  %v13339_v62 = vld [vmem:[#allocation15_spill] sm:$0xff] }
 0xa7a   : > { %v10029_v20 = vpop.f32.mrb[68].mxu1  ;;  %10061 = vmatprep.mubr.msk.bf16.mxu0 %vm1293_vm5, %v7613_v8  ;;  %v13341_v8 = vld [vmem:[#allocation17_spill] sm:$0xff] }
 0xa7b   : > { %v7493_v60 = vpop.f32.mrb[69].mxu1  ;;  %10062 = vmatmul.mubr.msk.bf16.gmra.mrb[32].mxu0 %vm1293_vm5, %v7614_v45  ;;  %v7586_v10 = vmax.f32 %v10029_v20, 0.0  ;;  %v13340_v45 = vld [vmem:[#allocation16_spill] sm:$0xff]  ;;  %v13342_v20 = vld [vmem:[#allocation18_spill] sm:$0xff] }
 0xa7c   : > { %v10030_v61 = vpop.f32.mrb[70].mxu1  ;;  %v7584_v54 = vmax.f32 %v7493_v60, 0.0  ;;  %v13343_v60 = vld [vmem:[#allocation19_spill] sm:$0xff] }
 0xa7d   : > { %v7587_v49 = vmax.f32 %v10030_v61, 0.0  ;;  %v7496_v22 = vpop.f32.mrb[71].mxu1 }
 0xa7e   : > { %v7585_v63 = vmax.f32 %v7496_v22, 0.0 }
 0xa7f   : > { %v7616_v52 = vpack.c.bf16 %v7587_v49, %v7586_v10 }
 0xa80   : > { %v7615_v58 = vpack.c.bf16 %v7585_v63, %v7584_v54 }
 0xa82   : > { %v10033_v7 = vpop.f32.mrb[72].mxu1  ;;  %10065 = vmatprep.mubr.msk.bf16.mxu0 %vm1293_vm5, %v7615_v58 }
 0xa83   : > { %v7509_v24 = vpop.f32.mrb[73].mxu1  ;;  %10066 = vmatmul.mubr.msk.bf16.gmra.mrb[36].mxu0 %vm1293_vm5, %v7616_v52  ;;  %v7590_v23 = vmax.f32 %v10033_v7, 0.0 }
 0xa84   : > { %v10034_v40 = vpop.f32.mrb[74].mxu1  ;;  %v7588_v38 = vmax.f32 %v7509_v24, 0.0 }
 0xa85   : > { %v7591_v56 = vmax.f32 %v10034_v40, 0.0  ;;  %v7512_v28 = vpop.f32.mrb[75].mxu1 }
 0xa86   : > { %v7589_v59 = vmax.f32 %v7512_v28, 0.0 }
 0xa87   : > { %v7618_v41 = vpack.c.bf16 %v7591_v56, %v7590_v23 }
 0xa88   : > { %v7617_v6 = vpack.c.bf16 %v7589_v59, %v7588_v38 }
 0xa8a   : > { %v10037_v55 = vpop.f32.mrb[76].mxu1  ;;  %10069 = vmatprep.mubr.msk.bf16.mxu0 %vm1293_vm5, %v7617_v6 }
 0xa8b   : > { %v7525_v51 = vpop.f32.mrb[77].mxu1  ;;  %10070 = vmatmul.mubr.msk.bf16.gmra.mrb[40].mxu0 %vm1293_vm5, %v7618_v41  ;;  %v7594_v1 = vmax.f32 %v10037_v55, 0.0 }
 0xa8c   : > { %v10038_v34 = vpop.f32.mrb[78].mxu1  ;;  %v7592_v11 = vmax.f32 %v7525_v51, 0.0 }
 0xa8d   : > { %v7595_v32 = vmax.f32 %v10038_v34, 0.0  ;;  %v7528_v13 = vpop.f32.mrb[79].mxu1 }
 0xa8e   : > { %v7593_v36 = vmax.f32 %v7528_v13, 0.0 }
 0xa8f   : > { %v7620_v15 = vpack.c.bf16 %v7595_v32, %v7594_v1 }
 0xa90   : > { %v7619_v48 = vpack.c.bf16 %v7593_v36, %v7592_v11 }
 0xa92   : > { %v10041_v26 = vpop.f32.mrb[80].mxu1  ;;  %10073 = vmatprep.mubr.msk.bf16.mxu0 %vm1293_vm5, %v7619_v48 }
 0xa93   : > { %v7541_v18 = vpop.f32.mrb[81].mxu1  ;;  %10074 = vmatmul.mubr.msk.bf16.gmra.mrb[44].mxu0 %vm1293_vm5, %v7620_v15  ;;  %v7598_v35 = vmax.f32 %v10041_v26, 0.0 }
 0xa94   : > { %v10042_v3 = vpop.f32.mrb[82].mxu1  ;;  %v7596_v30 = vmax.f32 %v7541_v18, 0.0 }
 0xa95   : > { %v7599_v16 = vmax.f32 %v10042_v3, 0.0  ;;  %v7544_v33 = vpop.f32.mrb[83].mxu1 }
 0xa96   : > { %v7597_v37 = vmax.f32 %v7544_v33, 0.0 }
 0xa97   : > { %v7622_v53 = vpack.c.bf16 %v7599_v16, %v7598_v35 }
 0xa98   : > { %v7621_v2 = vpack.c.bf16 %v7597_v37, %v7596_v30 }
 0xa9a   : > { %v10045_v4 = vpop.f32.mrb[84].mxu1  ;;  %10077 = vmatprep.mubr.msk.bf16.mxu0 %vm1293_vm5, %v7621_v2 }
 0xa9b   : > { %v7557_v19 = vpop.f32.mrb[85].mxu1  ;;  %10078 = vmatmul.mubr.msk.bf16.gmra.mrb[48].mxu0 %vm1293_vm5, %v7622_v53  ;;  %v7602_v9 = vmax.f32 %v10045_v4, 0.0 }
 0xa9c   : > { %v10046_v50 = vpop.f32.mrb[86].mxu1  ;;  %v7600_v12 = vmax.f32 %v7557_v19, 0.0 }
 0xa9d   : > { %v7603_v5 = vmax.f32 %v10046_v50, 0.0  ;;  %v7560_v17 = vpop.f32.mrb[87].mxu1 }
 0xa9e   : > { %v7601_v25 = vmax.f32 %v7560_v17, 0.0 }
 0xa9f   : > { %v7624_v42 = vpack.c.bf16 %v7603_v5, %v7602_v9 }
 0xaa0   : > { %v7623_v31 = vpack.c.bf16 %v7601_v25, %v7600_v12 }
 0xaa2   : > { %10081 = vmatprep.mubr.msk.bf16.mxu0 %vm1293_vm5, %v7623_v31 }
 0xaa3   : > { %10082 = vmatmul.mubr.msk.bf16.gmra.mrb[52].mxu0 %vm1293_vm5, %v7624_v42 }
 0xaa4   : > { %10087 = vmatprep.mubr.msk.bf16.mxu0 %vm1011_vm2, %v13328_v21 }
 0xaab   : > { %10088 = vmatmul.mubr.msk.bf16.vlgmr.msra.gmra.mrb[24].mxu0 %vm1011_vm2, %v13329_v14 }
 0xaac   : > { %10091 = vmatprep.mubr.msk.bf16.mxu0 %vm1011_vm2, %v13330_v57 }
 0xab3   : > { %10092 = vmatmul.mubr.msk.bf16.gmra.mrb[28].mxu0 %vm1011_vm2, %v13331_v0 }
 0xab4   : > { %10095 = vmatprep.mubr.msk.bf16.mxu0 %vm1011_vm2, %v13332_v46 }
 0xabb   : > { %10096 = vmatmul.mubr.msk.bf16.gmra.mrb[32].mxu0 %vm1011_vm2, %v13333_v27 }
 0xabc   : > { %10099 = vmatprep.mubr.msk.bf16.mxu0 %vm1011_vm2, %v13334_v44 }
 0xac3   : > { %10100 = vmatmul.mubr.msk.bf16.gmra.mrb[36].mxu0 %vm1011_vm2, %v13335_v47 }
 0xac4   : > { %10103 = vmatprep.mubr.msk.bf16.mxu0 %vm1011_vm2, %v13336_v39 }
 0xacb   : > { %10104 = vmatmul.mubr.msk.bf16.gmra.mrb[40].mxu0 %vm1011_vm2, %v13337_v29 }
 0xacc   : > { %10107 = vmatprep.mubr.msk.bf16.mxu0 %vm1011_vm2, %v13338_v43 }
 0xad3   : > { %10108 = vmatmul.mubr.msk.bf16.gmra.mrb[44].mxu0 %vm1011_vm2, %v13339_v62 }
 0xad4   : > { %10111 = vmatprep.mubr.msk.bf16.mxu0 %vm1011_vm2, %v13340_v45 }
 0xadb   : > { %10112 = vmatmul.mubr.msk.bf16.gmra.mrb[48].mxu0 %vm1011_vm2, %v13341_v8 }
 0xadc   : > { %10115 = vmatprep.mubr.msk.bf16.mxu0 %vm1011_vm2, %v13342_v20 }
 0xae3   : > { %10116 = vmatmul.mubr.msk.bf16.gmra.mrb[52].mxu0 %vm1011_vm2, %v13343_v60 }
 0xb7e   : > { %v10089_v61 = vpop.f32.mrb[24].mxu0 }
 0xb7f   : > { %8025 = vst [vmem:[%s12797_s1 + $0x10] sm:$0xff] %v10089_v61  ;;  %v7896_v10 = vpop.f32.mrb[25].mxu0 }
 0xb80   : > { %8023 = vst [vmem:[%s12797_s1] sm:$0xff] %v7896_v10  ;;  %v10090_v49 = vpop.f32.mrb[26].mxu0 }
 0xb81   : > { %8026 = vst [vmem:[%s12797_s1 + $0x18] sm:$0xff] %v10090_v49  ;;  %v7899_v22 = vpop.f32.mrb[27].mxu0 }
 0xb82   : > { %8024 = vst [vmem:[%s12797_s1 + $0x8] sm:$0xff] %v7899_v22 }
 0xb86   : > { %v10093_v54 = vpop.f32.mrb[28].mxu0 }
 0xb87   : > { %8029 = vst [vmem:[%s12797_s1 + $0x30] sm:$0xff] %v10093_v54  ;;  %v7912_v63 = vpop.f32.mrb[29].mxu0 }
 0xb88   : > { %8027 = vst [vmem:[%s12797_s1 + $0x20] sm:$0xff] %v7912_v63  ;;  %v10094_v52 = vpop.f32.mrb[30].mxu0 }
 0xb89   : > { %8030 = vst [vmem:[%s12797_s1 + $0x38] sm:$0xff] %v10094_v52  ;;  %v7915_v58 = vpop.f32.mrb[31].mxu0 }
 0xb8a   : > { %8028 = vst [vmem:[%s12797_s1 + $0x28] sm:$0xff] %v7915_v58 }
 0xb8e   : > { %v10097_v7 = vpop.f32.mrb[32].mxu0 }
 0xb8f   : > { %8033 = vst [vmem:[%s12797_s1 + $0x50] sm:$0xff] %v10097_v7  ;;  %v7928_v24 = vpop.f32.mrb[33].mxu0 }
 0xb90   : > { %8031 = vst [vmem:[%s12797_s1 + $0x40] sm:$0xff] %v7928_v24  ;;  %v10098_v40 = vpop.f32.mrb[34].mxu0 }
 0xb91   : > { %8034 = vst [vmem:[%s12797_s1 + $0x58] sm:$0xff] %v10098_v40  ;;  %v7931_v23 = vpop.f32.mrb[35].mxu0 }
 0xb92   : > { %8032 = vst [vmem:[%s12797_s1 + $0x48] sm:$0xff] %v7931_v23 }
 0xb96   : > { %v10101_v56 = vpop.f32.mrb[36].mxu0 }
 0xb97   : > { %8037 = vst [vmem:[%s12797_s1 + $0x70] sm:$0xff] %v10101_v56  ;;  %v7944_v28 = vpop.f32.mrb[37].mxu0 }
 0xb98   : > { %8035 = vst [vmem:[%s12797_s1 + $0x60] sm:$0xff] %v7944_v28  ;;  %v10102_v38 = vpop.f32.mrb[38].mxu0 }
 0xb99   : > { %8038 = vst [vmem:[%s12797_s1 + $0x78] sm:$0xff] %v10102_v38  ;;  %v7947_v59 = vpop.f32.mrb[39].mxu0 }
 0xb9a   : > { %8036 = vst [vmem:[%s12797_s1 + $0x68] sm:$0xff] %v7947_v59 }
 0xb9e   : > { %v10105_v41 = vpop.f32.mrb[40].mxu0 }
 0xb9f   : > { %8041 = vst [vmem:[%s12797_s1 + $0x90] sm:$0xff] %v10105_v41  ;;  %v7960_v6 = vpop.f32.mrb[41].mxu0 }
 0xba0   : > { %8039 = vst [vmem:[%s12797_s1 + $0x80] sm:$0xff] %v7960_v6  ;;  %v10106_v55 = vpop.f32.mrb[42].mxu0 }
 0xba1   : > { %8042 = vst [vmem:[%s12797_s1 + $0x98] sm:$0xff] %v10106_v55  ;;  %v7963_v51 = vpop.f32.mrb[43].mxu0 }
 0xba2   : > { %8040 = vst [vmem:[%s12797_s1 + $0x88] sm:$0xff] %v7963_v51 }
 0xba6   : > { %v10109_v34 = vpop.f32.mrb[44].mxu0 }
 0xba7   : > { %8045 = vst [vmem:[%s12797_s1 + $0xb0] sm:$0xff] %v10109_v34  ;;  %v7976_v1 = vpop.f32.mrb[45].mxu0 }
 0xba8   : > { %8043 = vst [vmem:[%s12797_s1 + $0xa0] sm:$0xff] %v7976_v1  ;;  %v10110_v32 = vpop.f32.mrb[46].mxu0 }
 0xba9   : > { %8046 = vst [vmem:[%s12797_s1 + $0xb8] sm:$0xff] %v10110_v32  ;;  %v7979_v13 = vpop.f32.mrb[47].mxu0 }
 0xbaa   : > { %8044 = vst [vmem:[%s12797_s1 + $0xa8] sm:$0xff] %v7979_v13 }
 0xbae   : > { %v10113_v11 = vpop.f32.mrb[48].mxu0 }
 0xbaf   : > { %8049 = vst [vmem:[%s12797_s1 + $0xd0] sm:$0xff] %v10113_v11  ;;  %v7992_v36 = vpop.f32.mrb[49].mxu0 }
 0xbb0   : > { %8047 = vst [vmem:[%s12797_s1 + $0xc0] sm:$0xff] %v7992_v36  ;;  %v10114_v15 = vpop.f32.mrb[50].mxu0 }
 0xbb1   : > { %8050 = vst [vmem:[%s12797_s1 + $0xd8] sm:$0xff] %v10114_v15  ;;  %v7995_v48 = vpop.f32.mrb[51].mxu0 }
 0xbb2   : > { %8048 = vst [vmem:[%s12797_s1 + $0xc8] sm:$0xff] %v7995_v48 }
 0xbb6   : > { %v10117_v26 = vpop.f32.mrb[52].mxu0 }
 0xbb7   : > { %8053 = vst [vmem:[%s12797_s1 + $0xf0] sm:$0xff] %v10117_v26  ;;  %v8008_v18 = vpop.f32.mrb[53].mxu0 }
 0xbb8   : > { %8051 = vst [vmem:[%s12797_s1 + $0xe0] sm:$0xff] %v8008_v18  ;;  %v10118_v3 = vpop.f32.mrb[54].mxu0 }
 0xbb9   : > { %8054 = vst [vmem:[%s12797_s1 + $0xf8] sm:$0xff] %v10118_v3  ;;  %v8011_v35 = vpop.f32.mrb[55].mxu0 }
 0xbba   : > { %8052 = vst [vmem:[%s12797_s1 + $0xe8] sm:$0xff] %v8011_v35 }
 0xbbb PF: > { %s37_s7 = sadd.s32 1, %s10274_s7  }
 0xbbc   : > { %p34_p6 = scmp.ge.s32.totalorder %s37_s7, 4  }
 0xbbe   :  { %36 = sbr.rel (!%p34_p6) target bundleno = 13 (0xd), region = 173 }

</bundles_post_ra>
